<compile_context>
chip_gen: v7x
topology: tpu7x:2x2x1
jax: 0.10.0
libtpu: 0.0.40
codegen_flags: <defaults>
</compile_context>

<pallas_src>
import functools

import jax
import jax.numpy as jnp
from jax.experimental import pallas as pl
from jax.experimental.pallas import tpu as pltpu


# ----------------------------- Pallas kernels ------------------------------

def _ida_conv_kernel(x_ref, w_ref, b_ref, o_ref, *, H, W):
    """3x3 conv (C_in -> C_out) + ReLU on one halo-padded image.

    x_ref: (1, H+2, W+2, C_in) bf16   w_ref: (9, C_in, C_out) bf16
    b_ref: (1, C_out) f32             o_ref: (1, H*W, C_out) bf16
    """
    c_in = x_ref.shape[-1]
    c_out = w_ref.shape[-1]
    acc = jnp.zeros((H * W, c_out), jnp.float32)
    for dy in range(3):
        for dx in range(3):
            patch = x_ref[0, dy:dy + H, dx:dx + W, :].reshape(H * W, c_in)
            acc = acc + jnp.dot(patch, w_ref[dy * 3 + dx],
                                preferred_element_type=jnp.float32)
    o_ref[0] = jnp.maximum(acc + b_ref[...], 0.0).astype(o_ref.dtype)


def _fused_heads_kernel(fg_ref, w1_ref, b1_ref, w2_ref, b2_ref, o_ref, *, H, W, nc):
    """hm + ct_offset + wh + reg heads fused for one image.

    fg_ref: (1, H+2, W, 3*64) bf16   dy-grouped (dx, channel) patches of the 64-ch feature
    w1_ref: (3, 3*64, 1024) bf16     per-dy-tap first-conv weights of [hm|ct|wh|reg]
    b1_ref: (1, 1024) f32
    w2_ref: (1024, nc+6) bf16        block-diagonal 1x1 second-conv weights
    b2_ref: (1, nc+6) f32
    o_ref : (1, H*W, nc+6) f32       channel order [hm(nc) | ct(2) | wh(2) | reg(2)]
    """
    kg = fg_ref.shape[-1]
    c_hid = w1_ref.shape[-1]
    acc = jnp.zeros((H * W, c_hid), jnp.float32)
    for dy in range(3):
        patch = fg_ref[0, dy:dy + H, :, :].reshape(H * W, kg)
        acc = acc + jnp.dot(patch, w1_ref[dy], preferred_element_type=jnp.float32)
    h = jnp.maximum(acc + b1_ref[...], 0.0).astype(jnp.bfloat16)
    y = jnp.dot(h, w2_ref[...], preferred_element_type=jnp.float32) + b2_ref[...]
    # Final ReLU only on wh / reg channels (last 4), matching the reference Sequentials.
    col = jax.lax.broadcasted_iota(jnp.int32, y.shape, 1)
    y = jnp.where(col >= nc + 2, jnp.maximum(y, 0.0), y)
    o_ref[0] = y.astype(o_ref.dtype)


def _tracking_kernel(pgf_ref, pre_hs_ref, ref_ref,
                     tr1_w_ref, tr1_b_ref, tr0_w_ref, tr0_b_ref,
                     w1a_ref, w1b_ref, w1r_ref, b1_ref, w2_ref, b2_ref, o_ref):
    """ida_up_tracking[0/1] + tracking MLP for one decoder level (all track queries)."""
    a = jnp.maximum(jnp.dot(pgf_ref[...], tr1_w_ref[...],
                            preferred_element_type=jnp.float32) + tr1_b_ref[...], 0.0)
    b = jnp.maximum(jnp.dot(pre_hs_ref[0], tr0_w_ref[...],
                            preferred_element_type=jnp.float32) + tr0_b_ref[...], 0.0)
    r = ref_ref[...]
    h = jnp.dot(a, w1a_ref[...], preferred_element_type=jnp.float32)
    h = h + jnp.dot(b, w1b_ref[...], preferred_element_type=jnp.float32)
    # reference-point contribution (K=2) as two broadcasted outer products (avoids a K=2 matmul)
    h = h + r[:, 0:1] * w1r_ref[0:1, :] + r[:, 1:2] * w1r_ref[1:2, :]
    h = jnp.maximum(h + b1_ref[...], 0.0)
    y = jnp.dot(h, w2_ref[...], preferred_element_type=jnp.float32) + b2_ref[...]
    o_ref[0] = y.astype(o_ref.dtype)


# --------------------------- pallas_call wrappers ---------------------------

def ida_conv(x_pad, w, b, *, H, W):
    ln, hp, wp, c_in = x_pad.shape
    c_out = w.shape[-1]
    return pl.pallas_call(
        functools.partial(_ida_conv_kernel, H=H, W=W),
        out_shape=jax.ShapeDtypeStruct((ln, H * W, c_out), jnp.bfloat16),
        grid=(ln,),
        in_specs=[
            pl.BlockSpec((1, hp, wp, c_in), lambda i: (i, 0, 0, 0)),
            pl.BlockSpec((9, c_in, c_out), lambda i: (0, 0, 0)),
            pl.BlockSpec((1, c_out), lambda i: (0, 0)),
        ],
        out_specs=pl.BlockSpec((1, H * W, c_out), lambda i: (i, 0, 0)),
        compiler_params=pltpu.CompilerParams(dimension_semantics=("parallel",)),
    )(x_pad, w, b)


def fused_heads(feat_g, w1, b1, w2, b2, *, H, W, nc):
    ln, hp, wc, kg = feat_g.shape
    c_hid = w1.shape[-1]
    c_out = w2.shape[-1]
    return pl.pallas_call(
        functools.partial(_fused_heads_kernel, H=H, W=W, nc=nc),
        out_shape=jax.ShapeDtypeStruct((ln, H * W, c_out), jnp.float32),
        grid=(ln,),
        in_specs=[
            pl.BlockSpec((1, hp, wc, kg), lambda i: (i, 0, 0, 0)),
            pl.BlockSpec((3, kg, c_hid), lambda i: (0, 0, 0)),
            pl.BlockSpec((1, c_hid), lambda i: (0, 0)),
            pl.BlockSpec((c_hid, c_out), lambda i: (0, 0)),
            pl.BlockSpec((1, c_out), lambda i: (0, 0)),
        ],
        out_specs=pl.BlockSpec((1, H * W, c_out), lambda i: (i, 0, 0)),
        compiler_params=pltpu.CompilerParams(dimension_semantics=("parallel",)),
    )(feat_g, w1, b1, w2, b2)


def tracking_heads(pgf, pre_hs, pre_ref, tr1_w, tr1_b, tr0_w, tr0_b, w1, b1, w2, b2):
    L, bq, c = pre_hs.shape
    w1a, w1b, w1r = w1[0:64], w1[64:128], w1[128:130]
    return pl.pallas_call(
        _tracking_kernel,
        out_shape=jax.ShapeDtypeStruct((L, bq, 2), jnp.float32),
        grid=(L,),
        in_specs=[
            pl.BlockSpec((bq, c), lambda l: (0, 0)),          # pgf (shared across levels)
            pl.BlockSpec((1, bq, c), lambda l: (l, 0, 0)),    # pre_hs for level l
            pl.BlockSpec((bq, 2), lambda l: (0, 0)),          # pre_reference_points
            pl.BlockSpec((c, 64), lambda l: (0, 0)),          # ida_up_tracking[1] W
            pl.BlockSpec((1, 64), lambda l: (0, 0)),
            pl.BlockSpec((c, 64), lambda l: (0, 0)),          # ida_up_tracking[0] W
            pl.BlockSpec((1, 64), lambda l: (0, 0)),
            pl.BlockSpec((64, 256), lambda l: (0, 0)),        # tracking W1 (pgf rows)
            pl.BlockSpec((64, 256), lambda l: (0, 0)),        # tracking W1 (pre_hs rows)
            pl.BlockSpec((2, 256), lambda l: (0, 0)),         # tracking W1 (ref rows)
            pl.BlockSpec((1, 256), lambda l: (0, 0)),
            pl.BlockSpec((256, 2), lambda l: (0, 0)),         # tracking W2
            pl.BlockSpec((1, 2), lambda l: (0, 0)),
        ],
        out_specs=pl.BlockSpec((1, bq, 2), lambda l: (l, 0, 0)),
        compiler_params=pltpu.CompilerParams(dimension_semantics=("parallel",)),
    )(pgf, pre_hs, pre_ref, tr1_w, tr1_b, tr0_w, tr0_b, w1a, w1b, w1r, b1, w2, b2)


# ------------------------------- JAX glue -----------------------------------

_HEAD_ORDER = ('hm', 'ct_offset', 'wh', 'reg')


def _pack_head_weights(params, num_classes):
    c_outs = (num_classes, 2, 2, 2)
    c_tot = sum(c_outs)
    w1_cat = jnp.concatenate([params[h]['w1'] for h in _HEAD_ORDER], axis=-1)  # (9, 64, 1024)
    b1_cat = jnp.concatenate([params[h]['b1'] for h in _HEAD_ORDER], axis=-1)  # (1, 1024)
    # dy-grouped taps: K index = dx*64 + channel, matching feat_g built in the wrapper.
    w1_grp = w1_cat.reshape(3, 3 * 64, 4 * 256)
    w2_bd = jnp.zeros((4 * 256, c_tot), jnp.float32)
    off = 0
    for i, h in enumerate(_HEAD_ORDER):
        w2_bd = w2_bd.at[i * 256:(i + 1) * 256, off:off + c_outs[i]].set(params[h]['w2'])
        off += c_outs[i]
    b2_cat = jnp.concatenate([params[h]['b2'] for h in _HEAD_ORDER], axis=-1)  # (1, c_tot)
    return (w1_grp.astype(jnp.bfloat16), b1_cat, w2_bd.astype(jnp.bfloat16), b2_cat)


def init_params(key, num_classes):
    ks = jax.random.split(key, 18)
    s = 0.02

    def nrm(k, shape):
        return s * jax.random.normal(k, shape, jnp.float32)

    def head(k1, k2, c_out, b1, b2):
        return dict(w1=nrm(k1, (9, 64, 256)), b1=b1, w2=nrm(k2, (256, c_out)), b2=b2)

    params = {}
    # TODO(synk): IDAUpV3_bis definition is not in the reference; proxied by a single
    # 3x3 conv (256 -> 64) + ReLU producing the 64-channel head input.
    params['ida_w'] = nrm(ks[0], (9, 256, 64))
    params['ida_b'] = jnp.zeros((1, 64), jnp.float32)
    # hm: default first-conv bias, last bias filled with -4.6 (as in __init__).
    params['hm'] = head(ks[1], ks[2], num_classes, nrm(ks[3], (1, 256)),
                        jnp.full((1, num_classes), -4.6, jnp.float32))
    # fill_fc_weights -> all conv biases zero for ct_offset / reg / wh.
    zb256 = jnp.zeros((1, 256), jnp.float32)
    zb2 = jnp.zeros((1, 2), jnp.float32)
    params['ct_offset'] = head(ks[4], ks[5], 2, zb256, zb2)
    params['wh'] = head(ks[6], ks[7], 2, zb256, zb2)
    params['reg'] = head(ks[8], ks[9], 2, zb256, zb2)
    # ida_up_tracking: two Linear(256, 64) + ReLU branches.
    params['ida_tr0_w'] = nrm(ks[10], (256, 64))
    params['ida_tr0_b'] = nrm(ks[11], (1, 64))
    params['ida_tr1_w'] = nrm(ks[12], (256, 64))
    params['ida_tr1_b'] = nrm(ks[13], (1, 64))
    # tracking MLP: Linear(130,256)+ReLU -> Linear(256,2)  (Linear biases keep default init,
    # fill_fc_weights only zeroes Conv2d biases).
    params['tracking'] = dict(w1=nrm(ks[14], (130, 256)), b1=nrm(ks[15], (1, 256)),
                              w2=nrm(ks[16], (256, 2)), b2=nrm(ks[17], (1, 2)))
    return params


def deformable_detr_forward(params, hs_layers, pre_hs_layers, pre_gathered_features,
                            pre_hm, *, output_shape, num_classes):
    """
    hs_layers:             (L, N, H, W, 256)  decoder image features (NHWC)
    pre_hs_layers:         (L, B, Q, 256)     decoder track-query features
    pre_gathered_features: (B, Q, 256)
    pre_hm (pre_cts):      (B, Q, 2)          previous-frame centers in pixels
    """
    L, N, H, W, C = hs_layers.shape
    B, Q, _ = pre_hm.shape
    LN = L * N
    c_tot = num_classes + 6

    w1_grp, b1_cat, w2_bd, b2_cat = _pack_head_weights(params, num_classes)

    # ---------------- image branch: all levels + batch folded into one grid ----------------
    hs_pad = jnp.pad(hs_layers.reshape(LN, H, W, C).astype(jnp.bfloat16),
                     ((0, 0), (1, 1), (1, 1), (0, 0)))
    feat = ida_conv(hs_pad, params['ida_w'].astype(jnp.bfloat16), params['ida_b'],
                    H=H, W=W)                                       # (LN, H*W, 64) bf16
    feat = feat.reshape(LN, H, W, 64)
    feat_pad = jnp.pad(feat, ((0, 0), (1, 1), (1, 1), (0, 0)))
    # Lightweight dx-grouping (K=192 per tap) replaces the previous 9x-wide f32 im2col.
    feat_g = jnp.concatenate([feat_pad[:, :, dx:dx + W, :] for dx in range(3)], axis=-1)

    head_out = fused_heads(feat_g, w1_grp, b1_cat, w2_bd, b2_cat,
                           H=H, W=W, nc=num_classes)                # (LN, H*W, c_tot) f32
    # single NHWC -> NCHW transpose for all heads and all levels
    head_out = head_out.reshape(L, N, H, W, c_tot).transpose(0, 1, 4, 2, 3)

    hm = head_out[:, :, :num_classes]
    ct = head_out[:, :, num_classes:num_classes + 2]
    wh = head_out[:, :, num_classes + 2:num_classes + 4]
    reg = head_out[:, :, num_classes + 4:num_classes + 6]
    boxes = jnp.concatenate([reg + ct, wh], axis=2)

    # ---------------- tracking branch: all levels in one pallas_call ----------------
    scale = jnp.array([output_shape[1], output_shape[0]], jnp.float32)
    pre_ref = jnp.clip(pre_hm / scale, 0.0, 1.0).reshape(B * Q, 2)
    pgf = jax.lax.stop_gradient(pre_gathered_features).reshape(B * Q, 256)
    tw = params['tracking']
    tracking = tracking_heads(pgf, pre_hs_layers.reshape(L, B * Q, 256), pre_ref,
                              params['ida_tr1_w'], params['ida_tr1_b'],
                              params['ida_tr0_w'], params['ida_tr0_b'],
                              tw['w1'], tw['b1'], tw['w2'], tw['b2']).reshape(L, B, Q, 2)

    return {'hm': hm, 'boxes': boxes, 'wh': wh, 'reg': reg,
            'center_offset': ct, 'tracking': tracking}


if __name__ == "__main__":
    key = jax.random.PRNGKey(0)
    k_param, k_hs, k_pre_hs, k_pgf, k_hm = jax.random.split(key, 5)

    num_classes = 3
    L, N, H, W = 2, 2, 16, 16      # decoder layers, batch, feature-map spatial
    B, Q = N, 8                    # batch, number of previous-frame (track) queries
    output_shape = (H, W)

    params = init_params(k_param, num_classes)

    # TODO(synk): the Deformable transformer is an injected dependency with no reference
    # implementation; its outputs are synthesized deterministically here.
    hs_layers = jax.random.normal(k_hs, (L, N, H, W, 256), jnp.float32)
    pre_hs_layers = jax.random.normal(k_pre_hs, (L, B, Q, 256), jnp.float32)
    pre_gathered = jax.random.normal(k_pgf, (B, Q, 256), jnp.float32)
    pre_hm = jax.random.uniform(k_hm, (B, Q, 2), jnp.float32, 0.0, float(max(output_shape)))

    fwd = jax.jit(functools.partial(deformable_detr_forward,
                                    output_shape=output_shape, num_classes=num_classes))
    out = fwd(params, hs_layers, pre_hs_layers, pre_gathered, pre_hm)
    jax.block_until_ready(out)

    assert out['hm'].shape == (L, N, num_classes, H, W)
    assert out['boxes'].shape == (L, N, 4, H, W)
    assert out['wh'].shape == (L, N, 2, H, W)
    assert out['reg'].shape == (L, N, 2, H, W)
    assert out['center_offset'].shape == (L, N, 2, H, W)
    assert out['tracking'].shape == (L, B, Q, 2)
    print("KERNEL_OK")
</pallas_src>

<mosaic_0001>
module attributes {stable_mosaic.version = 11 : i64} {
  func.func @_ida_conv_kernel(%arg0: i32, %arg1: memref<1x18x18x256xbf16, #tpu.memory_space<vmem>>, %arg2: memref<9x256x64xbf16, #tpu.memory_space<vmem>>, %arg3: memref<1x64xf32, #tpu.memory_space<vmem>>, %arg4: memref<1x256x64xbf16, #tpu.memory_space<vmem>>) attributes {dimension_semantics = [#tpu.dimension_semantics<parallel>], iteration_bounds = array<i64: 4>, scalar_prefetch = 0 : i64, scratch_operands = 0 : i64, tpu.core_type = #tpu.core_type<tc>, window_params = [{transform_indices = @transform_0, window_bounds = array<i64: 1, 18, 18, 256>}, {pipeline_mode = #tpu.pipeline_mode<synchronous>, transform_indices = @transform_1, window_bounds = array<i64: 9, 256, 64>}, {pipeline_mode = #tpu.pipeline_mode<synchronous>, transform_indices = @transform_2, window_bounds = array<i64: 1, 64>}, {transform_indices = @transform_3, window_bounds = array<i64: 1, 256, 64>}]} {
    %cst = arith.constant 0.000000e+00 : f32
    %0 = vector.broadcast %cst : f32 to vector<256x64xf32>
    %c0 = arith.constant 0 : index
    %c0_0 = arith.constant 0 : index
    %c0_1 = arith.constant 0 : index
    %c0_2 = arith.constant 0 : index
    %1 = vector.load %arg1[%c0, %c0_0, %c0_1, %c0_2] : memref<1x18x18x256xbf16, #tpu.memory_space<vmem>>, vector<1x16x16x256xbf16>
    %2 = vector.shape_cast %1 : vector<1x16x16x256xbf16> to vector<16x16x256xbf16>
    %3 = vector.shape_cast %2 : vector<16x16x256xbf16> to vector<256x256xbf16>
    %c0_3 = arith.constant 0 : index
    %c0_4 = arith.constant 0 : index
    %c0_5 = arith.constant 0 : index
    %4 = vector.load %arg2[%c0_3, %c0_4, %c0_5] : memref<9x256x64xbf16, #tpu.memory_space<vmem>>, vector<1x256x64xbf16>
    %5 = vector.shape_cast %4 : vector<1x256x64xbf16> to vector<256x64xbf16>
    %cst_6 = arith.constant dense<0.000000e+00> : vector<256x64xf32>
    %6 = tpu.matmul %3, %5, %cst_6 {dimension_numbers = #tpu.dot_dimension_numbers<[1], [0], [0], [1], [0, 0, 1, 1], [], []>} : vector<256x256xbf16>, vector<256x64xbf16>, vector<256x64xf32> -> vector<256x64xf32>
    %7 = arith.addf %0, %6 : vector<256x64xf32>
    %c0_7 = arith.constant 0 : index
    %c0_8 = arith.constant 0 : index
    %c1 = arith.constant 1 : index
    %c0_9 = arith.constant 0 : index
    %8 = vector.load %arg1[%c0_7, %c0_8, %c1, %c0_9] : memref<1x18x18x256xbf16, #tpu.memory_space<vmem>>, vector<1x16x16x256xbf16>
    %9 = vector.shape_cast %8 : vector<1x16x16x256xbf16> to vector<16x16x256xbf16>
    %10 = vector.shape_cast %9 : vector<16x16x256xbf16> to vector<256x256xbf16>
    %c1_10 = arith.constant 1 : index
    %c0_11 = arith.constant 0 : index
    %c0_12 = arith.constant 0 : index
    %11 = vector.load %arg2[%c1_10, %c0_11, %c0_12] : memref<9x256x64xbf16, #tpu.memory_space<vmem>>, vector<1x256x64xbf16>
    %12 = vector.shape_cast %11 : vector<1x256x64xbf16> to vector<256x64xbf16>
    %cst_13 = arith.constant dense<0.000000e+00> : vector<256x64xf32>
    %13 = tpu.matmul %10, %12, %cst_13 {dimension_numbers = #tpu.dot_dimension_numbers<[1], [0], [0], [1], [0, 0, 1, 1], [], []>} : vector<256x256xbf16>, vector<256x64xbf16>, vector<256x64xf32> -> vector<256x64xf32>
    %14 = arith.addf %7, %13 : vector<256x64xf32>
    %c0_14 = arith.constant 0 : index
    %c0_15 = arith.constant 0 : index
    %c2 = arith.constant 2 : index
    %c0_16 = arith.constant 0 : index
    %15 = vector.load %arg1[%c0_14, %c0_15, %c2, %c0_16] : memref<1x18x18x256xbf16, #tpu.memory_space<vmem>>, vector<1x16x16x256xbf16>
    %16 = vector.shape_cast %15 : vector<1x16x16x256xbf16> to vector<16x16x256xbf16>
    %17 = vector.shape_cast %16 : vector<16x16x256xbf16> to vector<256x256xbf16>
    %c2_17 = arith.constant 2 : index
    %c0_18 = arith.constant 0 : index
    %c0_19 = arith.constant 0 : index
    %18 = vector.load %arg2[%c2_17, %c0_18, %c0_19] : memref<9x256x64xbf16, #tpu.memory_space<vmem>>, vector<1x256x64xbf16>
    %19 = vector.shape_cast %18 : vector<1x256x64xbf16> to vector<256x64xbf16>
    %cst_20 = arith.constant dense<0.000000e+00> : vector<256x64xf32>
    %20 = tpu.matmul %17, %19, %cst_20 {dimension_numbers = #tpu.dot_dimension_numbers<[1], [0], [0], [1], [0, 0, 1, 1], [], []>} : vector<256x256xbf16>, vector<256x64xbf16>, vector<256x64xf32> -> vector<256x64xf32>
    %21 = arith.addf %14, %20 : vector<256x64xf32>
    %c0_21 = arith.constant 0 : index
    %c1_22 = arith.constant 1 : index
    %c0_23 = arith.constant 0 : index
    %c0_24 = arith.constant 0 : index
    %22 = vector.load %arg1[%c0_21, %c1_22, %c0_23, %c0_24] : memref<1x18x18x256xbf16, #tpu.memory_space<vmem>>, vector<1x16x16x256xbf16>
    %23 = vector.shape_cast %22 : vector<1x16x16x256xbf16> to vector<16x16x256xbf16>
    %24 = vector.shape_cast %23 : vector<16x16x256xbf16> to vector<256x256xbf16>
    %c3 = arith.constant 3 : index
    %c0_25 = arith.constant 0 : index
    %c0_26 = arith.constant 0 : index
    %25 = vector.load %arg2[%c3, %c0_25, %c0_26] : memref<9x256x64xbf16, #tpu.memory_space<vmem>>, vector<1x256x64xbf16>
    %26 = vector.shape_cast %25 : vector<1x256x64xbf16> to vector<256x64xbf16>
    %cst_27 = arith.constant dense<0.000000e+00> : vector<256x64xf32>
    %27 = tpu.matmul %24, %26, %cst_27 {dimension_numbers = #tpu.dot_dimension_numbers<[1], [0], [0], [1], [0, 0, 1, 1], [], []>} : vector<256x256xbf16>, vector<256x64xbf16>, vector<256x64xf32> -> vector<256x64xf32>
    %28 = arith.addf %21, %27 : vector<256x64xf32>
    %c0_28 = arith.constant 0 : index
    %c1_29 = arith.constant 1 : index
    %c1_30 = arith.constant 1 : index
    %c0_31 = arith.constant 0 : index
    %29 = vector.load %arg1[%c0_28, %c1_29, %c1_30, %c0_31] : memref<1x18x18x256xbf16, #tpu.memory_space<vmem>>, vector<1x16x16x256xbf16>
    %30 = vector.shape_cast %29 : vector<1x16x16x256xbf16> to vector<16x16x256xbf16>
    %31 = vector.shape_cast %30 : vector<16x16x256xbf16> to vector<256x256xbf16>
    %c4 = arith.constant 4 : index
    %c0_32 = arith.constant 0 : index
    %c0_33 = arith.constant 0 : index
    %32 = vector.load %arg2[%c4, %c0_32, %c0_33] : memref<9x256x64xbf16, #tpu.memory_space<vmem>>, vector<1x256x64xbf16>
    %33 = vector.shape_cast %32 : vector<1x256x64xbf16> to vector<256x64xbf16>
    %cst_34 = arith.constant dense<0.000000e+00> : vector<256x64xf32>
    %34 = tpu.matmul %31, %33, %cst_34 {dimension_numbers = #tpu.dot_dimension_numbers<[1], [0], [0], [1], [0, 0, 1, 1], [], []>} : vector<256x256xbf16>, vector<256x64xbf16>, vector<256x64xf32> -> vector<256x64xf32>
    %35 = arith.addf %28, %34 : vector<256x64xf32>
    %c0_35 = arith.constant 0 : index
    %c1_36 = arith.constant 1 : index
    %c2_37 = arith.constant 2 : index
    %c0_38 = arith.constant 0 : index
    %36 = vector.load %arg1[%c0_35, %c1_36, %c2_37, %c0_38] : memref<1x18x18x256xbf16, #tpu.memory_space<vmem>>, vector<1x16x16x256xbf16>
    %37 = vector.shape_cast %36 : vector<1x16x16x256xbf16> to vector<16x16x256xbf16>
    %38 = vector.shape_cast %37 : vector<16x16x256xbf16> to vector<256x256xbf16>
    %c5 = arith.constant 5 : index
    %c0_39 = arith.constant 0 : index
    %c0_40 = arith.constant 0 : index
    %39 = vector.load %arg2[%c5, %c0_39, %c0_40] : memref<9x256x64xbf16, #tpu.memory_space<vmem>>, vector<1x256x64xbf16>
    %40 = vector.shape_cast %39 : vector<1x256x64xbf16> to vector<256x64xbf16>
    %cst_41 = arith.constant dense<0.000000e+00> : vector<256x64xf32>
    %41 = tpu.matmul %38, %40, %cst_41 {dimension_numbers = #tpu.dot_dimension_numbers<[1], [0], [0], [1], [0, 0, 1, 1], [], []>} : vector<256x256xbf16>, vector<256x64xbf16>, vector<256x64xf32> -> vector<256x64xf32>
    %42 = arith.addf %35, %41 : vector<256x64xf32>
    %c0_42 = arith.constant 0 : index
    %c2_43 = arith.constant 2 : index
    %c0_44 = arith.constant 0 : index
    %c0_45 = arith.constant 0 : index
    %43 = vector.load %arg1[%c0_42, %c2_43, %c0_44, %c0_45] : memref<1x18x18x256xbf16, #tpu.memory_space<vmem>>, vector<1x16x16x256xbf16>
    %44 = vector.shape_cast %43 : vector<1x16x16x256xbf16> to vector<16x16x256xbf16>
    %45 = vector.shape_cast %44 : vector<16x16x256xbf16> to vector<256x256xbf16>
    %c6 = arith.constant 6 : index
    %c0_46 = arith.constant 0 : index
    %c0_47 = arith.constant 0 : index
    %46 = vector.load %arg2[%c6, %c0_46, %c0_47] : memref<9x256x64xbf16, #tpu.memory_space<vmem>>, vector<1x256x64xbf16>
    %47 = vector.shape_cast %46 : vector<1x256x64xbf16> to vector<256x64xbf16>
    %cst_48 = arith.constant dense<0.000000e+00> : vector<256x64xf32>
    %48 = tpu.matmul %45, %47, %cst_48 {dimension_numbers = #tpu.dot_dimension_numbers<[1], [0], [0], [1], [0, 0, 1, 1], [], []>} : vector<256x256xbf16>, vector<256x64xbf16>, vector<256x64xf32> -> vector<256x64xf32>
    %49 = arith.addf %42, %48 : vector<256x64xf32>
    %c0_49 = arith.constant 0 : index
    %c2_50 = arith.constant 2 : index
    %c1_51 = arith.constant 1 : index
    %c0_52 = arith.constant 0 : index
    %50 = vector.load %arg1[%c0_49, %c2_50, %c1_51, %c0_52] : memref<1x18x18x256xbf16, #tpu.memory_space<vmem>>, vector<1x16x16x256xbf16>
    %51 = vector.shape_cast %50 : vector<1x16x16x256xbf16> to vector<16x16x256xbf16>
    %52 = vector.shape_cast %51 : vector<16x16x256xbf16> to vector<256x256xbf16>
    %c7 = arith.constant 7 : index
    %c0_53 = arith.constant 0 : index
    %c0_54 = arith.constant 0 : index
    %53 = vector.load %arg2[%c7, %c0_53, %c0_54] : memref<9x256x64xbf16, #tpu.memory_space<vmem>>, vector<1x256x64xbf16>
    %54 = vector.shape_cast %53 : vector<1x256x64xbf16> to vector<256x64xbf16>
    %cst_55 = arith.constant dense<0.000000e+00> : vector<256x64xf32>
    %55 = tpu.matmul %52, %54, %cst_55 {dimension_numbers = #tpu.dot_dimension_numbers<[1], [0], [0], [1], [0, 0, 1, 1], [], []>} : vector<256x256xbf16>, vector<256x64xbf16>, vector<256x64xf32> -> vector<256x64xf32>
    %56 = arith.addf %49, %55 : vector<256x64xf32>
    %c0_56 = arith.constant 0 : index
    %c2_57 = arith.constant 2 : index
    %c2_58 = arith.constant 2 : index
    %c0_59 = arith.constant 0 : index
    %57 = vector.load %arg1[%c0_56, %c2_57, %c2_58, %c0_59] : memref<1x18x18x256xbf16, #tpu.memory_space<vmem>>, vector<1x16x16x256xbf16>
    %58 = vector.shape_cast %57 : vector<1x16x16x256xbf16> to vector<16x16x256xbf16>
    %59 = vector.shape_cast %58 : vector<16x16x256xbf16> to vector<256x256xbf16>
    %c8 = arith.constant 8 : index
    %c0_60 = arith.constant 0 : index
    %c0_61 = arith.constant 0 : index
    %60 = vector.load %arg2[%c8, %c0_60, %c0_61] : memref<9x256x64xbf16, #tpu.memory_space<vmem>>, vector<1x256x64xbf16>
    %61 = vector.shape_cast %60 : vector<1x256x64xbf16> to vector<256x64xbf16>
    %cst_62 = arith.constant dense<0.000000e+00> : vector<256x64xf32>
    %62 = tpu.matmul %59, %61, %cst_62 {dimension_numbers = #tpu.dot_dimension_numbers<[1], [0], [0], [1], [0, 0, 1, 1], [], []>} : vector<256x256xbf16>, vector<256x64xbf16>, vector<256x64xf32> -> vector<256x64xf32>
    %63 = arith.addf %56, %62 : vector<256x64xf32>
    %c0_63 = arith.constant 0 : index
    %c0_64 = arith.constant 0 : index
    %64 = vector.load %arg3[%c0_63, %c0_64] : memref<1x64xf32, #tpu.memory_space<vmem>>, vector<1x64xf32>
    %65 = vector.broadcast %64 : vector<1x64xf32> to vector<256x64xf32>
    %66 = arith.addf %63, %65 : vector<256x64xf32>
    %cst_65 = arith.constant 0.000000e+00 : f32
    %67 = vector.broadcast %cst_65 : f32 to vector<256x64xf32>
    %68 = arith.maximumf %66, %67 : vector<256x64xf32>
    %69 = arith.truncf %68 : vector<256x64xf32> to vector<256x64xbf16>
    %c0_66 = arith.constant 0 : index
    %c0_67 = arith.constant 0 : index
    %c0_68 = arith.constant 0 : index
    %70 = vector.load %arg4[%c0_66, %c0_67, %c0_68] : memref<1x256x64xbf16, #tpu.memory_space<vmem>>, vector<1x256x64xbf16>
    %71 = vector.shape_cast %70 : vector<1x256x64xbf16> to vector<256x64xbf16>
    %72 = vector.shape_cast %69 : vector<256x64xbf16> to vector<1x256x64xbf16>
    tpu.vector_store %arg4[%c0_66, %c0_67, %c0_68], %72 {strides = array<i32>} : memref<1x256x64xbf16, #tpu.memory_space<vmem>>, vector<1x256x64xbf16>,
    return
  }
  func.func @transform_0(%arg0: i32) -> (i32, i32, i32, i32) {
    %c0_i32 = arith.constant 0 : i32
    %c0_i32_0 = arith.constant 0 : i32
    %c0_i32_1 = arith.constant 0 : i32
    %c0_i32_2 = arith.constant 0 : i32
    return %arg0, %c0_i32, %c0_i32_0, %c0_i32_1 : i32, i32, i32, i32
  }
  func.func @transform_1(%arg0: i32) -> (i32, i32, i32) {
    %c0_i32 = arith.constant 0 : i32
    %c0_i32_0 = arith.constant 0 : i32
    %c0_i32_1 = arith.constant 0 : i32
    %c0_i32_2 = arith.constant 0 : i32
    return %c0_i32, %c0_i32_0, %c0_i32_1 : i32, i32, i32
  }
  func.func @transform_2(%arg0: i32) -> (i32, i32) {
    %c0_i32 = arith.constant 0 : i32
    %c0_i32_0 = arith.constant 0 : i32
    %c0_i32_1 = arith.constant 0 : i32
    return %c0_i32, %c0_i32_0 : i32, i32
  }
  func.func @transform_3(%arg0: i32) -> (i32, i32, i32) {
    %c0_i32 = arith.constant 0 : i32
    %c0_i32_0 = arith.constant 0 : i32
    %c0_i32_1 = arith.constant 0 : i32
    return %arg0, %c0_i32, %c0_i32_0 : i32, i32, i32
  }
}

module attributes {stable_mosaic.version = 11 : i64} {
  func.func @_fused_heads_kernel(%arg0: i32, %arg1: memref<1x18x16x192xbf16, #tpu.memory_space<vmem>>, %arg2: memref<3x192x1024xbf16, #tpu.memory_space<vmem>>, %arg3: memref<1x1024xf32, #tpu.memory_space<vmem>>, %arg4: memref<1024x9xbf16, #tpu.memory_space<vmem>>, %arg5: memref<1x9xf32, #tpu.memory_space<vmem>>, %arg6: memref<1x256x9xf32, #tpu.memory_space<vmem>>) attributes {dimension_semantics = [#tpu.dimension_semantics<parallel>], iteration_bounds = array<i64: 4>, scalar_prefetch = 0 : i64, scratch_operands = 0 : i64, tpu.core_type = #tpu.core_type<tc>, window_params = [{transform_indices = @transform_0, window_bounds = array<i64: 1, 18, 16, 192>}, {pipeline_mode = #tpu.pipeline_mode<synchronous>, transform_indices = @transform_1, window_bounds = array<i64: 3, 192, 1024>}, {pipeline_mode = #tpu.pipeline_mode<synchronous>, transform_indices = @transform_2, window_bounds = array<i64: 1, 1024>}, {pipeline_mode = #tpu.pipeline_mode<synchronous>, transform_indices = @transform_3, window_bounds = array<i64: 1024, 9>}, {pipeline_mode = #tpu.pipeline_mode<synchronous>, transform_indices = @transform_4, window_bounds = array<i64: 1, 9>}, {transform_indices = @transform_5, window_bounds = array<i64: 1, 256, 9>}]} {
    %cst = arith.constant 0.000000e+00 : f32
    %0 = vector.broadcast %cst : f32 to vector<256x1024xf32>
    %c0 = arith.constant 0 : index
    %c0_0 = arith.constant 0 : index
    %c0_1 = arith.constant 0 : index
    %c0_2 = arith.constant 0 : index
    %1 = vector.load %arg1[%c0, %c0_0, %c0_1, %c0_2] : memref<1x18x16x192xbf16, #tpu.memory_space<vmem>>, vector<1x16x16x192xbf16>
    %2 = vector.shape_cast %1 : vector<1x16x16x192xbf16> to vector<16x16x192xbf16>
    %3 = vector.shape_cast %2 : vector<16x16x192xbf16> to vector<256x192xbf16>
    %c0_3 = arith.constant 0 : index
    %c0_4 = arith.constant 0 : index
    %c0_5 = arith.constant 0 : index
    %4 = vector.load %arg2[%c0_3, %c0_4, %c0_5] : memref<3x192x1024xbf16, #tpu.memory_space<vmem>>, vector<1x192x1024xbf16>
    %5 = vector.shape_cast %4 : vector<1x192x1024xbf16> to vector<192x1024xbf16>
    %cst_6 = arith.constant dense<0.000000e+00> : vector<256x1024xf32>
    %6 = tpu.matmul %3, %5, %cst_6 {dimension_numbers = #tpu.dot_dimension_numbers<[1], [0], [0], [1], [0, 0, 1, 1], [], []>} : vector<256x192xbf16>, vector<192x1024xbf16>, vector<256x1024xf32> -> vector<256x1024xf32>
    %7 = arith.addf %0, %6 : vector<256x1024xf32>
    %c0_7 = arith.constant 0 : index
    %c1 = arith.constant 1 : index
    %c0_8 = arith.constant 0 : index
    %c0_9 = arith.constant 0 : index
    %8 = vector.load %arg1[%c0_7, %c1, %c0_8, %c0_9] : memref<1x18x16x192xbf16, #tpu.memory_space<vmem>>, vector<1x16x16x192xbf16>
    %9 = vector.shape_cast %8 : vector<1x16x16x192xbf16> to vector<16x16x192xbf16>
    %10 = vector.shape_cast %9 : vector<16x16x192xbf16> to vector<256x192xbf16>
    %c1_10 = arith.constant 1 : index
    %c0_11 = arith.constant 0 : index
    %c0_12 = arith.constant 0 : index
    %11 = vector.load %arg2[%c1_10, %c0_11, %c0_12] : memref<3x192x1024xbf16, #tpu.memory_space<vmem>>, vector<1x192x1024xbf16>
    %12 = vector.shape_cast %11 : vector<1x192x1024xbf16> to vector<192x1024xbf16>
    %cst_13 = arith.constant dense<0.000000e+00> : vector<256x1024xf32>
    %13 = tpu.matmul %10, %12, %cst_13 {dimension_numbers = #tpu.dot_dimension_numbers<[1], [0], [0], [1], [0, 0, 1, 1], [], []>} : vector<256x192xbf16>, vector<192x1024xbf16>, vector<256x1024xf32> -> vector<256x1024xf32>
    %14 = arith.addf %7, %13 : vector<256x1024xf32>
    %c0_14 = arith.constant 0 : index
    %c2 = arith.constant 2 : index
    %c0_15 = arith.constant 0 : index
    %c0_16 = arith.constant 0 : index
    %15 = vector.load %arg1[%c0_14, %c2, %c0_15, %c0_16] : memref<1x18x16x192xbf16, #tpu.memory_space<vmem>>, vector<1x16x16x192xbf16>
    %16 = vector.shape_cast %15 : vector<1x16x16x192xbf16> to vector<16x16x192xbf16>
    %17 = vector.shape_cast %16 : vector<16x16x192xbf16> to vector<256x192xbf16>
    %c2_17 = arith.constant 2 : index
    %c0_18 = arith.constant 0 : index
    %c0_19 = arith.constant 0 : index
    %18 = vector.load %arg2[%c2_17, %c0_18, %c0_19] : memref<3x192x1024xbf16, #tpu.memory_space<vmem>>, vector<1x192x1024xbf16>
    %19 = vector.shape_cast %18 : vector<1x192x1024xbf16> to vector<192x1024xbf16>
    %cst_20 = arith.constant dense<0.000000e+00> : vector<256x1024xf32>
    %20 = tpu.matmul %17, %19, %cst_20 {dimension_numbers = #tpu.dot_dimension_numbers<[1], [0], [0], [1], [0, 0, 1, 1], [], []>} : vector<256x192xbf16>, vector<192x1024xbf16>, vector<256x1024xf32> -> vector<256x1024xf32>
    %21 = arith.addf %14, %20 : vector<256x1024xf32>
    %c0_21 = arith.constant 0 : index
    %c0_22 = arith.constant 0 : index
    %22 = vector.load %arg3[%c0_21, %c0_22] : memref<1x1024xf32, #tpu.memory_space<vmem>>, vector<1x1024xf32>
    %23 = vector.broadcast %22 : vector<1x1024xf32> to vector<256x1024xf32>
    %24 = arith.addf %21, %23 : vector<256x1024xf32>
    %cst_23 = arith.constant 0.000000e+00 : f32
    %25 = vector.broadcast %cst_23 : f32 to vector<256x1024xf32>
    %26 = arith.maximumf %24, %25 : vector<256x1024xf32>
    %27 = arith.truncf %26 : vector<256x1024xf32> to vector<256x1024xbf16>
    %c0_24 = arith.constant 0 : index
    %c0_25 = arith.constant 0 : index
    %28 = vector.load %arg4[%c0_24, %c0_25] : memref<1024x9xbf16, #tpu.memory_space<vmem>>, vector<1024x9xbf16>
    %cst_26 = arith.constant dense<0.000000e+00> : vector<256x9xf32>
    %29 = tpu.matmul %27, %28, %cst_26 {dimension_numbers = #tpu.dot_dimension_numbers<[1], [0], [0], [1], [0, 0, 1, 1], [], []>} : vector<256x1024xbf16>, vector<1024x9xbf16>, vector<256x9xf32> -> vector<256x9xf32>
    %c0_27 = arith.constant 0 : index
    %c0_28 = arith.constant 0 : index
    %30 = vector.load %arg5[%c0_27, %c0_28] : memref<1x9xf32, #tpu.memory_space<vmem>>, vector<1x9xf32>
    %31 = vector.broadcast %30 : vector<1x9xf32> to vector<256x9xf32>
    %32 = arith.addf %29, %31 : vector<256x9xf32>
    %33 = tpu.iota {dimensions = array<i32: 1>} : vector<256x9xi32>
    %c5_i32 = arith.constant 5 : i32
    %34 = vector.broadcast %c5_i32 : i32 to vector<256x9xi32>
    %35 = arith.cmpi sge, %33, %34 : vector<256x9xi32>
    %cst_29 = arith.constant 0.000000e+00 : f32
    %36 = vector.broadcast %cst_29 : f32 to vector<256x9xf32>
    %37 = arith.maximumf %32, %36 : vector<256x9xf32>
    %38 = arith.select %35, %37, %32 : vector<256x9xi1>, vector<256x9xf32>
    %c0_30 = arith.constant 0 : index
    %c0_31 = arith.constant 0 : index
    %c0_32 = arith.constant 0 : index
    %39 = vector.load %arg6[%c0_30, %c0_31, %c0_32] : memref<1x256x9xf32, #tpu.memory_space<vmem>>, vector<1x256x9xf32>
    %40 = vector.shape_cast %39 : vector<1x256x9xf32> to vector<256x9xf32>
    %41 = vector.shape_cast %38 : vector<256x9xf32> to vector<1x256x9xf32>
    tpu.vector_store %arg6[%c0_30, %c0_31, %c0_32], %41 {strides = array<i32>} : memref<1x256x9xf32, #tpu.memory_space<vmem>>, vector<1x256x9xf32>,
    return
  }
  func.func @transform_0(%arg0: i32) -> (i32, i32, i32, i32) {
    %c0_i32 = arith.constant 0 : i32
    %c0_i32_0 = arith.constant 0 : i32
    %c0_i32_1 = arith.constant 0 : i32
    %c0_i32_2 = arith.constant 0 : i32
    return %arg0, %c0_i32, %c0_i32_0, %c0_i32_1 : i32, i32, i32, i32
  }
  func.func @transform_1(%arg0: i32) -> (i32, i32, i32) {
    %c0_i32 = arith.constant 0 : i32
    %c0_i32_0 = arith.constant 0 : i32
    %c0_i32_1 = arith.constant 0 : i32
    %c0_i32_2 = arith.constant 0 : i32
    return %c0_i32, %c0_i32_0, %c0_i32_1 : i32, i32, i32
  }
  func.func @transform_2(%arg0: i32) -> (i32, i32) {
    %c0_i32 = arith.constant 0 : i32
    %c0_i32_0 = arith.constant 0 : i32
    %c0_i32_1 = arith.constant 0 : i32
    return %c0_i32, %c0_i32_0 : i32, i32
  }
  func.func @transform_3(%arg0: i32) -> (i32, i32) {
    %c0_i32 = arith.constant 0 : i32
    %c0_i32_0 = arith.constant 0 : i32
    %c0_i32_1 = arith.constant 0 : i32
    return %c0_i32, %c0_i32_0 : i32, i32
  }
  func.func @transform_4(%arg0: i32) -> (i32, i32) {
    %c0_i32 = arith.constant 0 : i32
    %c0_i32_0 = arith.constant 0 : i32
    %c0_i32_1 = arith.constant 0 : i32
    return %c0_i32, %c0_i32_0 : i32, i32
  }
  func.func @transform_5(%arg0: i32) -> (i32, i32, i32) {
    %c0_i32 = arith.constant 0 : i32
    %c0_i32_0 = arith.constant 0 : i32
    %c0_i32_1 = arith.constant 0 : i32
    return %arg0, %c0_i32, %c0_i32_0 : i32, i32, i32
  }
}

module attributes {stable_mosaic.version = 11 : i64} {
  func.func @_tracking_kernel(%arg0: i32, %arg1: memref<16x256xf32, #tpu.memory_space<vmem>>, %arg2: memref<1x16x256xf32, #tpu.memory_space<vmem>>, %arg3: memref<16x2xf32, #tpu.memory_space<vmem>>, %arg4: memref<256x64xf32, #tpu.memory_space<vmem>>, %arg5: memref<1x64xf32, #tpu.memory_space<vmem>>, %arg6: memref<256x64xf32, #tpu.memory_space<vmem>>, %arg7: memref<1x64xf32, #tpu.memory_space<vmem>>, %arg8: memref<64x256xf32, #tpu.memory_space<vmem>>, %arg9: memref<64x256xf32, #tpu.memory_space<vmem>>, %arg10: memref<2x256xf32, #tpu.memory_space<vmem>>, %arg11: memref<1x256xf32, #tpu.memory_space<vmem>>, %arg12: memref<256x2xf32, #tpu.memory_space<vmem>>, %arg13: memref<1x2xf32, #tpu.memory_space<vmem>>, %arg14: memref<1x16x2xf32, #tpu.memory_space<vmem>>) attributes {dimension_semantics = [#tpu.dimension_semantics<parallel>], iteration_bounds = array<i64: 2>, scalar_prefetch = 0 : i64, scratch_operands = 0 : i64, tpu.core_type = #tpu.core_type<tc>, window_params = [{pipeline_mode = #tpu.pipeline_mode<synchronous>, transform_indices = @transform_0, window_bounds = array<i64: 16, 256>}, {transform_indices = @transform_1, window_bounds = array<i64: 1, 16, 256>}, {pipeline_mode = #tpu.pipeline_mode<synchronous>, transform_indices = @transform_2, window_bounds = array<i64: 16, 2>}, {pipeline_mode = #tpu.pipeline_mode<synchronous>, transform_indices = @transform_3, window_bounds = array<i64: 256, 64>}, {pipeline_mode = #tpu.pipeline_mode<synchronous>, transform_indices = @transform_4, window_bounds = array<i64: 1, 64>}, {pipeline_mode = #tpu.pipeline_mode<synchronous>, transform_indices = @transform_5, window_bounds = array<i64: 256, 64>}, {pipeline_mode = #tpu.pipeline_mode<synchronous>, transform_indices = @transform_6, window_bounds = array<i64: 1, 64>}, {pipeline_mode = #tpu.pipeline_mode<synchronous>, transform_indices = @transform_7, window_bounds = array<i64: 64, 256>}, {pipeline_mode = #tpu.pipeline_mode<synchronous>, transform_indices = @transform_8, window_bounds = array<i64: 64, 256>}, {pipeline_mode = #tpu.pipeline_mode<synchronous>, transform_indices = @transform_9, window_bounds = array<i64: 2, 256>}, {pipeline_mode = #tpu.pipeline_mode<synchronous>, transform_indices = @transform_10, window_bounds = array<i64: 1, 256>}, {pipeline_mode = #tpu.pipeline_mode<synchronous>, transform_indices = @transform_11, window_bounds = array<i64: 256, 2>}, {pipeline_mode = #tpu.pipeline_mode<synchronous>, transform_indices = @transform_12, window_bounds = array<i64: 1, 2>}, {transform_indices = @transform_13, window_bounds = array<i64: 1, 16, 2>}]} {
    %c0 = arith.constant 0 : index
    %c0_0 = arith.constant 0 : index
    %0 = vector.load %arg1[%c0, %c0_0] : memref<16x256xf32, #tpu.memory_space<vmem>>, vector<16x256xf32>
    %c0_1 = arith.constant 0 : index
    %c0_2 = arith.constant 0 : index
    %1 = vector.load %arg4[%c0_1, %c0_2] : memref<256x64xf32, #tpu.memory_space<vmem>>, vector<256x64xf32>
    %cst = arith.constant dense<0.000000e+00> : vector<16x64xf32>
    %2 = tpu.matmul %0, %1, %cst {dimension_numbers = #tpu.dot_dimension_numbers<[1], [0], [0], [1], [0, 0, 1, 1], [], []>} : vector<16x256xf32>, vector<256x64xf32>, vector<16x64xf32> -> vector<16x64xf32>
    %c0_3 = arith.constant 0 : index
    %c0_4 = arith.constant 0 : index
    %3 = vector.load %arg5[%c0_3, %c0_4] : memref<1x64xf32, #tpu.memory_space<vmem>>, vector<1x64xf32>
    %4 = vector.broadcast %3 : vector<1x64xf32> to vector<16x64xf32>
    %5 = arith.addf %2, %4 : vector<16x64xf32>
    %cst_5 = arith.constant 0.000000e+00 : f32
    %6 = vector.broadcast %cst_5 : f32 to vector<16x64xf32>
    %7 = arith.maximumf %5, %6 : vector<16x64xf32>
    %c0_6 = arith.constant 0 : index
    %c0_7 = arith.constant 0 : index
    %c0_8 = arith.constant 0 : index
    %8 = vector.load %arg2[%c0_6, %c0_7, %c0_8] : memref<1x16x256xf32, #tpu.memory_space<vmem>>, vector<1x16x256xf32>
    %9 = vector.shape_cast %8 : vector<1x16x256xf32> to vector<16x256xf32>
    %c0_9 = arith.constant 0 : index
    %c0_10 = arith.constant 0 : index
    %10 = vector.load %arg6[%c0_9, %c0_10] : memref<256x64xf32, #tpu.memory_space<vmem>>, vector<256x64xf32>
    %cst_11 = arith.constant dense<0.000000e+00> : vector<16x64xf32>
    %11 = tpu.matmul %9, %10, %cst_11 {dimension_numbers = #tpu.dot_dimension_numbers<[1], [0], [0], [1], [0, 0, 1, 1], [], []>} : vector<16x256xf32>, vector<256x64xf32>, vector<16x64xf32> -> vector<16x64xf32>
    %c0_12 = arith.constant 0 : index
    %c0_13 = arith.constant 0 : index
    %12 = vector.load %arg7[%c0_12, %c0_13] : memref<1x64xf32, #tpu.memory_space<vmem>>, vector<1x64xf32>
    %13 = vector.broadcast %12 : vector<1x64xf32> to vector<16x64xf32>
    %14 = arith.addf %11, %13 : vector<16x64xf32>
    %cst_14 = arith.constant 0.000000e+00 : f32
    %15 = vector.broadcast %cst_14 : f32 to vector<16x64xf32>
    %16 = arith.maximumf %14, %15 : vector<16x64xf32>
    %c0_15 = arith.constant 0 : index
    %c0_16 = arith.constant 0 : index
    %17 = vector.load %arg3[%c0_15, %c0_16] : memref<16x2xf32, #tpu.memory_space<vmem>>, vector<16x2xf32>
    %c0_17 = arith.constant 0 : index
    %c0_18 = arith.constant 0 : index
    %18 = vector.load %arg8[%c0_17, %c0_18] : memref<64x256xf32, #tpu.memory_space<vmem>>, vector<64x256xf32>
    %cst_19 = arith.constant dense<0.000000e+00> : vector<16x256xf32>
    %19 = tpu.matmul %7, %18, %cst_19 {dimension_numbers = #tpu.dot_dimension_numbers<[1], [0], [0], [1], [0, 0, 1, 1], [], []>} : vector<16x64xf32>, vector<64x256xf32>, vector<16x256xf32> -> vector<16x256xf32>
    %c0_20 = arith.constant 0 : index
    %c0_21 = arith.constant 0 : index
    %20 = vector.load %arg9[%c0_20, %c0_21] : memref<64x256xf32, #tpu.memory_space<vmem>>, vector<64x256xf32>
    %cst_22 = arith.constant dense<0.000000e+00> : vector<16x256xf32>
    %21 = tpu.matmul %16, %20, %cst_22 {dimension_numbers = #tpu.dot_dimension_numbers<[1], [0], [0], [1], [0, 0, 1, 1], [], []>} : vector<16x64xf32>, vector<64x256xf32>, vector<16x256xf32> -> vector<16x256xf32>
    %22 = arith.addf %19, %21 : vector<16x256xf32>
    %23 = vector.extract_strided_slice %17 {offsets = [0, 0], sizes = [16, 1], strides = [1, 1]} : vector<16x2xf32> to vector<16x1xf32>
    %c0_23 = arith.constant 0 : index
    %c0_24 = arith.constant 0 : index
    %24 = vector.load %arg10[%c0_23, %c0_24] : memref<2x256xf32, #tpu.memory_space<vmem>>, vector<1x256xf32>
    %25 = vector.broadcast %23 : vector<16x1xf32> to vector<16x256xf32>
    %26 = vector.broadcast %24 : vector<1x256xf32> to vector<16x256xf32>
    %27 = arith.mulf %25, %26 : vector<16x256xf32>
    %28 = arith.addf %22, %27 : vector<16x256xf32>
    %29 = vector.extract_strided_slice %17 {offsets = [0, 1], sizes = [16, 1], strides = [1, 1]} : vector<16x2xf32> to vector<16x1xf32>
    %c1 = arith.constant 1 : index
    %c0_25 = arith.constant 0 : index
    %30 = vector.load %arg10[%c1, %c0_25] : memref<2x256xf32, #tpu.memory_space<vmem>>, vector<1x256xf32>
    %31 = vector.broadcast %29 : vector<16x1xf32> to vector<16x256xf32>
    %32 = vector.broadcast %30 : vector<1x256xf32> to vector<16x256xf32>
    %33 = arith.mulf %31, %32 : vector<16x256xf32>
    %34 = arith.addf %28, %33 : vector<16x256xf32>
    %c0_26 = arith.constant 0 : index
    %c0_27 = arith.constant 0 : index
    %35 = vector.load %arg11[%c0_26, %c0_27] : memref<1x256xf32, #tpu.memory_space<vmem>>, vector<1x256xf32>
    %36 = vector.broadcast %35 : vector<1x256xf32> to vector<16x256xf32>
    %37 = arith.addf %34, %36 : vector<16x256xf32>
    %cst_28 = arith.constant 0.000000e+00 : f32
    %38 = vector.broadcast %cst_28 : f32 to vector<16x256xf32>
    %39 = arith.maximumf %37, %38 : vector<16x256xf32>
    %c0_29 = arith.constant 0 : index
    %c0_30 = arith.constant 0 : index
    %40 = vector.load %arg12[%c0_29, %c0_30] : memref<256x2xf32, #tpu.memory_space<vmem>>, vector<256x2xf32>
    %cst_31 = arith.constant dense<0.000000e+00> : vector<16x2xf32>
    %41 = tpu.matmul %39, %40, %cst_31 {dimension_numbers = #tpu.dot_dimension_numbers<[1], [0], [0], [1], [0, 0, 1, 1], [], []>} : vector<16x256xf32>, vector<256x2xf32>, vector<16x2xf32> -> vector<16x2xf32>
    %c0_32 = arith.constant 0 : index
    %c0_33 = arith.constant 0 : index
    %42 = vector.load %arg13[%c0_32, %c0_33] : memref<1x2xf32, #tpu.memory_space<vmem>>, vector<1x2xf32>
    %43 = vector.broadcast %42 : vector<1x2xf32> to vector<16x2xf32>
    %44 = arith.addf %41, %43 : vector<16x2xf32>
    %c0_34 = arith.constant 0 : index
    %c0_35 = arith.constant 0 : index
    %c0_36 = arith.constant 0 : index
    %45 = vector.load %arg14[%c0_34, %c0_35, %c0_36] : memref<1x16x2xf32, #tpu.memory_space<vmem>>, vector<1x16x2xf32>
    %46 = vector.shape_cast %45 : vector<1x16x2xf32> to vector<16x2xf32>
    %47 = vector.shape_cast %44 : vector<16x2xf32> to vector<1x16x2xf32>
    tpu.vector_store %arg14[%c0_34, %c0_35, %c0_36], %47 {strides = array<i32>} : memref<1x16x2xf32, #tpu.memory_space<vmem>>, vector<1x16x2xf32>,
    return
  }
  func.func @transform_0(%arg0: i32) -> (i32, i32) {
    %c0_i32 = arith.constant 0 : i32
    %c0_i32_0 = arith.constant 0 : i32
    %c0_i32_1 = arith.constant 0 : i32
    return %c0_i32, %c0_i32_0 : i32, i32
  }
  func.func @transform_1(%arg0: i32) -> (i32, i32, i32) {
    %c0_i32 = arith.constant 0 : i32
    %c0_i32_0 = arith.constant 0 : i32
    %c0_i32_1 = arith.constant 0 : i32
    return %arg0, %c0_i32, %c0_i32_0 : i32, i32, i32
  }
  func.func @transform_2(%arg0: i32) -> (i32, i32) {
    %c0_i32 = arith.constant 0 : i32
    %c0_i32_0 = arith.constant 0 : i32
    %c0_i32_1 = arith.constant 0 : i32
    return %c0_i32, %c0_i32_0 : i32, i32
  }
  func.func @transform_3(%arg0: i32) -> (i32, i32) {
    %c0_i32 = arith.constant 0 : i32
    %c0_i32_0 = arith.constant 0 : i32
    %c0_i32_1 = arith.constant 0 : i32
    return %c0_i32, %c0_i32_0 : i32, i32
  }
  func.func @transform_4(%arg0: i32) -> (i32, i32) {
    %c0_i32 = arith.constant 0 : i32
    %c0_i32_0 = arith.constant 0 : i32
    %c0_i32_1 = arith.constant 0 : i32
    return %c0_i32, %c0_i32_0 : i32, i32
  }
  func.func @transform_5(%arg0: i32) -> (i32, i32) {
    %c0_i32 = arith.constant 0 : i32
    %c0_i32_0 = arith.constant 0 : i32
    %c0_i32_1 = arith.constant 0 : i32
    return %c0_i32, %c0_i32_0 : i32, i32
  }
  func.func @transform_6(%arg0: i32) -> (i32, i32) {
    %c0_i32 = arith.constant 0 : i32
    %c0_i32_0 = arith.constant 0 : i32
    %c0_i32_1 = arith.constant 0 : i32
    return %c0_i32, %c0_i32_0 : i32, i32
  }
  func.func @transform_7(%arg0: i32) -> (i32, i32) {
    %c0_i32 = arith.constant 0 : i32
    %c0_i32_0 = arith.constant 0 : i32
    %c0_i32_1 = arith.constant 0 : i32
    return %c0_i32, %c0_i32_0 : i32, i32
  }
  func.func @transform_8(%arg0: i32) -> (i32, i32) {
    %c0_i32 = arith.constant 0 : i32
    %c0_i32_0 = arith.constant 0 : i32
    %c0_i32_1 = arith.constant 0 : i32
    return %c0_i32, %c0_i32_0 : i32, i32
  }
  func.func @transform_9(%arg0: i32) -> (i32, i32) {
    %c0_i32 = arith.constant 0 : i32
    %c0_i32_0 = arith.constant 0 : i32
    %c0_i32_1 = arith.constant 0 : i32
    return %c0_i32, %c0_i32_0 : i32, i32
  }
  func.func @transform_10(%arg0: i32) -> (i32, i32) {
    %c0_i32 = arith.constant 0 : i32
    %c0_i32_0 = arith.constant 0 : i32
    %c0_i32_1 = arith.constant 0 : i32
    return %c0_i32, %c0_i32_0 : i32, i32
  }
  func.func @transform_11(%arg0: i32) -> (i32, i32) {
    %c0_i32 = arith.constant 0 : i32
    %c0_i32_0 = arith.constant 0 : i32
    %c0_i32_1 = arith.constant 0 : i32
    return %c0_i32, %c0_i32_0 : i32, i32
  }
  func.func @transform_12(%arg0: i32) -> (i32, i32) {
    %c0_i32 = arith.constant 0 : i32
    %c0_i32_0 = arith.constant 0 : i32
    %c0_i32_1 = arith.constant 0 : i32
    return %c0_i32, %c0_i32_0 : i32, i32
  }
  func.func @transform_13(%arg0: i32) -> (i32, i32, i32) {
    %c0_i32 = arith.constant 0 : i32
    %c0_i32_0 = arith.constant 0 : i32
    %c0_i32_1 = arith.constant 0 : i32
    return %arg0, %c0_i32, %c0_i32_0 : i32, i32, i32
  }
}

</mosaic_0001>

<bundles_post_ra>
// kernel: deformable_detr_forward.3
= control target key start
LH: loop header
LB: loop body
LE: loop exit
PB: predicated region body
PF: predicated region fallthrough
CT: control target
= control target key end

     0   :  { %s8785_s12 = smov 0   ;;  %s11631_s0 = inlined_call_operand.vmem [shape: bf16[4,18,18,256], index: 0, kind: input, shape index: {}]   ;;  %s11632_s1 = inlined_call_operand.vmem [shape: bf16[9,256,64], index: 1, kind: input, shape index: {}]   ;;  %s11633_s2 = inlined_call_operand.vmem [shape: f32[1,64], index: 2, kind: input, shape index: {}]   ;;  %s11634_s3 = inlined_call_operand.vmem [shape: bf16[4,256,64], index: 3, kind: output, shape index: {}]  }
   0x1 LB: > { %s6420_s13 = sadd.s32 4294967295, %s8763_s12   ;;  %p6424_p0 = scmp.ge.s32.totalorder %s8763_s12, 1  ;;  %s8763_s12 = sphi %s8785_s12, %s13_s12  }
   0x2   : > { %p137_p1 = scmp.lt.s32.totalorder %s8763_s12, 5 }
   0x4   : > { %p138_p2 = pnand %p6424_p0, %p137_p1 }
   0x6   : > { %141 = sbr.rel (%p138_p2) target bundleno = 846 (0x34e), region = 32 }
   0xd   : > { %v8457_v0 = vld [vmem:[%s11632_s1 + $0xc0] sm:$0xff]   ;;  %p161_p3 = scmp.lt.s32.totalorder %s6420_s13, 3  ;;  %v8459_v2 = vld [vmem:[%s11632_s1 + $0xc8] sm:$0xff]   ;;  %v8461_v4 = vld [vmem:[%s11632_s1 + $0xd0] sm:$0xff]   ;;  %vm252_vm0 = vsmask.f32 3328 }
   0xe   : > { %v8458_v1 = vld [vmem:[%s11632_s1 + $0x80] sm:$0xff]   ;;  %7424 = vmatprep.subr.bf16.mxu0 %v8457_v0  ;;  %8432 = vmatprep.subr.bf16.mxu1 %v8457_v0  ;;  %v8460_v3 = vld [vmem:[%s11632_s1 + $0x88] sm:$0xff]   ;;  %v8462_v5 = vld [vmem:[%s11632_s1 + $0x90] sm:$0xff]   ;;  %vm253_vm1 = vsmask.f32 7440  ;;  %vm1522_vm3 = vcmask 1042432  }
   0xf   : > { %7425 = vmatpush3.bf16.msra.mxu0 %v8458_v1  ;;  %8440 = vmatpush3.bf16.msra.mxu1 %v8458_v1  ;;  %s11724_s13 = smov (!%p161_p3, %s6420_s13), 3  ;;  %v8463_v6 = vld [vmem:[%s11632_s1 + $0xd8] sm:$0xff]   ;;  %v8465_v8 = vld [vmem:[%s11632_s1 + $0xe0] sm:$0xff]   ;;  %v8467_v10 = vld [vmem:[%s11632_s1 + $0xe8] sm:$0xff]   ;;  %vm1523_vm4 = vcmask 1046532   ;;  %vm6332_vm6 = vcmask 519168  }
  0x10   : > { %7426 = vmatprep.subr.bf16.mxu0 %v8459_v2  ;;  %8433 = vmatprep.subr.bf16.mxu1 %v8459_v2  ;;  %s8448_s28 = smul.u32 432, %s11724_s13  ;;  %v8464_v7 = vld [vmem:[%s11632_s1 + $0x98] sm:$0xff]   ;;  %v8466_v9 = vld [vmem:[%s11632_s1 + $0xa0] sm:$0xff]   ;;  %v8468_v18 = vld [vmem:[%s11632_s1 + $0xa8] sm:$0xff]   ;;  %s7391_s18 = sshll.u32 %s11724_s13, 7 }
  0x11   : > { %v8469_v28 = vld [vmem:[%s11632_s1 + $0xf0] sm:$0xff]   ;;  %vm8861_vm2 = vmor %vm252_vm0, %vm253_vm1  ;;  %v8471_v42 = vld [vmem:[%s11632_s1 + $0xf8] sm:$0xff]   ;;  %s11502_s21 = scalar_lea.vmem %s11634_s3, %s7391_s18 }
  0x12   : > { %s8826_s8 = scalar_lea.vmem %s11631_s0, %s8448_s28  ;;  %v8470_v41 = vld [vmem:[%s11632_s1 + $0xb0] sm:$0xff]   ;;  %v8472_v49 = vld [vmem:[%s11632_s1 + $0xb8] sm:$0xff]   ;;  %v8473_v1 = vld [vmem:[%s11632_s1 + $0x40] sm:$0xff]  }
  0x13   : > { %7427 = vmatpush3.bf16.msra.mxu0 %v8460_v3  ;;  %8441 = vmatpush3.bf16.msra.mxu1 %v8460_v3  ;;  %v8835_v11 = vld [vmem:[%s8826_s8] sm:$0xff]  ;;  %v8838_v12 = vld [vmem:[%s8826_s8 + $0x8] sm:$0xff]  ;;  %v8841_v13 = vld [vmem:[%s8826_s8 + $0x10] sm:$0x11] }
  0x14   : > { %7428 = vmatprep.subr.bf16.mxu0 %v8461_v4  ;;  %8434 = vmatprep.subr.bf16.mxu1 %v8461_v4  ;;  %v256_v14 = vshrl.u32 %v8835_v11, 16  ;;  %v259_v15 = vshll.u32 %v8835_v11, 16  ;;  %v265_v16 = vshll.u32 %v8838_v12, 16  ;;  %v188_v17 = vld [vmem:[%s8826_s8 + $0xc0] sm:$0xff]  ;;  %v269_v19 = vshrl.u32 %v8838_v12, 16  ;;  %v189_v21 = vld [vmem:[%s8826_s8 + $0xc8] sm:$0xff]  ;;  %vm9200_vm5 = vmor %vm1522_vm3, %vm1523_vm4 }
  0x15   : > { %v275_v20 = vshll.u32 %v8841_v13, 16  ;;  %v244_v22 = vld [vmem:[%s8826_s8 + $0xd0] sm:$0x11]  ;;  %v6509_v23 = vcombine.high %v8835_v11, %v8838_v12  ;;  %v448_v27 = vshrl.u32 %v188_v17, 16  ;;  %v451_v30 = vshll.u32 %v188_v17, 16  ;;  %v8880_v53 = vld [vmem:[%s8826_s8 + $0x18] sm:$0xff] }
  0x16   : > { %v258_v24 = vrot.slane %v256_v14, 4  ;;  %v261_v25 = vrot.slane %v259_v15, 5  ;;  %v267_v26 = vrot.slane %v265_v16, 5  ;;  %v271_v29 = vrot.slane %v269_v19, 4  ;;  %v8883_v54 = vld [vmem:[%s8826_s8 + $0x20] sm:$0xff]  ;;  %v190_v61 = vld [vmem:[%s8826_s8 + $0xd8] sm:$0xff] }
  0x17   : > { %7429 = vmatpush3.bf16.msra.mxu0 %v8462_v5  ;;  %8442 = vmatpush3.bf16.msra.mxu1 %v8462_v5  ;;  %v457_v31 = vshll.u32 %v189_v21, 16  ;;  %v450_v33 = vrot.slane %v448_v27, 4  ;;  %v461_v34 = vshrl.u32 %v189_v21, 16  ;;  %v467_v35 = vshll.u32 %v244_v22, 16  ;;  %v8889_v58 = vld [vmem:[%s8826_s8 + $0x28] sm:$0x11] }
  0x18   : > { %7430 = vmatprep.subr.bf16.mxu0 %v8463_v6  ;;  %8435 = vmatprep.subr.bf16.mxu1 %v8463_v6  ;;  %v262_v32 = vor.u32 %v261_v25, %v258_v24  ;;  %v272_v37 = vor.u32 %v271_v29, %v267_v26  ;;  %v277_v38 = vrot.slane %v275_v20, 5  ;;  %v453_v39 = vrot.slane %v451_v30, 5  ;;  %v8475_v2 = vld [vmem:[%s11632_s1 + $0x140] sm:$0xff]   ;;  %v245_v4 = vld [vmem:[%s8826_s8 + $0xe8] sm:$0x11] }
  0x19   : > { %v459_v40 = vrot.slane %v457_v31, 5  ;;  %v463_v44 = vrot.slane %v461_v34, 4  ;;  %v1530_v47 = vrot.slane %v8841_v13, 5  ;;  %v469_v52 = vrot.slane %v467_v35, 5  ;;  %v8474_v14 = vld [vmem:[%s11632_s1] sm:$0xff]   ;;  %v8477_v24 = vld [vmem:[%s11632_s1 + $0x48] sm:$0xff]  }
  0x1a   : > { %v263_v43 = vrot.slane %v262_v32, 4  ;;  %v273_v46 = vrot.slane %v272_v37, 4  ;;  %v454_v48 = vor.u32 %v453_v39, %v450_v33  ;;  %v1527_v55 = vrot.slane %v8838_v12, 5  ;;  %v8476_v15 = vld [vmem:[%s11632_s1 + $0x100] sm:$0xff]   ;;  %v8479_v25 = vld [vmem:[%s11632_s1 + $0x148] sm:$0xff]   ;;  %v8922_v34 = vld [vmem:[%s8826_s8 + $0x30] sm:$0xff] }
  0x1b   : > { %7431 = vmatpush3.bf16.msra.mxu0 %v8464_v7  ;;  %8443 = vmatpush3.bf16.msra.mxu1 %v8464_v7  ;;  %v464_v51 = vor.u32 %v463_v44, %v459_v40  ;;  %v280_v59 = vshrl.u32 %v8880_v53, 16  ;;  %v283_v60 = vshll.u32 %v8880_v53, 16  ;;  %v289_v3 = vshll.u32 %v8883_v54, 16  ;;  %v8931_v44 = vld [vmem:[%s8826_s8 + $0x38] sm:$0xff] }
  0x1c   : > { %7432 = vmatprep.subr.bf16.mxu0 %v8465_v8  ;;  %8436 = vmatprep.subr.bf16.mxu1 %v8465_v8  ;;  %v268_v50 = vsel %vm8861_vm2, %v263_v43, %v267_v26  ;;  %v278_v56 = vsel %vm8861_vm2, %v273_v46, %v277_v38  ;;  %v455_v57 = vrot.slane %v454_v48, 4  ;;  %v293_v8 = vshrl.u32 %v8883_v54, 16  ;;  %v8934_v46 = vld [vmem:[%s8826_s8 + $0x40] sm:$0x11] }
  0x1d   : > { %v6460_v62 = vcombine.low %v268_v50, %v278_v56  ;;  %v6461_v63 = vcombine.high %v268_v50, %v278_v56  ;;  %v465_v0 = vrot.slane %v464_v51, 4  ;;  %v282_v6 = vrot.slane %v280_v59, 4  ;;  %v8480_v50 = vld [vmem:[%s11632_s1 + $0x108] sm:$0xff]  }
  0x1e   : > { %v460_v5 = vsel %vm8861_vm2, %v455_v57, %v459_v40  ;;  %v285_v7 = vrot.slane %v283_v60, 5  ;;  %v291_v16 = vrot.slane %v289_v3, 5  ;;  %v299_v17 = vshll.u32 %v8889_v58, 16  ;;  %v192_v57 = vld [vmem:[%s8826_s8 + $0xf0] sm:$0xff] }
  0x1f   : > { %7433 = vmatpush3.bf16.msra.mxu0 %v8466_v9  ;;  %8444 = vmatpush3.bf16.msra.mxu1 %v8466_v9  ;;  %v191_v9 = vld [vmem:[%s8826_s8 + $0xe0] sm:$0xff]  ;;  %v295_v22 = vrot.slane %v293_v8, 4  ;;  %v491_v33 = vshll.u32 %v245_v4, 16  ;;  %v304_v51 = vshrl.u32 %v8922_v34, 16  ;;  %v313_v56 = vshll.u32 %v8931_v44, 16 }
  0x20   : > { %7434 = vmatprep.subr.bf16.mxu0 %v8467_v10  ;;  %8437 = vmatprep.subr.bf16.mxu1 %v8467_v10  ;;  %v470_v10 = vsel %vm8861_vm2, %v465_v0, %v469_v52  ;;  %v286_v21 = vor.u32 %v285_v7, %v282_v6  ;;  %v301_v26 = vrot.slane %v299_v17, 5  ;;  %v481_v29 = vshll.u32 %v191_v9, 16  ;;  %v8481_v0 = vld [vmem:[%s11632_s1 + $0x50] sm:$0xff]  }
  0x21   : > { %928 = vmatprep.mubr.bf16.mxu0 %v6461_v63  ;;  %v6476_v19 = vcombine.low %v460_v5, %v470_v10  ;;  %v6477_v20 = vcombine.high %v460_v5, %v470_v10  ;;  %v296_v31 = vor.u32 %v295_v22, %v291_v16  ;;  %v485_v32 = vshrl.u32 %v191_v9, 16  ;;  %v193_v63 = vld [vmem:[%s8826_s8 + $0xf8] sm:$0xff]  ;;  %v246_v9 = vld [vmem:[%s8826_s8 + $0x100] sm:$0x11]  ;;  %v8482_v17 = vld [vmem:[%s11632_s1 + $0x10] sm:$0xff]  }
  0x22   : > { %v287_v30 = vrot.slane %v286_v21, 4  ;;  %v483_v37 = vrot.slane %v481_v29, 5  ;;  %v493_v43 = vrot.slane %v491_v33, 5  ;;  %v307_v52 = vshll.u32 %v8922_v34, 16  ;;  %v8483_v22 = vld [vmem:[%s11632_s1 + $0x150] sm:$0xff]   ;;  %v8969_v29 = vld [vmem:[%s8826_s8 + $0x48] sm:$0xff] }
  0x23   : > { %7435 = vmatpush3.bf16.msra.mxu0 %v8468_v18  ;;  %8445 = vmatpush3.bf16.msra.mxu1 %v8468_v18  ;;  %v472_v18 = vshrl.u32 %v190_v61, 16  ;;  %v306_v4 = vrot.slane %v304_v51, 4  ;;  %v315_v7 = vrot.slane %v313_v56, 5  ;;  %v505_v21 = vshll.u32 %v193_v63, 16  ;;  %v195_v56 = vld [vmem:[%s8826_s8 + $0x110] sm:$0xff] }
  0x24   : > { %7436 = vmatprep.subr.bf16.mxu0 %v8469_v28  ;;  %8438 = vmatprep.subr.bf16.mxu1 %v8469_v28  ;;  %v475_v28 = vshll.u32 %v190_v61, 16  ;;  %v292_v40 = vsel %vm8861_vm2, %v287_v30, %v291_v16  ;;  %v317_v61 = vshrl.u32 %v8931_v44, 16  ;;  %v309_v6 = vrot.slane %v307_v52, 5  ;;  %v194_v52 = vld [vmem:[%s8826_s8 + $0x108] sm:$0xff] }
  0x25   : > { %v474_v27 = vrot.slane %v472_v18, 4  ;;  %992 = vmatprep.mubr.bf16.mxu1 %v6477_v20  ;;  %v499_v16 = vshll.u32 %v192_v57, 16  ;;  %v509_v33 = vshrl.u32 %v193_v63, 16  ;;  %v8486_v63 = vld [vmem:[%s11632_s1 + $0x18] sm:$0xff]  }
  0x26   : > { %v477_v35 = vrot.slane %v475_v28, 5  ;;  %v319_v8 = vrot.slane %v317_v61, 4  ;;  %v8484_v28 = vld [vmem:[%s11632_s1 + $0x110] sm:$0xff]  }
  0x27   : > { %7437 = vmatpush3.bf16.msra.mxu0 %v8470_v41  ;;  %8446 = vmatpush3.bf16.msra.mxu1 %v8470_v41  ;;  %v297_v41 = vrot.slane %v296_v31, 4 }
  0x28   : > { %7438 = vmatprep.subr.bf16.mxu0 %v8471_v42  ;;  %8439 = vmatprep.subr.bf16.mxu1 %v8471_v42  ;;  %v487_v42 = vrot.slane %v485_v32, 4  ;;  %v478_v48 = vor.u32 %v477_v35, %v474_v27  ;;  %v320_v20 = vor.u32 %v319_v8, %v315_v7  ;;  %v501_v27 = vrot.slane %v499_v16, 5  ;;  %v8972_v35 = vld [vmem:[%s8826_s8 + $0x50] sm:$0xff]  ;;  %v247_v8 = vld [vmem:[%s8826_s8 + $0x118] sm:$0x11] }
  0x29   : > { %v302_v59 = vsel %vm8861_vm2, %v297_v41, %v301_v26  ;;  %v507_v32 = vrot.slane %v505_v21, 5  ;;  %v8975_v41 = vld [vmem:[%s8826_s8 + $0x58] sm:$0x11]  ;;  %v337_v51 = vshll.u32 %v8972_v35, 16  ;;  %v523_v16 = vshll.u32 %v194_v52, 16 }
  0x2a   : > { %v488_v60 = vor.u32 %v487_v42, %v483_v37  ;;  %v6462_v3 = vcombine.low %v292_v40, %v302_v59  ;;  %v321_v31 = vrot.slane %v320_v20, 4  ;;  %v328_v42 = vshrl.u32 %v8969_v29, 16 }
  0x2b   : > { %7439 = vmatpush3.bf16.msra.mxu0 %v8472_v49  ;;  %8447 = vmatpush3.bf16.msra.mxu1 %v8472_v49  ;;  %v8478_v49 = vld [vmem:[%s11632_s1 + $0x8] sm:$0xff]  }
  0x2c   : > { %7536 = vmatprep.subr.bf16.mxu1 %v8473_v1  ;;  %7648 = vmatprep.subr.bf16.mxu0 %v8475_v2  ;;  %v6463_v1 = vcombine.high %v292_v40, %v302_v59  ;;  %v479_v2 = vrot.slane %v478_v48, 4  ;;  %v489_v5 = vrot.slane %v488_v60, 4  ;;  %v515_v40 = vshll.u32 %v246_v9, 16 }
  0x2d   : > { %v520_v9 = vshrl.u32 %v194_v52, 16 }
  0x2e   : > { %929 = vmatmul.mubr.bf16.vlgmr.msra.gmra.mrb[0].mxu0 %v6460_v62  ;;  %993 = vmatmul.mubr.bf16.vlgmr.msra.gmra.mrb[0].mxu1 %v6476_v19  ;;  %v323_v62 = vshll.u32 %v8934_v46, 16  ;;  %v484_v10 = vsel %vm8861_vm2, %v479_v2, %v483_v37  ;;  %v494_v18 = vsel %vm8861_vm2, %v489_v5, %v493_v43  ;;  %v310_v19 = vor.u32 %v309_v6, %v306_v4  ;;  %v8487_v4 = vld [vmem:[%s11632_s1 + $0x158] sm:$0xff]  }
  0x2f   : > { %7537 = vmatpush3.bf16.msra.mxu1 %v8474_v14  ;;  %7649 = vmatpush3.bf16.msra.mxu0 %v8476_v15  ;;  %v496_v15 = vshrl.u32 %v192_v57, 16  ;;  %v331_v43 = vshll.u32 %v8969_v29, 16  ;;  %v517_v60 = vrot.slane %v515_v40, 5  ;;  %v341_v6 = vshrl.u32 %v8972_v35, 16 }
  0x30   : > { %7538 = vmatprep.subr.bf16.mxu1 %v8477_v24  ;;  %7650 = vmatprep.subr.bf16.mxu0 %v8479_v25  ;;  %v325_v14 = vrot.slane %v323_v62, 5  ;;  %v6479_v24 = vcombine.high %v484_v10, %v494_v18  ;;  %v6478_v25 = vcombine.low %v484_v10, %v494_v18  ;;  %v311_v30 = vrot.slane %v310_v19, 4  ;;  %v8485_v62 = vld [vmem:[%s11632_s1 + $0x58] sm:$0xff]   ;;  %v9004_v18 = vld [vmem:[%s8826_s8 + $0x60] sm:$0xff] }
  0x31   : > { %936 = vmatprep.mubr.bf16.mxu0 %v6463_v1  ;;  %v498_v26 = vrot.slane %v496_v15, 4  ;;  %v330_v1 = vrot.slane %v328_v42, 4  ;;  %v333_v2 = vrot.slane %v331_v43, 5  ;;  %v8488_v10 = vld [vmem:[%s11632_s1 + $0x118] sm:$0xff]   ;;  %v343_v19 = vrot.slane %v341_v6, 4  ;;  %v8491_v6 = vld [vmem:[%s11632_s1 + $0x160] sm:$0xff]  }
  0x32   : > { %1000 = vmatprep.mubr.bf16.mxu1 %v6479_v24  ;;  %v316_v48 = vsel %vm8861_vm2, %v311_v30, %v315_v7  ;;  %v347_v7 = vshll.u32 %v8975_v41, 16  ;;  %v522_v21 = vrot.slane %v520_v9, 4  ;;  %v539_v42 = vshll.u32 %v247_v8, 16  ;;  %v9014_v43 = vld [vmem:[%s8826_s8 + $0x70] sm:$0x11] }
  0x33   : > { %7539 = vmatpush3.bf16.msra.mxu1 %v8478_v49  ;;  %7651 = vmatpush3.bf16.msra.mxu0 %v8480_v50  ;;  %v502_v37 = vor.u32 %v501_v27, %v498_v26  ;;  %v326_v49 = vsel %vm8861_vm2, %v321_v31, %v325_v14  ;;  %v511_v50 = vrot.slane %v509_v33, 4  ;;  %v334_v15 = vor.u32 %v333_v2, %v330_v1 }
  0x34   : > { %7540 = vmatprep.subr.bf16.mxu1 %v8481_v0  ;;  %7652 = vmatprep.subr.bf16.mxu0 %v8483_v22  ;;  %v6465_v57 = vcombine.high %v316_v48, %v326_v49  ;;  %v6464_v61 = vcombine.low %v316_v48, %v326_v49  ;;  %v349_v20 = vrot.slane %v347_v7, 5  ;;  %v533_v22 = vshrl.u32 %v195_v56, 16  ;;  %v9018_v49 = vld [vmem:[%s8826_s8 + $0x120] sm:$0xff] }
  0x35   : > { %v503_v59 = vrot.slane %v502_v37, 4  ;;  %v512_v0 = vor.u32 %v511_v50, %v507_v32  ;;  %v525_v26 = vrot.slane %v523_v16, 5  ;;  %v352_v48 = vshrl.u32 %v9004_v18, 16  ;;  %v8489_v50 = vld [vmem:[%s11632_s1 + $0x60] sm:$0xff]  }
  0x36   : > { %937 = vmatmul.mubr.bf16.gmra.mrb[4].mxu0 %v6462_v3  ;;  %1001 = vmatmul.mubr.bf16.gmra.mrb[4].mxu1 %v6478_v25  ;;  %v339_v3 = vrot.slane %v337_v51, 5  ;;  %v335_v25 = vrot.slane %v334_v15, 4  ;;  %v535_v33 = vrot.slane %v533_v22, 4 }
  0x37   : > { %7541 = vmatpush3.bf16.msra.mxu1 %v8482_v17  ;;  %7653 = vmatpush3.bf16.msra.mxu0 %v8484_v28  ;;  %v508_v5 = vsel %vm8861_vm2, %v503_v59, %v507_v32  ;;  %v513_v14 = vrot.slane %v512_v0, 4  ;;  %v529_v17 = vshll.u32 %v195_v56, 16  ;;  %v9009_v28 = vld [vmem:[%s8826_s8 + $0x68] sm:$0xff]  ;;  %v526_v40 = vor.u32 %v525_v26, %v522_v21  ;;  %v8490_v59 = vld [vmem:[%s11632_s1 + $0x20] sm:$0xff]  }
  0x38   : > { %944 = vmatprep.mubr.bf16.mxu0 %v6465_v57  ;;  %7542 = vmatprep.subr.bf16.mxu1 %v8485_v62  ;;  %v344_v32 = vor.u32 %v343_v19, %v339_v3  ;;  %v340_v37 = vsel %vm8861_vm2, %v335_v25, %v339_v3  ;;  %v355_v56 = vshll.u32 %v9004_v18, 16  ;;  %v361_v57 = vshll.u32 %v9009_v28, 16  ;;  %v9030_v0 = vld [vmem:[%s8826_s8 + $0x128] sm:$0xff]  ;;  %v9051_v25 = vld [vmem:[%s8826_s8 + $0x78] sm:$0xff] }
  0x39   : > { %7654 = vmatprep.subr.bf16.mxu0 %v8487_v4  ;;  %v518_v24 = vsel %vm8861_vm2, %v513_v14, %v517_v60  ;;  %v531_v27 = vrot.slane %v529_v17, 5  ;;  %v527_v60 = vrot.slane %v526_v40, 4  ;;  %v354_v62 = vrot.slane %v352_v48, 4  ;;  %v8492_v14 = vld [vmem:[%s11632_s1 + $0x120] sm:$0xff]  }
  0x3a   : > { %v6481_v30 = vcombine.high %v508_v5, %v518_v24  ;;  %v6480_v31 = vcombine.low %v508_v5, %v518_v24  ;;  %v345_v51 = vrot.slane %v344_v32, 4  ;;  %v357_v3 = vrot.slane %v355_v56, 5  ;;  %v9035_v5 = vld [vmem:[%s8826_s8 + $0x130] sm:$0x11] }
  0x3b   : > { %7543 = vmatpush3.bf16.msra.mxu1 %v8486_v63  ;;  %7655 = vmatpush3.bf16.msra.mxu0 %v8488_v10  ;;  %v536_v52 = vor.u32 %v535_v33, %v531_v27  ;;  %v365_v63 = vshrl.u32 %v9009_v28, 16  ;;  %v363_v4 = vrot.slane %v361_v57, 5  ;;  %v532_v8 = vsel %vm8861_vm2, %v527_v60, %v531_v27  ;;  %v9067_v57 = vld [vmem:[%s8826_s8 + $0x138] sm:$0xff] }
  0x3c   : > { %1008 = vmatprep.mubr.bf16.mxu1 %v6481_v30  ;;  %7544 = vmatprep.subr.bf16.mxu1 %v8489_v50  ;;  %v350_v1 = vsel %vm8861_vm2, %v345_v51, %v349_v20  ;;  %v358_v16 = vor.u32 %v357_v3, %v354_v62  ;;  %v371_v17 = vshll.u32 %v9014_v43, 16  ;;  %v544_v19 = vshrl.u32 %v9018_v49, 16  ;;  %v9062_v51 = vld [vmem:[%s8826_s8 + $0x80] sm:$0xff] }
  0x3d   : > { %v537_v2 = vrot.slane %v536_v52, 4  ;;  %v6467_v7 = vcombine.high %v340_v37, %v350_v1  ;;  %v6466_v9 = vcombine.low %v340_v37, %v350_v1  ;;  %v367_v10 = vrot.slane %v365_v63, 4  ;;  %7656 = vmatprep.subr.bf16.mxu0 %v8491_v6  ;;  %v9075_v6 = vld [vmem:[%s8826_s8 + $0x140] sm:$0xff] }
  0x3e   : > { %945 = vmatmul.mubr.bf16.gmra.mrb[8].mxu0 %v6464_v61  ;;  %1009 = vmatmul.mubr.bf16.gmra.mrb[8].mxu1 %v6480_v31  ;;  %v541_v61 = vrot.slane %v539_v42, 5  ;;  %v547_v24 = vshll.u32 %v9018_v49, 16  ;;  %v359_v26 = vrot.slane %v358_v16, 4  ;;  %v373_v27 = vrot.slane %v371_v17, 5  ;;  %v9057_v42 = vld [vmem:[%s8826_s8 + $0x88] sm:$0x11] }
  0x3f   : > { %7545 = vmatpush3.bf16.msra.mxu1 %v8490_v59  ;;  %952 = vmatprep.mubr.bf16.mxu0 %v6467_v7  ;;  %v368_v22 = vor.u32 %v367_v10, %v363_v4  ;;  %v546_v30 = vrot.slane %v544_v19, 4  ;;  %v553_v31 = vshll.u32 %v9030_v0, 16  ;;  %v557_v37 = vshrl.u32 %v9030_v0, 16  ;;  %v8493_v59 = vld [vmem:[%s11632_s1 + $0x68] sm:$0xff]  }
  0x40   : > { %v542_v15 = vsel %vm8861_vm2, %v537_v2, %v541_v61  ;;  %7657 = vmatpush3.bf16.msra.mxu0 %v8492_v14  ;;  %v549_v33 = vrot.slane %v547_v24, 5  ;;  %v563_v40 = vshll.u32 %v9035_v5, 16  ;;  %v364_v48 = vsel %vm8861_vm2, %v359_v26, %v363_v4  ;;  %7546 = vmatprep.subr.bf16.mxu1 %v8493_v59  ;;  %v8494_v14 = vld [vmem:[%s11632_s1 + $0x28] sm:$0xff]   ;;  %v9104_v59 = vld [vmem:[%s8826_s8 + $0x98] sm:$0xff] }
  0x41   : > { %v6483_v20 = vcombine.high %v532_v8, %v542_v15  ;;  %v6482_v21 = vcombine.low %v532_v8, %v542_v15  ;;  %v369_v32 = vrot.slane %v368_v22, 4  ;;  %v555_v50 = vrot.slane %v553_v31, 5  ;;  %v9084_v17 = vld [vmem:[%s8826_s8 + $0x148] sm:$0x11] }
  0x42   : > { %v376_v52 = vshrl.u32 %v9051_v25, 16  ;;  %v379_v56 = vshll.u32 %v9051_v25, 16  ;;  %v550_v61 = vor.u32 %v549_v33, %v546_v30  ;;  %v559_v62 = vrot.slane %v557_v37, 4  ;;  %v8496_v30 = vld [vmem:[%s11632_s1 + $0x128] sm:$0xff]  }
  0x43   : > { %1016 = vmatprep.mubr.bf16.mxu1 %v6483_v20  ;;  %v374_v60 = vsel %vm8861_vm2, %v369_v32, %v373_v27  ;;  %v565_v63 = vrot.slane %v563_v40, 5  ;;  %v389_v10 = vshrl.u32 %v9062_v51, 16  ;;  %v395_v16 = vshll.u32 %v9057_v42, 16  ;;  %7547 = vmatpush3.bf16.msra.mxu1 %v8494_v14 }
  0x44   : > { %v6469_v1 = vcombine.high %v364_v48, %v374_v60  ;;  %v6468_v2 = vcombine.low %v364_v48, %v374_v60  ;;  %v378_v3 = vrot.slane %v376_v52, 4  ;;  %v381_v4 = vrot.slane %v379_v56, 5  ;;  %v9101_v56 = vld [vmem:[%s8826_s8 + $0x90] sm:$0xff] }
  0x45   : > { %v551_v7 = vrot.slane %v550_v61, 4  ;;  %v560_v8 = vor.u32 %v559_v62, %v555_v50  ;;  %v568_v19 = vshrl.u32 %v9067_v57, 16  ;;  %v571_v20 = vshll.u32 %v9067_v57, 16 }
  0x46   : > { %953 = vmatmul.mubr.bf16.gmra.mrb[12].mxu0 %v6466_v9  ;;  %1017 = vmatmul.mubr.bf16.gmra.mrb[12].mxu1 %v6482_v21  ;;  %v385_v9 = vshll.u32 %v9062_v51, 16  ;;  %v382_v15 = vor.u32 %v381_v4, %v378_v3  ;;  %v8495_v21 = vld [vmem:[%s11632_s1 + $0x168] sm:$0xff]   ;;  %v391_v27 = vrot.slane %v389_v10, 4  ;;  %v397_v32 = vrot.slane %v395_v16, 5 }
  0x47   : > { %960 = vmatprep.mubr.bf16.mxu0 %v6469_v1  ;;  %v556_v22 = vsel %vm8861_vm2, %v551_v7, %v555_v50  ;;  %v561_v24 = vrot.slane %v560_v8, 4  ;;  %v570_v33 = vrot.slane %v568_v19, 4  ;;  %v573_v37 = vrot.slane %v571_v20, 5  ;;  %7658 = vmatprep.subr.bf16.mxu0 %v8495_v21  ;;  %v9110_v7 = vld [vmem:[%s8826_s8 + $0xa0] sm:$0x11]  ;;  %v9113_v8 = vld [vmem:[%s8826_s8 + $0x150] sm:$0xff] }
  0x48   : > { %v387_v26 = vrot.slane %v385_v9, 5  ;;  %v383_v31 = vrot.slane %v382_v15, 4  ;;  %v577_v50 = vshll.u32 %v9075_v6, 16  ;;  %v581_v52 = vshrl.u32 %v9075_v6, 16  ;;  %7659 = vmatpush3.bf16.msra.mxu0 %v8496_v30  ;;  %v9116_v9 = vld [vmem:[%s8826_s8 + $0x158] sm:$0xff] }
  0x49   : > { %v566_v40 = vsel %vm8861_vm2, %v561_v24, %v565_v63  ;;  %v574_v1 = vor.u32 %v573_v37, %v570_v33  ;;  %v587_v4 = vshll.u32 %v9084_v17, 16  ;;  %v400_v14 = vshrl.u32 %v9101_v56, 16  ;;  %v8497_v24 = vld [vmem:[%s11632_s1 + $0x70] sm:$0xff]  }
  0x4a   : > { %v392_v48 = vor.u32 %v391_v27, %v387_v26  ;;  %v6485_v60 = vcombine.high %v556_v22, %v566_v40  ;;  %v6484_v61 = vcombine.low %v556_v22, %v566_v40  ;;  %v388_v62 = vsel %vm8861_vm2, %v383_v31, %v387_v26  ;;  %v8498_v26 = vld [vmem:[%s11632_s1 + $0x30] sm:$0xff]   ;;  %7548 = vmatprep.subr.bf16.mxu1 %v8497_v24 }
  0x4b   : > { %v579_v63 = vrot.slane %v577_v50, 5  ;;  %v583_v3 = vrot.slane %v581_v52, 4  ;;  %v575_v10 = vrot.slane %v574_v1, 4  ;;  %v403_v15 = vshll.u32 %v9101_v56, 16  ;;  %v9136_v52 = vld [vmem:[%s8826_s8 + $0x160] sm:$0x11]  ;;  %7549 = vmatpush3.bf16.msra.mxu1 %v8498_v26 }
  0x4c   : > { %1024 = vmatprep.mubr.bf16.mxu1 %v6485_v60  ;;  %v409_v16 = vshll.u32 %v9104_v59, 16  ;;  %v589_v21 = vrot.slane %v587_v4, 5  ;;  %v413_v22 = vshrl.u32 %v9104_v59, 16  ;;  %v402_v33 = vrot.slane %v400_v14, 4  ;;  %v9149_v14 = vld [vmem:[%s8826_s8 + $0xa8] sm:$0xff] }
  0x4d   : > { %v584_v20 = vor.u32 %v583_v3, %v579_v63  ;;  %v580_v30 = vsel %vm8861_vm2, %v575_v10, %v579_v63  ;;  %v405_v40 = vrot.slane %v403_v15, 5  ;;  %v419_v60 = vshll.u32 %v9110_v7, 16  ;;  %v8500_v10 = vld [vmem:[%s11632_s1 + $0x130] sm:$0xff]  }
  0x4e   : > { %961 = vmatmul.mubr.bf16.gmra.mrb[16].mxu0 %v6468_v2  ;;  %v393_v2 = vrot.slane %v392_v48, 4  ;;  %1025 = vmatmul.mubr.bf16.gmra.mrb[16].mxu1 %v6484_v61  ;;  %v411_v48 = vrot.slane %v409_v16, 5  ;;  %v415_v50 = vrot.slane %v413_v22, 4  ;;  %v592_v61 = vshrl.u32 %v9113_v8, 16 }
  0x4f   : > { %v585_v37 = vrot.slane %v584_v20, 4  ;;  %v601_v1 = vshll.u32 %v9116_v9, 16  ;;  %v406_v63 = vor.u32 %v405_v40, %v402_v33  ;;  %v605_v4 = vshrl.u32 %v9116_v9, 16  ;;  %v8501_v33 = vld [vmem:[%s11632_s1 + $0x78] sm:$0xff]  }
  0x50   : > { %v398_v19 = vsel %vm8861_vm2, %v393_v2, %v397_v32  ;;  %v8499_v32 = vld [vmem:[%s11632_s1 + $0x170] sm:$0xff]   ;;  %v416_v3 = vor.u32 %v415_v50, %v411_v48  ;;  %v594_v20 = vrot.slane %v592_v61, 4  ;;  %v427_v40 = vshll.u32 %v9149_v14, 16  ;;  %v9164_v50 = vld [vmem:[%s8826_s8 + $0x168] sm:$0xff]  ;;  %7550 = vmatprep.subr.bf16.mxu1 %v8501_v33 }
  0x51   : > { %v6471_v27 = vcombine.high %v388_v62, %v398_v19  ;;  %v6470_v31 = vcombine.low %v388_v62, %v398_v19  ;;  %v595_v62 = vshll.u32 %v9113_v8, 16  ;;  %v590_v2 = vsel %vm8861_vm2, %v585_v37, %v589_v21  ;;  %7660 = vmatprep.subr.bf16.mxu0 %v8499_v32  ;;  %v9152_v21 = vld [vmem:[%s8826_s8 + $0xb0] sm:$0xff] }
  0x52   : > { %v6487_v15 = vcombine.high %v580_v30, %v590_v2  ;;  %v6486_v16 = vcombine.low %v580_v30, %v590_v2  ;;  %v421_v19 = vrot.slane %v419_v60, 5  ;;  %v407_v22 = vrot.slane %v406_v63, 4  ;;  %7661 = vmatpush3.bf16.msra.mxu0 %v8500_v10  ;;  %v9167_v60 = vld [vmem:[%s8826_s8 + $0x170] sm:$0xff]  ;;  %v8502_v63 = vld [vmem:[%s11632_s1 + $0x38] sm:$0xff]  }
  0x53   : > { %968 = vmatprep.mubr.bf16.mxu0 %v6471_v27  ;;  %v417_v24 = vrot.slane %v416_v3, 4  ;;  %v597_v26 = vrot.slane %v595_v62, 5  ;;  %v603_v27 = vrot.slane %v601_v1, 5  ;;  %v607_v32 = vrot.slane %v605_v4, 4  ;;  %7551 = vmatpush3.bf16.msra.mxu1 %v8502_v63 }
  0x54   : > { %1032 = vmatprep.mubr.bf16.mxu1 %v6487_v15  ;;  %v611_v30 = vshll.u32 %v9136_v52, 16  ;;  %v424_v37 = vshrl.u32 %v9149_v14, 16  ;;  %v412_v61 = vsel %vm8861_vm2, %v407_v22, %v411_v48  ;;  %v433_v2 = vshll.u32 %v9152_v21, 16 }
  0x55   : > { %v422_v62 = vsel %vm8861_vm2, %v417_v24, %v421_v19  ;;  %v598_v1 = vor.u32 %v597_v26, %v594_v20  ;;  %v608_v4 = vor.u32 %v607_v32, %v603_v27  ;;  %v429_v39 = vrot.slane %v427_v40, 5  ;;  %v9181_v20 = vld [vmem:[%s8826_s8 + $0x178] sm:$0x11] }
  0x56   : > { %969 = vmatmul.mubr.bf16.gmra.mrb[20].mxu0 %v6470_v31  ;;  %v9155_v31 = vld [vmem:[%s8826_s8 + $0xb8] sm:$0x11]  ;;  %1033 = vmatmul.mubr.bf16.gmra.mrb[20].mxu1 %v6486_v16  ;;  %v6473_v3 = vcombine.high %v412_v61, %v422_v62  ;;  %v613_v10 = vrot.slane %v611_v30, 5  ;;  %v6472_v15 = vcombine.low %v412_v61, %v422_v62  ;;  %v426_v22 = vrot.slane %v424_v37, 4 }
  0x57   : > { %v8503_v16 = vld [vmem:[%s11632_s1 + $0x178] sm:$0xff]   ;;  %v599_v48 = vrot.slane %v598_v1, 4  ;;  %v435_v19 = vrot.slane %v433_v2, 5  ;;  %v609_v24 = vrot.slane %v608_v4, 4  ;;  %v437_v26 = vshrl.u32 %v9152_v21, 16 }
  0x58   : > { %976 = vmatprep.mubr.bf16.mxu0 %v6473_v3  ;;  %v443_v33 = vshll.u32 %v9155_v31, 16  ;;  %v616_v32 = vshrl.u32 %v9164_v50, 16  ;;  %7662 = vmatprep.subr.bf16.mxu0 %v8503_v16  ;;  %v430_v37 = vor.u32 %v429_v39, %v426_v22  ;;  %v619_v40 = vshll.u32 %v9164_v50, 16  ;;  %v8504_v3 = vld [vmem:[%s11632_s1 + $0x138] sm:$0xff]   ;;  %v1474_v4 = vld [vmem:[%s8826_s8] sm:$0xee] }
  0x59   : > { %v604_v30 = vsel %vm8861_vm2, %v599_v48, %v603_v27  ;;  %v625_v61 = vshll.u32 %v9167_v60, 16  ;;  %v614_v62 = vsel %vm8861_vm2, %v609_v24, %v613_v10  ;;  %v439_v1 = vrot.slane %v437_v26, 4  ;;  %7663 = vmatpush3.bf16.msra.mxu0 %v8504_v3  ;;  %v8507_v24 = vld [vmem:[%s11632_s1 + $0x1c0] sm:$0xff]  }
  0x5a   : > { %v445_v2 = vrot.slane %v443_v33, 5  ;;  %v618_v63 = vrot.slane %v616_v32, 4  ;;  %v6489_v16 = vcombine.high %v604_v30, %v614_v62  ;;  %v6488_v38 = vcombine.low %v604_v30, %v614_v62  ;;  %7760 = vmatprep.subr.bf16.mxu1 %v8507_v24 }
  0x5b   : > { %v431_v27 = vrot.slane %v430_v37, 4  ;;  %v440_v39 = vor.u32 %v439_v1, %v435_v19  ;;  %v627_v48 = vrot.slane %v625_v61, 5  ;;  %v629_v22 = vshrl.u32 %v9167_v60, 16  ;;  %v8509_v37 = vld [vmem:[%s11632_s1 + $0x240] sm:$0xff]  }
  0x5c   : > { %v635_v45 = vshll.u32 %v9181_v20, 16  ;;  %1040 = vmatprep.mubr.bf16.mxu1 %v6489_v16  ;;  %v6556_v32 = vrot.slane %v1474_v4, 9  ;;  %v1529_v30 = vrot.slane %v1527_v55, 4  ;;  %v6513_v1 = vcombine.high %v8922_v34, %v8931_v44  ;;  %7872 = vmatprep.subr.bf16.mxu0 %v8509_v37 }
  0x5d   : > { %v436_v26 = vsel %vm8861_vm2, %v431_v27, %v435_v19  ;;  %v631_v61 = vrot.slane %v629_v22, 4  ;;  %v1475_v27 = vld [vmem:[%s8826_s8 + $0x18] sm:$0xee]  ;;  %v1541_v37 = vrot.slane %v8931_v44, 5 }
  0x5e   : > { %977 = vmatmul.mubr.bf16.gmra.mrb[24].mxu0 %v6472_v15  ;;  %v621_v15 = vrot.slane %v619_v40, 5  ;;  %1041 = vmatmul.mubr.bf16.gmra.mrb[24].mxu1 %v6488_v38  ;;  %v441_v40 = vrot.slane %v440_v39, 4  ;;  %v637_v62 = vrot.slane %v635_v45, 5  ;;  %v9226_v38 = vsel %vm9200_vm5, %v1529_v30, %v1530_v47 }
  0x5f   : > { %v1534_v45 = vrot.slane %v8883_v54, 5  ;;  %v632_v4 = vor.u32 %v631_v61, %v627_v48  ;;  %v6557_v22 = vrot.slane %v1475_v27, 9  ;;  %v6515_v61 = vcombine.high %v8969_v29, %v8972_v35 }
  0x60   : > { %v622_v33 = vor.u32 %v621_v15, %v618_v63  ;;  %v9220_v63 = vsel %vm9200_vm5, %v6556_v32, %v1527_v55  ;;  %v446_v3 = vsel %vm8861_vm2, %v441_v40, %v445_v2  ;;  %v1476_v15 = vld [vmem:[%s8826_s8 + $0x30] sm:$0xee]  ;;  %v1537_v32 = vrot.slane %v8889_v58, 5 }
  0x61   : > { %v6604_v16 = vcombine.low %v9220_v63, %v9226_v38  ;;  %v6605_v55 = vcombine.high %v9220_v63, %v9226_v38  ;;  %v6475_v13 = vcombine.high %v436_v26, %v446_v3  ;;  %v6474_v39 = vcombine.low %v436_v26, %v446_v3  ;;  %v1477_v3 = vld [vmem:[%s8826_s8 + $0x48] sm:$0xee] }
  0x62   : > { %v623_v19 = vrot.slane %v622_v33, 4  ;;  %v633_v24 = vrot.slane %v632_v4, 4  ;;  %v1536_v33 = vrot.slane %v1534_v45, 4  ;;  %v6558_v2 = vrot.slane %v1476_v15, 9 }
  0x63   : > { %984 = vmatprep.mubr.bf16.mxu0 %v6475_v13  ;;  %v9242_v30 = vsel %vm9200_vm5, %v6557_v22, %v1534_v45  ;;  %v1544_v40 = vrot.slane %v8934_v46, 5  ;;  %v1543_v4 = vrot.slane %v1541_v37, 4  ;;  %v6559_v27 = vrot.slane %v1477_v3, 9  ;;  %v1478_v13 = vld [vmem:[%s8826_s8 + $0x60] sm:$0xee] }
  0x64   : > { %v628_v47 = vsel %vm8861_vm2, %v623_v19, %v627_v48  ;;  %v6512_v48 = vcombine.low %v8922_v34, %v8931_v44  ;;  %v638_v26 = vsel %vm8861_vm2, %v633_v24, %v637_v62  ;;  %v1538_v58 = vsel %vm9200_vm5, %v1536_v33, %v1537_v32  ;;  %v8558_v44 = vld [vmem:[%s11632_s1 + $0x230] sm:$0xff]  }
  0x65   : > { %v6514_v19 = vcombine.low %v8969_v29, %v8972_v35  ;;  %v6491_v63 = vcombine.high %v628_v47, %v638_v26  ;;  %v6490_v38 = vcombine.low %v628_v47, %v638_v26  ;;  %v6607_v46 = vcombine.high %v9242_v30, %v1538_v58  ;;  %v8510_v47 = vld [vmem:[%s11632_s1 + $0x200] sm:$0xff]  }
  0x66   : > { %985 = vmatmul.mubr.bf16.gmra.mrb[28].mxu0 %v6474_v39  ;;  %v6606_v45 = vcombine.low %v9242_v30, %v1538_v58  ;;  %v9261_v62 = vsel %vm9200_vm5, %v6558_v2, %v1541_v37  ;;  %v1548_v15 = vrot.slane %v8972_v35, 5  ;;  %v6517_v39 = vcombine.high %v9004_v18, %v9009_v28 }
  0x67   : > { %1926 = vmatprep.mubr.bf16.mxu0 %v6605_v55  ;;  %1048 = vmatprep.mubr.bf16.mxu1 %v6491_v63  ;;  %v1551_v55 = vrot.slane %v8975_v41, 5  ;;  %v6560_v22 = vrot.slane %v1478_v13, 9  ;;  %v1555_v24 = vrot.slane %v9009_v28, 5  ;;  %v9274_v33 = vsel %vm9200_vm5, %v1543_v4, %v1544_v40  ;;  %v8517_v40 = vld [vmem:[%s11632_s1 + $0x248] sm:$0xff]  }
  0x68   : > { %1049 = vmatmul.mubr.bf16.gmra.mrb[28].mxu1 %v6490_v38  ;;  %v9278_v32 = vsel %vm9200_vm5, %v6559_v27, %v1548_v15  ;;  %v1550_v2 = vrot.slane %v1548_v15, 4  ;;  %v1558_v30 = vrot.slane %v9014_v43, 5  ;;  %v6609_v41 = vcombine.high %v9261_v62, %v9274_v33 }
  0x69   : > { %1345 = vmatprep.mubr.bf16.mxu1 %v6509_v23  ;;  %v6608_v37 = vcombine.low %v9261_v62, %v9274_v33  ;;  %v9293_v26 = vsel %vm9200_vm5, %v6560_v22, %v1555_v24  ;;  %v1557_v58 = vrot.slane %v1555_v24, 4  ;;  %v6516_v23 = vcombine.low %v9004_v18, %v9009_v28  ;;  %v8515_v22 = vld [vmem:[%s11632_s1 + $0x1c8] sm:$0xff]   ;;  %v1487_v33 = vld [vmem:[%s8826_s8 + $0x138] sm:$0xee] }
  0x6a   : > { %v9297_v43 = vsel %vm9200_vm5, %v1550_v2, %v1551_v55  ;;  %v6519_v63 = vcombine.high %v9051_v25, %v9062_v51  ;;  %v6518_v38 = vcombine.low %v9051_v25, %v9062_v51  ;;  %v8508_v55 = vld [vmem:[%s11632_s1 + $0x180] sm:$0xff]   ;;  %v6521_v24 = vcombine.high %v9101_v56, %v9104_v59  ;;  %v8523_v2 = vld [vmem:[%s11632_s1 + $0x1d0] sm:$0xff]   ;;  %v8713_v28 = vld [vmem:[%s8826_s8 + $0xc8] sm:$0xff] }
  0x6b   : > { %v6611_v3 = vcombine.high %v9278_v32, %v9297_v43  ;;  %v6610_v4 = vcombine.low %v9278_v32, %v9297_v43  ;;  %v9311_v27 = vsel %vm9200_vm5, %v1557_v58, %v1558_v30  ;;  %v11640_v58 = vcombine.high %v8880_v53, %v8883_v54  ;;  %v8516_v30 = vld [vmem:[%s11632_s1 + $0x188] sm:$0xff]   ;;  %v8556_v43 = vld [vmem:[%s11632_s1 + $0x1b0] sm:$0xff]  }
  0x6c   : > { %v6613_v15 = vcombine.high %v9293_v26, %v9311_v27  ;;  %v6612_v13 = vcombine.low %v9293_v26, %v9311_v27  ;;  %v1614_v62 = vrot.slane %v9035_v5, 5 }
  0x6e   : > { %1927 = vmatmul.mubr.bf16.vlgmr.msra.gmra.mrb[32].mxu0 %v6604_v16  ;;  %v8518_v16 = vld [vmem:[%s11632_s1 + $0x208] sm:$0xff]  }
  0x6f   : > { %7873 = vmatpush3.bf16.msra.mxu0 %v8510_v47  ;;  %1934 = vmatprep.mubr.bf16.mxu0 %v6607_v46  ;;  %v8525_v46 = vld [vmem:[%s11632_s1 + $0x250] sm:$0xff]   ;;  %v6522_v47 = vcombine.low %v9149_v14, %v9152_v21 }
  0x70   : > { %7874 = vmatprep.subr.bf16.mxu0 %v8517_v40  ;;  %v11639_v40 = vcombine.low %v8835_v11, %v8838_v12  ;;  %v8526_v11 = vld [vmem:[%s11632_s1 + $0x210] sm:$0xff]   ;;  %v8533_v12 = vld [vmem:[%s11632_s1 + $0x258] sm:$0xff]  }
  0x72   : > { %1346 = vmatmul.mubr.bf16.vlgmr.msra.gmra.mrb[32].mxu1 %v11639_v40  ;;  %v8539_v40 = vld [vmem:[%s11632_s1 + $0x1e0] sm:$0xff]  }
  0x73   : > { %7761 = vmatpush3.bf16.msra.mxu1 %v8508_v55  ;;  %1353 = vmatprep.mubr.bf16.mxu1 %v11640_v58  ;;  %v8524_v55 = vld [vmem:[%s11632_s1 + $0x190] sm:$0xff]   ;;  %v1569_v58 = vrot.slane %v9104_v59, 5 }
  0x74   : > { %7762 = vmatprep.subr.bf16.mxu1 %v8515_v22  ;;  %7875 = vmatpush3.bf16.msra.mxu0 %v8518_v16  ;;  %v9359_v22 = vld [vmem:[%s8826_s8 + $0x78] sm:$0xee] }
  0x75   : > { %7876 = vmatprep.subr.bf16.mxu0 %v8525_v46  ;;  %v8531_v16 = vld [vmem:[%s11632_s1 + $0x1d8] sm:$0xff]   ;;  %v1571_v35 = vrot.slane %v1569_v58, 4 }
  0x76   : > { %1935 = vmatmul.mubr.bf16.gmra.mrb[36].mxu0 %v6606_v45  ;;  %v8534_v46 = vld [vmem:[%s11632_s1 + $0x218] sm:$0xff]   ;;  %v1562_v45 = vrot.slane %v9062_v51, 5  ;;  %v8715_v51 = vld [vmem:[%s8826_s8 + $0xe0] sm:$0xff] }
  0x77   : > { %1942 = vmatprep.mubr.bf16.mxu0 %v6609_v41  ;;  %7763 = vmatpush3.bf16.msra.mxu1 %v8516_v30  ;;  %v8532_v41 = vld [vmem:[%s11632_s1 + $0x198] sm:$0xff]   ;;  %v11641_v30 = vcombine.low %v8880_v53, %v8883_v54  ;;  %v6561_v54 = vrot.slane %v9359_v22, 9  ;;  %v1488_v53 = vld [vmem:[%s8826_s8 + $0x150] sm:$0xee] }
  0x78   : > { %7764 = vmatprep.subr.bf16.mxu1 %v8523_v2  ;;  %7877 = vmatpush3.bf16.msra.mxu0 %v8526_v11  ;;  %v8541_v2 = vld [vmem:[%s11632_s1 + $0x260] sm:$0xff]   ;;  %v1564_v22 = vrot.slane %v1562_v45, 4 }
  0x79   : > { %7878 = vmatprep.subr.bf16.mxu0 %v8533_v12  ;;  %v8542_v11 = vld [vmem:[%s11632_s1 + $0x220] sm:$0xff]   ;;  %v8549_v12 = vld [vmem:[%s11632_s1 + $0x268] sm:$0xff]   ;;  %v1563_v32 = vsel %vm9200_vm5, %v6561_v54, %v1562_v45 }
  0x7a   : > { %1354 = vmatmul.mubr.bf16.gmra.mrb[36].mxu1 %v11641_v30  ;;  %v8547_v30 = vld [vmem:[%s11632_s1 + $0x1e8] sm:$0xff]  }
  0x7b   : > { %1361 = vmatprep.mubr.bf16.mxu1 %v6513_v1  ;;  %7765 = vmatpush3.bf16.msra.mxu1 %v8524_v55  ;;  %v1565_v1 = vrot.slane %v9057_v42, 5  ;;  %v1486_v55 = vld [vmem:[%s8826_s8 + $0x120] sm:$0xee]  ;;  %v1489_v42 = vld [vmem:[%s8826_s8 + $0x168] sm:$0xee] }
  0x7c   : > { %7766 = vmatprep.subr.bf16.mxu1 %v8531_v16  ;;  %7879 = vmatpush3.bf16.msra.mxu0 %v8534_v46  ;;  %v6568_v16 = vrot.slane %v1486_v55, 9  ;;  %v1611_v46 = vrot.slane %v9030_v0, 5  ;;  %v8548_v55 = vld [vmem:[%s11632_s1 + $0x1a8] sm:$0xff]  }
  0x7d   : > { %7880 = vmatprep.subr.bf16.mxu0 %v8541_v2  ;;  %v8540_v2 = vld [vmem:[%s11632_s1 + $0x1a0] sm:$0xff]  }
  0x7e   : > { %1943 = vmatmul.mubr.bf16.gmra.mrb[40].mxu0 %v6608_v37  ;;  %v8550_v37 = vld [vmem:[%s11632_s1 + $0x228] sm:$0xff]   ;;  %v9426_v5 = vsel %vm9200_vm5, %v6568_v16, %v1611_v46  ;;  %v1625_v16 = vrot.slane %v9116_v9, 5 }
  0x7f   : > { %1950 = vmatprep.mubr.bf16.mxu0 %v6611_v3  ;;  %7767 = vmatpush3.bf16.msra.mxu1 %v8532_v41  ;;  %v1618_v3 = vrot.slane %v9075_v6, 5  ;;  %v8555_v41 = vld [vmem:[%s11632_s1 + $0x1f0] sm:$0xff]  }
  0x80   : > { %7768 = vmatprep.subr.bf16.mxu1 %v8539_v40  ;;  %7881 = vmatpush3.bf16.msra.mxu0 %v8542_v11  ;;  %v1613_v40 = vrot.slane %v1611_v46, 4  ;;  %v8557_v11 = vld [vmem:[%s11632_s1 + $0x270] sm:$0xff]   ;;  %v1621_v46 = vrot.slane %v9084_v17, 5 }
  0x81   : > { %7882 = vmatprep.subr.bf16.mxu0 %v8549_v12  ;;  %v1620_v12 = vrot.slane %v1618_v3, 4 }
  0x82   : > { %1362 = vmatmul.mubr.bf16.gmra.mrb[40].mxu1 %v6512_v48  ;;  %v9447_v34 = vsel %vm9200_vm5, %v1613_v40, %v1614_v62  ;;  %v6569_v48 = vrot.slane %v1487_v33, 9  ;;  %v6570_v62 = vrot.slane %v1488_v53, 9  ;;  %v1628_v40 = vrot.slane %v9136_v52, 5 }
  0x83   : > { %1369 = vmatprep.mubr.bf16.mxu1 %v6515_v61  ;;  %7769 = vmatpush3.bf16.msra.mxu1 %v8540_v2  ;;  %v6629_v61 = vcombine.high %v9426_v5, %v9447_v34  ;;  %v6628_v2 = vcombine.low %v9426_v5, %v9447_v34  ;;  %v1627_v33 = vrot.slane %v1625_v16, 4  ;;  %v11646_v5 = vcombine.high %v9067_v57, %v9075_v6 }
  0x84   : > { %7770 = vmatprep.subr.bf16.mxu1 %v8547_v30  ;;  %7883 = vmatpush3.bf16.msra.mxu0 %v8550_v37  ;;  %v9463_v17 = vsel %vm9200_vm5, %v6569_v48, %v1618_v3  ;;  %v9467_v30 = vsel %vm9200_vm5, %v1620_v12, %v1621_v46  ;;  %v1480_v37 = vld [vmem:[%s8826_s8 + $0x90] sm:$0xee]  ;;  %v9479_v3 = vsel %vm9200_vm5, %v6570_v62, %v1625_v16  ;;  %v1632_v12 = vrot.slane %v9167_v60, 5  ;;  %v8564_v46 = vld [vmem:[%s11632_s1 + $0x1b8] sm:$0xff]  }
  0x85   : > { %7884 = vmatprep.subr.bf16.mxu0 %v8557_v11  ;;  %v6631_v52 = vcombine.high %v9463_v17, %v9467_v30  ;;  %v6630_v53 = vcombine.low %v9463_v17, %v9467_v30  ;;  %v8565_v11 = vld [vmem:[%s11632_s1 + $0x278] sm:$0xff]   ;;  %v1635_v16 = vrot.slane %v9181_v20, 5  ;;  %v11647_v17 = vcombine.low %v9067_v57, %v9075_v6 }
  0x86   : > { %1951 = vmatmul.mubr.bf16.gmra.mrb[44].mxu0 %v6610_v4  ;;  %v9497_v4 = vsel %vm9200_vm5, %v1627_v33, %v1628_v40  ;;  %v8566_v20 = vld [vmem:[%s11632_s1 + $0x238] sm:$0xff]   ;;  %v1634_v48 = vrot.slane %v1632_v12, 4  ;;  %v8571_v40 = vld [vmem:[%s11632_s1 + $0x2c0] sm:$0xff]  }
  0x87   : > { %1958 = vmatprep.mubr.bf16.mxu0 %v6613_v15  ;;  %7771 = vmatpush3.bf16.msra.mxu1 %v8548_v55  ;;  %v1566_v15 = vsel %vm9200_vm5, %v1564_v22, %v1565_v1  ;;  %v6633_v45 = vcombine.high %v9479_v3, %v9497_v4  ;;  %v6632_v54 = vcombine.low %v9479_v3, %v9497_v4  ;;  %v8563_v55 = vld [vmem:[%s11632_s1 + $0x1f8] sm:$0xff]   ;;  %v6571_v1 = vrot.slane %v1489_v42, 9  ;;  %v8573_v33 = vld [vmem:[%s11632_s1 + $0x340] sm:$0xff]  }
  0x88   : > { %7772 = vmatprep.subr.bf16.mxu1 %v8555_v41  ;;  %7885 = vmatpush3.bf16.msra.mxu0 %v8558_v44  ;;  %v9520_v22 = vsel %vm9200_vm5, %v1634_v48, %v1635_v16  ;;  %v6615_v41 = vcombine.high %v1563_v32, %v1566_v15  ;;  %v6562_v44 = vrot.slane %v1480_v37, 9  ;;  %v6614_v26 = vcombine.low %v1563_v32, %v1566_v15  ;;  %v1482_v32 = vld [vmem:[%s8826_s8 + $0xc0] sm:$0xee]  ;;  %v8714_v15 = vld [vmem:[%s8826_s8 + $0xd0] sm:$0x11] }
  0x89   : > { %7886 = vmatprep.subr.bf16.mxu0 %v8565_v11  ;;  %v9530_v29 = vsel %vm9200_vm5, %v6571_v1, %v1632_v12  ;;  %v1481_v11 = vld [vmem:[%s8826_s8 + $0xa8] sm:$0xee]  ;;  %v1576_v12 = vrot.slane %v9152_v21, 5  ;;  %v1483_v1 = vld [vmem:[%s8826_s8 + $0xd8] sm:$0xee] }
  0x8a   : > { %1370 = vmatmul.mubr.bf16.gmra.mrb[44].mxu1 %v6514_v19  ;;  %v1572_v19 = vrot.slane %v9110_v7, 5  ;;  %v6634_v62 = vcombine.low %v9530_v29, %v9520_v22  ;;  %v1570_v7 = vsel %vm9200_vm5, %v6562_v44, %v1569_v58  ;;  %v11643_v44 = vcombine.high %v9149_v14, %v9152_v21 }
  0x8b   : > { %1377 = vmatprep.mubr.bf16.mxu1 %v6517_v39  ;;  %7773 = vmatpush3.bf16.msra.mxu1 %v8556_v43  ;;  %v6635_v39 = vcombine.high %v9530_v29, %v9520_v22  ;;  %v1578_v58 = vrot.slane %v1576_v12, 4  ;;  %v1579_v43 = vrot.slane %v9155_v31, 5  ;;  %v8574_v22 = vld [vmem:[%s11632_s1 + $0x300] sm:$0xff]   ;;  %v6775_v29 = vld [vmem:[%s8826_s8 + $0x70] sm:$0x11] }
  0x8c   : > { %7774 = vmatprep.subr.bf16.mxu1 %v8563_v55  ;;  %7887 = vmatpush3.bf16.msra.mxu0 %v8566_v20  ;;  %v1573_v37 = vsel %vm9200_vm5, %v1571_v35, %v1572_v19  ;;  %v1586_v55 = vrot.slane %v8714_v15, 5  ;;  %v6564_v20 = vrot.slane %v1482_v32, 9  ;;  %v6565_v35 = vrot.slane %v1483_v1, 9  ;;  %v8720_v32 = vld [vmem:[%s8826_s8 + $0xd8] sm:$0xff]  ;;  %v1485_v15 = vld [vmem:[%s8826_s8 + $0x108] sm:$0xee] }
  0x8d   : > { %8096 = vmatprep.subr.bf16.mxu0 %v8573_v33  ;;  %v6617_v27 = vcombine.high %v1570_v7, %v1573_v37  ;;  %v1580_v18 = vsel %vm9200_vm5, %v1578_v58, %v1579_v43  ;;  %v8723_v1 = vld [vmem:[%s8826_s8 + $0xf0] sm:$0xff] }
  0x8e   : > { %1959 = vmatmul.mubr.bf16.gmra.mrb[48].mxu0 %v6612_v13  ;;  %v6563_v13 = vrot.slane %v1481_v11, 9  ;;  %v1484_v11 = vld [vmem:[%s8826_s8 + $0xf0] sm:$0xee] }
  0x8f   : > { %1966 = vmatprep.mubr.bf16.mxu0 %v6615_v41  ;;  %7775 = vmatpush3.bf16.msra.mxu1 %v8564_v46  ;;  %v6566_v58 = vrot.slane %v1484_v11, 9 }
  0x90   : > { %7984 = vmatprep.subr.bf16.mxu1 %v8571_v40  ;;  %v1577_v16 = vsel %vm9200_vm5, %v6563_v13, %v1576_v12  ;;  %v8716_v40 = vld [vmem:[%s8826_s8 + $0xe8] sm:$0x11]  ;;  %v8718_v12 = vld [vmem:[%s8826_s8 + $0xf8] sm:$0xff] }
  0x91   : > { %v6619_v31 = vcombine.high %v1577_v16, %v1580_v18  ;;  %v6618_v41 = vcombine.low %v1577_v16, %v1580_v18  ;;  %v1593_v33 = vrot.slane %v8716_v40, 5  ;;  %v8719_v16 = vld [vmem:[%s8826_s8 + $0x100] sm:$0x11]  ;;  %v8724_v40 = vld [vmem:[%s8826_s8 + $0x108] sm:$0xff] }
  0x92   : > { %1378 = vmatmul.mubr.bf16.gmra.mrb[48].mxu1 %v6516_v23  ;;  %v1583_v23 = vrot.slane %v8713_v28, 5  ;;  %v1600_v18 = vrot.slane %v8719_v16, 5 }
  0x93   : > { %1385 = vmatprep.mubr.bf16.mxu1 %v6519_v63  ;;  %v6616_v63 = vcombine.low %v1570_v7, %v1573_v37  ;;  %v8717_v7 = vld [vmem:[%s8826_s8 + $0xc0] sm:$0xff] }
  0x94   : > { %v1585_v42 = vrot.slane %v1583_v23, 4  ;;  %v1584_v48 = vsel %vm9200_vm5, %v6564_v20, %v1583_v23  ;;  %v6525_v37 = vcombine.high %v8717_v7, %v8713_v28  ;;  %v6524_v23 = vcombine.low %v8717_v7, %v8713_v28 }
  0x95   : > { %v6567_v28 = vrot.slane %v1485_v15, 9 }
  0x96   : > { %1967 = vmatmul.mubr.bf16.gmra.mrb[52].mxu0 %v6614_v26  ;;  %v1587_v25 = vsel %vm9200_vm5, %v1585_v42, %v1586_v55  ;;  %v1597_v26 = vrot.slane %v8718_v12, 5 }
  0x97   : > { %1974 = vmatprep.mubr.bf16.mxu0 %v6617_v27  ;;  %v6621_v46 = vcombine.high %v1584_v48, %v1587_v25  ;;  %v6620_v27 = vcombine.low %v1584_v48, %v1587_v25  ;;  %v8722_v48 = vld [vmem:[%s8826_s8 + $0x118] sm:$0x11] }
  0x98   : > { %v1599_v43 = vrot.slane %v1597_v26, 4  ;;  %v1598_v14 = vsel %vm9200_vm5, %v6566_v58, %v1597_v26  ;;  %v1607_v25 = vrot.slane %v8722_v48, 5 }
  0x9a   : > { %1386 = vmatmul.mubr.bf16.gmra.mrb[52].mxu1 %v6518_v38  ;;  %v1590_v38 = vrot.slane %v8715_v51, 5  ;;  %v1601_v21 = vsel %vm9200_vm5, %v1599_v43, %v1600_v18  ;;  %v9634_v43 = vld [vmem:[%s8826_s8 + $0x30] sm:$0xff] }
  0x9b   : > { %1393 = vmatprep.mubr.bf16.mxu1 %v6521_v24  ;;  %v11642_v24 = vcombine.low %v9101_v56, %v9104_v59  ;;  %v6625_v20 = vcombine.high %v1598_v14, %v1601_v21 }
  0x9c   : > { %v1592_v19 = vrot.slane %v1590_v38, 4  ;;  %v1591_v56 = vsel %vm9200_vm5, %v6565_v35, %v1590_v38  ;;  %v6526_v38 = vcombine.low %v8720_v32, %v8715_v51 }
  0x9e   : > { %1975 = vmatmul.mubr.bf16.gmra.mrb[56].mxu0 %v6616_v63  ;;  %v1594_v59 = vsel %vm9200_vm5, %v1592_v19, %v1593_v33  ;;  %v6527_v63 = vcombine.high %v8720_v32, %v8715_v51  ;;  %v6528_v19 = vcombine.low %v8723_v1, %v8718_v12  ;;  %v11645_v32 = vcombine.low %v9018_v49, %v9030_v0 }
  0x9f   : > { %1982 = vmatprep.mubr.bf16.mxu0 %v6619_v31  ;;  %v6623_v13 = vcombine.high %v1591_v56, %v1594_v59  ;;  %v6622_v55 = vcombine.low %v1591_v56, %v1594_v59  ;;  %v9617_v56 = vld [vmem:[%s8826_s8 + $0x20] sm:$0xff]  ;;  %v11644_v59 = vcombine.high %v9018_v49, %v9030_v0 }
  0xa0   : > { %v2660_v26 = vshll.u32 %v9617_v56, 16 }
  0xa2   : > { %1394 = vmatmul.mubr.bf16.gmra.mrb[56].mxu1 %v11642_v24  ;;  %v6529_v24 = vcombine.high %v8723_v1, %v8718_v12  ;;  %v2662_v16 = vrot.slane %v2660_v26, 5 }
  0xa3   : > { %1401 = vmatprep.mubr.bf16.mxu1 %v11643_v44 }
  0xa6   : > { %1983 = vmatmul.mubr.bf16.gmra.mrb[60].mxu0 %v6618_v41 }
  0xa7   : > { %1990 = vmatprep.mubr.bf16.mxu0 %v6621_v46  ;;  %v6624_v46 = vcombine.low %v1598_v14, %v1601_v21  ;;  %v2678_v14 = vshll.u32 %v9634_v43, 16  ;;  %v6769_v21 = vld [vmem:[%s8826_s8 + $0x40] sm:$0x11] }
  0xaa   : > { %1402 = vmatmul.mubr.bf16.gmra.mrb[60].mxu1 %v6522_v47  ;;  %v8721_v47 = vld [vmem:[%s8826_s8 + $0x110] sm:$0xff] }
  0xab   : > { %1409 = vmatprep.mubr.bf16.mxu1 %v6525_v37  ;;  %v1604_v31 = vrot.slane %v8721_v47, 5  ;;  %v6531_v51 = vcombine.high %v8724_v40, %v8721_v47  ;;  %v6530_v7 = vcombine.low %v8724_v40, %v8721_v47  ;;  %v9614_v37 = vld [vmem:[%s8826_s8 + $0x18] sm:$0xff]  ;;  %v9657_v47 = vld [vmem:[%s8826_s8 + $0x48] sm:$0xff]  ;;  %v9684_v40 = vld [vmem:[%s8826_s8 + $0x60] sm:$0xff] }
  0xac   : > { %v2651_v11 = vshrl.u32 %v9614_v37, 16  ;;  %v2654_v12 = vshll.u32 %v9614_v37, 16  ;;  %v2723_v26 = vshrl.u32 %v9684_v40, 16 }
  0xad   : > { %v1606_v42 = vrot.slane %v1604_v31, 4  ;;  %v1605_v41 = vsel %vm9200_vm5, %v6567_v28, %v1604_v31  ;;  %v2680_v28 = vrot.slane %v2678_v14, 5 }
  0xae   : > { %1991 = vmatmul.mubr.bf16.gmra.mrb[64].mxu0 %v6620_v27  ;;  %v2664_v27 = vshrl.u32 %v9617_v56, 16  ;;  %v2656_v58 = vrot.slane %v2654_v12, 5 }
  0xaf   : > { %1998 = vmatprep.mubr.bf16.mxu0 %v6623_v13  ;;  %v1608_v44 = vsel %vm9200_vm5, %v1606_v42, %v1607_v25  ;;  %v2653_v13 = vrot.slane %v2651_v11, 4  ;;  %v9660_v42 = vld [vmem:[%s8826_s8 + $0x50] sm:$0xff]  ;;  %v2699_v25 = vshrl.u32 %v9657_v47, 16 }
  0xb0   : > { %v6627_v35 = vcombine.high %v1605_v41, %v1608_v44  ;;  %v6626_v33 = vcombine.low %v1605_v41, %v1608_v44  ;;  %v2666_v18 = vrot.slane %v2664_v27, 4  ;;  %v2708_v1 = vshll.u32 %v9660_v42, 16 }
  0xb1   : > { %v2712_v57 = vshrl.u32 %v9660_v42, 16  ;;  %v2726_v27 = vshll.u32 %v9684_v40, 16 }
  0xb2   : > { %1410 = vmatmul.mubr.bf16.gmra.mrb[64].mxu1 %v6524_v23  ;;  %v9637_v23 = vld [vmem:[%s8826_s8 + $0x38] sm:$0xff]  ;;  %v2710_v4 = vrot.slane %v2708_v1, 5  ;;  %v8589_v1 = vld [vmem:[%s11632_s1 + $0x350] sm:$0xff]  }
  0xb3   : > { %1417 = vmatprep.mubr.bf16.mxu1 %v6527_v63  ;;  %v2675_v63 = vshrl.u32 %v9634_v43, 16  ;;  %v2684_v49 = vshll.u32 %v9637_v23, 16  ;;  %v2688_v0 = vshrl.u32 %v9637_v23, 16 }
  0xb5   : > { %v2686_v30 = vrot.slane %v2684_v49, 5  ;;  %v2690_v48 = vrot.slane %v2688_v0, 4  ;;  %v9722_v49 = vld [vmem:[%s8826_s8 + $0x80] sm:$0xff]  ;;  %v2728_v0 = vrot.slane %v2726_v27, 5  ;;  %v6718_v27 = vcombine.low %v9634_v43, %v9637_v23 }
  0xb6   : > { %1999 = vmatmul.mubr.bf16.gmra.mrb[68].mxu0 %v6622_v55 }
  0xb7   : > { %2006 = vmatprep.mubr.bf16.mxu0 %v6625_v20  ;;  %v2677_v20 = vrot.slane %v2675_v63, 4  ;;  %v2691_v44 = vor.u32 %v2690_v48, %v2686_v30 }
  0xb9   : > { %v2681_v41 = vor.u32 %v2680_v28, %v2677_v20  ;;  %v2692_v11 = vrot.slane %v2691_v44, 4  ;;  %v8572_v20 = vld [vmem:[%s11632_s1 + $0x280] sm:$0xff]  }
  0xba   : > { %1418 = vmatmul.mubr.bf16.gmra.mrb[68].mxu1 %v6526_v38  ;;  %v2702_v38 = vshll.u32 %v9657_v47, 16 }
  0xbb   : > { %1425 = vmatprep.mubr.bf16.mxu1 %v6529_v24 }
  0xbc   : > { %v2704_v3 = vrot.slane %v2702_v38, 5  ;;  %v2760_v38 = vshrl.u32 %v9722_v49, 16 }
  0xbe   : > { %2007 = vmatmul.mubr.bf16.gmra.mrb[72].mxu0 %v6624_v46 }
  0xbf   : > { %2014 = vmatprep.mubr.bf16.mxu0 %v6627_v35  ;;  %v6772_v35 = vld [vmem:[%s8826_s8 + $0x58] sm:$0x11] }
  0xc0   : > { %v2718_v12 = vshll.u32 %v6772_v35, 16 }
  0xc2   : > { %1426 = vmatmul.mubr.bf16.gmra.mrb[72].mxu1 %v6528_v19  ;;  %v2701_v19 = vrot.slane %v2699_v25, 4  ;;  %v2756_v25 = vshll.u32 %v9722_v49, 16 }
  0xc3   : > { %1433 = vmatprep.mubr.bf16.mxu1 %v6531_v51  ;;  %v2714_v51 = vrot.slane %v2712_v57, 4 }
  0xc6   : > { %2015 = vmatmul.mubr.bf16.gmra.mrb[76].mxu0 %v6626_v33  ;;  %v11650_v33 = vcombine.high %v9164_v50, %v9167_v60 }
  0xc7   : > { %2022 = vmatprep.mubr.bf16.mxu0 %v6629_v61  ;;  %v6766_v61 = vld [vmem:[%s8826_s8 + $0x28] sm:$0x11] }
  0xc8   : > { %v2670_v34 = vshll.u32 %v6766_v61, 16  ;;  %v6717_v61 = vcombine.high %v9614_v37, %v9617_v56 }
  0xca   : > { %1434 = vmatmul.mubr.bf16.gmra.mrb[76].mxu1 %v6530_v7  ;;  %v2672_v31 = vrot.slane %v2670_v34, 5  ;;  %v8581_v34 = vld [vmem:[%s11632_s1 + $0x348] sm:$0xff]  }
  0xcb   : > { %1441 = vmatprep.mubr.bf16.mxu1 %v11644_v59  ;;  %v2682_v59 = vrot.slane %v2681_v41, 4  ;;  %v8580_v41 = vld [vmem:[%s11632_s1 + $0x288] sm:$0xff]  }
  0xce   : > { %2023 = vmatmul.mubr.bf16.gmra.mrb[80].mxu0 %v6628_v2  ;;  %v2657_v2 = vor.u32 %v2656_v58, %v2653_v13  ;;  %v2705_v13 = vor.u32 %v2704_v3, %v2701_v19  ;;  %v2715_v58 = vor.u32 %v2714_v51, %v2710_v4  ;;  %v9761_v19 = vld [vmem:[%s8826_s8 + $0x98] sm:$0xff]  ;;  %v2762_v51 = vrot.slane %v2760_v38, 4  ;;  %v8613_v38 = vld [vmem:[%s11632_s1 + $0x368] sm:$0xff]  }
  0xcf   : > { %2030 = vmatprep.mubr.bf16.mxu0 %v6631_v52  ;;  %v2667_v52 = vor.u32 %v2666_v18, %v2662_v16 }
  0xd0   : > { %v2658_v15 = vrot.slane %v2657_v2, 4  ;;  %v2725_v2 = vrot.slane %v2723_v26, 4  ;;  %v2706_v14 = vrot.slane %v2705_v13, 4  ;;  %v8597_v26 = vld [vmem:[%s11632_s1 + $0x358] sm:$0xff]  }
  0xd1   : > { %v2668_v55 = vrot.slane %v2667_v52, 4  ;;  %v9719_v52 = vld [vmem:[%s8826_s8 + $0x78] sm:$0xff] }
  0xd2   : > { %1442 = vmatmul.mubr.bf16.gmra.mrb[80].mxu1 %v11645_v32  ;;  %v2663_v6 = vsel %vm8861_vm2, %v2658_v15, %v2662_v16  ;;  %v2687_v16 = vsel %vm8861_vm2, %v2682_v59, %v2686_v30  ;;  %v9733_v28 = vsel %vm8861_vm2, %v2706_v14, %v2710_v4  ;;  %v8579_v30 = vld [vmem:[%s11632_s1 + $0x2c8] sm:$0xff]  }
  0xd3   : > { %1449 = vmatprep.mubr.bf16.mxu1 %v11646_v5  ;;  %v2673_v24 = vsel %vm8861_vm2, %v2668_v55, %v2672_v31  ;;  %v2720_v5 = vrot.slane %v2718_v12, 5  ;;  %v2742_v55 = vshll.u32 %v6775_v29, 16  ;;  %v6778_v59 = vld [vmem:[%s8826_s8 + $0x88] sm:$0x11]  ;;  %v8598_v29 = vld [vmem:[%s11632_s1 + $0x318] sm:$0xff]  }
  0xd4   : > { %v6845_v7 = vcombine.high %v2663_v6, %v2673_v24  ;;  %v6844_v32 = vcombine.low %v2663_v6, %v2673_v24  ;;  %v9753_v6 = vld [vmem:[%s8826_s8 + $0x90] sm:$0xff] }
  0xd5   : > { %v2744_v44 = vrot.slane %v2742_v55, 5  ;;  %v2774_v12 = vshll.u32 %v9753_v6, 16 }
  0xd6   : > { %2031 = vmatmul.mubr.bf16.gmra.mrb[84].mxu0 %v6630_v53  ;;  %v2694_v53 = vshll.u32 %v6769_v21, 16  ;;  %v2716_v21 = vrot.slane %v2715_v58, 4  ;;  %v8588_v58 = vld [vmem:[%s11632_s1 + $0x290] sm:$0xff]  }
  0xd7   : > { %2038 = vmatprep.mubr.bf16.mxu0 %v6633_v45  ;;  %v11648_v45 = vcombine.high %v9113_v8, %v9116_v9 }
  0xd8   : > { %v2696_v46 = vrot.slane %v2694_v53, 5  ;;  %v8582_v53 = vld [vmem:[%s11632_s1 + $0x308] sm:$0xff]  }
  0xda   : > { %1450 = vmatmul.mubr.bf16.gmra.mrb[84].mxu1 %v11647_v17  ;;  %v2697_v18 = vsel %vm8861_vm2, %v2692_v11, %v2696_v46  ;;  %v9737_v17 = vsel %vm8861_vm2, %v2716_v21, %v2720_v5  ;;  %v2771_v11 = vshrl.u32 %v9753_v6, 16  ;;  %v8605_v5 = vld [vmem:[%s11632_s1 + $0x360] sm:$0xff]   ;;  %v9810_v21 = vld [vmem:[%s8826_s8 + $0xa8] sm:$0xff] }
  0xdb   : > { %1457 = vmatprep.mubr.bf16.mxu1 %v11648_v45  ;;  %v6847_v63 = vcombine.high %v2687_v16, %v2697_v18  ;;  %v2729_v45 = vor.u32 %v2728_v0, %v2725_v2  ;;  %v6846_v57 = vcombine.low %v2687_v16, %v2697_v18  ;;  %v6849_v24 = vcombine.high %v9733_v28, %v9737_v17  ;;  %v6781_v2 = vld [vmem:[%s8826_s8 + $0xa0] sm:$0x11] }
  0xdc   : > { %v2766_v18 = vshll.u32 %v6778_v59, 16 }
  0xdd   : > { %v2730_v3 = vrot.slane %v2729_v45, 4 }
  0xde   : > { %2039 = vmatmul.mubr.bf16.gmra.mrb[88].mxu0 %v6632_v54  ;;  %v9687_v54 = vld [vmem:[%s8826_s8 + $0x68] sm:$0xff] }
  0xdf   : > { %2046 = vmatprep.mubr.bf16.mxu0 %v6635_v39  ;;  %v11649_v39 = vcombine.low %v9113_v8, %v9116_v9  ;;  %v2732_v8 = vshll.u32 %v9687_v54, 16  ;;  %v2736_v9 = vshrl.u32 %v9687_v54, 16 }
  0xe1   : > { %v2734_v31 = vrot.slane %v2732_v8, 5  ;;  %v2738_v15 = vrot.slane %v2736_v9, 4  ;;  %v2780_v8 = vshll.u32 %v9761_v19, 16  ;;  %v2784_v9 = vshrl.u32 %v9761_v19, 16 }
  0xe2   : > { %1458 = vmatmul.mubr.bf16.gmra.mrb[88].mxu1 %v11649_v39  ;;  %v9763_v39 = vrot.slane %v2756_v25, 5  ;;  %v2795_v25 = vshrl.u32 %v9810_v21, 16 }
  0xe3   : > { %1465 = vmatprep.mubr.bf16.mxu1 %v11650_v33  ;;  %v2739_v48 = vor.u32 %v2738_v15, %v2734_v31  ;;  %v8587_v33 = vld [vmem:[%s11632_s1 + $0x2d0] sm:$0xff]   ;;  %v9788_v16 = vsel %vm8861_vm2, %v2730_v3, %v2734_v31  ;;  %v2786_v14 = vrot.slane %v2784_v9, 4 }
  0xe4   : > { %v9815_v15 = vld [vmem:[%s8826_s8 + $0xb0] sm:$0xff] }
  0xe5   : > { %v2740_v4 = vrot.slane %v2739_v48, 4  ;;  %v2790_v48 = vshll.u32 %v6781_v2, 16  ;;  %v6722_v2 = vcombine.low %v9684_v40, %v9687_v54 }
  0xe6   : > { %2047 = vmatmul.mubr.bf16.gmra.mrb[92].mxu0 %v6634_v62  ;;  %v11651_v62 = vcombine.low %v9164_v50, %v9167_v60  ;;  %v6716_v50 = vcombine.low %v9614_v37, %v9617_v56  ;;  %v6719_v60 = vcombine.high %v9634_v43, %v9637_v23  ;;  %v2747_v37 = vshrl.u32 %v9719_v52, 16 }
  0xe7   : > { %3323 = vmatprep.mubr.bf16.mxu0 %v6845_v7  ;;  %v2750_v56 = vshll.u32 %v9719_v52, 16  ;;  %v8590_v7 = vld [vmem:[%s11632_s1 + $0x310] sm:$0xff]   ;;  %v9792_v43 = vsel %vm8861_vm2, %v2740_v4, %v2744_v44  ;;  %v2763_v23 = vor.u32 %v2762_v51, %v9763_v39  ;;  %v2804_v4 = vshll.u32 %v9815_v15, 16 }
  0xe8   : > { %v2749_v46 = vrot.slane %v2747_v37, 4  ;;  %v6851_v0 = vcombine.high %v9788_v16, %v9792_v43  ;;  %v8606_v37 = vld [vmem:[%s11632_s1 + $0x320] sm:$0xff]   ;;  %v2808_v51 = vshrl.u32 %v9815_v15, 16 }
  0xe9   : > { %v2752_v35 = vrot.slane %v2750_v56, 5  ;;  %v6720_v56 = vcombine.low %v9657_v47, %v9660_v42 }
  0xea   : > { %1466 = vmatmul.mubr.bf16.gmra.mrb[92].mxu1 %v11651_v62  ;;  %v2773_v62 = vrot.slane %v2771_v11, 4 }
  0xeb   : > { %2441 = vmatprep.mubr.bf16.mxu1 %v6717_v61  ;;  %v6721_v61 = vcombine.high %v9657_v47, %v9660_v42  ;;  %v2753_v13 = vor.u32 %v2752_v35, %v2749_v46  ;;  %v2798_v42 = vshll.u32 %v9810_v21, 16  ;;  %v6723_v35 = vcombine.high %v9684_v40, %v9687_v54 }
  0xed   : > { %v2754_v31 = vrot.slane %v2753_v13, 4  ;;  %v6784_v13 = vld [vmem:[%s8826_s8 + $0xb8] sm:$0x11] }
  0xee   : > { %3324 = vmatmul.mubr.bf16.vlgmr.msra.gmra.mrb[96].mxu0 %v6844_v32  ;;  %v2776_v32 = vrot.slane %v2774_v12, 5  ;;  %v8614_v12 = vld [vmem:[%s11632_s1 + $0x328] sm:$0xff]  }
  0xef   : > { %8097 = vmatpush3.bf16.msra.mxu0 %v8574_v22  ;;  %3331 = vmatprep.mubr.bf16.mxu0 %v6847_v63  ;;  %v8595_v22 = vld [vmem:[%s11632_s1 + $0x2d8] sm:$0xff]   ;;  %v9807_v63 = vrot.slane %v2780_v8, 5  ;;  %v9843_v3 = vsel %vm8861_vm2, %v2754_v31, %v9763_v39  ;;  %v8611_v39 = vld [vmem:[%s11632_s1 + $0x2e8] sm:$0xff]   ;;  %v8621_v8 = vld [vmem:[%s11632_s1 + $0x370] sm:$0xff]  }
  0xf0   : > { %8098 = vmatprep.subr.bf16.mxu0 %v8581_v34  ;;  %v6848_v34 = vcombine.low %v9733_v28, %v9737_v17  ;;  %v2768_v28 = vrot.slane %v2766_v18, 5  ;;  %v8603_v17 = vld [vmem:[%s11632_s1 + $0x2e0] sm:$0xff]   ;;  %v2777_v45 = vor.u32 %v2776_v32, %v2773_v62  ;;  %v9881_v32 = vld [vmem:[%s8826_s8 + $0xc8] sm:$0xff] }
  0xf1   : > { %v2787_v47 = vor.u32 %v2786_v14, %v9807_v63 }
  0xf2   : > { %2442 = vmatmul.mubr.bf16.vlgmr.msra.gmra.mrb[96].mxu1 %v6716_v50  ;;  %v8596_v50 = vld [vmem:[%s11632_s1 + $0x298] sm:$0xff]  }
  0xf3   : > { %7985 = vmatpush3.bf16.msra.mxu1 %v8572_v20  ;;  %2449 = vmatprep.mubr.bf16.mxu1 %v6719_v60  ;;  %v2764_v20 = vrot.slane %v2763_v23, 4  ;;  %v2788_v9 = vrot.slane %v2787_v47, 4  ;;  %v2800_v23 = vrot.slane %v2798_v42, 5  ;;  %v8630_v47 = vld [vmem:[%s11632_s1 + $0x338] sm:$0xff]  }
  0xf4   : > { %7986 = vmatprep.subr.bf16.mxu1 %v8579_v30  ;;  %8099 = vmatpush3.bf16.msra.mxu0 %v8582_v53 }
  0xf5   : > { %8100 = vmatprep.subr.bf16.mxu0 %v8589_v1  ;;  %v9856_v11 = vsel %vm8861_vm2, %v2764_v20, %v2768_v28 }
  0xf6   : > { %3332 = vmatmul.mubr.bf16.gmra.mrb[100].mxu0 %v6846_v57  ;;  %v6853_v18 = vcombine.high %v9843_v3, %v9856_v11 }
  0xf7   : > { %3339 = vmatprep.mubr.bf16.mxu0 %v6849_v24  ;;  %7987 = vmatpush3.bf16.msra.mxu1 %v8580_v41 }
  0xf8   : > { %7988 = vmatprep.subr.bf16.mxu1 %v8587_v33  ;;  %8101 = vmatpush3.bf16.msra.mxu0 %v8590_v7  ;;  %v8604_v33 = vld [vmem:[%s11632_s1 + $0x2a0] sm:$0xff]  }
  0xf9   : > { %8102 = vmatprep.subr.bf16.mxu0 %v8597_v26  ;;  %v6850_v26 = vcombine.low %v9788_v16, %v9792_v43  ;;  %v2810_v16 = vrot.slane %v2808_v51, 4  ;;  %v9875_v43 = vld [vmem:[%s8826_s8 + $0xc0] sm:$0xff] }
  0xfa   : > { %2450 = vmatmul.mubr.bf16.gmra.mrb[100].mxu1 %v6718_v27  ;;  %v2778_v27 = vrot.slane %v2777_v45, 4  ;;  %v2832_v45 = vshrl.u32 %v9881_v32, 16 }
  0xfb   : > { %2457 = vmatprep.mubr.bf16.mxu1 %v6721_v61  ;;  %7989 = vmatpush3.bf16.msra.mxu1 %v8588_v58  ;;  %v2792_v61 = vrot.slane %v2790_v48, 5  ;;  %v2797_v58 = vrot.slane %v2795_v25, 4  ;;  %v8620_v48 = vld [vmem:[%s11632_s1 + $0x2b0] sm:$0xff]  }
  0xfc   : > { %7990 = vmatprep.subr.bf16.mxu1 %v8595_v22  ;;  %8103 = vmatpush3.bf16.msra.mxu0 %v8598_v29  ;;  %v9872_v22 = vrot.slane %v2804_v4, 5  ;;  %v8612_v29 = vld [vmem:[%s11632_s1 + $0x2a8] sm:$0xff]   ;;  %v9896_v31 = vsel %vm8861_vm2, %v2778_v27, %v9807_v63  ;;  %v2834_v27 = vrot.slane %v2832_v45, 4 }
  0xfd   : > { %8104 = vmatprep.subr.bf16.mxu0 %v8605_v5  ;;  %v8619_v5 = vld [vmem:[%s11632_s1 + $0x2f0] sm:$0xff]   ;;  %v9905_v54 = vsel %vm8861_vm2, %v2788_v9, %v2792_v61  ;;  %v2801_v28 = vor.u32 %v2800_v23, %v2797_v58  ;;  %v9941_v61 = vld [vmem:[%s8826_s8 + $0xd8] sm:$0xff]  ;;  %v6724_v58 = vcombine.low %v9719_v52, %v9722_v49 }
  0xfe   : > { %3340 = vmatmul.mubr.bf16.gmra.mrb[104].mxu0 %v6848_v34  ;;  %v8622_v34 = vld [vmem:[%s11632_s1 + $0x330] sm:$0xff]   ;;  %v6855_v51 = vcombine.high %v9896_v31, %v9905_v54 }
  0xff   : > { %3347 = vmatprep.mubr.bf16.mxu0 %v6851_v0  ;;  %7991 = vmatpush3.bf16.msra.mxu1 %v8596_v50  ;;  %v6725_v0 = vcombine.high %v9719_v52, %v9722_v49  ;;  %v2814_v50 = vshll.u32 %v6784_v13, 16  ;;  %v8636_v13 = vld [vmem:[%s11632_s1 + $0x3c0] sm:$0xff]  }
 0x100   : > { %7992 = vmatprep.subr.bf16.mxu1 %v8603_v17  ;;  %8105 = vmatpush3.bf16.msra.mxu0 %v8606_v37  ;;  %v2819_v17 = vshrl.u32 %v9875_v43, 16 }
 0x101   : > { %v7440_v60 = vpop.f32.mrb[0].mxu0  ;;  %v7488_v55 = vpop.f32.mrb[0].mxu1  ;;  %8106 = vmatprep.subr.bf16.mxu0 %v8613_v38 }
 0x102   : > { %v7441_v30 = vpop.f32.mrb[1].mxu0  ;;  %v7489_v53 = vpop.f32.mrb[1].mxu1  ;;  %2458 = vmatmul.mubr.bf16.gmra.mrb[104].mxu1 %v6720_v56  ;;  %v2811_v56 = vor.u32 %v2810_v16, %v9872_v22 }
 0x103   : > { %v9832_v1 = vadd.f32 %v7441_v30, %v7440_v60  ;;  %v9834_v57 = vadd.f32 %v7489_v53, %v7488_v55  ;;  %v7443_v24 = vpop.f32.mrb[2].mxu0  ;;  %v7491_v41 = vpop.f32.mrb[2].mxu1  ;;  %2465 = vmatprep.mubr.bf16.mxu1 %v6723_v35  ;;  %7993 = vmatpush3.bf16.msra.mxu1 %v8604_v33  ;;  %v8629_v60 = vld [vmem:[%s11632_s1 + $0x378] sm:$0xff]   ;;  %v2822_v30 = vshll.u32 %v9875_v43, 16  ;;  %v2828_v53 = vshll.u32 %v9881_v32, 16  ;;  %v8638_v35 = vld [vmem:[%s11632_s1 + $0x440] sm:$0xff]  }
 0x104   : > { %v7444_v44 = vpop.f32.mrb[3].mxu0  ;;  %v7492_v46 = vpop.f32.mrb[3].mxu1  ;;  %7994 = vmatprep.subr.bf16.mxu1 %v8611_v39  ;;  %8107 = vmatpush3.bf16.msra.mxu0 %v8614_v12  ;;  %v2802_v33 = vrot.slane %v2801_v28, 4  ;;  %v6787_v39 = vld [vmem:[%s8826_s8 + $0xd0] sm:$0x11]  ;;  %v2821_v12 = vrot.slane %v2819_v17, 4 }
 0x105   : > { %v9850_v7 = vadd.f32 %v7444_v44, %v7443_v24  ;;  %v9852_v59 = vadd.f32 %v7492_v46, %v7491_v41  ;;  %8108 = vmatprep.subr.bf16.mxu0 %v8621_v8  ;;  %v8627_v41 = vld [vmem:[%s11632_s1 + $0x2f8] sm:$0xff]   ;;  %v6852_v44 = vcombine.low %v9843_v3, %v9856_v11  ;;  %v2816_v46 = vrot.slane %v2814_v50, 5 }
 0x106   : > { %3348 = vmatmul.mubr.bf16.gmra.mrb[108].mxu0 %v6850_v26  ;;  %v2812_v26 = vrot.slane %v2811_v56, 4  ;;  %v2824_v3 = vrot.slane %v2822_v30, 5  ;;  %v9935_v11 = vrot.slane %v2828_v53, 5  ;;  %v8628_v8 = vld [vmem:[%s11632_s1 + $0x2b8] sm:$0xff]  }
 0x107   : > { %3355 = vmatprep.mubr.bf16.mxu0 %v6853_v18  ;;  %7995 = vmatpush3.bf16.msra.mxu1 %v8612_v29  ;;  %v9949_v18 = vld [vmem:[%s8826_s8 + $0xe0] sm:$0xff] }
 0x108   : > { %7996 = vmatprep.subr.bf16.mxu1 %v8619_v5  ;;  %8109 = vmatpush3.bf16.msra.mxu0 %v8622_v34  ;;  %v9958_v5 = vsel %vm8861_vm2, %v2802_v33, %v9872_v22  ;;  %v2838_v34 = vshll.u32 %v6787_v39, 16  ;;  %v9962_v52 = vsel %vm8861_vm2, %v2812_v26, %v2816_v46  ;;  %v2825_v49 = vor.u32 %v2824_v3, %v2821_v12 }
 0x109   : > { %v7446_v62 = vpop.f32.mrb[4].mxu0  ;;  %v7494_v55 = vpop.f32.mrb[4].mxu1  ;;  %8110 = vmatprep.subr.bf16.mxu0 %v8629_v60  ;;  %v2852_v22 = vshll.u32 %v9949_v18, 16  ;;  %v6857_v53 = vcombine.high %v9958_v5, %v9962_v52  ;;  %v6729_v39 = vcombine.high %v9810_v21, %v9815_v15 }
 0x10a   : > { %v7447_v14 = vpop.f32.mrb[5].mxu0  ;;  %v7495_v63 = vpop.f32.mrb[5].mxu1  ;;  %2466 = vmatmul.mubr.bf16.gmra.mrb[108].mxu1 %v6722_v2  ;;  %v2840_v56 = vrot.slane %v2838_v34, 5  ;;  %v2826_v45 = vrot.slane %v2825_v49, 4 }
 0x10b   : > { %v9901_v20 = vadd.f32 %v7447_v14, %v7446_v62  ;;  %v7449_v40 = vpop.f32.mrb[6].mxu0  ;;  %v9915_v25 = vadd.f32 %v7495_v63, %v7494_v55  ;;  %v7497_v38 = vpop.f32.mrb[6].mxu1  ;;  %2473 = vmatprep.mubr.bf16.mxu1 %v6725_v0  ;;  %7997 = vmatpush3.bf16.msra.mxu1 %v8620_v48  ;;  %v6727_v62 = vcombine.high %v9753_v6, %v9761_v19  ;;  %v2843_v0 = vshrl.u32 %v9941_v61, 16 }
 0x10c   : > { %v7450_v37 = vpop.f32.mrb[7].mxu0  ;;  %v7498_v42 = vpop.f32.mrb[7].mxu1  ;;  %7998 = vmatprep.subr.bf16.mxu1 %v8627_v41  ;;  %8111 = vmatpush3.bf16.msra.mxu0 %v8630_v47  ;;  %v2835_v14 = vor.u32 %v2834_v27, %v9935_v11  ;;  %v2846_v55 = vshll.u32 %v9941_v61, 16  ;;  %v9978_v41 = vld [vmem:[%s8826_s8 + $0xf0] sm:$0xff]  ;;  %v2854_v46 = vrot.slane %v2852_v22, 5 }
 0x10d   : > { %v9917_v24 = vadd.f32 %v7450_v37, %v7449_v40  ;;  %v9930_v4 = vadd.f32 %v7498_v42, %v7497_v38  ;;  %8320 = vmatprep.subr.bf16.mxu0 %v8638_v35  ;;  %v2856_v40 = vshrl.u32 %v9949_v18, 16  ;;  %v6854_v37 = vcombine.low %v9896_v31, %v9905_v54  ;;  %v6790_v42 = vld [vmem:[%s8826_s8 + $0xe8] sm:$0x11] }
 0x10e   : > { %3356 = vmatmul.mubr.bf16.gmra.mrb[112].mxu0 %v6852_v44  ;;  %v2836_v48 = vrot.slane %v2835_v14, 4  ;;  %v2845_v38 = vrot.slane %v2843_v0, 4  ;;  %v2848_v44 = vrot.slane %v2846_v55, 5  ;;  %v6726_v54 = vcombine.low %v9753_v6, %v9761_v19 }
 0x10f   : > { %3363 = vmatprep.mubr.bf16.mxu0 %v6855_v51  ;;  %7999 = vmatpush3.bf16.msra.mxu1 %v8628_v8  ;;  %v2858_v35 = vrot.slane %v2856_v40, 4  ;;  %v9984_v51 = vld [vmem:[%s8826_s8 + $0xf8] sm:$0xff]  ;;  %v2867_v12 = vshrl.u32 %v9978_v41, 16  ;;  %v2870_v26 = vshll.u32 %v9978_v41, 16  ;;  %v2862_v8 = vshll.u32 %v6790_v42, 16 }
 0x110   : > { %8208 = vmatprep.subr.bf16.mxu1 %v8636_v13  ;;  %v2880_v13 = vshrl.u32 %v9984_v51, 16  ;;  %v9999_v19 = vsel %vm8861_vm2, %v2826_v45, %v9935_v11  ;;  %v6856_v0 = vcombine.low %v9958_v5, %v9962_v52  ;;  %v6793_v40 = vld [vmem:[%s8826_s8 + $0x100] sm:$0x11]  ;;  %v10017_v45 = vld [vmem:[%s8826_s8 + $0x108] sm:$0xff]  ;;  %v6728_v5 = vcombine.low %v9810_v21, %v9815_v15 }
 0x111   : > { %v7452_v9 = vpop.f32.mrb[8].mxu0  ;;  %v7500_v50 = vpop.f32.mrb[8].mxu1  ;;  %v2869_v11 = vrot.slane %v2867_v12, 4  ;;  %v6731_v42 = vcombine.high %v9875_v43, %v9881_v32  ;;  %v2894_v12 = vshll.u32 %v10017_v45, 16 }
 0x112   : > { %v7453_v23 = vpop.f32.mrb[9].mxu0  ;;  %v7501_v28 = vpop.f32.mrb[9].mxu1  ;;  %2474 = vmatmul.mubr.bf16.gmra.mrb[112].mxu1 %v6724_v58 }
 0x113   : > { %v9951_v16 = vadd.f32 %v7453_v23, %v7452_v9  ;;  %v7455_v29 = vpop.f32.mrb[10].mxu0  ;;  %v9971_v17 = vadd.f32 %v7501_v28, %v7500_v50  ;;  %v7503_v63 = vpop.f32.mrb[10].mxu1  ;;  %2481 = vmatprep.mubr.bf16.mxu1 %v6727_v62  ;;  %v2876_v9 = vshll.u32 %v9984_v51, 16  ;;  %v10003_v23 = vsel %vm8861_vm2, %v2836_v48, %v2840_v56 }
 0x114   : > { %v7456_v2 = vpop.f32.mrb[11].mxu0  ;;  %v7504_v30 = vpop.f32.mrb[11].mxu1  ;;  %v2859_v62 = vor.u32 %v2858_v35, %v2854_v46  ;;  %v2872_v50 = vrot.slane %v2870_v26, 5  ;;  %v6859_v22 = vcombine.high %v9999_v19, %v10003_v23  ;;  %v2886_v35 = vshll.u32 %v6793_v40, 16 }
 0x115   : > { %v9966_v60 = vadd.f32 %v7456_v2, %v7455_v29  ;;  %11652 = vst [vmem:[#allocation2_spill] sm:$0xff] %v9971_v17  ;;  %v9980_v47 = vadd.f32 %v7504_v30, %v7503_v63  ;;  %v2849_v29 = vor.u32 %v2848_v44, %v2845_v38  ;;  %v2878_v28 = vrot.slane %v2876_v9, 5  ;;  %v10020_v38 = vld [vmem:[%s8826_s8 + $0x110] sm:$0xff] }
 0x116   : > { %3364 = vmatmul.mubr.bf16.gmra.mrb[116].mxu0 %v6854_v37  ;;  %v2882_v63 = vrot.slane %v2880_v13, 4  ;;  %v2860_v30 = vrot.slane %v2859_v62, 4  ;;  %v2873_v44 = vor.u32 %v2872_v50, %v2869_v11  ;;  %v2896_v11 = vrot.slane %v2894_v12, 5 }
 0x117   : > { %11653 = vst [vmem:[#allocation3_spill] sm:$0xff] %v9980_v47  ;;  %3371 = vmatprep.mubr.bf16.mxu0 %v6857_v53  ;;  %v2850_v56 = vrot.slane %v2849_v29, 4  ;;  %v2864_v53 = vrot.slane %v2862_v8, 5  ;;  %v2904_v8 = vshrl.u32 %v10020_v38, 16 }
 0x119   : > { %v7458_v31 = vpop.f32.mrb[12].mxu0  ;;  %v7506_v58 = vpop.f32.mrb[12].mxu1  ;;  %v10032_v21 = vsel %vm8861_vm2, %v2850_v56, %v2854_v46  ;;  %v10036_v15 = vsel %vm8861_vm2, %v2860_v30, %v2864_v53  ;;  %v2888_v46 = vrot.slane %v2886_v35, 5  ;;  %v2906_v40 = vrot.slane %v2904_v8, 4  ;;  %v10055_v56 = vld [vmem:[%s8826_s8 + $0x128] sm:$0xff] }
 0x11a   : > { %v7459_v33 = vpop.f32.mrb[13].mxu0  ;;  %v7507_v34 = vpop.f32.mrb[13].mxu1  ;;  %2482 = vmatmul.mubr.bf16.gmra.mrb[116].mxu1 %v6726_v54  ;;  %v6861_v62 = vcombine.high %v10032_v21, %v10036_v15  ;;  %v2928_v12 = vshrl.u32 %v10055_v56, 16 }
 0x11b   : > { %v9992_v3 = vadd.f32 %v7459_v33, %v7458_v31  ;;  %v7461_v27 = vpop.f32.mrb[14].mxu0  ;;  %v10007_v49 = vadd.f32 %v7507_v34, %v7506_v58  ;;  %v7509_v14 = vpop.f32.mrb[14].mxu1  ;;  %2489 = vmatprep.mubr.bf16.mxu1 %v6729_v39  ;;  %v2883_v33 = vor.u32 %v2882_v63, %v2878_v28  ;;  %v2891_v39 = vshrl.u32 %v10017_v45, 16  ;;  %v10050_v63 = vld [vmem:[%s8826_s8 + $0x120] sm:$0xff] }
 0x11c   : > { %v7462_v6 = vpop.f32.mrb[15].mxu0  ;;  %v7510_v55 = vpop.f32.mrb[15].mxu1  ;;  %v6858_v58 = vcombine.low %v9999_v19, %v10003_v23  ;;  %v6730_v23 = vcombine.low %v9875_v43, %v9881_v32  ;;  %v2918_v35 = vshll.u32 %v10050_v63, 16 }
 0x11d   : > { %v10005_v2 = vadd.f32 %v7462_v6, %v7461_v27  ;;  %11654 = vst [vmem:[#allocation4_spill] sm:$0xff] %v10007_v49  ;;  %v10014_v37 = vadd.f32 %v7510_v55, %v7509_v14  ;;  %v2900_v27 = vshll.u32 %v10020_v38, 16  ;;  %v2874_v6 = vrot.slane %v2873_v44, 4  ;;  %v6796_v14 = vld [vmem:[%s8826_s8 + $0x118] sm:$0x11] }
 0x11e   : > { %3372 = vmatmul.mubr.bf16.gmra.mrb[120].mxu0 %v6856_v0  ;;  %v2884_v34 = vrot.slane %v2883_v33, 4  ;;  %v2893_v0 = vrot.slane %v2891_v39, 4  ;;  %v2915_v44 = vshrl.u32 %v10050_v63, 16 }
 0x11f   : > { %11655 = vst [vmem:[#allocation5_spill] sm:$0xff] %v10014_v37  ;;  %3379 = vmatprep.mubr.bf16.mxu0 %v6859_v22  ;;  %v2902_v22 = vrot.slane %v2900_v27, 5 }
 0x120   : > { %v10067_v43 = vsel %vm8861_vm2, %v2884_v34, %v2888_v46  ;;  %v2897_v32 = vor.u32 %v2896_v11, %v2893_v0  ;;  %v10083_v46 = vld [vmem:[%s8826_s8 + $0x140] sm:$0xff]  ;;  %v2920_v0 = vrot.slane %v2918_v35, 5 }
 0x121   : > { %v7464_v48 = vpop.f32.mrb[16].mxu0  ;;  %v7512_v13 = vpop.f32.mrb[16].mxu1  ;;  %v2907_v39 = vor.u32 %v2906_v40, %v2902_v22 }
 0x122   : > { %v7465_v52 = vpop.f32.mrb[17].mxu0  ;;  %2490 = vmatmul.mubr.bf16.gmra.mrb[120].mxu1 %v6728_v5  ;;  %v7513_v29 = vpop.f32.mrb[17].mxu1  ;;  %v10063_v5 = vsel %vm8861_vm2, %v2874_v6, %v2878_v28  ;;  %v2924_v28 = vshll.u32 %v10055_v56, 16  ;;  %v10080_v6 = vld [vmem:[%s8826_s8 + $0x138] sm:$0xff]  ;;  %v2898_v34 = vrot.slane %v2897_v32, 4  ;;  %v6732_v32 = vcombine.low %v9941_v61, %v9949_v18 }
 0x123   : > { %v10026_v31 = vadd.f32 %v7465_v52, %v7464_v48  ;;  %v7467_v54 = vpop.f32.mrb[18].mxu0  ;;  %2497 = vmatprep.mubr.bf16.mxu1 %v6731_v42  ;;  %v10047_v50 = vadd.f32 %v7513_v29, %v7512_v13  ;;  %v7515_v55 = vpop.f32.mrb[18].mxu1  ;;  %v6733_v48 = vcombine.high %v9941_v61, %v9949_v18  ;;  %v2910_v52 = vshll.u32 %v6796_v14, 16 }
 0x124   : > { %v7468_v26 = vpop.f32.mrb[19].mxu0  ;;  %v7516_v19 = vpop.f32.mrb[19].mxu1  ;;  %v6860_v13 = vcombine.low %v10032_v21, %v10036_v15  ;;  %v2917_v14 = vrot.slane %v2915_v44, 4  ;;  %v2908_v40 = vrot.slane %v2907_v39, 4  ;;  %v2930_v21 = vrot.slane %v2928_v12, 4 }
 0x125   : > { %v10040_v9 = vadd.f32 %v7468_v26, %v7467_v54  ;;  %11656 = vst [vmem:[#allocation6_spill] sm:$0xff] %v10047_v50  ;;  %v10057_v30 = vadd.f32 %v7516_v19, %v7515_v55  ;;  %v6799_v19 = vld [vmem:[%s8826_s8 + $0x130] sm:$0x11]  ;;  %v6735_v39 = vcombine.high %v9978_v41, %v9984_v51  ;;  %v10184_v50 = vld [vmem:[%s8826_s8 + $0x180] sm:$0xff] }
 0x126   : > { %3380 = vmatmul.mubr.bf16.gmra.mrb[124].mxu0 %v6858_v58  ;;  %v2912_v58 = vrot.slane %v2910_v52, 5  ;;  %v2942_v52 = vshll.u32 %v10080_v6, 16  ;;  %v2934_v12 = vshll.u32 %v6799_v19, 16  ;;  %v6862_v19 = vcombine.low %v10063_v5, %v10067_v43 }
 0x127   : > { %11657 = vst [vmem:[#allocation7_spill] sm:$0xff] %v10057_v30  ;;  %3387 = vmatprep.mubr.bf16.mxu0 %v6861_v62  ;;  %v6863_v62 = vcombine.high %v10063_v5, %v10067_v43 }
 0x128   : > { %v10108_v61 = vsel %vm8861_vm2, %v2908_v40, %v2912_v58 }
 0x129   : > { %v7470_v53 = vpop.f32.mrb[20].mxu0  ;;  %v7518_v27 = vpop.f32.mrb[20].mxu1 }
 0x12a   : > { %v7471_v42 = vpop.f32.mrb[21].mxu0  ;;  %2498 = vmatmul.mubr.bf16.gmra.mrb[124].mxu1 %v6730_v23  ;;  %v7519_v29 = vpop.f32.mrb[21].mxu1  ;;  %v2926_v23 = vrot.slane %v2924_v28, 5  ;;  %v2921_v28 = vor.u32 %v2920_v0, %v2917_v14 }
 0x12b   : > { %v10071_v54 = vadd.f32 %v7471_v42, %v7470_v53  ;;  %v7473_v33 = vpop.f32.mrb[22].mxu0  ;;  %2505 = vmatprep.mubr.bf16.mxu1 %v6733_v48  ;;  %v10087_v11 = vadd.f32 %v7519_v29, %v7518_v27  ;;  %v7521_v55 = vpop.f32.mrb[22].mxu1  ;;  %v2939_v53 = vshrl.u32 %v10080_v6, 16  ;;  %v2948_v48 = vshll.u32 %v10083_v46, 16 }
 0x12c   : > { %v7474_v26 = vpop.f32.mrb[23].mxu0  ;;  %v7522_v15 = vpop.f32.mrb[23].mxu1  ;;  %v2952_v42 = vshrl.u32 %v10083_v46, 16  ;;  %v10104_v29 = vsel %vm8861_vm2, %v2898_v34, %v2902_v22  ;;  %v2931_v18 = vor.u32 %v2930_v21, %v2926_v23  ;;  %v10118_v34 = vld [vmem:[%s8826_s8 + $0x150] sm:$0xff]  ;;  %v2922_v21 = vrot.slane %v2921_v28, 4 }
 0x12d   : > { %v10075_v8 = vadd.f32 %v7474_v26, %v7473_v33  ;;  %11658 = vst [vmem:[#allocation8_spill] sm:$0xff] %v10087_v11  ;;  %v10094_v33 = vadd.f32 %v7522_v15, %v7521_v55  ;;  %v2941_v55 = vrot.slane %v2939_v53, 4  ;;  %v2950_v15 = vrot.slane %v2948_v48, 5  ;;  %v10121_v48 = vld [vmem:[%s8826_s8 + $0x158] sm:$0xff] }
 0x12e   : > { %3388 = vmatmul.mubr.bf16.gmra.mrb[128].mxu0 %v6860_v13  ;;  %v2954_v14 = vrot.slane %v2952_v42, 4  ;;  %v6865_v58 = vcombine.high %v10104_v29, %v10108_v61  ;;  %v2932_v53 = vrot.slane %v2931_v18, 4  ;;  %v2972_v18 = vshll.u32 %v10121_v48, 16 }
 0x12f   : > { %11659 = vst [vmem:[#allocation9_spill] sm:$0xff] %v10094_v33  ;;  %3395 = vmatprep.mubr.bf16.mxu0 %v6863_v62  ;;  %v2944_v62 = vrot.slane %v2942_v52, 5  ;;  %v2936_v52 = vrot.slane %v2934_v12, 5  ;;  %v2966_v33 = vshll.u32 %v10118_v34, 16  ;;  %v6737_v12 = vcombine.high %v10017_v45, %v10020_v38 }
 0x131   : > { %v7476_v44 = vpop.f32.mrb[24].mxu0  ;;  %v7524_v22 = vpop.f32.mrb[24].mxu1 }
 0x132   : > { %v7477_v35 = vpop.f32.mrb[25].mxu0  ;;  %2506 = vmatmul.mubr.bf16.gmra.mrb[128].mxu1 %v6732_v32  ;;  %v7525_v40 = vpop.f32.mrb[25].mxu1 }
 0x133   : > { %v10100_v26 = vadd.f32 %v7477_v35, %v7476_v44  ;;  %v7479_v27 = vpop.f32.mrb[26].mxu0  ;;  %v6802_v44 = vld [vmem:[%s8826_s8 + $0x148] sm:$0x11]  ;;  %2513 = vmatprep.mubr.bf16.mxu1 %v6735_v39  ;;  %v10123_v42 = vadd.f32 %v7525_v40, %v7524_v22  ;;  %v7527_v32 = vpop.f32.mrb[26].mxu1  ;;  %v2945_v35 = vor.u32 %v2944_v62, %v2941_v55  ;;  %v6734_v39 = vcombine.low %v9978_v41, %v9984_v51 }
 0x134   : > { %v7480_v13 = vpop.f32.mrb[27].mxu0  ;;  %v2958_v5 = vshll.u32 %v6802_v44, 16  ;;  %v7528_v43 = vpop.f32.mrb[27].mxu1  ;;  %v2976_v55 = vshrl.u32 %v10121_v48, 16  ;;  %v10137_v62 = vsel %vm8861_vm2, %v2922_v21, %v2926_v23  ;;  %v10141_v41 = vsel %vm8861_vm2, %v2932_v53, %v2936_v52  ;;  %v6805_v53 = vld [vmem:[%s8826_s8 + $0x160] sm:$0x11] }
 0x135   : > { %v10110_v0 = vadd.f32 %v7480_v13, %v7479_v27  ;;  %11660 = vst [vmem:[#allocation10_spill] sm:$0xff] %v10123_v42  ;;  %v2955_v27 = vor.u32 %v2954_v14, %v2950_v15  ;;  %v2963_v13 = vshrl.u32 %v10118_v34, 16  ;;  %v10129_v28 = vadd.f32 %v7528_v43, %v7527_v32 }
 0x136   : > { %3396 = vmatmul.mubr.bf16.gmra.mrb[132].mxu0 %v6862_v19  ;;  %v2946_v14 = vrot.slane %v2945_v35, 4  ;;  %v2960_v44 = vrot.slane %v2958_v5, 5  ;;  %v2968_v32 = vrot.slane %v2966_v33, 5  ;;  %v6867_v21 = vcombine.high %v10137_v62, %v10141_v41 }
 0x137   : > { %11661 = vst [vmem:[#allocation11_spill] sm:$0xff] %v10129_v28  ;;  %3403 = vmatprep.mubr.bf16.mxu0 %v6865_v58  ;;  %v2956_v19 = vrot.slane %v2955_v27, 4  ;;  %v6864_v58 = vcombine.low %v10104_v29, %v10108_v61  ;;  %v2965_v40 = vrot.slane %v2963_v13, 4  ;;  %v2974_v52 = vrot.slane %v2972_v18, 5  ;;  %v10151_v27 = vld [vmem:[%s8826_s8 + $0x168] sm:$0xff]  ;;  %v10156_v28 = vld [vmem:[%s8826_s8 + $0x170] sm:$0xff] }
 0x138   : > { %v2978_v35 = vrot.slane %v2976_v55, 4  ;;  %v6739_v61 = vcombine.high %v10050_v63, %v10055_v56  ;;  %v10164_v13 = vsel %vm8861_vm2, %v2946_v14, %v2950_v15  ;;  %v2996_v15 = vshll.u32 %v10156_v28, 16 }
 0x139   : > { %v7482_v51 = vpop.f32.mrb[28].mxu0  ;;  %v2969_v55 = vor.u32 %v2968_v32, %v2965_v40  ;;  %v3000_v14 = vshrl.u32 %v10156_v28, 16  ;;  %v6866_v40 = vcombine.low %v10137_v62, %v10141_v41 }
 0x13a   : > { %2514 = vmatmul.mubr.bf16.gmra.mrb[132].mxu1 %v6734_v39  ;;  %v7483_v22 = vpop.f32.mrb[29].mxu0  ;;  %v6736_v39 = vcombine.low %v10017_v45, %v10020_v38  ;;  %v2982_v45 = vshll.u32 %v6805_v53, 16  ;;  %v2987_v38 = vshrl.u32 %v10151_v27, 16 }
 0x13b   : > { %v10145_v43 = vadd.f32 %v7483_v22, %v7482_v51  ;;  %v7485_v23 = vpop.f32.mrb[30].mxu0  ;;  %2521 = vmatprep.mubr.bf16.mxu1 %v6737_v12  ;;  %v7530_v29 = vpop.f32.mrb[28].mxu1  ;;  %v10168_v12 = vsel %vm8861_vm2, %v2956_v19, %v2960_v44  ;;  %v2990_v51 = vshll.u32 %v10151_v27, 16  ;;  %v3002_v11 = vrot.slane %v3000_v14, 4 }
 0x13c   : > { %v7486_v5 = vpop.f32.mrb[31].mxu0  ;;  %v7531_v18 = vpop.f32.mrb[29].mxu1  ;;  %v6869_v32 = vcombine.high %v10164_v13, %v10168_v12 }
 0x13d   : > { %v10158_v33 = vadd.f32 %v7486_v5, %v7485_v23  ;;  %v10172_v22 = vadd.f32 %v7531_v18, %v7530_v29  ;;  %v7533_v23 = vpop.f32.mrb[30].mxu1  ;;  %v2979_v5 = vor.u32 %v2978_v35, %v2974_v52  ;;  %v2984_v35 = vrot.slane %v2982_v45, 5 }
 0x13e   : > { %3404 = vmatmul.mubr.bf16.gmra.mrb[136].mxu0 %v6864_v58  ;;  %v7534_v19 = vpop.f32.mrb[31].mxu1  ;;  %v2989_v29 = vrot.slane %v2987_v38, 4  ;;  %v2992_v18 = vrot.slane %v2990_v51, 5  ;;  %v6741_v45 = vcombine.high %v10080_v6, %v10083_v46 }
 0x13f   : > { %11662 = vst [vmem:[#allocation12_spill] sm:$0xff] %v10172_v22  ;;  %3411 = vmatprep.mubr.bf16.mxu0 %v6867_v21  ;;  %v10176_v44 = vadd.f32 %v7534_v19, %v7533_v23  ;;  %v2970_v21 = vrot.slane %v2969_v55, 4  ;;  %v2980_v23 = vrot.slane %v2979_v5, 4  ;;  %v6808_v19 = vld [vmem:[%s8826_s8 + $0x178] sm:$0x11]  ;;  %v6738_v55 = vcombine.low %v10050_v63, %v10055_v56 }
 0x140   : > { %v3006_v38 = vshll.u32 %v6808_v19, 16  ;;  %v3011_v63 = vshrl.u32 %v10184_v50, 16  ;;  %v3014_v56 = vshll.u32 %v10184_v50, 16 }
 0x141   : > { %11663 = vst [vmem:[#allocation13_spill] sm:$0xff] %v10176_v44  ;;  %v7664_v58 = vpop.f32.mrb[32].mxu0  ;;  %v2998_v44 = vrot.slane %v2996_v15, 5 }
 0x142   : > { %2522 = vmatmul.mubr.bf16.gmra.mrb[136].mxu1 %v6736_v39  ;;  %v7665_v53 = vpop.f32.mrb[33].mxu0  ;;  %v10187_v39 = vld [vmem:[%s8826_s8 + $0x188] sm:$0xff] }
 0x143   : > { %v7666_v22 = vadd.f32 %v7665_v53, %v7664_v58  ;;  %v7667_v42 = vpop.f32.mrb[34].mxu0  ;;  %2529 = vmatprep.mubr.bf16.mxu1 %v6739_v61  ;;  %v2993_v61 = vor.u32 %v2992_v18, %v2989_v29  ;;  %v3003_v15 = vor.u32 %v3002_v11, %v2998_v44  ;;  %v3020_v58 = vshll.u32 %v10187_v39, 16 }
 0x144   : > { %v7668_v30 = vpop.f32.mrb[35].mxu0  ;;  %v3008_v29 = vrot.slane %v3006_v38, 5 }
 0x145   : > { %v7552_v62 = vpop.f32.mrb[32].mxu1  ;;  %v7669_v41 = vadd.f32 %v7668_v30, %v7667_v42  ;;  %v10195_v30 = vsel %vm8861_vm2, %v2970_v21, %v2974_v52  ;;  %v10199_v42 = vsel %vm8861_vm2, %v2980_v23, %v2984_v35  ;;  %v6868_v21 = vcombine.low %v10164_v13, %v10168_v12 }
 0x146   : > { %v7553_v37 = vpop.f32.mrb[33].mxu1  ;;  %3412 = vmatmul.mubr.bf16.gmra.mrb[140].mxu0 %v6866_v40  ;;  %v6871_v11 = vcombine.high %v10195_v30, %v10199_v42  ;;  %v2994_v35 = vrot.slane %v2993_v61, 4  ;;  %v6811_v61 = vld [vmem:[%s8826_s8 + $0x190] sm:$0x11] }
 0x147   : > { %v7554_v51 = vadd.f32 %v7553_v37, %v7552_v62  ;;  %v7555_v5 = vpop.f32.mrb[34].mxu1  ;;  %3419 = vmatprep.mubr.bf16.mxu0 %v6869_v32  ;;  %v3024_v37 = vshrl.u32 %v10187_v39, 16 }
 0x148   : > { %v7556_v14 = vpop.f32.mrb[35].mxu1 }
 0x149   : > { %v1348_v40 = vadd.f32 %v7554_v51, %v9832_v1  ;;  %v7557_v32 = vadd.f32 %v7556_v14, %v7555_v5  ;;  %v7670_v53 = vpop.f32.mrb[36].mxu0  ;;  %v3004_v1 = vrot.slane %v3003_v15, 4  ;;  %v3016_v5 = vrot.slane %v3014_v56, 5 }
 0x14a   : > { %2530 = vmatmul.mubr.bf16.gmra.mrb[140].mxu1 %v6738_v55  ;;  %v7671_v52 = vpop.f32.mrb[37].mxu0  ;;  %v3013_v55 = vrot.slane %v3011_v63, 4  ;;  %v3022_v14 = vrot.slane %v3020_v58, 5  ;;  %v3026_v49 = vrot.slane %v3024_v37, 4  ;;  %v2999_v15 = vsel %vm8861_vm2, %v2994_v35, %v2998_v44 }
 0x14b   : > { %v10210_v18 = vadd.f32 %v7666_v22, %v1348_v40  ;;  %v1351_v23 = vadd.f32 %v7557_v32, %v9850_v7  ;;  %v7672_v19 = vadd.f32 %v7671_v52, %v7670_v53  ;;  %v7673_v62 = vpop.f32.mrb[38].mxu0  ;;  %2537 = vmatprep.mubr.bf16.mxu1 %v6741_v45  ;;  %v6740_v22 = vcombine.low %v10080_v6, %v10083_v46 }
 0x14c   : > { %v7674_v51 = vpop.f32.mrb[39].mxu0  ;;  %v6743_v45 = vcombine.high %v10118_v34, %v10121_v48  ;;  %v3017_v56 = vor.u32 %v3016_v5, %v3013_v55  ;;  %v3027_v58 = vor.u32 %v3026_v49, %v3022_v14  ;;  %v3030_v37 = vshll.u32 %v6811_v61, 16 }
 0x14d   : > { %v10213_v13 = vadd.f32 %v7669_v41, %v1351_v23  ;;  %v7558_v12 = vpop.f32.mrb[36].mxu1  ;;  %v7675_v47 = vadd.f32 %v7674_v51, %v7673_v62  ;;  %v3009_v41 = vsel %vm8861_vm2, %v3004_v1, %v3008_v29  ;;  %v6870_v32 = vcombine.low %v10195_v30, %v10199_v42 }
 0x14e   : > { %v7559_v17 = vpop.f32.mrb[37].mxu1  ;;  %3420 = vmatmul.mubr.bf16.gmra.mrb[144].mxu0 %v6868_v21  ;;  %v3018_v49 = vrot.slane %v3017_v56, 4  ;;  %v3028_v29 = vrot.slane %v3027_v58, 4  ;;  %v3032_v23 = vrot.slane %v3030_v37, 5  ;;  %v6742_v30 = vcombine.low %v10118_v34, %v10121_v48  ;;  %v8725_v58 = vld [vmem:[%s8826_s8 + $0x20] sm:$0xff] }
 0x14f   : > { %v7560_v7 = vadd.f32 %v7559_v17, %v7558_v12  ;;  %v7561_v38 = vpop.f32.mrb[38].mxu1  ;;  %3427 = vmatprep.mubr.bf16.mxu0 %v6871_v11  ;;  %v6873_v11 = vcombine.high %v2999_v15, %v3009_v41  ;;  %v6872_v48 = vcombine.low %v2999_v15, %v3009_v41  ;;  %v3550_v37 = vrot.slane %v8725_v58, 5  ;;  %v8728_v58 = vld [vmem:[%s8826_s8 + $0x40] sm:$0x11] }
 0x150   : > { %v7562_v63 = vpop.f32.mrb[39].mxu1  ;;  %v3023_v5 = vsel %vm8861_vm2, %v3018_v49, %v3022_v14  ;;  %v6744_v15 = vcombine.low %v10151_v27, %v10156_v28 }
 0x151   : > { %v1356_v40 = vadd.f32 %v7560_v7, %v9901_v20  ;;  %v7563_v6 = vadd.f32 %v7562_v63, %v7561_v38  ;;  %v7676_v46 = vpop.f32.mrb[40].mxu0 }
 0x152   : > { %2538 = vmatmul.mubr.bf16.gmra.mrb[144].mxu1 %v6740_v22  ;;  %v7677_v17 = vpop.f32.mrb[41].mxu0 }
 0x153   : > { %v10227_v53 = vadd.f32 %v7672_v19, %v1356_v40  ;;  %v1359_v44 = vadd.f32 %v7563_v6, %v9917_v24  ;;  %v7678_v52 = vadd.f32 %v7677_v17, %v7676_v46  ;;  %v7679_v21 = vpop.f32.mrb[42].mxu0  ;;  %2545 = vmatprep.mubr.bf16.mxu1 %v6743_v45  ;;  %v6745_v24 = vcombine.high %v10151_v27, %v10156_v28  ;;  %v6892_v46 = vld [vmem:[%s8826_s8 + $0x18] sm:$0xee] }
 0x154   : > { %v7680_v35 = vpop.f32.mrb[43].mxu0 }
 0x155   : > { %v10230_v20 = vadd.f32 %v7675_v47, %v1359_v44  ;;  %v7564_v62 = vpop.f32.mrb[40].mxu1  ;;  %v7681_v1 = vadd.f32 %v7680_v35, %v7679_v21  ;;  %v3033_v47 = vsel %vm8861_vm2, %v3028_v29, %v3032_v23  ;;  %v3552_v21 = vrot.slane %v3550_v37, 4 }
 0x156   : > { %v7565_v51 = vpop.f32.mrb[41].mxu1  ;;  %3428 = vmatmul.mubr.bf16.gmra.mrb[148].mxu0 %v6870_v32  ;;  %v6875_v56 = vcombine.high %v3023_v5, %v3033_v47  ;;  %v6747_v32 = vcombine.high %v10184_v50, %v10187_v39  ;;  %v6874_v27 = vcombine.low %v3023_v5, %v3033_v47 }
 0x157   : > { %v7566_v42 = vadd.f32 %v7565_v51, %v7564_v62  ;;  %v7567_v19 = vpop.f32.mrb[42].mxu1  ;;  %3435 = vmatprep.mubr.bf16.mxu0 %v6873_v11  ;;  %v8726_v11 = vld [vmem:[%s8826_s8 + $0x28] sm:$0x11] }
 0x158   : > { %v7568_v55 = vpop.f32.mrb[43].mxu1  ;;  %v3553_v35 = vrot.slane %v8726_v11, 5  ;;  %v8729_v11 = vld [vmem:[%s8826_s8 + $0x50] sm:$0xff] }
 0x159   : > { %v1364_v12 = vadd.f32 %v7566_v42, %v9951_v16  ;;  %v7569_v61 = vadd.f32 %v7568_v55, %v7567_v19  ;;  %v7682_v22 = vpop.f32.mrb[44].mxu0  ;;  %v8635_v42 = vld [vmem:[%s8826_s8 + $0x34] ss:$8 sps:$4 sm:$0xff]  }
 0x15a   : > { %2546 = vmatmul.mubr.bf16.gmra.mrb[148].mxu1 %v6742_v30  ;;  %v7683_v34 = vpop.f32.mrb[45].mxu0  ;;  %v8727_v55 = vld [vmem:[%s8826_s8 + $0x38] sm:$0xff] }
 0x15b   : > { %v10241_v7 = vadd.f32 %v7678_v52, %v1364_v12  ;;  %v1367_v38 = vadd.f32 %v7569_v61, %v9966_v60  ;;  %v7684_v45 = vadd.f32 %v7683_v34, %v7682_v22  ;;  %v7685_v63 = vpop.f32.mrb[46].mxu0  ;;  %2553 = vmatprep.mubr.bf16.mxu1 %v6745_v24  ;;  %v6908_v52 = vrot.slane %v6892_v46, 9  ;;  %v6893_v61 = vld [vmem:[%s8826_s8 + $0x30] sm:$0xee] }
 0x15c   : > { %v7686_v14 = vpop.f32.mrb[47].mxu0  ;;  %v3557_v5 = vrot.slane %v8727_v55, 5  ;;  %v6746_v34 = vcombine.low %v10184_v50, %v10187_v39  ;;  %v8633_v39 = vld [vmem:[%s8826_s8 + $0x30] ss:$8 sps:$4 sm:$0xff]  }
 0x15d   : > { %v10245_v40 = vadd.f32 %v7681_v1, %v1367_v38  ;;  %v7570_v16 = vpop.f32.mrb[44].mxu1  ;;  %v7687_v6 = vadd.f32 %v7686_v14, %v7685_v63  ;;  %v10260_v24 = vsel %vm9200_vm5, %v6908_v52, %v3550_v37  ;;  %v3560_v37 = vrot.slane %v8728_v58, 5 }
 0x15e   : > { %v7571_v17 = vpop.f32.mrb[45].mxu1  ;;  %3436 = vmatmul.mubr.bf16.gmra.mrb[152].mxu0 %v6872_v48  ;;  %v3559_v14 = vrot.slane %v3557_v5, 4 }
 0x15f   : > { %v7572_v41 = vadd.f32 %v7571_v17, %v7570_v16  ;;  %v7573_v60 = vpop.f32.mrb[46].mxu1  ;;  %3443 = vmatprep.mubr.bf16.mxu0 %v6875_v56  ;;  %v6909_v56 = vrot.slane %v6893_v61, 9 }
 0x160   : > { %v7574_v44 = vpop.f32.mrb[47].mxu1 }
 0x161   : > { %v1372_v49 = vadd.f32 %v7572_v41, %v9992_v3  ;;  %v7575_v29 = vadd.f32 %v7574_v44, %v7573_v60  ;;  %v7688_v23 = vpop.f32.mrb[48].mxu0  ;;  %v10264_v3 = vsel %vm9200_vm5, %v3552_v21, %v3553_v35  ;;  %v8640_v44 = vld [vmem:[%s8826_s8 + $0x4c] ss:$8 sps:$4 sm:$0xff]   ;;  %v10286_v52 = vsel %vm9200_vm5, %v6909_v56, %v3557_v5 }
 0x162   : > { %2554 = vmatmul.mubr.bf16.gmra.mrb[152].mxu1 %v6744_v15  ;;  %v7689_v28 = vpop.f32.mrb[49].mxu0  ;;  %v10290_v21 = vsel %vm9200_vm5, %v3559_v14, %v3560_v37  ;;  %v3564_v35 = vrot.slane %v8729_v11, 5  ;;  %v8668_v11 = vld [vmem:[%s11632_s1 + $0x458] sm:$0xff]  }
 0x163   : > { %v10254_v62 = vadd.f32 %v7684_v45, %v1372_v49  ;;  %v1375_v1 = vadd.f32 %v7575_v29, %v10005_v2  ;;  %v7690_v51 = vadd.f32 %v7689_v28, %v7688_v23  ;;  %v7691_v30 = vpop.f32.mrb[50].mxu0  ;;  %2561 = vmatprep.mubr.bf16.mxu1 %v6747_v32  ;;  %v6957_v45 = vcombine.high %v10260_v24, %v10264_v3  ;;  %v8639_v32 = vld [vmem:[%s11632_s1 + $0x400] sm:$0xff]   ;;  %v6894_v28 = vld [vmem:[%s8826_s8 + $0x48] sm:$0xee] }
 0x164   : > { %v7692_v19 = vpop.f32.mrb[51].mxu0  ;;  %v6910_v5 = vrot.slane %v6894_v28, 9 }
 0x165   : > { %v10267_v47 = vadd.f32 %v7687_v6, %v1375_v1  ;;  %v7576_v12 = vpop.f32.mrb[48].mxu1  ;;  %v7693_v2 = vadd.f32 %v7692_v19, %v7691_v30  ;;  %v6956_v1 = vcombine.low %v10260_v24, %v10264_v3  ;;  %v6959_v19 = vcombine.high %v10286_v52, %v10290_v21  ;;  %v8646_v24 = vld [vmem:[%s11632_s1 + $0x3c8] sm:$0xff]  }
 0x166   : > { %v7577_v22 = vpop.f32.mrb[49].mxu1  ;;  %3444 = vmatmul.mubr.bf16.gmra.mrb[156].mxu0 %v6874_v27  ;;  %v8649_v3 = vld [vmem:[%s11632_s1 + $0x408] sm:$0xff]  }
 0x167   : > { %v7578_v48 = vadd.f32 %v7577_v22, %v7576_v12  ;;  %v7579_v38 = vpop.f32.mrb[50].mxu1  ;;  %4464 = vmatprep.mubr.bf16.mxu0 %v8635_v42  ;;  %v8637_v42 = vld [vmem:[%s11632_s1 + $0x380] sm:$0xff]   ;;  %v3566_v12 = vrot.slane %v3564_v35, 4 }
 0x168   : > { %v7580_v63 = vpop.f32.mrb[51].mxu1 }
 0x169   : > { %v1380_v16 = vadd.f32 %v7578_v48, %v10026_v31  ;;  %v7581_v6 = vadd.f32 %v7580_v63, %v7579_v38  ;;  %v7694_v46 = vpop.f32.mrb[52].mxu0  ;;  %v8658_v38 = vld [vmem:[%s11632_s1 + $0x450] sm:$0xff]  }
 0x16a   : > { %2562 = vmatmul.mubr.bf16.gmra.mrb[156].mxu1 %v6746_v34  ;;  %v7695_v50 = vpop.f32.mrb[53].mxu0  ;;  %v8642_v63 = vld [vmem:[%s8826_s8 + $0x48] ss:$8 sps:$4 sm:$0xff]  }
 0x16b   : > { %v10277_v17 = vadd.f32 %v7690_v51, %v1380_v16  ;;  %v1383_v15 = vadd.f32 %v7581_v6, %v10040_v9  ;;  %v7696_v41 = vadd.f32 %v7695_v50, %v7694_v46  ;;  %v7697_v60 = vpop.f32.mrb[54].mxu0  ;;  %3949 = vmatprep.mubr.bf16.mxu1 %v6957_v45  ;;  %v8648_v9 = vld [vmem:[%s11632_s1 + $0x448] sm:$0xff]   ;;  %v10327_v46 = vsel %vm9200_vm5, %v6910_v5, %v3564_v35 }
 0x16c   : > { %v7698_v31 = vpop.f32.mrb[55].mxu0  ;;  %v8647_v16 = vld [vmem:[%s11632_s1 + $0x388] sm:$0xff]  }
 0x16d   : > { %v10296_v49 = vadd.f32 %v7693_v2, %v1383_v15  ;;  %v7582_v29 = vpop.f32.mrb[52].mxu1  ;;  %v7699_v23 = vadd.f32 %v7698_v31, %v7697_v60  ;;  %v8730_v2 = vld [vmem:[%s8826_s8 + $0x58] sm:$0x11]  ;;  %v8656_v15 = vld [vmem:[%s11632_s1 + $0x3d0] sm:$0xff]   ;;  %v6895_v31 = vld [vmem:[%s8826_s8 + $0x60] sm:$0xee] }
 0x16e   : > { %v7583_v27 = vpop.f32.mrb[53].mxu1  ;;  %4465 = vmatmul.mubr.bf16.vlgmr.msra.gmra.mrb[160].mxu0 %v8633_v39  ;;  %v3567_v61 = vrot.slane %v8730_v2, 5  ;;  %v8678_v2 = vld [vmem:[%s11632_s1 + $0x460] sm:$0xff]  }
 0x16f   : > { %v7584_v51 = vadd.f32 %v7583_v27, %v7582_v29  ;;  %v7585_v30 = vpop.f32.mrb[54].mxu1  ;;  %8321 = vmatpush3.bf16.msra.mxu0 %v8639_v32  ;;  %4472 = vmatprep.mubr.bf16.mxu0 %v8640_v44  ;;  %v8657_v27 = vld [vmem:[%s11632_s1 + $0x390] sm:$0xff]  }
 0x170   : > { %v7586_v55 = vpop.f32.mrb[55].mxu1  ;;  %8322 = vmatprep.subr.bf16.mxu0 %v8648_v9  ;;  %v10331_v50 = vsel %vm9200_vm5, %v3566_v12, %v3567_v61  ;;  %v6958_v9 = vcombine.low %v10286_v52, %v10290_v21  ;;  %v8666_v52 = vld [vmem:[%s11632_s1 + $0x3d8] sm:$0xff]  }
 0x171   : > { %v1388_v22 = vadd.f32 %v7584_v51, %v10071_v54  ;;  %v7587_v34 = vadd.f32 %v7586_v55, %v7585_v30  ;;  %v7700_v48 = vpop.f32.mrb[56].mxu0  ;;  %v8643_v54 = vld [vmem:[%s8826_s8 + $0x64] ss:$8 sps:$4 sm:$0xff]   ;;  %v6911_v51 = vrot.slane %v6895_v31, 9  ;;  %v8669_v21 = vld [vmem:[%s11632_s1 + $0x418] sm:$0xff]  }
 0x172   : > { %3950 = vmatmul.mubr.bf16.vlgmr.msra.gmra.mrb[160].mxu1 %v6956_v1  ;;  %v7701_v45 = vpop.f32.mrb[57].mxu0 }
 0x173   : > { %v10318_v56 = vadd.f32 %v7696_v41, %v1388_v22  ;;  %v1391_v14 = vadd.f32 %v7587_v34, %v10075_v8  ;;  %8209 = vmatpush3.bf16.msra.mxu1 %v8637_v42  ;;  %v7702_v58 = vadd.f32 %v7701_v45, %v7700_v48  ;;  %v7703_v37 = vpop.f32.mrb[58].mxu0  ;;  %3957 = vmatprep.mubr.bf16.mxu1 %v6959_v19  ;;  %v8731_v8 = vld [vmem:[%s8826_s8 + $0x68] sm:$0xff]  ;;  %v8659_v41 = vld [vmem:[%s11632_s1 + $0x410] sm:$0xff]  }
 0x174   : > { %v7704_v6 = vpop.f32.mrb[59].mxu0  ;;  %8210 = vmatprep.subr.bf16.mxu1 %v8646_v24  ;;  %8323 = vmatpush3.bf16.msra.mxu0 %v8649_v3  ;;  %v3571_v39 = vrot.slane %v8731_v8, 5  ;;  %v8732_v42 = vld [vmem:[%s8826_s8 + $0x70] sm:$0x11]  ;;  %v8645_v24 = vld [vmem:[%s8826_s8 + $0x60] ss:$8 sps:$4 sm:$0xff]  }
 0x175   : > { %v10340_v60 = vadd.f32 %v7699_v23, %v1391_v14  ;;  %v7588_v32 = vpop.f32.mrb[56].mxu1  ;;  %v7705_v44 = vadd.f32 %v7704_v6, %v7703_v37  ;;  %8324 = vmatprep.subr.bf16.mxu0 %v8658_v38  ;;  %v6961_v23 = vcombine.high %v10327_v46, %v10331_v50  ;;  %v3574_v19 = vrot.slane %v8732_v42, 5  ;;  %v8667_v38 = vld [vmem:[%s11632_s1 + $0x398] sm:$0xff]   ;;  %v8676_v37 = vld [vmem:[%s11632_s1 + $0x3e0] sm:$0xff]   ;;  %v8698_v42 = vld [vmem:[%s11632_s1 + $0x470] sm:$0xff]  }
 0x176   : > { %v7589_v35 = vpop.f32.mrb[57].mxu1  ;;  %4473 = vmatmul.mubr.bf16.gmra.mrb[164].mxu0 %v8642_v63  ;;  %v3573_v30 = vrot.slane %v3571_v39, 4  ;;  %v10374_v63 = vsel %vm9200_vm5, %v6911_v51, %v3571_v39  ;;  %v6896_v39 = vld [vmem:[%s8826_s8 + $0x78] sm:$0xee] }
 0x177   : > { %v7590_v29 = vadd.f32 %v7589_v35, %v7588_v32  ;;  %v7591_v28 = vpop.f32.mrb[58].mxu1  ;;  %4480 = vmatprep.mubr.bf16.mxu0 %v8643_v54  ;;  %8211 = vmatpush3.bf16.msra.mxu1 %v8647_v16  ;;  %v8679_v54 = vld [vmem:[%s11632_s1 + $0x420] sm:$0xff]   ;;  %v6960_v32 = vcombine.low %v10327_v46, %v10331_v50  ;;  %v8686_v46 = vld [vmem:[%s11632_s1 + $0x3e8] sm:$0xff]  }
 0x178   : > { %v7592_v1 = vpop.f32.mrb[59].mxu1  ;;  %8212 = vmatprep.subr.bf16.mxu1 %v8656_v15  ;;  %8325 = vmatpush3.bf16.msra.mxu0 %v8659_v41  ;;  %v10378_v14 = vsel %vm9200_vm5, %v3573_v30, %v3574_v19  ;;  %v8688_v15 = vld [vmem:[%s11632_s1 + $0x468] sm:$0xff]   ;;  %v8677_v35 = vld [vmem:[%s11632_s1 + $0x3a0] sm:$0xff]  }
 0x179   : > { %v1396_v55 = vadd.f32 %v7590_v29, %v10100_v26  ;;  %v7593_v5 = vadd.f32 %v7592_v1, %v7591_v28  ;;  %v7706_v12 = vpop.f32.mrb[60].mxu0  ;;  %8326 = vmatprep.subr.bf16.mxu0 %v8668_v11  ;;  %v8650_v26 = vld [vmem:[%s8826_s8 + $0x7c] ss:$8 sps:$4 sm:$0xff]   ;;  %v6912_v29 = vrot.slane %v6896_v39, 9  ;;  %v8689_v50 = vld [vmem:[%s11632_s1 + $0x428] sm:$0xff]  }
 0x17a   : > { %3958 = vmatmul.mubr.bf16.gmra.mrb[164].mxu1 %v6958_v9  ;;  %v7707_v61 = vpop.f32.mrb[61].mxu0 }
 0x17b   : > { %v10365_v3 = vadd.f32 %v7702_v58, %v1396_v55  ;;  %v1399_v22 = vadd.f32 %v7593_v5, %v10110_v0  ;;  %v7708_v34 = vadd.f32 %v7707_v61, %v7706_v12  ;;  %v7709_v48 = vpop.f32.mrb[62].mxu0  ;;  %3965 = vmatprep.mubr.bf16.mxu1 %v6961_v23  ;;  %8213 = vmatpush3.bf16.msra.mxu1 %v8657_v27  ;;  %v8733_v0 = vld [vmem:[%s8826_s8 + $0x80] sm:$0xff]  ;;  %v8734_v23 = vld [vmem:[%s8826_s8 + $0x88] sm:$0x11] }
 0x17c   : > { %v7710_v45 = vpop.f32.mrb[63].mxu0  ;;  %v3578_v58 = vrot.slane %v8733_v0, 5  ;;  %8214 = vmatprep.subr.bf16.mxu1 %v8666_v52  ;;  %8327 = vmatpush3.bf16.msra.mxu0 %v8669_v21  ;;  %v3581_v27 = vrot.slane %v8734_v23, 5  ;;  %v8652_v52 = vld [vmem:[%s8826_s8 + $0x78] ss:$8 sps:$4 sm:$0xff]  }
 0x17d   : > { %v10387_v16 = vadd.f32 %v7705_v44, %v1399_v22  ;;  %v7594_v6 = vpop.f32.mrb[60].mxu1  ;;  %v7711_v8 = vadd.f32 %v7710_v45, %v7709_v48  ;;  %8328 = vmatprep.subr.bf16.mxu0 %v8678_v2  ;;  %v6963_v44 = vcombine.high %v10374_v63, %v10378_v14  ;;  %v8687_v2 = vld [vmem:[%s11632_s1 + $0x3a8] sm:$0xff]   ;;  %v8696_v48 = vld [vmem:[%s11632_s1 + $0x3f0] sm:$0xff]  }
 0x17e   : > { %v7595_v41 = vpop.f32.mrb[61].mxu1  ;;  %4481 = vmatmul.mubr.bf16.gmra.mrb[168].mxu0 %v8645_v24  ;;  %v3580_v28 = vrot.slane %v3578_v58, 4  ;;  %v10421_v24 = vsel %vm9200_vm5, %v6912_v29, %v3578_v58  ;;  %v6897_v58 = vld [vmem:[%s8826_s8 + $0x90] sm:$0xee] }
 0x17f   : > { %v7596_v31 = vadd.f32 %v7595_v41, %v7594_v6  ;;  %v7597_v11 = vpop.f32.mrb[62].mxu1  ;;  %4488 = vmatprep.mubr.bf16.mxu0 %v8650_v26  ;;  %8215 = vmatpush3.bf16.msra.mxu1 %v8667_v38  ;;  %v8699_v26 = vld [vmem:[%s11632_s1 + $0x430] sm:$0xff]   ;;  %v6962_v6 = vcombine.low %v10374_v63, %v10378_v14  ;;  %v8706_v63 = vld [vmem:[%s11632_s1 + $0x3f8] sm:$0xff]  }
 0x180   : > { %v7598_v9 = vpop.f32.mrb[63].mxu1  ;;  %8216 = vmatprep.subr.bf16.mxu1 %v8676_v37  ;;  %8329 = vmatpush3.bf16.msra.mxu0 %v8679_v54  ;;  %v10425_v22 = vsel %vm9200_vm5, %v3580_v28, %v3581_v27  ;;  %v8708_v37 = vld [vmem:[%s11632_s1 + $0x478] sm:$0xff]   ;;  %v8697_v41 = vld [vmem:[%s11632_s1 + $0x3b0] sm:$0xff]  }
 0x181   : > { %v1404_v1 = vadd.f32 %v7596_v31, %v10145_v43  ;;  %v7599_v51 = vadd.f32 %v7598_v9, %v7597_v11  ;;  %v7712_v30 = vpop.f32.mrb[64].mxu0  ;;  %8330 = vmatprep.subr.bf16.mxu0 %v8688_v15  ;;  %v8653_v43 = vld [vmem:[%s8826_s8 + $0x94] ss:$8 sps:$4 sm:$0xff]   ;;  %v6913_v31 = vrot.slane %v6897_v58, 9  ;;  %v8655_v27 = vld [vmem:[%s8826_s8 + $0x90] ss:$8 sps:$4 sm:$0xff]  }
 0x182   : > { %3966 = vmatmul.mubr.bf16.gmra.mrb[168].mxu1 %v6960_v32  ;;  %v7713_v19 = vpop.f32.mrb[65].mxu0  ;;  %v8709_v14 = vld [vmem:[%s11632_s1 + $0x438] sm:$0xff]  }
 0x183   : > { %v10412_v21 = vadd.f32 %v7708_v34, %v1404_v1  ;;  %v1407_v55 = vadd.f32 %v7599_v51, %v10158_v33  ;;  %v7714_v5 = vadd.f32 %v7713_v19, %v7712_v30  ;;  %v7715_v12 = vpop.f32.mrb[66].mxu0  ;;  %3973 = vmatprep.mubr.bf16.mxu1 %v6963_v44  ;;  %8217 = vmatpush3.bf16.msra.mxu1 %v8677_v35  ;;  %v8735_v33 = vld [vmem:[%s8826_s8 + $0x98] sm:$0xff]  ;;  %v8736_v44 = vld [vmem:[%s8826_s8 + $0xa0] sm:$0x11]  ;;  %v8660_v30 = vld [vmem:[%s8826_s8 + $0xac] ss:$8 sps:$4 sm:$0xff]  }
 0x184   : > { %v7716_v61 = vpop.f32.mrb[67].mxu0  ;;  %v3585_v34 = vrot.slane %v8735_v33, 5  ;;  %8218 = vmatprep.subr.bf16.mxu1 %v8686_v46  ;;  %8331 = vmatpush3.bf16.msra.mxu0 %v8689_v50  ;;  %v3588_v35 = vrot.slane %v8736_v44, 5  ;;  %v6964_v33 = vcombine.low %v10421_v24, %v10425_v22 }
 0x185   : > { %v10434_v38 = vadd.f32 %v7711_v8, %v1407_v55  ;;  %v7600_v45 = vpop.f32.mrb[64].mxu1  ;;  %v7717_v0 = vadd.f32 %v7716_v61, %v7715_v12  ;;  %8332 = vmatprep.subr.bf16.mxu0 %v8698_v42  ;;  %v6965_v8 = vcombine.high %v10421_v24, %v10425_v22  ;;  %v8737_v55 = vld [vmem:[%s8826_s8 + $0xb0] sm:$0xff] }
 0x186   : > { %v7601_v54 = vpop.f32.mrb[65].mxu1  ;;  %4489 = vmatmul.mubr.bf16.gmra.mrb[172].mxu0 %v8652_v52  ;;  %v3587_v11 = vrot.slane %v3585_v34, 4  ;;  %v3586_v19 = vsel %vm9200_vm5, %v6913_v31, %v3585_v34  ;;  %v8662_v22 = vld [vmem:[%s8826_s8 + $0xa8] ss:$8 sps:$4 sm:$0xff]  }
 0x187   : > { %v7602_v39 = vadd.f32 %v7601_v54, %v7600_v45  ;;  %v7603_v15 = vpop.f32.mrb[66].mxu1  ;;  %4496 = vmatprep.mubr.bf16.mxu0 %v8653_v43  ;;  %8219 = vmatpush3.bf16.msra.mxu1 %v8687_v2  ;;  %v6898_v2 = vld [vmem:[%s8826_s8 + $0xa8] sm:$0xee] }
 0x188   : > { %v7604_v32 = vpop.f32.mrb[67].mxu1  ;;  %8220 = vmatprep.subr.bf16.mxu1 %v8696_v48  ;;  %8333 = vmatpush3.bf16.msra.mxu0 %v8699_v26  ;;  %v3589_v52 = vsel %vm9200_vm5, %v3587_v11, %v3588_v35  ;;  %v6914_v58 = vrot.slane %v6898_v2, 9  ;;  %v8663_v11 = vld [vmem:[%s8826_s8 + $0xc4] ss:$8 sps:$4 sm:$0xff]  }
 0x189   : > { %v1412_v9 = vadd.f32 %v7602_v39, %v9834_v57  ;;  %v7605_v29 = vadd.f32 %v7604_v32, %v7603_v15  ;;  %v7718_v28 = vpop.f32.mrb[68].mxu0  ;;  %8334 = vmatprep.subr.bf16.mxu0 %v8708_v37  ;;  %v8707_v57 = vld [vmem:[%s11632_s1 + $0x3b8] sm:$0xff]   ;;  %v6967_v26 = vcombine.high %v3586_v19, %v3589_v52 }
 0x18a   : > { %3974 = vmatmul.mubr.bf16.gmra.mrb[172].mxu1 %v6962_v6  ;;  %v7719_v23 = vpop.f32.mrb[69].mxu0 }
 0x18b   : > { %v10456_v46 = vadd.f32 %v7714_v5, %v1412_v9  ;;  %v1415_v50 = vadd.f32 %v7605_v29, %v9852_v59  ;;  %v7720_v1 = vadd.f32 %v7719_v23, %v7718_v28  ;;  %v7721_v51 = vpop.f32.mrb[70].mxu0  ;;  %3981 = vmatprep.mubr.bf16.mxu1 %v6965_v8  ;;  %8221 = vmatpush3.bf16.msra.mxu1 %v8697_v41  ;;  %v3592_v5 = vrot.slane %v8737_v55, 5  ;;  %v6899_v23 = vld [vmem:[%s8826_s8 + $0xc0] sm:$0xee]  ;;  %v8740_v55 = vld [vmem:[%s8826_s8 + $0xd0] sm:$0x11] }
 0x18c   : > { %v7722_v42 = vpop.f32.mrb[71].mxu0  ;;  %8222 = vmatprep.subr.bf16.mxu1 %v8706_v63  ;;  %8335 = vmatpush3.bf16.msra.mxu0 %v8709_v14  ;;  %v8739_v63 = vld [vmem:[%s8826_s8 + $0xc8] sm:$0xff] }
 0x18d   : > { %v10468_v59 = vadd.f32 %v7717_v0, %v1415_v50  ;;  %v7606_v12 = vpop.f32.mrb[68].mxu1  ;;  %v7723_v43 = vadd.f32 %v7722_v42, %v7721_v51  ;;  %v3594_v37 = vrot.slane %v3592_v5, 4  ;;  %v8738_v0 = vld [vmem:[%s8826_s8 + $0xb8] sm:$0x11]  ;;  %v3593_v35 = vsel %vm9200_vm5, %v6914_v58, %v3592_v5 }
 0x18e   : > { %v7607_v61 = vpop.f32.mrb[69].mxu1  ;;  %4497 = vmatmul.mubr.bf16.gmra.mrb[176].mxu0 %v8655_v27  ;;  %v3595_v54 = vrot.slane %v8738_v0, 5  ;;  %v3599_v14 = vrot.slane %v8739_v63, 5  ;;  %v6966_v27 = vcombine.low %v3586_v19, %v3589_v52  ;;  %v3602_v5 = vrot.slane %v8740_v55, 5  ;;  %v8665_v19 = vld [vmem:[%s8826_s8 + $0xc0] ss:$8 sps:$4 sm:$0xff]  }
 0x18f   : > { %v7608_v34 = vadd.f32 %v7607_v61, %v7606_v12  ;;  %v7609_v48 = vpop.f32.mrb[70].mxu1  ;;  %4504 = vmatprep.mubr.bf16.mxu0 %v8660_v30  ;;  %8223 = vmatpush3.bf16.msra.mxu1 %v8707_v57  ;;  %v6915_v57 = vrot.slane %v6899_v23, 9  ;;  %v11664_v12 = vld [vmem:[#allocation2_spill] sm:$0xff] }
 0x190   : > { %v7610_v45 = vpop.f32.mrb[71].mxu1  ;;  %v3601_v42 = vrot.slane %v3599_v14, 4  ;;  %v8670_v58 = vld [vmem:[%s8826_s8 + $0xdc] ss:$8 sps:$4 sm:$0xff]  }
 0x191   : > { %v1420_v6 = vadd.f32 %v7608_v34, %v9915_v25  ;;  %v7611_v39 = vadd.f32 %v7610_v45, %v7609_v48  ;;  %v7724_v15 = vpop.f32.mrb[72].mxu0  ;;  %v3596_v25 = vsel %vm9200_vm5, %v3594_v37, %v3595_v54  ;;  %v11665_v34 = vld [vmem:[#allocation3_spill] sm:$0xff]  ;;  %v3600_v0 = vsel %vm9200_vm5, %v6915_v57, %v3599_v14  ;;  %v11667_v57 = vld [vmem:[#allocation5_spill] sm:$0xff] }
 0x192   : > { %3982 = vmatmul.mubr.bf16.gmra.mrb[176].mxu1 %v6964_v33  ;;  %v7725_v24 = vpop.f32.mrb[73].mxu0  ;;  %v6969_v51 = vcombine.high %v3593_v35, %v3596_v25  ;;  %v3603_v54 = vsel %vm9200_vm5, %v3601_v42, %v3602_v5 }
 0x193   : > { %v10476_v8 = vadd.f32 %v7720_v1, %v1420_v6  ;;  %v1423_v41 = vadd.f32 %v7611_v39, %v9930_v4  ;;  %v7726_v32 = vadd.f32 %v7725_v24, %v7724_v15  ;;  %v7727_v31 = vpop.f32.mrb[74].mxu0  ;;  %3989 = vmatprep.mubr.bf16.mxu1 %v6967_v26  ;;  %v8741_v6 = vld [vmem:[%s8826_s8 + $0xe0] sm:$0xff]  ;;  %v6971_v63 = vcombine.high %v3600_v0, %v3603_v54 }
 0x194   : > { %v7728_v44 = vpop.f32.mrb[75].mxu0  ;;  %v3606_v39 = vrot.slane %v8741_v6, 5 }
 0x195   : > { %v10485_v9 = vadd.f32 %v7723_v43, %v1423_v41  ;;  %v7612_v29 = vpop.f32.mrb[72].mxu1  ;;  %v7729_v28 = vadd.f32 %v7728_v44, %v7727_v31  ;;  %v6900_v41 = vld [vmem:[%s8826_s8 + $0xd8] sm:$0xee]  ;;  %v6968_v31 = vcombine.low %v3593_v35, %v3596_v25 }
 0x196   : > { %v7613_v4 = vpop.f32.mrb[73].mxu1  ;;  %4505 = vmatmul.mubr.bf16.gmra.mrb[180].mxu0 %v8662_v22  ;;  %v3608_v23 = vrot.slane %v3606_v39, 4  ;;  %v8672_v35 = vld [vmem:[%s8826_s8 + $0xd8] ss:$8 sps:$4 sm:$0xff]  }
 0x197   : > { %v7614_v50 = vadd.f32 %v7613_v4, %v7612_v29  ;;  %v7615_v1 = vpop.f32.mrb[74].mxu1  ;;  %4512 = vmatprep.mubr.bf16.mxu0 %v8663_v11  ;;  %v6916_v29 = vrot.slane %v6900_v41, 9  ;;  %v8742_v4 = vld [vmem:[%s8826_s8 + $0xe8] sm:$0x11] }
 0x198   : > { %v7616_v30 = vpop.f32.mrb[75].mxu1 }
 0x199   : > { %v1428_v43 = vadd.f32 %v7614_v50, %v11664_v12  ;;  %v7617_v2 = vadd.f32 %v7616_v30, %v7615_v1  ;;  %v7730_v61 = vpop.f32.mrb[76].mxu0  ;;  %v11666_v50 = vld [vmem:[#allocation4_spill] sm:$0xff] }
 0x19a   : > { %3990 = vmatmul.mubr.bf16.gmra.mrb[180].mxu1 %v6966_v27  ;;  %v7731_v33 = vpop.f32.mrb[77].mxu0  ;;  %v3609_v27 = vrot.slane %v8742_v4, 5  ;;  %v8673_v12 = vld [vmem:[%s8826_s8 + $0xf4] ss:$8 sps:$4 sm:$0xff]   ;;  %v11669_v4 = vld [vmem:[#allocation7_spill] sm:$0xff] }
 0x19b   : > { %v10491_v52 = vadd.f32 %v7726_v32, %v1428_v43  ;;  %v1431_v48 = vadd.f32 %v7617_v2, %v11665_v34  ;;  %v7732_v26 = vadd.f32 %v7731_v33, %v7730_v61  ;;  %v7733_v45 = vpop.f32.mrb[78].mxu0  ;;  %3997 = vmatprep.mubr.bf16.mxu1 %v6969_v51  ;;  %v3607_v2 = vsel %vm9200_vm5, %v6916_v29, %v3606_v39  ;;  %v8743_v33 = vld [vmem:[%s8826_s8 + $0xf8] sm:$0xff] }
 0x19c   : > { %v7734_v37 = vpop.f32.mrb[79].mxu0  ;;  %v3610_v61 = vsel %vm9200_vm5, %v3608_v23, %v3609_v27 }
 0x19d   : > { %v10500_v15 = vadd.f32 %v7729_v28, %v1431_v48  ;;  %v7618_v24 = vpop.f32.mrb[76].mxu1  ;;  %v7735_v22 = vadd.f32 %v7734_v37, %v7733_v45  ;;  %v6901_v45 = vld [vmem:[%s8826_s8 + $0xf0] sm:$0xee]  ;;  %v6970_v37 = vcombine.low %v3600_v0, %v3603_v54  ;;  %v6973_v41 = vcombine.high %v3607_v2, %v3610_v61 }
 0x19e   : > { %v7619_v32 = vpop.f32.mrb[77].mxu1  ;;  %4513 = vmatmul.mubr.bf16.gmra.mrb[184].mxu0 %v8665_v19  ;;  %v3613_v19 = vrot.slane %v8743_v33, 5  ;;  %v8675_v0 = vld [vmem:[%s8826_s8 + $0xf0] ss:$8 sps:$4 sm:$0xff]  }
 0x19f   : > { %v7620_v11 = vadd.f32 %v7619_v32, %v7618_v24  ;;  %v7621_v44 = vpop.f32.mrb[78].mxu1  ;;  %4520 = vmatprep.mubr.bf16.mxu0 %v8670_v58  ;;  %v6917_v32 = vrot.slane %v6901_v45, 9 }
 0x1a0   : > { %v7622_v14 = vpop.f32.mrb[79].mxu1 }
 0x1a1   : > { %v1436_v28 = vadd.f32 %v7620_v11, %v11666_v50  ;;  %v7623_v1 = vadd.f32 %v7622_v14, %v7621_v44  ;;  %v7736_v51 = vpop.f32.mrb[80].mxu0  ;;  %v8744_v11 = vld [vmem:[%s8826_s8 + $0x100] sm:$0x11] }
 0x1a2   : > { %3998 = vmatmul.mubr.bf16.gmra.mrb[184].mxu1 %v6968_v31  ;;  %v7737_v30 = vpop.f32.mrb[81].mxu0  ;;  %v3615_v31 = vrot.slane %v3613_v19, 4  ;;  %v3616_v44 = vrot.slane %v8744_v11, 5 }
 0x1a3   : > { %v10506_v25 = vadd.f32 %v7732_v26, %v1436_v28  ;;  %v1439_v42 = vadd.f32 %v7623_v1, %v11667_v57  ;;  %v7738_v55 = vadd.f32 %v7737_v30, %v7736_v51  ;;  %v7739_v5 = vpop.f32.mrb[82].mxu0  ;;  %4005 = vmatprep.mubr.bf16.mxu1 %v6971_v63  ;;  %v11668_v63 = vld [vmem:[#allocation6_spill] sm:$0xff]  ;;  %v8680_v1 = vld [vmem:[%s8826_s8 + $0x10c] ss:$8 sps:$4 sm:$0xff]   ;;  %v3614_v30 = vsel %vm9200_vm5, %v6917_v32, %v3613_v19 }
 0x1a4   : > { %v7740_v43 = vpop.f32.mrb[83].mxu0  ;;  %v8745_v57 = vld [vmem:[%s8826_s8 + $0x110] sm:$0xff] }
 0x1a5   : > { %v10515_v34 = vadd.f32 %v7735_v22, %v1439_v42  ;;  %v7624_v48 = vpop.f32.mrb[80].mxu1  ;;  %v7741_v26 = vadd.f32 %v7740_v43, %v7739_v5  ;;  %v3620_v42 = vrot.slane %v8745_v57, 5  ;;  %v6902_v43 = vld [vmem:[%s8826_s8 + $0x108] sm:$0xee]  ;;  %v11671_v32 = vld [vmem:[#allocation8_spill] sm:$0xff] }
 0x1a6   : > { %v7625_v58 = vpop.f32.mrb[81].mxu1  ;;  %4521 = vmatmul.mubr.bf16.gmra.mrb[188].mxu0 %v8672_v35  ;;  %v3617_v35 = vsel %vm9200_vm5, %v3615_v31, %v3616_v44 }
 0x1a7   : > { %v7626_v6 = vadd.f32 %v7625_v58, %v7624_v48  ;;  %v7627_v24 = vpop.f32.mrb[82].mxu1  ;;  %4528 = vmatprep.mubr.bf16.mxu0 %v8673_v12  ;;  %v6972_v48 = vcombine.low %v3607_v2, %v3610_v61  ;;  %v8682_v2 = vld [vmem:[%s8826_s8 + $0x108] ss:$8 sps:$4 sm:$0xff]  }
 0x1a8   : > { %v7628_v39 = vpop.f32.mrb[83].mxu1 }
 0x1a9   : > { %v1444_v22 = vadd.f32 %v7626_v6, %v11668_v63  ;;  %v7629_v14 = vadd.f32 %v7628_v39, %v7627_v24  ;;  %v7742_v29 = vpop.f32.mrb[84].mxu0  ;;  %v6918_v6 = vrot.slane %v6902_v43, 9  ;;  %v3622_v24 = vrot.slane %v3620_v42, 4  ;;  %v11673_v63 = vld [vmem:[#allocation9_spill] sm:$0xff] }
 0x1aa   : > { %4006 = vmatmul.mubr.bf16.gmra.mrb[188].mxu1 %v6970_v37  ;;  %v7743_v23 = vpop.f32.mrb[85].mxu0  ;;  %v6975_v37 = vcombine.high %v3614_v30, %v3617_v35 }
 0x1ab   : > { %v10521_v54 = vadd.f32 %v7738_v55, %v1444_v22  ;;  %v1447_v27 = vadd.f32 %v7629_v14, %v11669_v4  ;;  %v7744_v50 = vadd.f32 %v7743_v23, %v7742_v29  ;;  %v7745_v28 = vpop.f32.mrb[86].mxu0  ;;  %4013 = vmatprep.mubr.bf16.mxu1 %v6973_v41  ;;  %v8746_v41 = vld [vmem:[%s8826_s8 + $0x118] sm:$0x11]  ;;  %v8683_v23 = vld [vmem:[%s8826_s8 + $0x124] ss:$8 sps:$4 sm:$0xff]   ;;  %v3621_v4 = vsel %vm9200_vm5, %v6918_v6, %v3620_v42 }
 0x1ac   : > { %v7746_v51 = vpop.f32.mrb[87].mxu0  ;;  %v3623_v39 = vrot.slane %v8746_v41, 5  ;;  %v8748_v6 = vld [vmem:[%s8826_s8 + $0x130] sm:$0x11] }
 0x1ad   : > { %v10530_v5 = vadd.f32 %v7741_v26, %v1447_v27  ;;  %v7630_v55 = vpop.f32.mrb[84].mxu1  ;;  %v7747_v12 = vadd.f32 %v7746_v51, %v7745_v28  ;;  %v8747_v28 = vld [vmem:[%s8826_s8 + $0x128] sm:$0xff] }
 0x1ae   : > { %v7631_v33 = vpop.f32.mrb[85].mxu1  ;;  %4529 = vmatmul.mubr.bf16.gmra.mrb[192].mxu0 %v8675_v0  ;;  %v3624_v27 = vsel %vm9200_vm5, %v3622_v24, %v3623_v39  ;;  %v11675_v24 = vld [vmem:[#allocation10_spill] sm:$0xff] }
 0x1af   : > { %11670 = vst [vmem:[#allocation2_spill] sm:$0xff] %v10530_v5  ;;  %v7632_v45 = vadd.f32 %v7631_v33, %v7630_v55  ;;  %v7633_v58 = vpop.f32.mrb[86].mxu1  ;;  %4536 = vmatprep.mubr.bf16.mxu0 %v8680_v1  ;;  %v3627_v1 = vrot.slane %v8747_v28, 5  ;;  %v6903_v55 = vld [vmem:[%s8826_s8 + $0x120] sm:$0xee]  ;;  %v6974_v33 = vcombine.low %v3614_v30, %v3617_v35 }
 0x1b0   : > { %v7634_v19 = vpop.f32.mrb[87].mxu1  ;;  %v8685_v35 = vld [vmem:[%s8826_s8 + $0x120] ss:$8 sps:$4 sm:$0xff]  }
 0x1b1   : > { %v1452_v26 = vadd.f32 %v7632_v45, %v11671_v32  ;;  %v7635_v31 = vadd.f32 %v7634_v19, %v7633_v58  ;;  %v7748_v11 = vpop.f32.mrb[88].mxu0  ;;  %v6977_v58 = vcombine.high %v3621_v4, %v3624_v27  ;;  %v3629_v19 = vrot.slane %v3627_v1, 4  ;;  %v10817_v5 = vld [vmem:[%s8826_s8 + $0xa0] sm:$0x11] }
 0x1b2   : > { %4014 = vmatmul.mubr.bf16.gmra.mrb[192].mxu1 %v6972_v48  ;;  %v7749_v44 = vpop.f32.mrb[89].mxu0 }
 0x1b3   : > { %v10536_v61 = vadd.f32 %v7744_v50, %v1452_v26  ;;  %v1455_v22 = vadd.f32 %v7635_v31, %v11673_v63  ;;  %v7750_v14 = vadd.f32 %v7749_v44, %v7748_v11  ;;  %v7751_v29 = vpop.f32.mrb[90].mxu0  ;;  %4021 = vmatprep.mubr.bf16.mxu1 %v6975_v37  ;;  %v6919_v37 = vrot.slane %v6903_v55, 9  ;;  %v8749_v26 = vld [vmem:[%s8826_s8 + $0x140] sm:$0xff]  ;;  %v11677_v44 = vld [vmem:[#allocation11_spill] sm:$0xff] }
 0x1b4   : > { %v7752_v0 = vpop.f32.mrb[91].mxu0  ;;  %v3634_v31 = vrot.slane %v8749_v26, 5 }
 0x1b5   : > { %11672 = vst [vmem:[#allocation3_spill] sm:$0xff] %v10536_v61  ;;  %v10545_v51 = vadd.f32 %v7747_v12, %v1455_v22  ;;  %v7636_v50 = vpop.f32.mrb[88].mxu1  ;;  %v7753_v57 = vadd.f32 %v7752_v0, %v7751_v29  ;;  %v3630_v12 = vrot.slane %v8748_v6, 5  ;;  %v8690_v29 = vld [vmem:[%s8826_s8 + $0x13c] ss:$8 sps:$4 sm:$0xff]   ;;  %v10559_v28 = vsel %vm9200_vm5, %v6919_v37, %v3627_v1 }
 0x1b6   : > { %v7637_v43 = vpop.f32.mrb[89].mxu1  ;;  %4537 = vmatmul.mubr.bf16.gmra.mrb[196].mxu0 %v8682_v2 }
 0x1b7   : > { %11674 = vst [vmem:[#allocation4_spill] sm:$0xff] %v10545_v51  ;;  %v7638_v48 = vadd.f32 %v7637_v43, %v7636_v50  ;;  %v7639_v45 = vpop.f32.mrb[90].mxu1  ;;  %4544 = vmatprep.mubr.bf16.mxu0 %v8683_v23  ;;  %v6904_v23 = vld [vmem:[%s8826_s8 + $0x138] sm:$0xee]  ;;  %v10563_v50 = vsel %vm9200_vm5, %v3629_v19, %v3630_v12 }
 0x1b8   : > { %v7640_v42 = vpop.f32.mrb[91].mxu1  ;;  %v6979_v19 = vcombine.high %v10559_v28, %v10563_v50 }
 0x1b9   : > { %v1460_v41 = vadd.f32 %v7638_v48, %v11675_v24  ;;  %v7641_v39 = vadd.f32 %v7640_v42, %v7639_v45  ;;  %v7754_v32 = vpop.f32.mrb[92].mxu0  ;;  %v6920_v45 = vrot.slane %v6904_v23, 9  ;;  %v8750_v42 = vld [vmem:[%s8826_s8 + $0x148] sm:$0x11]  ;;  %v8751_v24 = vld [vmem:[%s8826_s8 + $0x158] sm:$0xff] }
 0x1ba   : > { %4022 = vmatmul.mubr.bf16.gmra.mrb[196].mxu1 %v6974_v33  ;;  %v7755_v30 = vpop.f32.mrb[93].mxu0  ;;  %v6976_v33 = vcombine.low %v3621_v4, %v3624_v27  ;;  %v3637_v6 = vrot.slane %v8750_v42, 5  ;;  %v3641_v1 = vrot.slane %v8751_v24, 5  ;;  %v11681_v23 = vld [vmem:[#allocation13_spill] sm:$0xff]  ;;  %v8752_v42 = vld [vmem:[%s8826_s8 + $0x160] sm:$0x11] }
 0x1bb   : > { %v10552_v11 = vadd.f32 %v7750_v14, %v1460_v41  ;;  %v1463_v2 = vadd.f32 %v7641_v39, %v11677_v44  ;;  %v7756_v63 = vadd.f32 %v7755_v30, %v7754_v32  ;;  %v7757_v22 = vpop.f32.mrb[94].mxu0  ;;  %4029 = vmatprep.mubr.bf16.mxu1 %v6977_v58  ;;  %v3636_v58 = vrot.slane %v3634_v31, 4  ;;  %v11679_v39 = vld [vmem:[#allocation12_spill] sm:$0xff] }
 0x1bc   : > { %v7758_v0 = vpop.f32.mrb[95].mxu0  ;;  %v10576_v26 = vsel %vm9200_vm5, %v6920_v45, %v3634_v31  ;;  %v3644_v24 = vrot.slane %v8752_v42, 5  ;;  %v6906_v31 = vld [vmem:[%s8826_s8 + $0x168] sm:$0xee]  ;;  %v8753_v45 = vld [vmem:[%s8826_s8 + $0x170] sm:$0xff] }
 0x1bd   : > { %11676 = vst [vmem:[#allocation5_spill] sm:$0xff] %v10552_v11  ;;  %v10565_v14 = vadd.f32 %v7753_v57, %v1463_v2  ;;  %v7642_v55 = vpop.f32.mrb[92].mxu1  ;;  %v7759_v43 = vadd.f32 %v7758_v0, %v7757_v22  ;;  %v6905_v57 = vld [vmem:[%s8826_s8 + $0x150] sm:$0xee]  ;;  %v10580_v44 = vsel %vm9200_vm5, %v3636_v58, %v3637_v6  ;;  %v3643_v22 = vrot.slane %v3641_v1, 4  ;;  %v8755_v42 = vld [vmem:[%s8826_s8 + $0x188] sm:$0xff] }
 0x1be   : > { %v7643_v48 = vpop.f32.mrb[93].mxu1  ;;  %4545 = vmatmul.mubr.bf16.gmra.mrb[200].mxu0 %v8685_v35  ;;  %v8692_v35 = vld [vmem:[%s8826_s8 + $0x138] ss:$8 sps:$4 sm:$0xff]   ;;  %v6921_v2 = vrot.slane %v6905_v57, 9 }
 0x1bf   : > { %11678 = vst [vmem:[#allocation6_spill] sm:$0xff] %v10565_v14  ;;  %v7644_v37 = vadd.f32 %v7643_v48, %v7642_v55  ;;  %v7645_v41 = vpop.f32.mrb[94].mxu1  ;;  %4552 = vmatprep.mubr.bf16.mxu0 %v8690_v29  ;;  %v8693_v48 = vld [vmem:[%s8826_s8 + $0x154] ss:$8 sps:$4 sm:$0xff]  }
 0x1c0   : > { %v7646_v12 = vpop.f32.mrb[95].mxu1 }
 0x1c1   : > { %v1468_v4 = vadd.f32 %v7644_v37, %v11679_v39  ;;  %v7647_v27 = vadd.f32 %v7646_v12, %v7645_v41  ;;  %v7888_v32 = vpop.f32.mrb[96].mxu0  ;;  %v3648_v41 = vrot.slane %v8753_v45, 5  ;;  %v6978_v12 = vcombine.low %v10559_v28, %v10563_v50  ;;  %v7116_v39 = vld [vmem:[%s8826_s8 + $0x30] sm:$0xff]  ;;  %v10605_v28 = vld [vmem:[%s8826_s8 + $0x38] sm:$0xff] }
 0x1c2   : > { %4030 = vmatmul.mubr.bf16.gmra.mrb[200].mxu1 %v6976_v33  ;;  %v7889_v30 = vpop.f32.mrb[97].mxu0 }
 0x1c3   : > { %v10582_v29 = vadd.f32 %v7756_v63, %v1468_v4  ;;  %v1471_v0 = vadd.f32 %v7647_v27, %v11681_v23  ;;  %v7890_v55 = vadd.f32 %v7889_v30, %v7888_v32  ;;  %v7891_v33 = vpop.f32.mrb[98].mxu0  ;;  %4037 = vmatprep.mubr.bf16.mxu1 %v6979_v19  ;;  %v6981_v19 = vcombine.high %v10576_v26, %v10580_v44  ;;  %v8754_v23 = vld [vmem:[%s8826_s8 + $0x178] sm:$0x11] }
 0x1c4   : > { %v7892_v37 = vpop.f32.mrb[99].mxu0  ;;  %v10602_v32 = vsel %vm9200_vm5, %v3643_v22, %v3644_v24  ;;  %v6922_v30 = vrot.slane %v6906_v31, 9  ;;  %v4674_v22 = vshrl.u32 %v7116_v39, 16  ;;  %v8695_v31 = vld [vmem:[%s8826_s8 + $0x150] ss:$8 sps:$4 sm:$0xff]  }
 0x1c5   : > { %11680 = vst [vmem:[#allocation7_spill] sm:$0xff] %v10582_v29  ;;  %v10589_v58 = vadd.f32 %v7759_v43, %v1471_v0  ;;  %v7776_v6 = vpop.f32.mrb[96].mxu1  ;;  %v7893_v63 = vadd.f32 %v7892_v37, %v7891_v33  ;;  %v10598_v43 = vsel %vm9200_vm5, %v6921_v2, %v3641_v1  ;;  %v3651_v0 = vrot.slane %v8754_v23, 5  ;;  %v6907_v33 = vld [vmem:[%s8826_s8 + $0x180] sm:$0xee] }
 0x1c6   : > { %v7777_v57 = vpop.f32.mrb[97].mxu1  ;;  %4553 = vmatmul.mubr.bf16.gmra.mrb[204].mxu0 %v8692_v35  ;;  %v3650_v35 = vrot.slane %v3648_v41, 4  ;;  %v3655_v37 = vrot.slane %v8755_v42, 5  ;;  %v6980_v2 = vcombine.low %v10576_v26, %v10580_v44  ;;  %v4683_v23 = vshll.u32 %v10605_v28, 16  ;;  %v8700_v44 = vld [vmem:[%s8826_s8 + $0x16c] ss:$8 sps:$4 sm:$0xff]  }
 0x1c7   : > { %11682 = vst [vmem:[#allocation8_spill] sm:$0xff] %v10589_v58  ;;  %v7778_v4 = vadd.f32 %v7777_v57, %v7776_v6  ;;  %v7779_v27 = vpop.f32.mrb[98].mxu1  ;;  %4560 = vmatprep.mubr.bf16.mxu0 %v8693_v48  ;;  %v6983_v6 = vcombine.high %v10598_v43, %v10602_v32  ;;  %v4677_v57 = vshll.u32 %v7116_v39, 16  ;;  %v4687_v42 = vshrl.u32 %v10605_v28, 16 }
 0x1c8   : > { %v7780_v50 = vpop.f32.mrb[99].mxu1  ;;  %v10624_v39 = vsel %vm9200_vm5, %v6922_v30, %v3648_v41  ;;  %v10628_v58 = vsel %vm9200_vm5, %v3650_v35, %v3651_v0  ;;  %v7119_v41 = vld [vmem:[%s8826_s8 + $0x48] sm:$0xff]  ;;  %v10640_v30 = vld [vmem:[%s8826_s8 + $0x50] sm:$0xff]  ;;  %v10642_v0 = vrot.slane %v4683_v23, 5 }
 0x1c9   : > { %v2570_v48 = vadd.f32 %v7778_v4, %v10210_v18  ;;  %v7781_v45 = vadd.f32 %v7780_v50, %v7779_v27  ;;  %v7894_v1 = vpop.f32.mrb[100].mxu0  ;;  %v4679_v35 = vrot.slane %v4677_v57, 5 }
 0x1ca   : > { %4038 = vmatmul.mubr.bf16.gmra.mrb[204].mxu1 %v6978_v12  ;;  %v7895_v24 = vpop.f32.mrb[101].mxu0  ;;  %v6923_v12 = vrot.slane %v6907_v33, 9  ;;  %v10636_v33 = vld [vmem:[%s8826_s8 + $0x40] sm:$0x11] }
 0x1cb   : > { %v10618_v18 = vadd.f32 %v7890_v55, %v2570_v48  ;;  %v2571_v4 = vadd.f32 %v7781_v45, %v10213_v13  ;;  %v7896_v27 = vadd.f32 %v7895_v24, %v7894_v1  ;;  %v7897_v26 = vpop.f32.mrb[102].mxu0  ;;  %4045 = vmatprep.mubr.bf16.mxu1 %v6981_v19  ;;  %v3657_v55 = vrot.slane %v3655_v37, 4  ;;  %v8756_v48 = vld [vmem:[%s8826_s8 + $0x190] sm:$0x11] }
 0x1cc   : > { %v7898_v50 = vpop.f32.mrb[103].mxu0  ;;  %v3658_v13 = vrot.slane %v8756_v48, 5  ;;  %v4689_v48 = vrot.slane %v4687_v42, 4  ;;  %v10651_v19 = vsel %vm9200_vm5, %v6923_v12, %v3655_v37  ;;  %v4707_v42 = vshll.u32 %v10640_v30, 16 }
 0x1cd   : > { %11683 = vst [vmem:[#allocation9_spill] sm:$0xff] %v10618_v18  ;;  %v10631_v45 = vadd.f32 %v7893_v63, %v2571_v4  ;;  %v7782_v1 = vpop.f32.mrb[100].mxu1  ;;  %v7899_v24 = vadd.f32 %v7898_v50, %v7897_v26  ;;  %v4676_v18 = vrot.slane %v4674_v22, 4  ;;  %v5573_v63 = vrot.slane %v10605_v28, 5 }
 0x1ce   : > { %v7783_v29 = vpop.f32.mrb[101].mxu1  ;;  %4561 = vmatmul.mubr.bf16.gmra.mrb[208].mxu0 %v8695_v31  ;;  %v7244_v31 = vld [vmem:[%s8826_s8 + $0x30] sm:$0xee]  ;;  %v10656_v23 = vsel %vm9200_vm5, %v3657_v55, %v3658_v13  ;;  %v4701_v28 = vshll.u32 %v7119_v41, 16  ;;  %v4693_v22 = vshll.u32 %v10636_v33, 16  ;;  %v4711_v37 = vshrl.u32 %v10640_v30, 16 }
 0x1cf   : > { %11684 = vst [vmem:[#allocation10_spill] sm:$0xff] %v10631_v45  ;;  %v7784_v4 = vadd.f32 %v7783_v29, %v7782_v1  ;;  %v7785_v26 = vpop.f32.mrb[102].mxu1  ;;  %4568 = vmatprep.mubr.bf16.mxu0 %v8700_v44  ;;  %v4698_v29 = vshrl.u32 %v7119_v41, 16  ;;  %v8702_v45 = vld [vmem:[%s8826_s8 + $0x168] ss:$8 sps:$4 sm:$0xff]   ;;  %v4680_v55 = vor.u32 %v4679_v35, %v4676_v18  ;;  %v4690_v13 = vor.u32 %v4689_v48, %v10642_v0 }
 0x1d0   : > { %v7786_v57 = vpop.f32.mrb[103].mxu1  ;;  %v7260_v41 = vrot.slane %v7244_v31, 9  ;;  %v5575_v14 = vrot.slane %v5573_v63, 4  ;;  %v5576_v51 = vrot.slane %v10636_v33, 5  ;;  %v10673_v35 = vld [vmem:[%s8826_s8 + $0x58] sm:$0x11]  ;;  %v11687_v18 = vcombine.low %v10598_v43, %v10602_v32 }
 0x1d1   : > { %v2572_v44 = vadd.f32 %v7784_v4, %v10227_v53  ;;  %v7787_v1 = vadd.f32 %v7786_v57, %v7785_v26  ;;  %v7900_v50 = vpop.f32.mrb[104].mxu0  ;;  %v8703_v57 = vld [vmem:[%s8826_s8 + $0x184] ss:$8 sps:$4 sm:$0xff]   ;;  %v4700_v48 = vrot.slane %v4698_v29, 4  ;;  %v4703_v31 = vrot.slane %v4701_v28, 5 }
 0x1d2   : > { %4046 = vmatmul.mubr.bf16.gmra.mrb[208].mxu1 %v6980_v2  ;;  %v7901_v12 = vpop.f32.mrb[105].mxu0  ;;  %v7122_v2 = vld [vmem:[%s8826_s8 + $0x60] sm:$0xff]  ;;  %v5580_v33 = vrot.slane %v10640_v30, 5  ;;  %v5583_v32 = vrot.slane %v10673_v35, 5 }
 0x1d3   : > { %v10664_v11 = vadd.f32 %v7896_v27, %v2572_v44  ;;  %v2573_v53 = vadd.f32 %v7787_v1, %v10230_v20  ;;  %v7902_v4 = vadd.f32 %v7901_v12, %v7900_v50  ;;  %v7903_v26 = vpop.f32.mrb[106].mxu0  ;;  %4053 = vmatprep.mubr.bf16.mxu1 %v6983_v6  ;;  %v10675_v27 = vrot.slane %v4707_v42, 5  ;;  %v10680_v1 = vld [vmem:[%s8826_s8 + $0x48] sm:$0xee]  ;;  %v8710_v43 = vld [vmem:[%s8826_s8 + $0x19c] ss:$8 sps:$4 sm:$0xff]  }
 0x1d4   : > { %v7904_v61 = vpop.f32.mrb[107].mxu0  ;;  %v4713_v6 = vrot.slane %v4711_v37, 4  ;;  %v4722_v29 = vshrl.u32 %v7122_v2, 16  ;;  %v4725_v28 = vshll.u32 %v7122_v2, 16  ;;  %v10687_v37 = vsel %vm9200_vm5, %v7260_v41, %v5573_v63 }
 0x1d5   : > { %11685 = vst [vmem:[#allocation11_spill] sm:$0xff] %v10664_v11  ;;  %v10677_v44 = vadd.f32 %v7899_v24, %v2573_v53  ;;  %v7788_v20 = vpop.f32.mrb[104].mxu1  ;;  %v7905_v50 = vadd.f32 %v7904_v61, %v7903_v26  ;;  %v4695_v11 = vrot.slane %v4693_v22, 5  ;;  %v4681_v53 = vrot.slane %v4680_v55, 4  ;;  %v10690_v26 = vld [vmem:[%s8826_s8 + $0x68] sm:$0xff] }
 0x1d6   : > { %v7789_v12 = vpop.f32.mrb[105].mxu1  ;;  %4569 = vmatmul.mubr.bf16.gmra.mrb[212].mxu0 %v8702_v45  ;;  %v4691_v61 = vrot.slane %v4690_v13, 4  ;;  %v10694_v45 = vsel %vm9200_vm5, %v5575_v14, %v5576_v51  ;;  %v4704_v22 = vor.u32 %v4703_v31, %v4700_v48  ;;  %v4717_v2 = vshll.u32 %v10673_v35, 16 }
 0x1d7   : > { %11686 = vst [vmem:[#allocation12_spill] sm:$0xff] %v10677_v44  ;;  %v7790_v42 = vadd.f32 %v7789_v12, %v7788_v20  ;;  %v7791_v24 = vpop.f32.mrb[106].mxu1  ;;  %4576 = vmatprep.mubr.bf16.mxu0 %v8703_v57  ;;  %v7261_v20 = vrot.slane %v10680_v1, 9  ;;  %v8705_v12 = vld [vmem:[%s8826_s8 + $0x180] ss:$8 sps:$4 sm:$0xff]   ;;  %v4714_v63 = vor.u32 %v4713_v6, %v10675_v27  ;;  %v5582_v41 = vrot.slane %v5580_v33, 4 }
 0x1d8   : > { %v7792_v30 = vpop.f32.mrb[107].mxu1  ;;  %v4724_v14 = vrot.slane %v4722_v29, 4  ;;  %v4727_v48 = vrot.slane %v4725_v28, 5  ;;  %v4731_v31 = vshll.u32 %v10690_v26, 16  ;;  %v4735_v1 = vshrl.u32 %v10690_v26, 16 }
 0x1d9   : > { %v2574_v57 = vadd.f32 %v7790_v42, %v10241_v7  ;;  %v7793_v55 = vadd.f32 %v7792_v30, %v7791_v24  ;;  %v7906_v13 = vpop.f32.mrb[108].mxu0  ;;  %v11689_v6 = vcombine.high %v10624_v39, %v10628_v58  ;;  %v10717_v29 = vsel %vm8861_vm2, %v4681_v53, %v10642_v0 }
 0x1da   : > { %4054 = vmatmul.mubr.bf16.gmra.mrb[212].mxu1 %v11687_v18  ;;  %v7907_v51 = vpop.f32.mrb[109].mxu0  ;;  %v4705_v28 = vrot.slane %v4704_v22, 4  ;;  %v4719_v35 = vrot.slane %v4717_v2, 5  ;;  %v7309_v0 = vcombine.high %v10687_v37, %v10694_v45  ;;  %v4728_v53 = vor.u32 %v4727_v48, %v4724_v14 }
 0x1db   : > { %v10706_v44 = vadd.f32 %v7902_v4, %v2574_v57  ;;  %v2575_v7 = vadd.f32 %v7793_v55, %v10245_v40  ;;  %v7908_v42 = vadd.f32 %v7907_v51, %v7906_v13  ;;  %v7909_v24 = vpop.f32.mrb[110].mxu0  ;;  %4061 = vmatprep.mubr.bf16.mxu1 %v11689_v6  ;;  %v10721_v40 = vsel %vm8861_vm2, %v4691_v61, %v4695_v11  ;;  %v7125_v51 = vld [vmem:[%s8826_s8 + $0x78] sm:$0xff]  ;;  %v10731_v11 = vld [vmem:[%s8826_s8 + $0x70] sm:$0x11] }
 0x1dc   : > { %v7910_v18 = vpop.f32.mrb[111].mxu0  ;;  %v4715_v13 = vrot.slane %v4714_v63, 4  ;;  %v4733_v61 = vrot.slane %v4731_v31, 5  ;;  %v4737_v4 = vrot.slane %v4735_v1, 4  ;;  %v10737_v2 = vsel %vm9200_vm5, %v7261_v20, %v5580_v33 }
 0x1dd   : > { %11688 = vst [vmem:[#allocation13_spill] sm:$0xff] %v10706_v44  ;;  %v10725_v30 = vadd.f32 %v7905_v50, %v2575_v7  ;;  %v7794_v57 = vpop.f32.mrb[108].mxu1  ;;  %v7911_v55 = vadd.f32 %v7910_v18, %v7909_v24  ;;  %v7246_v7 = vld [vmem:[%s8826_s8 + $0x60] sm:$0xee]  ;;  %v10750_v48 = vsel %vm8861_vm2, %v4705_v28, %v10675_v27  ;;  %v5587_v31 = vrot.slane %v10690_v26, 5 }
 0x1de   : > { %v7795_v6 = vpop.f32.mrb[109].mxu1  ;;  %4577 = vmatmul.mubr.bf16.gmra.mrb[216].mxu0 %v8705_v12  ;;  %v10741_v12 = vsel %vm9200_vm5, %v5582_v41, %v5583_v32  ;;  %v10745_v24 = vld [vmem:[%s8826_s8 + $0x80] sm:$0xff]  ;;  %v4746_v1 = vshrl.u32 %v7125_v51, 16  ;;  %v10756_v41 = vsel %vm8861_vm2, %v4715_v13, %v4719_v35  ;;  %v4741_v32 = vshll.u32 %v10731_v11, 16 }
 0x1df   : > { %11690 = vst [vmem:[#allocation14_spill] sm:$0xff] %v10725_v30  ;;  %v7796_v22 = vadd.f32 %v7795_v6, %v7794_v57  ;;  %v7797_v50 = vpop.f32.mrb[110].mxu1  ;;  %4584 = vmatprep.mubr.bf16.mxu0 %v8710_v43  ;;  %v4749_v43 = vshll.u32 %v7125_v51, 16  ;;  %v11691_v57 = vcombine.low %v10624_v39, %v10628_v58  ;;  %v8712_v28 = vld [vmem:[%s8826_s8 + $0x198] ss:$8 sps:$4 sm:$0xff]   ;;  %v4729_v6 = vrot.slane %v4728_v53, 4 }
 0x1e0   : > { %v7798_v14 = vpop.f32.mrb[111].mxu1  ;;  %v4738_v26 = vor.u32 %v4737_v4, %v4733_v61  ;;  %v7262_v63 = vrot.slane %v7246_v7, 9  ;;  %v4755_v51 = vshll.u32 %v10745_v24, 16  ;;  %v11693_v35 = vcombine.high %v10651_v19, %v10656_v23 }
 0x1e1   : > { %v2576_v33 = vadd.f32 %v7796_v22, %v10254_v62  ;;  %v7799_v20 = vadd.f32 %v7798_v14, %v7797_v50  ;;  %v7912_v18 = vpop.f32.mrb[112].mxu0  ;;  %v4759_v58 = vshrl.u32 %v10745_v24, 16  ;;  %v5589_v14 = vrot.slane %v5587_v31, 4 }
 0x1e2   : > { %4062 = vmatmul.mubr.bf16.gmra.mrb[216].mxu1 %v11691_v57  ;;  %v7913_v27 = vpop.f32.mrb[113].mxu0  ;;  %v5590_v4 = vrot.slane %v10731_v11, 5  ;;  %v4748_v53 = vrot.slane %v4746_v1, 4  ;;  %v4751_v7 = vrot.slane %v4749_v43, 5  ;;  %v4743_v1 = vrot.slane %v4741_v32, 5  ;;  %v7128_v43 = vld [vmem:[%s8826_s8 + $0x90] sm:$0xff] }
 0x1e3   : > { %v10764_v62 = vadd.f32 %v7908_v42, %v2576_v33  ;;  %v2577_v22 = vadd.f32 %v7799_v20, %v10267_v47  ;;  %v7914_v50 = vadd.f32 %v7913_v27, %v7912_v18  ;;  %v7915_v13 = vpop.f32.mrb[114].mxu0  ;;  %4069 = vmatprep.mubr.bf16.mxu1 %v11693_v35  ;;  %v7197_v33 = vcombine.high %v10717_v29, %v10721_v40 }
 0x1e4   : > { %v7916_v39 = vpop.f32.mrb[115].mxu0  ;;  %v7311_v20 = vcombine.high %v10737_v2, %v10741_v12  ;;  %v10785_v35 = vsel %vm9200_vm5, %v7262_v63, %v5587_v31  ;;  %v10793_v11 = vsel %vm8861_vm2, %v4729_v6, %v4733_v61  ;;  %v10797_v32 = vsel %vm9200_vm5, %v5589_v14, %v5590_v4 }
 0x1e5   : > { %11692 = vst [vmem:[#allocation15_spill] sm:$0xff] %v10764_v62  ;;  %v10772_v57 = vadd.f32 %v7911_v55, %v2577_v22  ;;  %v7800_v42 = vpop.f32.mrb[112].mxu1  ;;  %v7917_v47 = vadd.f32 %v7916_v39, %v7915_v13  ;;  %v4739_v55 = vrot.slane %v4738_v26, 4  ;;  %v7127_v39 = vld [vmem:[%s8826_s8 + $0x88] sm:$0x11]  ;;  %v10789_v62 = vld [vmem:[%s8826_s8 + $0x98] sm:$0xff]  ;;  %v4752_v26 = vor.u32 %v4751_v7, %v4748_v53 }
 0x1e6   : > { %v7801_v18 = vpop.f32.mrb[113].mxu1  ;;  %4585 = vmatmul.mubr.bf16.gmra.mrb[220].mxu0 %v8712_v28  ;;  %v4761_v28 = vrot.slane %v4759_v58, 4  ;;  %v4770_v58 = vshrl.u32 %v7128_v43, 16  ;;  %v11695_v30 = vcombine.low %v10651_v19, %v10656_v23  ;;  %v4765_v14 = vshll.u32 %v7127_v39, 16 }
 0x1e7   : > { %11694 = vst [vmem:[#allocation16_spill] sm:$0xff] %v10772_v57  ;;  %v7802_v22 = vadd.f32 %v7801_v18, %v7800_v42  ;;  %v7803_v13 = vpop.f32.mrb[114].mxu1  ;;  %5972 = vmatprep.mubr.bf16.mxu0 %v7309_v0  ;;  %v4757_v57 = vrot.slane %v4755_v51, 5  ;;  %v5594_v0 = vrot.slane %v10745_v24, 5  ;;  %v7247_v51 = vld [vmem:[%s8826_s8 + $0x78] sm:$0xee]  ;;  %v10807_v6 = vsel %vm8861_vm2, %v4739_v55, %v4743_v1 }
 0x1e8   : > { %v7804_v27 = vpop.f32.mrb[115].mxu1  ;;  %v4773_v18 = vshll.u32 %v7128_v43, 16  ;;  %v4779_v4 = vshll.u32 %v10789_v62, 16  ;;  %v7263_v43 = vrot.slane %v7247_v51, 9  ;;  %v5597_v55 = vrot.slane %v7127_v39, 5 }
 0x1e9   : > { %v2578_v63 = vadd.f32 %v7802_v22, %v10277_v17  ;;  %v7805_v31 = vadd.f32 %v7804_v27, %v7803_v13  ;;  %v7918_v42 = vpop.f32.mrb[116].mxu0  ;;  %v4783_v17 = vshrl.u32 %v10789_v62, 16  ;;  %v4762_v19 = vor.u32 %v4761_v28, %v4757_v57 }
 0x1ea   : > { %4070 = vmatmul.mubr.bf16.gmra.mrb[220].mxu1 %v11695_v30  ;;  %v7919_v61 = vpop.f32.mrb[117].mxu0  ;;  %v4753_v30 = vrot.slane %v4752_v26, 4  ;;  %v5596_v22 = vrot.slane %v5594_v0, 4  ;;  %v7313_v39 = vcombine.high %v10785_v35, %v10797_v32 }
 0x1eb   : > { %v10811_v24 = vadd.f32 %v7914_v50, %v2578_v63  ;;  %v2579_v53 = vadd.f32 %v7805_v31, %v10296_v49  ;;  %v7920_v7 = vadd.f32 %v7919_v61, %v7918_v42  ;;  %v7921_v27 = vpop.f32.mrb[118].mxu0  ;;  %5346 = vmatprep.mubr.bf16.mxu1 %v7197_v33  ;;  %v4772_v50 = vrot.slane %v4770_v58, 4 }
 0x1ec   : > { %v7922_v23 = vpop.f32.mrb[119].mxu0  ;;  %v4775_v63 = vrot.slane %v4773_v18, 5  ;;  %v11697_v49 = vcombine.low %v10687_v37, %v10694_v45  ;;  %v7198_v33 = vcombine.low %v10750_v48, %v10756_v41  ;;  %v4785_v28 = vrot.slane %v4783_v17, 4  ;;  %v7131_v45 = vld [vmem:[%s8826_s8 + $0xa8] sm:$0xff] }
 0x1ed   : > { %11696 = vst [vmem:[#allocation17_spill] sm:$0xff] %v10811_v24  ;;  %v10814_v1 = vadd.f32 %v7917_v47, %v2579_v53  ;;  %v7806_v13 = vpop.f32.mrb[116].mxu1  ;;  %v7923_v44 = vadd.f32 %v7922_v23, %v7921_v27  ;;  %v10826_v47 = vrot.slane %v4779_v4, 5  ;;  %v7312_v42 = vcombine.low %v10785_v35, %v10797_v32  ;;  %v10849_v23 = vld [vmem:[%s8826_s8 + $0xb0] sm:$0xff] }
 0x1ee   : > { %v7807_v24 = vpop.f32.mrb[117].mxu1  ;;  %5973 = vmatmul.mubr.bf16.vlgmr.msra.gmra.mrb[224].mxu0 %v11697_v49  ;;  %v4763_v51 = vrot.slane %v4762_v19, 4  ;;  %v4767_v37 = vrot.slane %v4765_v14, 5  ;;  %v7201_v18 = vcombine.high %v10793_v11, %v10807_v6  ;;  %v10835_v61 = vsel %vm8861_vm2, %v4753_v30, %v4757_v57  ;;  %v7248_v19 = vld [vmem:[%s8826_s8 + $0x90] sm:$0xee] }
 0x1ef   : > { %v7808_v26 = vadd.f32 %v7807_v24, %v7806_v13  ;;  %v7809_v31 = vpop.f32.mrb[118].mxu1  ;;  %5980 = vmatprep.mubr.bf16.mxu0 %v7311_v20  ;;  %v10839_v4 = vsel %vm9200_vm5, %v7263_v43, %v5594_v0  ;;  %v4789_v20 = vshll.u32 %v10817_v5, 16  ;;  %v10845_v14 = vsel %vm9200_vm5, %v5596_v22, %v5597_v55 }
 0x1f0   : > { %v7810_v58 = vpop.f32.mrb[119].mxu1  ;;  %v4776_v27 = vor.u32 %v4775_v63, %v4772_v50  ;;  %v11698_v57 = vcombine.low %v10717_v29, %v10721_v40  ;;  %v4786_v30 = vor.u32 %v4785_v28, %v10826_v47  ;;  %v5601_v43 = vrot.slane %v10789_v62, 5 }
 0x1f1   : > { %v2580_v17 = vadd.f32 %v7808_v26, %v10318_v56  ;;  %v7811_v24 = vadd.f32 %v7810_v58, %v7809_v31  ;;  %v7924_v53 = vpop.f32.mrb[120].mxu0  ;;  %v4794_v56 = vshrl.u32 %v7131_v45, 16  ;;  %v4797_v13 = vshll.u32 %v7131_v45, 16 }
 0x1f2   : > { %5347 = vmatmul.mubr.bf16.vlgmr.msra.gmra.mrb[224].mxu1 %v11698_v57  ;;  %v7925_v0 = vpop.f32.mrb[121].mxu0  ;;  %v11699_v63 = vcombine.high %v10750_v48, %v10756_v41  ;;  %v10864_v29 = vsel %vm8861_vm2, %v4763_v51, %v4767_v37  ;;  %v4791_v28 = vrot.slane %v4789_v20, 5  ;;  %v7264_v62 = vrot.slane %v7248_v19, 9  ;;  %v7134_v57 = vld [vmem:[%s8826_s8 + $0xc0] sm:$0xff] }
 0x1f3   : > { %v10856_v49 = vadd.f32 %v7920_v7, %v2580_v17  ;;  %v2581_v22 = vadd.f32 %v7811_v24, %v10340_v60  ;;  %v7926_v55 = vadd.f32 %v7925_v0, %v7924_v53  ;;  %v7927_v50 = vpop.f32.mrb[122].mxu0  ;;  %v4803_v26 = vshll.u32 %v10849_v23, 16 }
 0x1f4   : > { %5354 = vmatprep.mubr.bf16.mxu1 %v11699_v63  ;;  %v7928_v40 = vpop.f32.mrb[123].mxu0  ;;  %v4807_v7 = vshrl.u32 %v10849_v23, 16  ;;  %v4777_v58 = vrot.slane %v4776_v27, 4  ;;  %v5604_v17 = vrot.slane %v10817_v5, 5  ;;  %v11700_v51 = vcombine.low %v10737_v2, %v10741_v12 }
 0x1f5   : > { %v10868_v31 = vadd.f32 %v7923_v44, %v2581_v22  ;;  %v7812_v60 = vpop.f32.mrb[120].mxu1  ;;  %v7929_v45 = vadd.f32 %v7928_v40, %v7927_v50  ;;  %v4787_v37 = vrot.slane %v4786_v30, 4  ;;  %v5603_v53 = vrot.slane %v5601_v43, 4  ;;  %v10889_v40 = vld [vmem:[%s8826_s8 + $0xb8] sm:$0x11] }
 0x1f6   : > { %v7813_v24 = vpop.f32.mrb[121].mxu1  ;;  %5981 = vmatmul.mubr.bf16.gmra.mrb[228].mxu0 %v11700_v51  ;;  %v4796_v20 = vrot.slane %v4794_v56, 4  ;;  %v4799_v19 = vrot.slane %v4797_v13, 5  ;;  %v7200_v27 = vcombine.low %v10793_v11, %v10807_v6  ;;  %v7315_v5 = vcombine.high %v10839_v4, %v10845_v14 }
 0x1f7   : > { %v7814_v0 = vadd.f32 %v7813_v24, %v7812_v60  ;;  %v7815_v44 = vpop.f32.mrb[122].mxu1  ;;  %5988 = vmatprep.mubr.bf16.mxu0 %v7313_v39  ;;  %v7203_v30 = vcombine.high %v10835_v61, %v10864_v29  ;;  %v10885_v56 = vsel %vm9200_vm5, %v7264_v62, %v5601_v43  ;;  %v4805_v13 = vrot.slane %v4803_v26, 5  ;;  %v10892_v60 = vld [vmem:[%s8826_s8 + $0xc8] sm:$0xff] }
 0x1f8   : > { %v7816_v12 = vpop.f32.mrb[123].mxu1  ;;  %v4809_v22 = vrot.slane %v4807_v7, 4  ;;  %v4818_v24 = vshrl.u32 %v7134_v57, 16  ;;  %v4821_v51 = vshll.u32 %v7134_v57, 16  ;;  %v10900_v43 = vsel %vm8861_vm2, %v4777_v58, %v10826_v47  ;;  %v7249_v47 = vld [vmem:[%s8826_s8 + $0xa8] sm:$0xee] }
 0x1f9   : > { %v2582_v39 = vadd.f32 %v7814_v0, %v10365_v3  ;;  %v7817_v50 = vadd.f32 %v7816_v12, %v7815_v44  ;;  %v7930_v63 = vpop.f32.mrb[124].mxu0  ;;  %v10904_v3 = vsel %vm8861_vm2, %v4787_v37, %v4791_v28  ;;  %v10908_v62 = vsel %vm9200_vm5, %v5603_v53, %v5604_v17 }
 0x1fa   : > { %5355 = vmatmul.mubr.bf16.gmra.mrb[228].mxu1 %v7198_v33  ;;  %v7931_v2 = vpop.f32.mrb[125].mxu0  ;;  %v4800_v26 = vor.u32 %v4799_v19, %v4796_v20  ;;  %v5608_v58 = vrot.slane %v10849_v23, 5  ;;  %v4810_v37 = vor.u32 %v4809_v22, %v4805_v13  ;;  %v4813_v57 = vshll.u32 %v10889_v40, 16 }
 0x1fb   : > { %v10910_v7 = vadd.f32 %v7926_v55, %v2582_v39  ;;  %v2583_v48 = vadd.f32 %v7817_v50, %v10387_v16  ;;  %v7932_v41 = vadd.f32 %v7931_v2, %v7930_v63  ;;  %v7933_v33 = vpop.f32.mrb[126].mxu0  ;;  %5362 = vmatprep.mubr.bf16.mxu1 %v7201_v18  ;;  %v4827_v17 = vshll.u32 %v10892_v60, 16 }
 0x1fc   : > { %v7934_v28 = vpop.f32.mrb[127].mxu0  ;;  %v4831_v55 = vshrl.u32 %v10892_v60, 16  ;;  %v4820_v19 = vrot.slane %v4818_v24, 4  ;;  %v4823_v0 = vrot.slane %v4821_v51, 5  ;;  %v7202_v11 = vcombine.low %v10835_v61, %v10864_v29 }
 0x1fd   : > { %v10921_v53 = vadd.f32 %v7929_v45, %v2583_v48  ;;  %v7818_v16 = vpop.f32.mrb[124].mxu1  ;;  %v7935_v20 = vadd.f32 %v7934_v28, %v7933_v33  ;;  %v7205_v6 = vcombine.high %v10900_v43, %v10904_v3  ;;  %v4801_v18 = vrot.slane %v4800_v26, 4 }
 0x1fe   : > { %v7819_v44 = vpop.f32.mrb[125].mxu1  ;;  %5989 = vmatmul.mubr.bf16.gmra.mrb[232].mxu0 %v7312_v42  ;;  %v7265_v23 = vrot.slane %v7249_v47, 9  ;;  %v7204_v12 = vcombine.low %v10900_v43, %v10904_v3  ;;  %v5610_v22 = vrot.slane %v5608_v58, 4  ;;  %v5611_v35 = vrot.slane %v10889_v40, 5  ;;  %v7137_v47 = vld [vmem:[%s8826_s8 + $0xd8] sm:$0xff] }
 0x1ff   : > { %v7820_v45 = vadd.f32 %v7819_v44, %v7818_v16  ;;  %v7821_v2 = vpop.f32.mrb[126].mxu1  ;;  %5996 = vmatprep.mubr.bf16.mxu0 %v7315_v5  ;;  %v7317_v42 = vcombine.high %v10885_v56, %v10908_v62  ;;  %v4815_v39 = vrot.slane %v4813_v57, 5  ;;  %v4829_v50 = vrot.slane %v4827_v17, 5  ;;  %v7136_v5 = vld [vmem:[%s8826_s8 + $0xd0] sm:$0x11] }
 0x200   : > { %v7822_v32 = vpop.f32.mrb[127].mxu1  ;;  %v4833_v63 = vrot.slane %v4831_v55, 4  ;;  %v4811_v48 = vrot.slane %v4810_v37, 4  ;;  %v4824_v33 = vor.u32 %v4823_v0, %v4820_v19  ;;  %v7316_v40 = vcombine.low %v10885_v56, %v10908_v62  ;;  %v7250_v19 = vld [vmem:[%s8826_s8 + $0xc0] sm:$0xee] }
 0x201   : > { %v2584_v24 = vadd.f32 %v7820_v45, %v10412_v21  ;;  %v7823_v51 = vadd.f32 %v7822_v32, %v7821_v2  ;;  %v7936_v26 = vpop.f32.mrb[128].mxu0  ;;  %v10942_v57 = vsel %vm8861_vm2, %v4801_v18, %v4805_v13  ;;  %v10946_v21 = vsel %vm9200_vm5, %v7265_v23, %v5608_v58  ;;  %v10961_v0 = vld [vmem:[%s8826_s8 + $0xe0] sm:$0xff] }
 0x202   : > { %5363 = vmatmul.mubr.bf16.gmra.mrb[232].mxu1 %v7200_v27  ;;  %v7937_v28 = vpop.f32.mrb[129].mxu0  ;;  %v5615_v37 = vrot.slane %v10892_v60, 5  ;;  %v10957_v13 = vsel %vm9200_vm5, %v5610_v22, %v5611_v35  ;;  %v4834_v44 = vor.u32 %v4833_v63, %v4829_v50  ;;  %v4837_v60 = vshll.u32 %v7136_v5, 16 }
 0x203   : > { %v10949_v17 = vadd.f32 %v7932_v41, %v2584_v24  ;;  %v2585_v55 = vadd.f32 %v7823_v51, %v10434_v38  ;;  %v7938_v16 = vadd.f32 %v7937_v28, %v7936_v26  ;;  %v7939_v27 = vpop.f32.mrb[130].mxu0  ;;  %5370 = vmatprep.mubr.bf16.mxu1 %v7203_v30  ;;  %v4842_v41 = vshrl.u32 %v7137_v47, 16 }
 0x204   : > { %v7940_v58 = vpop.f32.mrb[131].mxu0  ;;  %v4845_v18 = vshll.u32 %v7137_v47, 16  ;;  %v10967_v2 = vsel %vm8861_vm2, %v4811_v48, %v4815_v39  ;;  %v4825_v30 = vrot.slane %v4824_v33, 4  ;;  %v11701_v22 = vcombine.low %v10839_v4, %v10845_v14 }
 0x205   : > { %v10963_v23 = vadd.f32 %v7935_v20, %v2585_v55  ;;  %v7824_v38 = vpop.f32.mrb[128].mxu1  ;;  %v7941_v45 = vadd.f32 %v7940_v58, %v7939_v27  ;;  %v7266_v35 = vrot.slane %v7250_v19, 9  ;;  %v5617_v24 = vrot.slane %v5615_v37, 4 }
 0x206   : > { %v7825_v32 = vpop.f32.mrb[129].mxu1  ;;  %5997 = vmatmul.mubr.bf16.gmra.mrb[236].mxu0 %v11701_v22  ;;  %v5618_v63 = vrot.slane %v7136_v5, 5  ;;  %v4851_v51 = vshll.u32 %v10961_v0, 16  ;;  %v7319_v39 = vcombine.high %v10946_v21, %v10957_v13  ;;  %v7318_v48 = vcombine.low %v10946_v21, %v10957_v13 }
 0x207   : > { %v7826_v26 = vadd.f32 %v7825_v32, %v7824_v38  ;;  %v7827_v20 = vpop.f32.mrb[130].mxu1  ;;  %6004 = vmatprep.mubr.bf16.mxu0 %v7317_v42  ;;  %v4855_v33 = vshrl.u32 %v10961_v0, 16  ;;  %v4835_v14 = vrot.slane %v4834_v44, 4  ;;  %v4839_v47 = vrot.slane %v4837_v60, 5  ;;  %v7139_v38 = vld [vmem:[%s8826_s8 + $0xe8] sm:$0x11] }
 0x208   : > { %v7828_v4 = vpop.f32.mrb[131].mxu1  ;;  %v4844_v5 = vrot.slane %v4842_v41, 4  ;;  %v4847_v28 = vrot.slane %v4845_v18, 5  ;;  %v7207_v42 = vcombine.high %v10942_v57, %v10967_v2  ;;  %v10983_v58 = vsel %vm8861_vm2, %v4825_v30, %v4829_v50  ;;  %v7251_v32 = vld [vmem:[%s8826_s8 + $0xd8] sm:$0xee]  ;;  %v7140_v18 = vld [vmem:[%s8826_s8 + $0xf0] sm:$0xff] }
 0x209   : > { %v2586_v55 = vadd.f32 %v7826_v26, %v10456_v46  ;;  %v7829_v27 = vadd.f32 %v7828_v4, %v7827_v20  ;;  %v7942_v19 = vpop.f32.mrb[132].mxu0  ;;  %v10992_v46 = vsel %vm9200_vm5, %v7266_v35, %v5615_v37  ;;  %v10996_v60 = vsel %vm9200_vm5, %v5617_v24, %v5618_v63  ;;  %v11009_v37 = vld [vmem:[%s8826_s8 + $0xf8] sm:$0xff] }
 0x20a   : > { %5371 = vmatmul.mubr.bf16.gmra.mrb[236].mxu1 %v7202_v11  ;;  %v7943_v44 = vpop.f32.mrb[133].mxu0  ;;  %v10998_v41 = vrot.slane %v4851_v51, 5  ;;  %v5622_v50 = vrot.slane %v10961_v0, 5  ;;  %v4857_v11 = vrot.slane %v4855_v33, 4  ;;  %v11013_v24 = vsel %vm8861_vm2, %v4835_v14, %v4839_v47 }
 0x20b   : > { %v11002_v30 = vadd.f32 %v7938_v16, %v2586_v55  ;;  %v2587_v22 = vadd.f32 %v7829_v27, %v10468_v59  ;;  %v7944_v61 = vadd.f32 %v7943_v44, %v7942_v19  ;;  %v7945_v29 = vpop.f32.mrb[134].mxu0  ;;  %5378 = vmatprep.mubr.bf16.mxu1 %v7205_v6  ;;  %v4848_v0 = vor.u32 %v4847_v28, %v4844_v5 }
 0x20c   : > { %v7946_v35 = vpop.f32.mrb[135].mxu0  ;;  %v4861_v63 = vshll.u32 %v7139_v38, 16  ;;  %v7267_v16 = vrot.slane %v7251_v32, 9  ;;  %v5625_v20 = vrot.slane %v7139_v38, 5  ;;  %v4866_v4 = vshrl.u32 %v7140_v18, 16 }
 0x20d   : > { %v11015_v51 = vadd.f32 %v7941_v45, %v2587_v22  ;;  %v7830_v59 = vpop.f32.mrb[132].mxu1  ;;  %v7947_v26 = vadd.f32 %v7946_v35, %v7945_v29  ;;  %v5624_v6 = vrot.slane %v5622_v50, 4  ;;  %v4869_v33 = vshll.u32 %v7140_v18, 16  ;;  %v7143_v22 = vld [vmem:[%s8826_s8 + $0x108] sm:$0xff]  ;;  %v11038_v29 = vld [vmem:[%s8826_s8 + $0x110] sm:$0xff] }
 0x20e   : > { %v7831_v55 = vpop.f32.mrb[133].mxu1  ;;  %6005 = vmatmul.mubr.bf16.gmra.mrb[240].mxu0 %v7316_v40  ;;  %v4875_v27 = vshll.u32 %v11009_v37, 16  ;;  %v4879_v14 = vshrl.u32 %v11009_v37, 16  ;;  %v7206_v45 = vcombine.low %v10942_v57, %v10967_v2  ;;  %v7321_v28 = vcombine.high %v10992_v46, %v10996_v60 }
 0x20f   : > { %v7832_v47 = vadd.f32 %v7831_v55, %v7830_v59  ;;  %v7833_v5 = vpop.f32.mrb[134].mxu1  ;;  %6012 = vmatprep.mubr.bf16.mxu0 %v7319_v39  ;;  %v4858_v56 = vor.u32 %v4857_v11, %v10998_v41  ;;  %v7209_v40 = vcombine.high %v10983_v58, %v11013_v24  ;;  %v7208_v19 = vcombine.low %v10983_v58, %v11013_v24 }
 0x210   : > { %v7834_v62 = vpop.f32.mrb[135].mxu1  ;;  %v4849_v38 = vrot.slane %v4848_v0, 4  ;;  %v4863_v32 = vrot.slane %v4861_v63, 5  ;;  %v11034_v57 = vsel %vm9200_vm5, %v7267_v16, %v5622_v50  ;;  %v4868_v2 = vrot.slane %v4866_v4, 4 }
 0x211   : > { %v2588_v39 = vadd.f32 %v7832_v47, %v10476_v8  ;;  %v7835_v44 = vadd.f32 %v7834_v62, %v7833_v5  ;;  %v7948_v18 = vpop.f32.mrb[136].mxu0  ;;  %v11045_v35 = vsel %vm9200_vm5, %v5624_v6, %v5625_v20  ;;  %v11048_v8 = vld [vmem:[%s8826_s8 + $0x100] sm:$0x11]  ;;  %v4871_v0 = vrot.slane %v4869_v33, 5  ;;  %v7252_v62 = vld [vmem:[%s8826_s8 + $0xf0] sm:$0xee] }
 0x212   : > { %5379 = vmatmul.mubr.bf16.gmra.mrb[240].mxu1 %v7204_v12  ;;  %v7949_v11 = vpop.f32.mrb[137].mxu0  ;;  %v11050_v63 = vrot.slane %v4875_v27, 5  ;;  %v4881_v50 = vrot.slane %v4879_v14, 4  ;;  %v4859_v43 = vrot.slane %v4858_v56, 4  ;;  %v4890_v12 = vshrl.u32 %v7143_v22, 16 }
 0x213   : > { %v11052_v16 = vadd.f32 %v7944_v61, %v2588_v39  ;;  %v2589_v59 = vadd.f32 %v7835_v44, %v10485_v9  ;;  %v7950_v4 = vadd.f32 %v7949_v11, %v7948_v18  ;;  %v7951_v55 = vpop.f32.mrb[138].mxu0  ;;  %5386 = vmatprep.mubr.bf16.mxu1 %v7207_v42  ;;  %v4893_v47 = vshll.u32 %v7143_v22, 16 }
 0x214   : > { %v7952_v3 = vpop.f32.mrb[139].mxu0  ;;  %v4899_v20 = vshll.u32 %v11038_v29, 16  ;;  %v4903_v6 = vshrl.u32 %v11038_v29, 16  ;;  %v7320_v9 = vcombine.low %v10992_v46, %v10996_v60  ;;  %v4885_v61 = vshll.u32 %v11048_v8, 16 }
 0x215   : > { %v11057_v33 = vadd.f32 %v7947_v26, %v2589_v59  ;;  %v7836_v27 = vpop.f32.mrb[136].mxu1  ;;  %v7953_v14 = vadd.f32 %v7952_v3, %v7951_v55  ;;  %v11068_v5 = vsel %vm8861_vm2, %v4849_v38, %v10998_v41  ;;  %v4872_v26 = vor.u32 %v4871_v0, %v4868_v2 }
 0x216   : > { %v7837_v42 = vpop.f32.mrb[137].mxu1  ;;  %6013 = vmatmul.mubr.bf16.gmra.mrb[244].mxu0 %v7318_v48  ;;  %v4882_v56 = vor.u32 %v4881_v50, %v11050_v63  ;;  %v5629_v39 = vrot.slane %v11009_v37, 5  ;;  %v11075_v60 = vsel %vm8861_vm2, %v4859_v43, %v4863_v32  ;;  %v7323_v21 = vcombine.high %v11034_v57, %v11045_v35  ;;  %v11082_v48 = vld [vmem:[%s8826_s8 + $0x118] sm:$0x11] }
 0x217   : > { %v7838_v44 = vadd.f32 %v7837_v42, %v7836_v27  ;;  %v7839_v46 = vpop.f32.mrb[138].mxu1  ;;  %6020 = vmatprep.mubr.bf16.mxu0 %v7321_v28  ;;  %v7322_v13 = vcombine.low %v11034_v57, %v11045_v35  ;;  %v4892_v38 = vrot.slane %v4890_v12, 4  ;;  %v4895_v18 = vrot.slane %v4893_v47, 5 }
 0x218   : > { %v7840_v41 = vpop.f32.mrb[139].mxu1  ;;  %v11084_v2 = vrot.slane %v4899_v20, 5  ;;  %v4905_v37 = vrot.slane %v4903_v6, 4  ;;  %v4887_v11 = vrot.slane %v4885_v61, 5  ;;  %v7268_v0 = vrot.slane %v7252_v62, 9 }
 0x219   : > { %v2590_v28 = vadd.f32 %v7838_v44, %v10491_v52  ;;  %v7841_v22 = vadd.f32 %v7840_v41, %v7839_v46  ;;  %v7954_v32 = vpop.f32.mrb[140].mxu0  ;;  %v4873_v59 = vrot.slane %v4872_v26, 4  ;;  %v4883_v55 = vrot.slane %v4882_v56, 4 }
 0x21a   : > { %5387 = vmatmul.mubr.bf16.gmra.mrb[244].mxu1 %v7206_v45  ;;  %v7955_v50 = vpop.f32.mrb[141].mxu0  ;;  %v5631_v43 = vrot.slane %v5629_v39, 4  ;;  %v5632_v3 = vrot.slane %v11048_v8, 5  ;;  %v4909_v52 = vshll.u32 %v11082_v48, 16  ;;  %v7253_v45 = vld [vmem:[%s8826_s8 + $0x108] sm:$0xee]  ;;  %v7211_v61 = vcombine.high %v11068_v5, %v11075_v60 }
 0x21b   : > { %v11088_v12 = vadd.f32 %v7950_v4, %v2590_v28  ;;  %v2591_v47 = vadd.f32 %v7841_v22, %v10500_v15  ;;  %v7956_v20 = vadd.f32 %v7955_v50, %v7954_v32  ;;  %v7957_v6 = vpop.f32.mrb[142].mxu0  ;;  %5394 = vmatprep.mubr.bf16.mxu1 %v7209_v40  ;;  %v4896_v42 = vor.u32 %v4895_v18, %v4892_v38  ;;  %v7146_v15 = vld [vmem:[%s8826_s8 + $0x120] sm:$0xff]  ;;  %v11123_v18 = vld [vmem:[%s8826_s8 + $0x128] sm:$0xff] }
 0x21c   : > { %v7958_v27 = vpop.f32.mrb[143].mxu0  ;;  %v4906_v8 = vor.u32 %v4905_v37, %v11084_v2  ;;  %v5636_v4 = vrot.slane %v11038_v29, 5  ;;  %v7210_v40 = vcombine.low %v11068_v5, %v11075_v60  ;;  %v11107_v44 = vsel %vm9200_vm5, %v7268_v0, %v5629_v39 }
 0x21d   : > { %v11101_v26 = vadd.f32 %v7953_v14, %v2591_v47  ;;  %v7842_v56 = vpop.f32.mrb[140].mxu1  ;;  %v7959_v62 = vadd.f32 %v7958_v27, %v7957_v6  ;;  %v11112_v41 = vsel %vm8861_vm2, %v4873_v59, %v11050_v63  ;;  %v11116_v29 = vsel %vm8861_vm2, %v4883_v55, %v4887_v11 }
 0x21e   : > { %v7843_v46 = vpop.f32.mrb[141].mxu1  ;;  %6021 = vmatmul.mubr.bf16.gmra.mrb[248].mxu0 %v7320_v9  ;;  %v11120_v14 = vsel %vm9200_vm5, %v5631_v43, %v5632_v3  ;;  %v7269_v38 = vrot.slane %v7253_v45, 9  ;;  %v4911_v9 = vrot.slane %v4909_v52, 5  ;;  %v5639_v28 = vrot.slane %v11082_v48, 5 }
 0x21f   : > { %v7844_v39 = vadd.f32 %v7843_v46, %v7842_v56  ;;  %v7845_v37 = vpop.f32.mrb[142].mxu1  ;;  %6028 = vmatprep.mubr.bf16.mxu0 %v7323_v21  ;;  %v4914_v22 = vshrl.u32 %v7146_v15, 16  ;;  %v4897_v32 = vrot.slane %v4896_v42, 4  ;;  %v4907_v0 = vrot.slane %v4906_v8, 4  ;;  %v7149_v42 = vld [vmem:[%s8826_s8 + $0x138] sm:$0xff]  ;;  %v11161_v46 = vld [vmem:[%s8826_s8 + $0x140] sm:$0xff] }
 0x220   : > { %v7846_v63 = vpop.f32.mrb[143].mxu1  ;;  %v5638_v50 = vrot.slane %v5636_v4, 4  ;;  %v4917_v11 = vshll.u32 %v7146_v15, 16  ;;  %v4923_v3 = vshll.u32 %v11123_v18, 16  ;;  %v4927_v47 = vshrl.u32 %v11123_v18, 16 }
 0x221   : > { %v2592_v59 = vadd.f32 %v7844_v39, %v10506_v25  ;;  %v7847_v55 = vadd.f32 %v7846_v63, %v7845_v37  ;;  %v7960_v43 = vpop.f32.mrb[144].mxu0  ;;  %v7212_v48 = vcombine.low %v11112_v41, %v11116_v29  ;;  %v7213_v6 = vcombine.high %v11112_v41, %v11116_v29 }
 0x222   : > { %5395 = vmatmul.mubr.bf16.gmra.mrb[248].mxu1 %v7208_v19  ;;  %v7961_v21 = vpop.f32.mrb[145].mxu0  ;;  %v7325_v25 = vcombine.high %v11107_v44, %v11120_v14  ;;  %v11140_v52 = vsel %vm9200_vm5, %v7269_v38, %v5636_v4  ;;  %v4916_v27 = vrot.slane %v4914_v22, 4  ;;  %v11149_v15 = vsel %vm8861_vm2, %v4897_v32, %v11084_v2  ;;  %v7254_v22 = vld [vmem:[%s8826_s8 + $0x120] sm:$0xee] }
 0x223   : > { %v11142_v45 = vadd.f32 %v7956_v20, %v2592_v59  ;;  %v2593_v58 = vadd.f32 %v7847_v55, %v10515_v34  ;;  %v7962_v24 = vadd.f32 %v7961_v21, %v7960_v43  ;;  %v7963_v19 = vpop.f32.mrb[146].mxu0  ;;  %5402 = vmatprep.mubr.bf16.mxu1 %v7211_v61  ;;  %v11153_v4 = vsel %vm8861_vm2, %v4907_v0, %v4911_v9  ;;  %v7148_v34 = vld [vmem:[%s8826_s8 + $0x130] sm:$0x11] }
 0x224   : > { %v7964_v8 = vpop.f32.mrb[147].mxu0  ;;  %v11157_v20 = vsel %vm9200_vm5, %v5638_v50, %v5639_v28  ;;  %v4919_v56 = vrot.slane %v4917_v11, 5  ;;  %v11165_v37 = vrot.slane %v4923_v3, 5  ;;  %v4929_v2 = vrot.slane %v4927_v47, 4 }
 0x225   : > { %v11163_v61 = vadd.f32 %v7959_v62, %v2593_v58  ;;  %v7848_v38 = vpop.f32.mrb[144].mxu1  ;;  %v7965_v39 = vadd.f32 %v7964_v8, %v7963_v19  ;;  %v7324_v9 = vcombine.low %v11107_v44, %v11120_v14  ;;  %v5643_v28 = vrot.slane %v11123_v18, 5 }
 0x226   : > { %v7849_v63 = vpop.f32.mrb[145].mxu1  ;;  %6029 = vmatmul.mubr.bf16.gmra.mrb[252].mxu0 %v7322_v13  ;;  %v4938_v32 = vshrl.u32 %v7149_v42, 16  ;;  %v4941_v0 = vshll.u32 %v7149_v42, 16  ;;  %v7215_v11 = vcombine.high %v11149_v15, %v11153_v4  ;;  %v4947_v57 = vshll.u32 %v11161_v46, 16 }
 0x227   : > { %v7850_v62 = vadd.f32 %v7849_v63, %v7848_v38  ;;  %v7851_v50 = vpop.f32.mrb[146].mxu1  ;;  %6036 = vmatprep.mubr.bf16.mxu0 %v7325_v25  ;;  %v7327_v13 = vcombine.high %v11140_v52, %v11157_v20  ;;  %v4933_v44 = vshll.u32 %v7148_v34, 16  ;;  %v7270_v14 = vrot.slane %v7254_v22, 9  ;;  %v7152_v25 = vld [vmem:[%s8826_s8 + $0x150] sm:$0xff] }
 0x228   : > { %v7852_v35 = vpop.f32.mrb[147].mxu1  ;;  %v4951_v18 = vshrl.u32 %v11161_v46, 16  ;;  %v4920_v47 = vor.u32 %v4919_v56, %v4916_v27  ;;  %v4930_v21 = vor.u32 %v4929_v2, %v11165_v37  ;;  %v5645_v19 = vrot.slane %v5643_v28, 4  ;;  %v7151_v27 = vld [vmem:[%s8826_s8 + $0x148] sm:$0x11] }
 0x229   : > { %v2594_v55 = vadd.f32 %v7850_v62, %v10521_v54  ;;  %v7853_v43 = vadd.f32 %v7852_v35, %v7851_v50  ;;  %v7966_v3 = vpop.f32.mrb[148].mxu0  ;;  %v5646_v42 = vrot.slane %v7148_v34, 5  ;;  %v4940_v8 = vrot.slane %v4938_v32, 4  ;;  %v11702_v54 = vld [vmem:[#allocation2_spill] sm:$0xff]  ;;  %v7255_v2 = vld [vmem:[%s8826_s8 + $0x138] sm:$0xee] }
 0x22a   : > { %5403 = vmatmul.mubr.bf16.gmra.mrb[252].mxu1 %v7210_v40  ;;  %v7967_v58 = vpop.f32.mrb[149].mxu0  ;;  %v4943_v38 = vrot.slane %v4941_v0, 5  ;;  %v11192_v56 = vrot.slane %v4947_v57, 5  ;;  %v4953_v5 = vrot.slane %v4951_v18, 4  ;;  %v5650_v60 = vrot.slane %v11161_v46, 5 }
 0x22b   : > { %v11188_v22 = vadd.f32 %v7962_v24, %v2594_v55  ;;  %v2595_v63 = vadd.f32 %v7853_v43, %v11702_v54  ;;  %v7968_v62 = vadd.f32 %v7967_v58, %v7966_v3  ;;  %v7969_v50 = vpop.f32.mrb[150].mxu0  ;;  %5410 = vmatprep.mubr.bf16.mxu1 %v7213_v6  ;;  %v4962_v40 = vshrl.u32 %v7152_v25, 16  ;;  %v11207_v58 = vld [vmem:[%s8826_s8 + $0x158] sm:$0xff] }
 0x22c   : > { %v7970_v35 = vpop.f32.mrb[151].mxu0  ;;  %v4965_v34 = vshll.u32 %v7152_v25, 16  ;;  %v4921_v55 = vrot.slane %v4920_v47, 4  ;;  %v4935_v43 = vrot.slane %v4933_v44, 5  ;;  %v4931_v6 = vrot.slane %v4930_v21, 4 }
 0x22d   : > { %v11196_v32 = vadd.f32 %v7965_v39, %v2595_v63  ;;  %v7854_v24 = vpop.f32.mrb[148].mxu1  ;;  %v7971_v0 = vadd.f32 %v7970_v35, %v7969_v50  ;;  %v11200_v57 = vsel %vm9200_vm5, %v7270_v14, %v5643_v28  ;;  %v11204_v18 = vsel %vm9200_vm5, %v5645_v19, %v5646_v42  ;;  %v11703_v14 = vld [vmem:[#allocation3_spill] sm:$0xff] }
 0x22e   : > { %v7855_v3 = vpop.f32.mrb[149].mxu1  ;;  %6037 = vmatmul.mubr.bf16.gmra.mrb[0].mxu0 %v7324_v9  ;;  %v4944_v46 = vor.u32 %v4943_v38, %v4940_v8  ;;  %v4957_v54 = vshll.u32 %v7151_v27, 16  ;;  %v7271_v47 = vrot.slane %v7255_v2, 9  ;;  %v5653_v44 = vrot.slane %v7151_v27, 5 }
 0x22f   : > { %v7856_v39 = vadd.f32 %v7855_v3, %v7854_v24  ;;  %v7857_v25 = vpop.f32.mrb[150].mxu1  ;;  %6044 = vmatprep.mubr.bf16.mxu0 %v7327_v13  ;;  %v4954_v9 = vor.u32 %v4953_v5, %v11192_v56  ;;  %v5652_v21 = vrot.slane %v5650_v60, 4  ;;  %v4964_v50 = vrot.slane %v4962_v40, 4 }
 0x230   : > { %v7858_v63 = vpop.f32.mrb[151].mxu1  ;;  %v4967_v28 = vrot.slane %v4965_v34, 5  ;;  %v4971_v42 = vshll.u32 %v11207_v58, 16  ;;  %v4975_v8 = vshrl.u32 %v11207_v58, 16  ;;  %v11219_v38 = vsel %vm8861_vm2, %v4921_v55, %v11165_v37  ;;  %v11704_v34 = vld [vmem:[#allocation4_spill] sm:$0xff] }
 0x231   : > { %v2596_v35 = vadd.f32 %v7856_v39, %v11703_v14  ;;  %v7859_v59 = vadd.f32 %v7858_v63, %v7857_v25  ;;  %v7972_v19 = vpop.f32.mrb[152].mxu0  ;;  %v11223_v27 = vsel %vm8861_vm2, %v4931_v6, %v4935_v43  ;;  %v7329_v2 = vcombine.high %v11200_v57, %v11204_v18  ;;  %v7154_v39 = vld [vmem:[%s8826_s8 + $0x160] sm:$0x11] }
 0x232   : > { %5411 = vmatmul.mubr.bf16.gmra.mrb[0].mxu1 %v7212_v48  ;;  %v7973_v13 = vpop.f32.mrb[153].mxu0  ;;  %v4945_v5 = vrot.slane %v4944_v46, 4  ;;  %v4959_v37 = vrot.slane %v4957_v54, 5  ;;  %v4955_v55 = vrot.slane %v4954_v9, 4  ;;  %v11235_v43 = vsel %vm9200_vm5, %v7271_v47, %v5650_v60  ;;  %v7256_v47 = vld [vmem:[%s8826_s8 + $0x150] sm:$0xee] }
 0x233   : > { %v11227_v40 = vadd.f32 %v7968_v62, %v2596_v35  ;;  %v2597_v41 = vadd.f32 %v7859_v59, %v11704_v34  ;;  %v7974_v29 = vadd.f32 %v7973_v13, %v7972_v19  ;;  %v7975_v48 = vpop.f32.mrb[154].mxu0  ;;  %5418 = vmatprep.mubr.bf16.mxu1 %v7215_v11  ;;  %v11239_v62 = vsel %vm9200_vm5, %v5652_v21, %v5653_v44  ;;  %v11268_v35 = vld [vmem:[%s8826_s8 + $0x170] sm:$0xff] }
 0x234   : > { %v7976_v24 = vpop.f32.mrb[155].mxu0  ;;  %v4968_v3 = vor.u32 %v4967_v28, %v4964_v50  ;;  %v4973_v11 = vrot.slane %v4971_v42, 5  ;;  %v4977_v25 = vrot.slane %v4975_v8, 4  ;;  %v7214_v63 = vcombine.low %v11149_v15, %v11153_v4 }
 0x235   : > { %v11241_v59 = vadd.f32 %v7971_v0, %v2597_v41  ;;  %v7860_v6 = vpop.f32.mrb[152].mxu1  ;;  %v7977_v46 = vadd.f32 %v7976_v24, %v7975_v48  ;;  %v11705_v60 = vcombine.low %v11140_v52, %v11157_v20  ;;  %v5657_v44 = vrot.slane %v11207_v58, 5  ;;  %v7155_v52 = vld [vmem:[%s8826_s8 + $0x168] sm:$0xff] }
 0x236   : > { %v7861_v54 = vpop.f32.mrb[153].mxu1  ;;  %v7217_v21 = vcombine.high %v11219_v38, %v11223_v27  ;;  %v7328_v50 = vcombine.low %v11200_v57, %v11204_v18  ;;  %v11258_v15 = vsel %vm8861_vm2, %v4945_v5, %v11192_v56  ;;  %v11263_v20 = vsel %vm8861_vm2, %v4955_v55, %v4959_v37  ;;  %v11706_v57 = vld [vmem:[#allocation5_spill] sm:$0xff]  ;;  %v11707_v37 = vld [vmem:[#allocation6_spill] sm:$0xff] }
 0x237   : > { %6045 = vmatmul.mubr.bf16.gmra.mrb[4].mxu0 %v11705_v60  ;;  %v7862_v0 = vadd.f32 %v7861_v54, %v7860_v6  ;;  %v7863_v9 = vpop.f32.mrb[154].mxu1  ;;  %v7331_v58 = vcombine.high %v11235_v43, %v11239_v62  ;;  %v4969_v28 = vrot.slane %v4968_v3, 4  ;;  %v4981_v14 = vshll.u32 %v7154_v39, 16 }
 0x238   : > { %6052 = vmatprep.mubr.bf16.mxu0 %v7329_v2  ;;  %v7864_v4 = vpop.f32.mrb[155].mxu1  ;;  %v4978_v8 = vor.u32 %v4977_v25, %v4973_v11  ;;  %v7272_v56 = vrot.slane %v7256_v47, 9  ;;  %v5659_v2 = vrot.slane %v5657_v44, 4  ;;  %v5660_v5 = vrot.slane %v7154_v39, 5 }
 0x239   : > { %v2598_v18 = vadd.f32 %v7862_v0, %v11706_v57  ;;  %v7865_v19 = vadd.f32 %v7864_v4, %v7863_v9  ;;  %v7978_v42 = vpop.f32.mrb[156].mxu0  ;;  %v4986_v34 = vshrl.u32 %v7155_v52, 16  ;;  %v4989_v41 = vshll.u32 %v7155_v52, 16  ;;  %v7158_v4 = vld [vmem:[%s8826_s8 + $0x180] sm:$0xff] }
 0x23a   : > { %5419 = vmatmul.mubr.bf16.gmra.mrb[4].mxu1 %v7214_v63  ;;  %v7979_v13 = vpop.f32.mrb[157].mxu0  ;;  %v4995_v6 = vshll.u32 %v11268_v35, 16  ;;  %v7216_v25 = vcombine.low %v11219_v38, %v11223_v27  ;;  %v7219_v39 = vcombine.high %v11258_v15, %v11263_v20  ;;  %v7330_v63 = vcombine.low %v11235_v43, %v11239_v62 }
 0x23b   : > { %v11271_v48 = vadd.f32 %v7974_v29, %v2598_v18  ;;  %v2599_v24 = vadd.f32 %v7865_v19, %v11707_v37  ;;  %v7980_v55 = vadd.f32 %v7979_v13, %v7978_v42  ;;  %v7981_v3 = vpop.f32.mrb[158].mxu0  ;;  %5426 = vmatprep.mubr.bf16.mxu1 %v7217_v21  ;;  %v4999_v29 = vshrl.u32 %v11268_v35, 16  ;;  %v7257_v21 = vld [vmem:[%s8826_s8 + $0x168] sm:$0xee] }
 0x23c   : > { %v7982_v54 = vpop.f32.mrb[159].mxu0  ;;  %v4983_v9 = vrot.slane %v4981_v14, 5  ;;  %v5664_v52 = vrot.slane %v11268_v35, 5  ;;  %v11289_v27 = vsel %vm8861_vm2, %v4969_v28, %v4973_v11  ;;  %v4979_v43 = vrot.slane %v4978_v8, 4  ;;  %v7157_v35 = vld [vmem:[%s8826_s8 + $0x178] sm:$0x11] }
 0x23d   : > { %v11282_v60 = vadd.f32 %v7977_v46, %v2599_v24  ;;  %v7866_v47 = vpop.f32.mrb[156].mxu1  ;;  %v7983_v0 = vadd.f32 %v7982_v54, %v7981_v3  ;;  %v11293_v62 = vsel %vm9200_vm5, %v7272_v56, %v5657_v44  ;;  %v4988_v46 = vrot.slane %v4986_v34, 4  ;;  %v11303_v42 = vld [vmem:[%s8826_s8 + $0x188] sm:$0xff] }
 0x23e   : > { %v7867_v38 = vpop.f32.mrb[157].mxu1  ;;  %v11297_v14 = vsel %vm9200_vm5, %v5659_v2, %v5660_v5  ;;  %v4991_v19 = vrot.slane %v4989_v41, 5  ;;  %v5001_v28 = vrot.slane %v4999_v29, 4  ;;  %v7273_v8 = vrot.slane %v7257_v21, 9  ;;  %v11708_v56 = vld [vmem:[#allocation7_spill] sm:$0xff] }
 0x23f   : > { %6053 = vmatmul.mubr.bf16.gmra.mrb[8].mxu0 %v7328_v50  ;;  %v7868_v57 = vadd.f32 %v7867_v38, %v7866_v47  ;;  %v7869_v18 = vpop.f32.mrb[158].mxu1  ;;  %v11300_v50 = vrot.slane %v4995_v6, 5  ;;  %v5010_v13 = vshrl.u32 %v7158_v4, 16  ;;  %v5013_v44 = vshll.u32 %v7158_v4, 16  ;;  %v11710_v47 = vld [vmem:[#allocation8_spill] sm:$0xff] }
 0x240   : > { %6060 = vmatprep.mubr.bf16.mxu0 %v7331_v58  ;;  %v7870_v11 = vpop.f32.mrb[159].mxu1  ;;  %v5666_v58 = vrot.slane %v5664_v52, 4  ;;  %v5667_v3 = vrot.slane %v7157_v35, 5  ;;  %v11308_v5 = vsel %vm8861_vm2, %v4979_v43, %v4983_v9  ;;  %v5005_v41 = vshll.u32 %v7157_v35, 16 }
 0x241   : > { %v2600_v34 = vadd.f32 %v7868_v57, %v11708_v56  ;;  %v7871_v37 = vadd.f32 %v7870_v11, %v7869_v18  ;;  %v8112_v24 = vpop.f32.mrb[160].mxu0  ;;  %v5019_v6 = vshll.u32 %v11303_v42, 16  ;;  %v5023_v54 = vshrl.u32 %v11303_v42, 16 }
 0x242   : > { %5427 = vmatmul.mubr.bf16.gmra.mrb[8].mxu1 %v7216_v25  ;;  %v8113_v2 = vpop.f32.mrb[161].mxu0  ;;  %v7333_v25 = vcombine.high %v11293_v62, %v11297_v14  ;;  %v4992_v18 = vor.u32 %v4991_v19, %v4988_v46  ;;  %v5002_v9 = vor.u32 %v5001_v28, %v11300_v50  ;;  %v5012_v43 = vrot.slane %v5010_v13, 4 }
 0x243   : > { %v11312_v29 = vadd.f32 %v7980_v55, %v2600_v34  ;;  %v2601_v21 = vadd.f32 %v7871_v37, %v11710_v47  ;;  %v8114_v4 = vadd.f32 %v8113_v2, %v8112_v24  ;;  %v8115_v38 = vpop.f32.mrb[162].mxu0  ;;  %5434 = vmatprep.mubr.bf16.mxu1 %v7219_v39  ;;  %v5015_v35 = vrot.slane %v5013_v44, 5  ;;  %v7160_v37 = vld [vmem:[%s8826_s8 + $0x190] sm:$0x11]  ;;  %v7258_v44 = vld [vmem:[%s8826_s8 + $0x180] sm:$0xee] }
 0x244   : > { %v8116_v57 = vpop.f32.mrb[163].mxu0  ;;  %v11322_v34 = vsel %vm9200_vm5, %v7273_v8, %v5664_v52  ;;  %v11326_v39 = vsel %vm9200_vm5, %v5666_v58, %v5667_v3  ;;  %v7218_v19 = vcombine.low %v11258_v15, %v11263_v20  ;;  %v11333_v28 = vrot.slane %v5019_v6, 5  ;;  %v7161_v2 = vld [vmem:[%s8826_s8 + $0x198] sm:$0xff] }
 0x245   : > { %11709 = vst [vmem:[#allocation2_spill] sm:$0xff] %v11312_v29  ;;  %v11318_v11 = vadd.f32 %v7983_v0, %v2601_v21  ;;  %v8000_v55 = vpop.f32.mrb[160].mxu1  ;;  %v8117_v56 = vadd.f32 %v8116_v57, %v8115_v38  ;;  %v7221_v0 = vcombine.high %v11289_v27, %v11308_v5  ;;  %v5025_v13 = vrot.slane %v5023_v54, 4  ;;  %v11712_v54 = vld [vmem:[#allocation9_spill] sm:$0xff] }
 0x246   : > { %v8001_v46 = vpop.f32.mrb[161].mxu1  ;;  %v7332_v24 = vcombine.low %v11293_v62, %v11297_v14  ;;  %v5007_v58 = vrot.slane %v5005_v41, 5  ;;  %v5671_v3 = vrot.slane %v11303_v42, 5  ;;  %v4993_v20 = vrot.slane %v4992_v18, 4 }
 0x247   : > { %11711 = vst [vmem:[#allocation3_spill] sm:$0xff] %v11318_v11  ;;  %6061 = vmatmul.mubr.bf16.gmra.mrb[12].mxu0 %v7330_v63  ;;  %v8002_v52 = vadd.f32 %v8001_v46, %v8000_v55  ;;  %v8003_v8 = vpop.f32.mrb[162].mxu1  ;;  %v5003_v63 = vrot.slane %v5002_v9, 4  ;;  %v7335_v6 = vcombine.high %v11322_v34, %v11326_v39  ;;  %v5016_v47 = vor.u32 %v5015_v35, %v5012_v43  ;;  %v11344_v11 = vld [vmem:[%s8826_s8 + $0x1a0] sm:$0xff] }
 0x248   : > { %6068 = vmatprep.mubr.bf16.mxu0 %v7333_v25  ;;  %v8004_v15 = vpop.f32.mrb[163].mxu1  ;;  %v5029_v55 = vshll.u32 %v7160_v37, 16  ;;  %v7274_v46 = vrot.slane %v7258_v44, 9  ;;  %v5026_v14 = vor.u32 %v5025_v13, %v11333_v28  ;;  %v5674_v42 = vrot.slane %v7160_v37, 5  ;;  %v11713_v9 = vld [vmem:[#allocation10_spill] sm:$0xff] }
 0x249   : > { %v4078_v21 = vadd.f32 %v8002_v52, %v11712_v54  ;;  %v8005_v38 = vadd.f32 %v8004_v15, %v8003_v8  ;;  %v8118_v57 = vpop.f32.mrb[164].mxu0  ;;  %v5034_v41 = vshrl.u32 %v7161_v2, 16  ;;  %v5037_v25 = vshll.u32 %v7161_v2, 16 }
 0x24a   : > { %5435 = vmatmul.mubr.bf16.gmra.mrb[12].mxu1 %v7218_v19  ;;  %v8119_v62 = vpop.f32.mrb[165].mxu0  ;;  %v5673_v52 = vrot.slane %v5671_v3, 4  ;;  %v11353_v44 = vsel %vm8861_vm2, %v4993_v20, %v11300_v50  ;;  %v11357_v19 = vsel %vm8861_vm2, %v5003_v63, %v5007_v58  ;;  %v5043_v37 = vshll.u32 %v11344_v11, 16 }
 0x24b   : > { %v11347_v18 = vadd.f32 %v8114_v4, %v4078_v21  ;;  %v4079_v29 = vadd.f32 %v8005_v38, %v11713_v9  ;;  %v8120_v43 = vadd.f32 %v8119_v62, %v8118_v57  ;;  %v8121_v35 = vpop.f32.mrb[166].mxu0  ;;  %5442 = vmatprep.mubr.bf16.mxu1 %v7221_v0  ;;  %v5047_v4 = vshrl.u32 %v11344_v11, 16 }
 0x24c   : > { %v8122_v8 = vpop.f32.mrb[167].mxu0  ;;  %v7220_v0 = vcombine.low %v11289_v27, %v11308_v5  ;;  %v5017_v54 = vrot.slane %v5016_v47, 4  ;;  %v5027_v50 = vrot.slane %v5026_v14, 4  ;;  %v5031_v20 = vrot.slane %v5029_v55, 5  ;;  %v11714_v14 = vld [vmem:[#allocation11_spill] sm:$0xff] }
 0x24d   : > { %v11361_v13 = vadd.f32 %v8117_v56, %v4079_v29  ;;  %v8006_v2 = vpop.f32.mrb[164].mxu1  ;;  %v8123_v15 = vadd.f32 %v8122_v8, %v8121_v35  ;;  %v5036_v38 = vrot.slane %v5034_v41, 4  ;;  %v5039_v58 = vrot.slane %v5037_v25, 5  ;;  %v7259_v35 = vld [vmem:[%s8826_s8 + $0x198] sm:$0xee] }
 0x24e   : > { %v8007_v21 = vpop.f32.mrb[165].mxu1  ;;  %v7223_v29 = vcombine.high %v11353_v44, %v11357_v19  ;;  %v11369_v56 = vsel %vm9200_vm5, %v7274_v46, %v5671_v3  ;;  %v11373_v27 = vsel %vm9200_vm5, %v5673_v52, %v5674_v42  ;;  %v5045_v47 = vrot.slane %v5043_v37, 5  ;;  %v11715_v37 = vld [vmem:[#allocation12_spill] sm:$0xff] }
 0x24f   : > { %6069 = vmatmul.mubr.bf16.gmra.mrb[16].mxu0 %v7332_v24  ;;  %v8008_v63 = vadd.f32 %v8007_v21, %v8006_v2  ;;  %v8009_v57 = vpop.f32.mrb[166].mxu1  ;;  %v7163_v24 = vld [vmem:[%s8826_s8 + $0x1a8] sm:$0x11]  ;;  %v5049_v55 = vrot.slane %v5047_v4, 4  ;;  %v5678_v62 = vrot.slane %v11344_v11, 5  ;;  %v5022_v46 = vsel %vm8861_vm2, %v5017_v54, %v11333_v28 }
 0x250   : > { %6076 = vmatprep.mubr.bf16.mxu0 %v7335_v6  ;;  %v8010_v5 = vpop.f32.mrb[167].mxu1  ;;  %v7334_v6 = vcombine.low %v11322_v34, %v11326_v39  ;;  %v5032_v42 = vsel %vm8861_vm2, %v5027_v50, %v5031_v20  ;;  %v7337_v11 = vcombine.high %v11369_v56, %v11373_v27  ;;  %v5040_v52 = vor.u32 %v5039_v58, %v5036_v38 }
 0x251   : > { %v4080_v41 = vadd.f32 %v8008_v63, %v11714_v14  ;;  %v8011_v25 = vadd.f32 %v8010_v5, %v8009_v57  ;;  %v8124_v9 = vpop.f32.mrb[168].mxu0  ;;  %v5053_v39 = vshll.u32 %v7163_v24, 16  ;;  %v5050_v21 = vor.u32 %v5049_v55, %v5045_v47 }
 0x252   : > { %5443 = vmatmul.mubr.bf16.gmra.mrb[16].mxu1 %v7220_v0  ;;  %v8125_v3 = vpop.f32.mrb[169].mxu0  ;;  %v7275_v63 = vrot.slane %v7259_v35, 9  ;;  %v5680_v57 = vrot.slane %v5678_v62, 4  ;;  %v5681_v28 = vrot.slane %v7163_v24, 5  ;;  %v7225_v14 = vcombine.high %v5022_v46, %v5032_v42 }
 0x253   : > { %v11388_v8 = vadd.f32 %v8120_v43, %v4080_v41  ;;  %v4081_v4 = vadd.f32 %v8011_v25, %v11715_v37  ;;  %v8126_v2 = vadd.f32 %v8125_v3, %v8124_v9  ;;  %v8127_v34 = vpop.f32.mrb[170].mxu0  ;;  %5450 = vmatprep.mubr.bf16.mxu1 %v7223_v29  ;;  %v7222_v43 = vcombine.low %v11353_v44, %v11357_v19  ;;  %v11716_v9 = vld [vmem:[#allocation13_spill] sm:$0xff] }
 0x254   : > { %v8128_v0 = vpop.f32.mrb[171].mxu0  ;;  %v5041_v29 = vrot.slane %v5040_v52, 4  ;;  %v5051_v25 = vrot.slane %v5050_v21, 4  ;;  %v5055_v55 = vrot.slane %v5053_v39, 5  ;;  %v5679_v24 = vsel %vm9200_vm5, %v7275_v63, %v5678_v62 }
 0x255   : > { %v11391_v54 = vadd.f32 %v8123_v15, %v4081_v4  ;;  %v8012_v50 = vpop.f32.mrb[168].mxu1  ;;  %v8129_v20 = vadd.f32 %v8128_v0, %v8127_v34  ;;  %v5682_v15 = vsel %vm9200_vm5, %v5680_v57, %v5681_v28  ;;  %v7336_v19 = vcombine.low %v11369_v56, %v11373_v27 }
 0x256   : > { %v8013_v5 = vpop.f32.mrb[169].mxu1  ;;  %v7339_v62 = vcombine.high %v5679_v24, %v5682_v15  ;;  %v5046_v10 = vsel %vm8861_vm2, %v5041_v29, %v5045_v47  ;;  %v5056_v0 = vsel %vm8861_vm2, %v5051_v25, %v5055_v55  ;;  %v7224_v27 = vcombine.low %v5022_v46, %v5032_v42 }
 0x257   : > { %6077 = vmatmul.mubr.bf16.gmra.mrb[20].mxu0 %v7334_v6  ;;  %v8014_v38 = vadd.f32 %v8013_v5, %v8012_v50  ;;  %v8015_v58 = vpop.f32.mrb[170].mxu1  ;;  %v7227_v50 = vcombine.high %v5046_v10, %v5056_v0  ;;  %v7338_v36 = vcombine.low %v5679_v24, %v5682_v15 }
 0x258   : > { %6084 = vmatprep.mubr.bf16.mxu0 %v7337_v11  ;;  %v8016_v41 = vpop.f32.mrb[171].mxu1  ;;  %v11717_v11 = vld [vmem:[#allocation14_spill] sm:$0xff] }
 0x259   : > { %v4082_v35 = vadd.f32 %v8014_v38, %v11716_v9  ;;  %v8017_v3 = vadd.f32 %v8016_v41, %v8015_v58  ;;  %v8130_v37 = vpop.f32.mrb[172].mxu0 }
 0x25a   : > { %5451 = vmatmul.mubr.bf16.gmra.mrb[20].mxu1 %v7222_v43  ;;  %v8131_v44 = vpop.f32.mrb[173].mxu0  ;;  %v11718_v43 = vld [vmem:[#allocation15_spill] sm:$0xff] }
 0x25b   : > { %v11402_v6 = vadd.f32 %v8126_v2, %v4082_v35  ;;  %v4083_v52 = vadd.f32 %v8017_v3, %v11717_v11  ;;  %v8132_v4 = vadd.f32 %v8131_v44, %v8130_v37  ;;  %v8133_v34 = vpop.f32.mrb[174].mxu0  ;;  %5458 = vmatprep.mubr.bf16.mxu1 %v7225_v14  ;;  %v7226_v37 = vcombine.low %v5046_v10, %v5056_v0 }
 0x25c   : > { %v8134_v39 = vpop.f32.mrb[175].mxu0 }
 0x25d   : > { %v11409_v21 = vadd.f32 %v8129_v20, %v4083_v52  ;;  %v8018_v63 = vpop.f32.mrb[172].mxu1  ;;  %v8135_v57 = vadd.f32 %v8134_v39, %v8133_v34  ;;  %v11719_v20 = vld [vmem:[#allocation16_spill] sm:$0xff]  ;;  %v11720_v52 = vld [vmem:[#allocation17_spill] sm:$0xff] }
 0x25e   : > { %v8019_v56 = vpop.f32.mrb[173].mxu1 }
 0x25f   : > { %6085 = vmatmul.mubr.bf16.gmra.mrb[24].mxu0 %v7336_v19  ;;  %v8020_v2 = vadd.f32 %v8019_v56, %v8018_v63  ;;  %v8021_v28 = vpop.f32.mrb[174].mxu1 }
 0x260   : > { %6092 = vmatprep.mubr.bf16.mxu0 %v7339_v62  ;;  %v8022_v5 = vpop.f32.mrb[175].mxu1 }
 0x261   : > { %v4084_v38 = vadd.f32 %v8020_v2, %v11718_v43  ;;  %v8023_v58 = vadd.f32 %v8022_v5, %v8021_v28  ;;  %v8136_v14 = vpop.f32.mrb[176].mxu0 }
 0x262   : > { %5459 = vmatmul.mubr.bf16.gmra.mrb[24].mxu1 %v7224_v27  ;;  %v8137_v47 = vpop.f32.mrb[177].mxu0 }
 0x263   : > { %v11412_v29 = vadd.f32 %v8132_v4, %v4084_v38  ;;  %v4085_v41 = vadd.f32 %v8023_v58, %v11719_v20  ;;  %v8138_v25 = vadd.f32 %v8137_v47, %v8136_v14  ;;  %v8139_v55 = vpop.f32.mrb[178].mxu0  ;;  %5466 = vmatprep.mubr.bf16.mxu1 %v7227_v50 }
 0x264   : > { %v8140_v46 = vpop.f32.mrb[179].mxu0 }
 0x265   : > { %v11415_v42 = vadd.f32 %v8135_v57, %v4085_v41  ;;  %v8024_v9 = vpop.f32.mrb[176].mxu1  ;;  %v8141_v35 = vadd.f32 %v8140_v46, %v8139_v55 }
 0x266   : > { %v8025_v3 = vpop.f32.mrb[177].mxu1 }
 0x267   : > { %6093 = vmatmul.mubr.bf16.gmra.mrb[28].mxu0 %v7338_v36  ;;  %v8026_v44 = vadd.f32 %v8025_v3, %v8024_v9  ;;  %v8027_v19 = vpop.f32.mrb[178].mxu1 }
 0x268   : > { %v8028_v11 = vpop.f32.mrb[179].mxu1 }
 0x269   : > { %v4086_v24 = vadd.f32 %v8026_v44, %v11720_v52  ;;  %v8029_v15 = vadd.f32 %v8028_v11, %v8027_v19  ;;  %v8142_v4 = vpop.f32.mrb[180].mxu0 }
 0x26a   : > { %5467 = vmatmul.mubr.bf16.gmra.mrb[28].mxu1 %v7226_v37  ;;  %v8143_v34 = vpop.f32.mrb[181].mxu0 }
 0x26b   : > { %v11418_v62 = vadd.f32 %v8138_v25, %v4086_v24  ;;  %v4087_v39 = vadd.f32 %v8029_v15, %v10814_v1  ;;  %v8144_v63 = vadd.f32 %v8143_v34, %v8142_v4  ;;  %v8145_v57 = vpop.f32.mrb[182].mxu0 }
 0x26c   : > { %v8146_v56 = vpop.f32.mrb[183].mxu0 }
 0x26d   : > { %v11421_v27 = vadd.f32 %v8141_v35, %v4087_v39  ;;  %v8030_v10 = vpop.f32.mrb[180].mxu1  ;;  %v8147_v0 = vadd.f32 %v8146_v56, %v8145_v57 }
 0x26e   : > { %v8031_v2 = vpop.f32.mrb[181].mxu1 }
 0x26f   : > { %v8032_v28 = vadd.f32 %v8031_v2, %v8030_v10  ;;  %v8033_v50 = vpop.f32.mrb[182].mxu1 }
 0x270   : > { %v8034_v5 = vpop.f32.mrb[183].mxu1 }
 0x271   : > { %v4088_v43 = vadd.f32 %v8032_v28, %v10856_v49  ;;  %v8035_v38 = vadd.f32 %v8034_v5, %v8033_v50  ;;  %v8148_v58 = vpop.f32.mrb[184].mxu0 }
 0x272   : > { %v8149_v14 = vpop.f32.mrb[185].mxu0 }
 0x273   : > { %v11424_v47 = vadd.f32 %v8144_v63, %v4088_v43  ;;  %v4089_v1 = vadd.f32 %v8035_v38, %v10868_v31  ;;  %v8150_v36 = vadd.f32 %v8149_v14, %v8148_v58  ;;  %v8151_v20 = vpop.f32.mrb[186].mxu0 }
 0x274   : > { %v8152_v41 = vpop.f32.mrb[187].mxu0 }
 0x275   : > { %v11427_v25 = vadd.f32 %v8147_v0, %v4089_v1  ;;  %v8036_v55 = vpop.f32.mrb[184].mxu1  ;;  %v8153_v46 = vadd.f32 %v8152_v41, %v8151_v20 }
 0x276   : > { %v8037_v9 = vpop.f32.mrb[185].mxu1 }
 0x277   : > { %v8038_v35 = vadd.f32 %v8037_v9, %v8036_v55  ;;  %v8039_v3 = vpop.f32.mrb[186].mxu1 }
 0x278   : > { %v8040_v37 = vpop.f32.mrb[187].mxu1 }
 0x279   : > { %v4090_v49 = vadd.f32 %v8038_v35, %v10910_v7  ;;  %v8041_v44 = vadd.f32 %v8040_v37, %v8039_v3  ;;  %v8154_v19 = vpop.f32.mrb[188].mxu0 }
 0x27a   : > { %v8155_v11 = vpop.f32.mrb[189].mxu0 }
 0x27b   : > { %v11430_v52 = vadd.f32 %v8150_v36, %v4090_v49  ;;  %v4091_v31 = vadd.f32 %v8041_v44, %v10921_v53  ;;  %v8156_v24 = vadd.f32 %v8155_v11, %v8154_v19  ;;  %v8157_v15 = vpop.f32.mrb[190].mxu0 }
 0x27c   : > { %v8158_v4 = vpop.f32.mrb[191].mxu0 }
 0x27d   : > { %v11433_v34 = vadd.f32 %v8153_v46, %v4091_v31  ;;  %v8042_v39 = vpop.f32.mrb[188].mxu1  ;;  %v8159_v63 = vadd.f32 %v8158_v4, %v8157_v15 }
 0x27e   : > { %v8043_v57 = vpop.f32.mrb[189].mxu1 }
 0x27f   : > { %v8044_v56 = vadd.f32 %v8043_v57, %v8042_v39  ;;  %v8045_v10 = vpop.f32.mrb[190].mxu1 }
 0x280   : > { %v8046_v0 = vpop.f32.mrb[191].mxu1 }
 0x281   : > { %v4092_v7 = vadd.f32 %v8044_v56, %v10949_v17  ;;  %v8047_v2 = vadd.f32 %v8046_v0, %v8045_v10  ;;  %v8160_v28 = vpop.f32.mrb[192].mxu0 }
 0x282   : > { %v8161_v50 = vpop.f32.mrb[193].mxu0 }
 0x283   : > { %v11436_v5 = vadd.f32 %v8156_v24, %v4092_v7  ;;  %v4093_v53 = vadd.f32 %v8047_v2, %v10963_v23  ;;  %v8162_v43 = vadd.f32 %v8161_v50, %v8160_v28  ;;  %v8163_v38 = vpop.f32.mrb[194].mxu0 }
 0x284   : > { %v8164_v58 = vpop.f32.mrb[195].mxu0 }
 0x285   : > { %v11439_v14 = vadd.f32 %v8159_v63, %v4093_v53  ;;  %v8048_v1 = vpop.f32.mrb[192].mxu1  ;;  %v8165_v36 = vadd.f32 %v8164_v58, %v8163_v38 }
 0x286   : > { %v8049_v20 = vpop.f32.mrb[193].mxu1 }
 0x287   : > { %v8050_v41 = vadd.f32 %v8049_v20, %v8048_v1  ;;  %v8051_v55 = vpop.f32.mrb[194].mxu1 }
 0x288   : > { %v8052_v46 = vpop.f32.mrb[195].mxu1 }
 0x289   : > { %v4094_v17 = vadd.f32 %v8050_v41, %v11002_v30  ;;  %v8053_v9 = vadd.f32 %v8052_v46, %v8051_v55  ;;  %v8166_v35 = vpop.f32.mrb[196].mxu0 }
 0x28a   : > { %v8167_v3 = vpop.f32.mrb[197].mxu0 }
 0x28b   : > { %v11442_v37 = vadd.f32 %v8162_v43, %v4094_v17  ;;  %v4095_v23 = vadd.f32 %v8053_v9, %v11015_v51  ;;  %v8168_v49 = vadd.f32 %v8167_v3, %v8166_v35  ;;  %v8169_v44 = vpop.f32.mrb[198].mxu0 }
 0x28c   : > { %v8170_v19 = vpop.f32.mrb[199].mxu0 }
 0x28d   : > { %v11445_v11 = vadd.f32 %v8165_v36, %v4095_v23  ;;  %v8054_v31 = vpop.f32.mrb[196].mxu1  ;;  %v8171_v24 = vadd.f32 %v8170_v19, %v8169_v44 }
 0x28e   : > { %v8055_v15 = vpop.f32.mrb[197].mxu1 }
 0x28f   : > { %v8056_v4 = vadd.f32 %v8055_v15, %v8054_v31  ;;  %v8057_v39 = vpop.f32.mrb[198].mxu1 }
 0x290   : > { %v8058_v63 = vpop.f32.mrb[199].mxu1 }
 0x291   : > { %v4096_v30 = vadd.f32 %v8056_v4, %v11052_v16  ;;  %v8059_v57 = vadd.f32 %v8058_v63, %v8057_v39  ;;  %v8172_v56 = vpop.f32.mrb[200].mxu0 }
 0x292   : > { %v8173_v10 = vpop.f32.mrb[201].mxu0 }
 0x293   : > { %v11448_v0 = vadd.f32 %v8168_v49, %v4096_v30  ;;  %v4097_v51 = vadd.f32 %v8059_v57, %v11057_v33  ;;  %v8174_v7 = vadd.f32 %v8173_v10, %v8172_v56  ;;  %v8175_v2 = vpop.f32.mrb[202].mxu0 }
 0x294   : > { %v8176_v28 = vpop.f32.mrb[203].mxu0 }
 0x295   : > { %v11451_v50 = vadd.f32 %v8171_v24, %v4097_v51  ;;  %v8060_v53 = vpop.f32.mrb[200].mxu1  ;;  %v8177_v43 = vadd.f32 %v8176_v28, %v8175_v2 }
 0x296   : > { %v8061_v38 = vpop.f32.mrb[201].mxu1 }
 0x297   : > { %v8062_v58 = vadd.f32 %v8061_v38, %v8060_v53  ;;  %v8063_v1 = vpop.f32.mrb[202].mxu1 }
 0x298   : > { %v8064_v36 = vpop.f32.mrb[203].mxu1 }
 0x299   : > { %v4098_v16 = vadd.f32 %v8062_v58, %v11088_v12  ;;  %v8065_v20 = vadd.f32 %v8064_v36, %v8063_v1  ;;  %v8178_v41 = vpop.f32.mrb[204].mxu0 }
 0x29a   : > { %v8179_v55 = vpop.f32.mrb[205].mxu0 }
 0x29b   : > { %v11454_v46 = vadd.f32 %v8174_v7, %v4098_v16  ;;  %v4099_v33 = vadd.f32 %v8065_v20, %v11101_v26  ;;  %v8180_v17 = vadd.f32 %v8179_v55, %v8178_v41  ;;  %v8181_v9 = vpop.f32.mrb[206].mxu0 }
 0x29c   : > { %v8182_v35 = vpop.f32.mrb[207].mxu0 }
 0x29d   : > { %v11457_v3 = vadd.f32 %v8177_v43, %v4099_v33  ;;  %v8066_v23 = vpop.f32.mrb[204].mxu1  ;;  %v8183_v49 = vadd.f32 %v8182_v35, %v8181_v9 }
 0x29e   : > { %v8067_v44 = vpop.f32.mrb[205].mxu1 }
 0x29f   : > { %v8068_v19 = vadd.f32 %v8067_v44, %v8066_v23  ;;  %v8069_v31 = vpop.f32.mrb[206].mxu1 }
 0x2a0   : > { %v8070_v24 = vpop.f32.mrb[207].mxu1 }
 0x2a1   : > { %v4100_v12 = vadd.f32 %v8068_v19, %v11142_v45  ;;  %v8071_v15 = vadd.f32 %v8070_v24, %v8069_v31  ;;  %v8184_v4 = vpop.f32.mrb[208].mxu0 }
 0x2a2   : > { %v8185_v39 = vpop.f32.mrb[209].mxu0 }
 0x2a3   : > { %v11460_v63 = vadd.f32 %v8180_v17, %v4100_v12  ;;  %v4101_v26 = vadd.f32 %v8071_v15, %v11163_v61  ;;  %v8186_v30 = vadd.f32 %v8185_v39, %v8184_v4  ;;  %v8187_v57 = vpop.f32.mrb[210].mxu0 }
 0x2a4   : > { %v8188_v56 = vpop.f32.mrb[211].mxu0 }
 0x2a5   : > { %v11463_v10 = vadd.f32 %v8183_v49, %v4101_v26  ;;  %v8072_v51 = vpop.f32.mrb[208].mxu1  ;;  %v8189_v7 = vadd.f32 %v8188_v56, %v8187_v57 }
 0x2a6   : > { %v8073_v2 = vpop.f32.mrb[209].mxu1 }
 0x2a7   : > { %v8074_v28 = vadd.f32 %v8073_v2, %v8072_v51  ;;  %v8075_v53 = vpop.f32.mrb[210].mxu1 }
 0x2a8   : > { %v8076_v43 = vpop.f32.mrb[211].mxu1 }
 0x2a9   : > { %v4102_v45 = vadd.f32 %v8074_v28, %v11188_v22  ;;  %v8077_v38 = vadd.f32 %v8076_v43, %v8075_v53  ;;  %v8190_v58 = vpop.f32.mrb[212].mxu0 }
 0x2aa   : > { %v8191_v1 = vpop.f32.mrb[213].mxu0 }
 0x2ab   : > { %v11466_v36 = vadd.f32 %v8186_v30, %v4102_v45  ;;  %v4103_v61 = vadd.f32 %v8077_v38, %v11196_v32  ;;  %v8192_v16 = vadd.f32 %v8191_v1, %v8190_v58  ;;  %v8193_v20 = vpop.f32.mrb[214].mxu0 }
 0x2ac   : > { %v8194_v41 = vpop.f32.mrb[215].mxu0 }
 0x2ad   : > { %v11469_v55 = vadd.f32 %v8189_v7, %v4103_v61  ;;  %v8078_v33 = vpop.f32.mrb[212].mxu1  ;;  %v8195_v17 = vadd.f32 %v8194_v41, %v8193_v20 }
 0x2ae   : > { %v8079_v9 = vpop.f32.mrb[213].mxu1 }
 0x2af   : > { %v8080_v35 = vadd.f32 %v8079_v9, %v8078_v33  ;;  %v8081_v23 = vpop.f32.mrb[214].mxu1  ;;  %v11721_v9 = vld [vmem:[#allocation2_spill] sm:$0xff] }
 0x2b0   : > { %v8082_v49 = vpop.f32.mrb[215].mxu1 }
 0x2b1   : > { %v4104_v22 = vadd.f32 %v8080_v35, %v11227_v40  ;;  %v8083_v44 = vadd.f32 %v8082_v49, %v8081_v23  ;;  %v8196_v19 = vpop.f32.mrb[216].mxu0 }
 0x2b2   : > { %v8197_v31 = vpop.f32.mrb[217].mxu0 }
 0x2b3   : > { %v11472_v24 = vadd.f32 %v8192_v16, %v4104_v22  ;;  %v4105_v32 = vadd.f32 %v8083_v44, %v11241_v59  ;;  %v8198_v12 = vadd.f32 %v8197_v31, %v8196_v19  ;;  %v8199_v15 = vpop.f32.mrb[218].mxu0  ;;  %v11722_v44 = vld [vmem:[#allocation3_spill] sm:$0xff] }
 0x2b4   : > { %v8200_v4 = vpop.f32.mrb[219].mxu0 }
 0x2b5   : > { %v11475_v39 = vadd.f32 %v8195_v17, %v4105_v32  ;;  %v8084_v26 = vpop.f32.mrb[216].mxu1  ;;  %v8201_v30 = vadd.f32 %v8200_v4, %v8199_v15 }
 0x2b6   : > { %v8085_v57 = vpop.f32.mrb[217].mxu1 }
 0x2b7   : > { %v8086_v56 = vadd.f32 %v8085_v57, %v8084_v26  ;;  %v8087_v51 = vpop.f32.mrb[218].mxu1 }
 0x2b8   : > { %v8088_v7 = vpop.f32.mrb[219].mxu1 }
 0x2b9   : > { %v4106_v40 = vadd.f32 %v8086_v56, %v11271_v48  ;;  %v8089_v2 = vadd.f32 %v8088_v7, %v8087_v51  ;;  %v8202_v28 = vpop.f32.mrb[220].mxu0 }
 0x2ba   : > { %v8203_v53 = vpop.f32.mrb[221].mxu0 }
 0x2bb   : > { %v11478_v43 = vadd.f32 %v8198_v12, %v4106_v40  ;;  %v4107_v59 = vadd.f32 %v8089_v2, %v11282_v60  ;;  %v8204_v45 = vadd.f32 %v8203_v53, %v8202_v28  ;;  %v8205_v38 = vpop.f32.mrb[222].mxu0  ;;  %v11493_v2 = vld [vmem:[%s11633_s2] ss:$0 sm:$0xff] }
 0x2bc   : > { %v8206_v58 = vpop.f32.mrb[223].mxu0 }
 0x2bd   : > { %v11481_v1 = vadd.f32 %v8201_v30, %v4107_v59  ;;  %v8090_v61 = vpop.f32.mrb[220].mxu1  ;;  %v8207_v16 = vadd.f32 %v8206_v58, %v8205_v38 }
 0x2be   : > { %v8091_v20 = vpop.f32.mrb[221].mxu1 }
 0x2bf   : > { %v8092_v41 = vadd.f32 %v8091_v20, %v8090_v61  ;;  %v8093_v33 = vpop.f32.mrb[222].mxu1 }
 0x2c0   : > { %v8094_v17 = vpop.f32.mrb[223].mxu1 }
 0x2c1   : > { %v4108_v48 = vadd.f32 %v8092_v41, %v11721_v9  ;;  %v8095_v35 = vadd.f32 %v8094_v17, %v8093_v33  ;;  %v8336_v23 = vpop.f32.mrb[224].mxu0 }
 0x2c2   : > { %v8337_v49 = vpop.f32.mrb[225].mxu0 }
 0x2c3   : > { %v11484_v22 = vadd.f32 %v8204_v45, %v4108_v48  ;;  %v4109_v60 = vadd.f32 %v8095_v35, %v11722_v44  ;;  %v8338_v19 = vadd.f32 %v8337_v49, %v8336_v23  ;;  %v8339_v31 = vpop.f32.mrb[226].mxu0 }
 0x2c4   : > { %v8340_v32 = vpop.f32.mrb[227].mxu0 }
 0x2c5   : > { %v11487_v12 = vadd.f32 %v8207_v16, %v4109_v60  ;;  %v8224_v15 = vpop.f32.mrb[224].mxu1  ;;  %v8341_v4 = vadd.f32 %v8340_v32, %v8339_v31 }
 0x2c6   : > { %v8225_v26 = vpop.f32.mrb[225].mxu1 }
 0x2c7   : > { %v8226_v30 = vadd.f32 %v8225_v26, %v8224_v15  ;;  %v8227_v57 = vpop.f32.mrb[226].mxu1 }
 0x2c8   : > { %v8228_v56 = vpop.f32.mrb[227].mxu1 }
 0x2c9   : > { %v5475_v51 = vadd.f32 %v8226_v30, %v11347_v18  ;;  %v8229_v7 = vadd.f32 %v8228_v56, %v8227_v57  ;;  %v8342_v40 = vpop.f32.mrb[228].mxu0 }
 0x2ca   : > { %v8343_v28 = vpop.f32.mrb[229].mxu0 }
 0x2cb   : > { %v6101_v53 = vadd.f32 %v8338_v19, %v5475_v51  ;;  %v5476_v59 = vadd.f32 %v8229_v7, %v11361_v13  ;;  %v8344_v45 = vadd.f32 %v8343_v28, %v8342_v40  ;;  %v8345_v38 = vpop.f32.mrb[230].mxu0 }
 0x2cc   : > { %v8346_v58 = vpop.f32.mrb[231].mxu0 }
 0x2cd   : > { %v6140_v61 = vadd.f32 %v11493_v2, %v6101_v53  ;;  %v6102_v16 = vadd.f32 %v8341_v4, %v5476_v59  ;;  %v8230_v20 = vpop.f32.mrb[228].mxu1  ;;  %v8347_v18 = vadd.f32 %v8346_v58, %v8345_v38 }
 0x2ce   : > { %v8231_v41 = vpop.f32.mrb[229].mxu1 }
 0x2cf   : > { %v6172_v33 = vmax.f32 %v6140_v61, 0.0  ;;  %v6141_v17 = vadd.f32 %v11493_v2, %v6102_v16  ;;  %v8232_v9 = vadd.f32 %v8231_v41, %v8230_v20  ;;  %v8233_v48 = vpop.f32.mrb[230].mxu1 }
 0x2d0   : > { %v8234_v13 = vpop.f32.mrb[231].mxu1 }
 0x2d1   : > { %v7392_v35 = vpack.c.bf16 %v6172_v33, %v6172_v33  ;;  %v6173_v23 = vmax.f32 %v6141_v17, 0.0  ;;  %v5477_v49 = vadd.f32 %v8232_v9, %v11388_v8  ;;  %v8235_v44 = vadd.f32 %v8234_v13, %v8233_v48  ;;  %v8348_v60 = vpop.f32.mrb[232].mxu0 }
 0x2d2   : > { %v8349_v19 = vpop.f32.mrb[233].mxu0 }
 0x2d3   : > { %6333 = vst.msk [vmem:[%s11502_s21] sm:$0xf] %vm6332_vm6, %v7392_v35  ;;  %v7393_v31 = vpack.c.bf16 %v6173_v23, %v6173_v23  ;;  %v6103_v32 = vadd.f32 %v8344_v45, %v5477_v49  ;;  %v5478_v15 = vadd.f32 %v8235_v44, %v11391_v54  ;;  %v8350_v4 = vadd.f32 %v8349_v19, %v8348_v60  ;;  %v8351_v26 = vpop.f32.mrb[234].mxu0 }
 0x2d4   : > { %v8352_v30 = vpop.f32.mrb[235].mxu0 }
 0x2d5   : > { %6334 = vst.msk [vmem:[%s11502_s21 + $0x4] sm:$0xf] %vm6332_vm6, %v7393_v31  ;;  %v6142_v57 = vadd.f32 %v11493_v2, %v6103_v32  ;;  %v6104_v56 = vadd.f32 %v8347_v18, %v5478_v15  ;;  %v8236_v51 = vpop.f32.mrb[232].mxu1  ;;  %v8353_v8 = vadd.f32 %v8352_v30, %v8351_v26 }
 0x2d6   : > { %v8237_v7 = vpop.f32.mrb[233].mxu1 }
 0x2d7   : > { %v6174_v40 = vmax.f32 %v6142_v57, 0.0  ;;  %v6143_v28 = vadd.f32 %v11493_v2, %v6104_v56  ;;  %v8238_v53 = vadd.f32 %v8237_v7, %v8236_v51  ;;  %v8239_v59 = vpop.f32.mrb[234].mxu1 }
 0x2d8   : > { %v8240_v45 = vpop.f32.mrb[235].mxu1 }
 0x2d9   : > { %v7394_v54 = vpack.c.bf16 %v6174_v40, %v6174_v40  ;;  %v6175_v38 = vmax.f32 %v6143_v28, 0.0  ;;  %v5479_v58 = vadd.f32 %v8238_v53, %v11402_v6  ;;  %v8241_v61 = vadd.f32 %v8240_v45, %v8239_v59  ;;  %v8354_v16 = vpop.f32.mrb[236].mxu0 }
 0x2da   : > { %v8355_v20 = vpop.f32.mrb[237].mxu0 }
 0x2db   : > { %6335 = vst.msk [vmem:[%s11502_s21 + $0x8] sm:$0xf] %vm6332_vm6, %v7394_v54  ;;  %v7395_v18 = vpack.c.bf16 %v6175_v38, %v6175_v38  ;;  %v6105_v41 = vadd.f32 %v8350_v4, %v5479_v58  ;;  %v5480_v33 = vadd.f32 %v8241_v61, %v11409_v21  ;;  %v8356_v17 = vadd.f32 %v8355_v20, %v8354_v16  ;;  %v8357_v9 = vpop.f32.mrb[238].mxu0 }
 0x2dc   : > { %v8358_v48 = vpop.f32.mrb[239].mxu0 }
 0x2dd   : > { %6336 = vst.msk [vmem:[%s11502_s21 + $0xc] sm:$0xf] %vm6332_vm6, %v7395_v18  ;;  %v6144_v13 = vadd.f32 %v11493_v2, %v6105_v41  ;;  %v6106_v35 = vadd.f32 %v8353_v8, %v5480_v33  ;;  %v8242_v23 = vpop.f32.mrb[236].mxu1  ;;  %v8359_v6 = vadd.f32 %v8358_v48, %v8357_v9 }
 0x2de   : > { %v8243_v49 = vpop.f32.mrb[237].mxu1 }
 0x2df   : > { %v6176_v44 = vmax.f32 %v6144_v13, 0.0  ;;  %v6145_v60 = vadd.f32 %v11493_v2, %v6106_v35  ;;  %v8244_v19 = vadd.f32 %v8243_v49, %v8242_v23  ;;  %v8245_v31 = vpop.f32.mrb[238].mxu1 }
 0x2e0   : > { %v8246_v32 = vpop.f32.mrb[239].mxu1 }
 0x2e1   : > { %v7396_v21 = vpack.c.bf16 %v6176_v44, %v6176_v44  ;;  %v6177_v15 = vmax.f32 %v6145_v60, 0.0  ;;  %v5481_v4 = vadd.f32 %v8244_v19, %v11412_v29  ;;  %v8247_v26 = vadd.f32 %v8246_v32, %v8245_v31  ;;  %v8360_v30 = vpop.f32.mrb[240].mxu0 }
 0x2e2   : > { %v8361_v57 = vpop.f32.mrb[241].mxu0 }
 0x2e3   : > { %6337 = vst.msk [vmem:[%s11502_s21 + $0x10] sm:$0xf] %vm6332_vm6, %v7396_v21  ;;  %v7397_v56 = vpack.c.bf16 %v6177_v15, %v6177_v15  ;;  %v6107_v51 = vadd.f32 %v8356_v17, %v5481_v4  ;;  %v5482_v8 = vadd.f32 %v8247_v26, %v11415_v42  ;;  %v8362_v7 = vadd.f32 %v8361_v57, %v8360_v30  ;;  %v8363_v40 = vpop.f32.mrb[242].mxu0 }
 0x2e4   : > { %v8364_v28 = vpop.f32.mrb[243].mxu0 }
 0x2e5   : > { %6338 = vst.msk [vmem:[%s11502_s21 + $0x14] sm:$0xf] %vm6332_vm6, %v7397_v56  ;;  %v6146_v53 = vadd.f32 %v11493_v2, %v6107_v51  ;;  %v6108_v59 = vadd.f32 %v8359_v6, %v5482_v8  ;;  %v8248_v45 = vpop.f32.mrb[240].mxu1  ;;  %v8365_v29 = vadd.f32 %v8364_v28, %v8363_v40 }
 0x2e6   : > { %v8249_v54 = vpop.f32.mrb[241].mxu1 }
 0x2e7   : > { %v6178_v38 = vmax.f32 %v6146_v53, 0.0  ;;  %v6147_v58 = vadd.f32 %v11493_v2, %v6108_v59  ;;  %v8250_v61 = vadd.f32 %v8249_v54, %v8248_v45  ;;  %v8251_v16 = vpop.f32.mrb[242].mxu1 }
 0x2e8   : > { %v8252_v20 = vpop.f32.mrb[243].mxu1 }
 0x2e9   : > { %v7398_v42 = vpack.c.bf16 %v6178_v38, %v6178_v38  ;;  %v6179_v18 = vmax.f32 %v6147_v58, 0.0  ;;  %v5483_v41 = vadd.f32 %v8250_v61, %v11418_v62  ;;  %v8253_v33 = vadd.f32 %v8252_v20, %v8251_v16  ;;  %v8366_v17 = vpop.f32.mrb[244].mxu0 }
 0x2ea   : > { %v8367_v9 = vpop.f32.mrb[245].mxu0 }
 0x2eb   : > { %6339 = vst.msk [vmem:[%s11502_s21 + $0x18] sm:$0xf] %vm6332_vm6, %v7398_v42  ;;  %v7399_v48 = vpack.c.bf16 %v6179_v18, %v6179_v18  ;;  %v6109_v13 = vadd.f32 %v8362_v7, %v5483_v41  ;;  %v5484_v35 = vadd.f32 %v8253_v33, %v11421_v27  ;;  %v8368_v23 = vadd.f32 %v8367_v9, %v8366_v17  ;;  %v8369_v6 = vpop.f32.mrb[246].mxu0 }
 0x2ec   : > { %v8370_v49 = vpop.f32.mrb[247].mxu0 }
 0x2ed   : > { %6340 = vst.msk [vmem:[%s11502_s21 + $0x1c] sm:$0xf] %vm6332_vm6, %v7399_v48  ;;  %v6148_v44 = vadd.f32 %v11493_v2, %v6109_v13  ;;  %v6110_v60 = vadd.f32 %v8365_v29, %v5484_v35  ;;  %v8254_v19 = vpop.f32.mrb[244].mxu1  ;;  %v8371_v62 = vadd.f32 %v8370_v49, %v8369_v6 }
 0x2ee   : > { %v8255_v31 = vpop.f32.mrb[245].mxu1 }
 0x2ef   : > { %v6180_v32 = vmax.f32 %v6148_v44, 0.0  ;;  %v6149_v21 = vadd.f32 %v11493_v2, %v6110_v60  ;;  %v8256_v15 = vadd.f32 %v8255_v31, %v8254_v19  ;;  %v8257_v4 = vpop.f32.mrb[246].mxu1 }
 0x2f0   : > { %v8258_v26 = vpop.f32.mrb[247].mxu1 }
 0x2f1   : > { %v7400_v27 = vpack.c.bf16 %v6180_v32, %v6180_v32  ;;  %v6181_v30 = vmax.f32 %v6149_v21, 0.0  ;;  %v5485_v57 = vadd.f32 %v8256_v15, %v11424_v47  ;;  %v8259_v56 = vadd.f32 %v8258_v26, %v8257_v4  ;;  %v8372_v51 = vpop.f32.mrb[248].mxu0 }
 0x2f2   : > { %v8373_v8 = vpop.f32.mrb[249].mxu0 }
 0x2f3   : > { %6341 = vst.msk [vmem:[%s11502_s21 + $0x20] sm:$0xf] %vm6332_vm6, %v7400_v27  ;;  %v7401_v7 = vpack.c.bf16 %v6181_v30, %v6181_v30  ;;  %v6111_v40 = vadd.f32 %v8368_v23, %v5485_v57  ;;  %v5486_v28 = vadd.f32 %v8259_v56, %v11427_v25  ;;  %v8374_v53 = vadd.f32 %v8373_v8, %v8372_v51  ;;  %v8375_v59 = vpop.f32.mrb[250].mxu0 }
 0x2f4   : > { %v8376_v45 = vpop.f32.mrb[251].mxu0 }
 0x2f5   : > { %6342 = vst.msk [vmem:[%s11502_s21 + $0x24] sm:$0xf] %vm6332_vm6, %v7401_v7  ;;  %v6150_v29 = vadd.f32 %v11493_v2, %v6111_v40  ;;  %v6112_v54 = vadd.f32 %v8371_v62, %v5486_v28  ;;  %v8260_v38 = vpop.f32.mrb[248].mxu1  ;;  %v8377_v47 = vadd.f32 %v8376_v45, %v8375_v59 }
 0x2f6   : > { %v8261_v58 = vpop.f32.mrb[249].mxu1 }
 0x2f7   : > { %v6182_v61 = vmax.f32 %v6150_v29, 0.0  ;;  %v6151_v16 = vadd.f32 %v11493_v2, %v6112_v54  ;;  %v8262_v20 = vadd.f32 %v8261_v58, %v8260_v38  ;;  %v8263_v42 = vpop.f32.mrb[250].mxu1 }
 0x2f8   : > { %v8264_v18 = vpop.f32.mrb[251].mxu1 }
 0x2f9   : > { %v7402_v25 = vpack.c.bf16 %v6182_v61, %v6182_v61  ;;  %v6183_v41 = vmax.f32 %v6151_v16, 0.0  ;;  %v5487_v33 = vadd.f32 %v8262_v20, %v11430_v52  ;;  %v8265_v17 = vadd.f32 %v8264_v18, %v8263_v42  ;;  %v8378_v9 = vpop.f32.mrb[252].mxu0 }
 0x2fa   : > { %v8379_v48 = vpop.f32.mrb[253].mxu0 }
 0x2fb   : > { %6343 = vst.msk [vmem:[%s11502_s21 + $0x28] sm:$0xf] %vm6332_vm6, %v7402_v25  ;;  %v7403_v13 = vpack.c.bf16 %v6183_v41, %v6183_v41  ;;  %v6113_v35 = vadd.f32 %v8374_v53, %v5487_v33  ;;  %v5488_v23 = vadd.f32 %v8265_v17, %v11433_v34  ;;  %v8380_v6 = vadd.f32 %v8379_v48, %v8378_v9  ;;  %v8381_v49 = vpop.f32.mrb[254].mxu0 }
 0x2fc   : > { %v8382_v44 = vpop.f32.mrb[255].mxu0 }
 0x2fd   : > { %6344 = vst.msk [vmem:[%s11502_s21 + $0x2c] sm:$0xf] %vm6332_vm6, %v7403_v13  ;;  %v6152_v60 = vadd.f32 %v11493_v2, %v6113_v35  ;;  %v6114_v19 = vadd.f32 %v8377_v47, %v5488_v23  ;;  %v8266_v62 = vpop.f32.mrb[252].mxu1  ;;  %v8383_v52 = vadd.f32 %v8382_v44, %v8381_v49 }
 0x2fe   : > { %v8267_v31 = vpop.f32.mrb[253].mxu1 }
 0x2ff   : > { %v6184_v32 = vmax.f32 %v6152_v60, 0.0  ;;  %v6153_v21 = vadd.f32 %v11493_v2, %v6114_v19  ;;  %v8268_v15 = vadd.f32 %v8267_v31, %v8266_v62  ;;  %v8269_v4 = vpop.f32.mrb[254].mxu1 }
 0x300   : > { %v8270_v26 = vpop.f32.mrb[255].mxu1 }
 0x301   : > { %v7404_v34 = vpack.c.bf16 %v6184_v32, %v6184_v32  ;;  %v6185_v27 = vmax.f32 %v6153_v21, 0.0  ;;  %v5489_v30 = vadd.f32 %v8268_v15, %v11436_v5  ;;  %v8271_v57 = vadd.f32 %v8270_v26, %v8269_v4  ;;  %v8384_v56 = vpop.f32.mrb[0].mxu0 }
 0x302   : > { %v8385_v51 = vpop.f32.mrb[1].mxu0 }
 0x303   : > { %6345 = vst.msk [vmem:[%s11502_s21 + $0x30] sm:$0xf] %vm6332_vm6, %v7404_v34  ;;  %v7405_v8 = vpack.c.bf16 %v6185_v27, %v6185_v27  ;;  %v6115_v7 = vadd.f32 %v8380_v6, %v5489_v30  ;;  %v5490_v40 = vadd.f32 %v8271_v57, %v11439_v14  ;;  %v8386_v28 = vadd.f32 %v8385_v51, %v8384_v56  ;;  %v8387_v53 = vpop.f32.mrb[2].mxu0 }
 0x304   : > { %v8388_v59 = vpop.f32.mrb[3].mxu0 }
 0x305   : > { %6346 = vst.msk [vmem:[%s11502_s21 + $0x34] sm:$0xf] %vm6332_vm6, %v7405_v8  ;;  %v6154_v45 = vadd.f32 %v11493_v2, %v6115_v7  ;;  %v6116_v29 = vadd.f32 %v8383_v52, %v5490_v40  ;;  %v8272_v54 = vpop.f32.mrb[0].mxu1  ;;  %v8389_v5 = vadd.f32 %v8388_v59, %v8387_v53 }
 0x306   : > { %v8273_v38 = vpop.f32.mrb[1].mxu1 }
 0x307   : > { %v6186_v47 = vmax.f32 %v6154_v45, 0.0  ;;  %v6155_v58 = vadd.f32 %v11493_v2, %v6116_v29  ;;  %v8274_v61 = vadd.f32 %v8273_v38, %v8272_v54  ;;  %v8275_v16 = vpop.f32.mrb[2].mxu1 }
 0x308   : > { %v8276_v20 = vpop.f32.mrb[3].mxu1 }
 0x309   : > { %v7406_v14 = vpack.c.bf16 %v6186_v47, %v6186_v47  ;;  %v6187_v42 = vmax.f32 %v6155_v58, 0.0  ;;  %v5491_v18 = vadd.f32 %v8274_v61, %v11442_v37  ;;  %v8277_v25 = vadd.f32 %v8276_v20, %v8275_v16 }
 0x30a   : > { %v8390_v41 = vpop.f32.mrb[4].mxu0 }
 0x30b   : > { %v8391_v33 = vpop.f32.mrb[5].mxu0  ;;  %6347 = vst.msk [vmem:[%s11502_s21 + $0x38] sm:$0xf] %vm6332_vm6, %v7406_v14  ;;  %v7407_v17 = vpack.c.bf16 %v6187_v42, %v6187_v42  ;;  %v6117_v9 = vadd.f32 %v8386_v28, %v5491_v18  ;;  %v5492_v48 = vadd.f32 %v8277_v25, %v11445_v11 }
 0x30c   : > { %v8392_v13 = vadd.f32 %v8391_v33, %v8390_v41  ;;  %v8393_v35 = vpop.f32.mrb[6].mxu0 }
 0x30d   : > { %v8394_v23 = vpop.f32.mrb[7].mxu0  ;;  %6348 = vst.msk [vmem:[%s11502_s21 + $0x3c] sm:$0xf] %vm6332_vm6, %v7407_v17  ;;  %v6156_v6 = vadd.f32 %v11493_v2, %v6117_v9  ;;  %v6118_v49 = vadd.f32 %v8389_v5, %v5492_v48  ;;  %v8278_v44 = vpop.f32.mrb[4].mxu1 }
 0x30e   : > { %v8395_v37 = vadd.f32 %v8394_v23, %v8393_v35  ;;  %v8279_v60 = vpop.f32.mrb[5].mxu1 }
 0x30f   : > { %v6188_v19 = vmax.f32 %v6156_v6, 0.0  ;;  %v6157_v62 = vadd.f32 %v11493_v2, %v6118_v49  ;;  %v8280_v52 = vadd.f32 %v8279_v60, %v8278_v44  ;;  %v8281_v31 = vpop.f32.mrb[6].mxu1 }
 0x310   : > { %v8282_v32 = vpop.f32.mrb[7].mxu1 }
 0x311   : > { %v7408_v11 = vpack.c.bf16 %v6188_v19, %v6188_v19  ;;  %v6189_v21 = vmax.f32 %v6157_v62, 0.0  ;;  %v5493_v15 = vadd.f32 %v8280_v52, %v11448_v0  ;;  %v8283_v4 = vadd.f32 %v8282_v32, %v8281_v31 }
 0x312   : > { %v8396_v26 = vpop.f32.mrb[8].mxu0 }
 0x313   : > { %v8397_v34 = vpop.f32.mrb[9].mxu0  ;;  %6349 = vst.msk [vmem:[%s11502_s21 + $0x40] sm:$0xf] %vm6332_vm6, %v7408_v11  ;;  %v7409_v27 = vpack.c.bf16 %v6189_v21, %v6189_v21  ;;  %v6119_v30 = vadd.f32 %v8392_v13, %v5493_v15  ;;  %v5494_v57 = vadd.f32 %v8283_v4, %v11451_v50 }
 0x314   : > { %v8398_v56 = vadd.f32 %v8397_v34, %v8396_v26  ;;  %v8399_v51 = vpop.f32.mrb[10].mxu0 }
 0x315   : > { %v8400_v8 = vpop.f32.mrb[11].mxu0  ;;  %6350 = vst.msk [vmem:[%s11502_s21 + $0x44] sm:$0xf] %vm6332_vm6, %v7409_v27  ;;  %v6158_v7 = vadd.f32 %v11493_v2, %v6119_v30  ;;  %v6120_v40 = vadd.f32 %v8395_v37, %v5494_v57  ;;  %v8284_v28 = vpop.f32.mrb[8].mxu1 }
 0x316   : > { %v8401_v0 = vadd.f32 %v8400_v8, %v8399_v51  ;;  %v8285_v53 = vpop.f32.mrb[9].mxu1 }
 0x317   : > { %v6190_v59 = vmax.f32 %v6158_v7, 0.0  ;;  %v6159_v45 = vadd.f32 %v11493_v2, %v6120_v40  ;;  %v8286_v29 = vadd.f32 %v8285_v53, %v8284_v28  ;;  %v8287_v54 = vpop.f32.mrb[10].mxu1 }
 0x318   : > { %v8288_v5 = vpop.f32.mrb[11].mxu1 }
 0x319   : > { %v7410_v50 = vpack.c.bf16 %v6190_v59, %v6190_v59  ;;  %v6191_v38 = vmax.f32 %v6159_v45, 0.0  ;;  %v5495_v47 = vadd.f32 %v8286_v29, %v11454_v46  ;;  %v8289_v58 = vadd.f32 %v8288_v5, %v8287_v54 }
 0x31a   : > { %v8402_v61 = vpop.f32.mrb[12].mxu0 }
 0x31b   : > { %v8403_v16 = vpop.f32.mrb[13].mxu0  ;;  %6351 = vst.msk [vmem:[%s11502_s21 + $0x48] sm:$0xf] %vm6332_vm6, %v7410_v50  ;;  %v7411_v20 = vpack.c.bf16 %v6191_v38, %v6191_v38  ;;  %v6121_v14 = vadd.f32 %v8398_v56, %v5495_v47  ;;  %v5496_v42 = vadd.f32 %v8289_v58, %v11457_v3 }
 0x31c   : > { %v8404_v18 = vadd.f32 %v8403_v16, %v8402_v61  ;;  %v8405_v25 = vpop.f32.mrb[14].mxu0 }
 0x31d   : > { %v8406_v41 = vpop.f32.mrb[15].mxu0  ;;  %6352 = vst.msk [vmem:[%s11502_s21 + $0x4c] sm:$0xf] %vm6332_vm6, %v7411_v20  ;;  %v6160_v33 = vadd.f32 %v11493_v2, %v6121_v14  ;;  %v6122_v17 = vadd.f32 %v8401_v0, %v5496_v42  ;;  %v8290_v9 = vpop.f32.mrb[12].mxu1 }
 0x31e   : > { %v8407_v46 = vadd.f32 %v8406_v41, %v8405_v25  ;;  %v8291_v48 = vpop.f32.mrb[13].mxu1 }
 0x31f   : > { %v6192_v13 = vmax.f32 %v6160_v33, 0.0  ;;  %v6161_v35 = vadd.f32 %v11493_v2, %v6122_v17  ;;  %v8292_v23 = vadd.f32 %v8291_v48, %v8290_v9  ;;  %v8293_v6 = vpop.f32.mrb[14].mxu1 }
 0x320   : > { %v8294_v49 = vpop.f32.mrb[15].mxu1 }
 0x321   : > { %v7412_v3 = vpack.c.bf16 %v6192_v13, %v6192_v13  ;;  %v6193_v44 = vmax.f32 %v6161_v35, 0.0  ;;  %v5497_v37 = vadd.f32 %v8292_v23, %v11460_v63  ;;  %v8295_v60 = vadd.f32 %v8294_v49, %v8293_v6 }
 0x322   : > { %v8408_v19 = vpop.f32.mrb[16].mxu0 }
 0x323   : > { %v8409_v62 = vpop.f32.mrb[17].mxu0  ;;  %6353 = vst.msk [vmem:[%s11502_s21 + $0x50] sm:$0xf] %vm6332_vm6, %v7412_v3  ;;  %v7413_v52 = vpack.c.bf16 %v6193_v44, %v6193_v44  ;;  %v6123_v31 = vadd.f32 %v8404_v18, %v5497_v37  ;;  %v5498_v32 = vadd.f32 %v8295_v60, %v11463_v10 }
 0x324   : > { %v8410_v11 = vadd.f32 %v8409_v62, %v8408_v19  ;;  %v8411_v21 = vpop.f32.mrb[18].mxu0 }
 0x325   : > { %v8412_v15 = vpop.f32.mrb[19].mxu0  ;;  %6354 = vst.msk [vmem:[%s11502_s21 + $0x54] sm:$0xf] %vm6332_vm6, %v7413_v52  ;;  %v6162_v4 = vadd.f32 %v11493_v2, %v6123_v31  ;;  %v6124_v26 = vadd.f32 %v8407_v46, %v5498_v32  ;;  %v8296_v34 = vpop.f32.mrb[16].mxu1 }
 0x326   : > { %v8413_v63 = vadd.f32 %v8412_v15, %v8411_v21  ;;  %v8297_v27 = vpop.f32.mrb[17].mxu1 }
 0x327   : > { %v6194_v30 = vmax.f32 %v6162_v4, 0.0  ;;  %v6163_v57 = vadd.f32 %v11493_v2, %v6124_v26  ;;  %v8298_v56 = vadd.f32 %v8297_v27, %v8296_v34  ;;  %v8299_v51 = vpop.f32.mrb[18].mxu1 }
 0x328   : > { %v8300_v8 = vpop.f32.mrb[19].mxu1 }
 0x329   : > { %v7414_v10 = vpack.c.bf16 %v6194_v30, %v6194_v30  ;;  %v6195_v7 = vmax.f32 %v6163_v57, 0.0  ;;  %v5499_v40 = vadd.f32 %v8298_v56, %v11466_v36  ;;  %v8301_v28 = vadd.f32 %v8300_v8, %v8299_v51 }
 0x32a   : > { %v8414_v0 = vpop.f32.mrb[20].mxu0 }
 0x32b   : > { %v8415_v53 = vpop.f32.mrb[21].mxu0  ;;  %6355 = vst.msk [vmem:[%s11502_s21 + $0x58] sm:$0xf] %vm6332_vm6, %v7414_v10  ;;  %v7415_v59 = vpack.c.bf16 %v6195_v7, %v6195_v7  ;;  %v6125_v45 = vadd.f32 %v8410_v11, %v5499_v40  ;;  %v5500_v29 = vadd.f32 %v8301_v28, %v11469_v55 }
 0x32c   : > { %v8416_v54 = vadd.f32 %v8415_v53, %v8414_v0  ;;  %v8417_v5 = vpop.f32.mrb[22].mxu0 }
 0x32d   : > { %v8418_v50 = vpop.f32.mrb[23].mxu0  ;;  %6356 = vst.msk [vmem:[%s11502_s21 + $0x5c] sm:$0xf] %vm6332_vm6, %v7415_v59  ;;  %v6164_v38 = vadd.f32 %v11493_v2, %v6125_v45  ;;  %v6126_v47 = vadd.f32 %v8413_v63, %v5500_v29  ;;  %v8302_v58 = vpop.f32.mrb[20].mxu1 }
 0x32e   : > { %v8419_v36 = vadd.f32 %v8418_v50, %v8417_v5  ;;  %v8303_v61 = vpop.f32.mrb[21].mxu1 }
 0x32f   : > { %v6196_v16 = vmax.f32 %v6164_v38, 0.0  ;;  %v6165_v20 = vadd.f32 %v11493_v2, %v6126_v47  ;;  %v8304_v14 = vadd.f32 %v8303_v61, %v8302_v58  ;;  %v8305_v42 = vpop.f32.mrb[22].mxu1 }
 0x330   : > { %v8306_v18 = vpop.f32.mrb[23].mxu1 }
 0x331   : > { %v7416_v55 = vpack.c.bf16 %v6196_v16, %v6196_v16  ;;  %v6197_v25 = vmax.f32 %v6165_v20, 0.0  ;;  %v5501_v41 = vadd.f32 %v8304_v14, %v11472_v24  ;;  %v8307_v33 = vadd.f32 %v8306_v18, %v8305_v42 }
 0x332   : > { %v8420_v17 = vpop.f32.mrb[24].mxu0 }
 0x333   : > { %v8421_v9 = vpop.f32.mrb[25].mxu0  ;;  %6357 = vst.msk [vmem:[%s11502_s21 + $0x60] sm:$0xf] %vm6332_vm6, %v7416_v55  ;;  %v7417_v46 = vpack.c.bf16 %v6197_v25, %v6197_v25  ;;  %v6127_v48 = vadd.f32 %v8416_v54, %v5501_v41  ;;  %v5502_v13 = vadd.f32 %v8307_v33, %v11475_v39 }
 0x334   : > { %v8422_v35 = vadd.f32 %v8421_v9, %v8420_v17  ;;  %v8423_v23 = vpop.f32.mrb[26].mxu0 }
 0x335   : > { %v8424_v6 = vpop.f32.mrb[27].mxu0  ;;  %6358 = vst.msk [vmem:[%s11502_s21 + $0x64] sm:$0xf] %vm6332_vm6, %v7417_v46  ;;  %v6166_v49 = vadd.f32 %v11493_v2, %v6127_v48  ;;  %v6128_v3 = vadd.f32 %v8419_v36, %v5502_v13  ;;  %v8308_v44 = vpop.f32.mrb[24].mxu1 }
 0x336   : > { %v8425_v24 = vadd.f32 %v8424_v6, %v8423_v23  ;;  %v8309_v37 = vpop.f32.mrb[25].mxu1 }
 0x337   : > { %v6198_v60 = vmax.f32 %v6166_v49, 0.0  ;;  %v6167_v19 = vadd.f32 %v11493_v2, %v6128_v3  ;;  %v8310_v62 = vadd.f32 %v8309_v37, %v8308_v44  ;;  %v8311_v52 = vpop.f32.mrb[26].mxu1 }
 0x338   : > { %v8312_v31 = vpop.f32.mrb[27].mxu1 }
 0x339   : > { %v7418_v39 = vpack.c.bf16 %v6198_v60, %v6198_v60  ;;  %v6199_v32 = vmax.f32 %v6167_v19, 0.0  ;;  %v5503_v11 = vadd.f32 %v8310_v62, %v11478_v43  ;;  %v8313_v21 = vadd.f32 %v8312_v31, %v8311_v52 }
 0x33a   : > { %v8426_v15 = vpop.f32.mrb[28].mxu0 }
 0x33b   : > { %v8427_v4 = vpop.f32.mrb[29].mxu0  ;;  %6359 = vst.msk [vmem:[%s11502_s21 + $0x68] sm:$0xf] %vm6332_vm6, %v7418_v39  ;;  %v7419_v26 = vpack.c.bf16 %v6199_v32, %v6199_v32  ;;  %v6129_v34 = vadd.f32 %v8422_v35, %v5503_v11  ;;  %v5504_v63 = vadd.f32 %v8313_v21, %v11481_v1 }
 0x33c   : > { %v8428_v27 = vadd.f32 %v8427_v4, %v8426_v15  ;;  %v8429_v30 = vpop.f32.mrb[30].mxu0 }
 0x33d   : > { %v8430_v57 = vpop.f32.mrb[31].mxu0  ;;  %6360 = vst.msk [vmem:[%s11502_s21 + $0x6c] sm:$0xf] %vm6332_vm6, %v7419_v26  ;;  %v6168_v56 = vadd.f32 %v11493_v2, %v6129_v34  ;;  %v6130_v51 = vadd.f32 %v8425_v24, %v5504_v63  ;;  %v8314_v8 = vpop.f32.mrb[28].mxu1 }
 0x33e   : > { %v8431_v43 = vadd.f32 %v8430_v57, %v8429_v30  ;;  %v8315_v10 = vpop.f32.mrb[29].mxu1 }
 0x33f   : > { %v6200_v7 = vmax.f32 %v6168_v56, 0.0  ;;  %v6169_v40 = vadd.f32 %v11493_v2, %v6130_v51  ;;  %v8316_v28 = vadd.f32 %v8315_v10, %v8314_v8  ;;  %v8317_v0 = vpop.f32.mrb[30].mxu1 }
 0x340   : > { %v8318_v53 = vpop.f32.mrb[31].mxu1 }
 0x341   : > { %v7420_v1 = vpack.c.bf16 %v6200_v7, %v6200_v7  ;;  %v6201_v59 = vmax.f32 %v6169_v40, 0.0  ;;  %v5505_v45 = vadd.f32 %v8316_v28, %v11484_v22  ;;  %v8319_v29 = vadd.f32 %v8318_v53, %v8317_v0 }
 0x343   : > { %6361 = vst.msk [vmem:[%s11502_s21 + $0x70] sm:$0xf] %vm6332_vm6, %v7420_v1  ;;  %v7421_v54 = vpack.c.bf16 %v6201_v59, %v6201_v59  ;;  %v6131_v5 = vadd.f32 %v8428_v27, %v5505_v45  ;;  %v5506_v50 = vadd.f32 %v8319_v29, %v11487_v12 }
 0x345   : > { %6362 = vst.msk [vmem:[%s11502_s21 + $0x74] sm:$0xf] %vm6332_vm6, %v7421_v54  ;;  %v6170_v38 = vadd.f32 %v11493_v2, %v6131_v5  ;;  %v6132_v47 = vadd.f32 %v8431_v43, %v5506_v50 }
 0x347   : > { %v6202_v58 = vmax.f32 %v6170_v38, 0.0  ;;  %v6171_v36 = vadd.f32 %v11493_v2, %v6132_v47 }
 0x349   : > { %v7422_v61 = vpack.c.bf16 %v6202_v58, %v6202_v58  ;;  %v6203_v16 = vmax.f32 %v6171_v36, 0.0 }
 0x34b   : > { %6363 = vst.msk [vmem:[%s11502_s21 + $0x78] sm:$0xf] %vm6332_vm6, %v7422_v61  ;;  %v7423_v22 = vpack.c.bf16 %v6203_v16, %v6203_v16 }
 0x34d   : > { %6364 = vst.msk [vmem:[%s11502_s21 + $0x7c] sm:$0xf] %vm6332_vm6, %v7423_v22 }
 0x34e PF: > { %s13_s12 = sadd.s32 1, %s8763_s12  }
 0x34f   : > { %p10_p4 = scmp.ge.s32.totalorder %s13_s12, 6  }
 0x351   :  { %12 = sbr.rel (!%p10_p4) target bundleno = 1 (0x1), region = 72 }

// kernel: deformable_detr_forward.5
= control target key start
LH: loop header
LB: loop body
LE: loop exit
PB: predicated region body
PF: predicated region fallthrough
CT: control target
= control target key end

     0   :  { %s1496_s25 = smov 0   ;;  %s1961_s0 = inlined_call_operand.vmem [shape: f32[16,256], index: 0, kind: input, shape index: {}]   ;;  %s1962_s1 = inlined_call_operand.vmem [shape: f32[2,16,256], index: 1, kind: input, shape index: {}]   ;;  %s1963_s2 = inlined_call_operand.vmem [shape: f32[16,2], index: 2, kind: input, shape index: {}]   ;;  %s1964_s3 = inlined_call_operand.vmem [shape: f32[256,64], index: 3, kind: input, shape index: {}]   ;;  %s1965_s4 = inlined_call_operand.vmem [shape: f32[1,64], index: 4, kind: input, shape index: {}]   ;;  %s1966_s5 = inlined_call_operand.vmem [shape: f32[256,64], index: 5, kind: input, shape index: {}]   ;;  %s1967_s6 = inlined_call_operand.vmem [shape: f32[1,64], index: 6, kind: input, shape index: {}]   ;;  %s1968_s7 = inlined_call_operand.vmem [shape: f32[64,256], index: 7, kind: input, shape index: {}]   ;;  %s1969_s8 = inlined_call_operand.vmem [shape: f32[64,256], index: 8, kind: input, shape index: {}]   ;;  %s1970_s9 = inlined_call_operand.vmem [shape: f32[2,256], index: 9, kind: input, shape index: {}]   ;;  %s1971_s10 = inlined_call_operand.vmem [shape: f32[1,256], index: 10, kind: input, shape index: {}]   ;;  %s1972_s11 = inlined_call_operand.vmem [shape: f32[256,2], index: 11, kind: input, shape index: {}]   ;;  %s1973_s12 = inlined_call_operand.vmem [shape: f32[1,2], index: 12, kind: input, shape index: {}]   ;;  %s1974_s13 = inlined_call_operand.vmem [shape: f32[2,16,2], index: 13, kind: output, shape index: {}]  }
   0x1 LB: > { %s1133_s26 = sadd.s32 4294967295, %s1421_s25   ;;  %p1137_p0 = scmp.ge.s32.totalorder %s1421_s25, 1  ;;  %s1421_s25 = sphi %s1496_s25, %s23_s25  }
   0x2   : > { %p387_p1 = scmp.lt.s32.totalorder %s1421_s25, 3 }
   0x4   : > { %p388_p2 = pnand %p1137_p0, %p387_p1 }
   0x5   : > { %v581_v0 = vld [vmem:[%s1966_s5 + $0x80] sm:$0xff] (!%p388_p2)  ;;  %v582_v1 = vld [vmem:[%s1966_s5 + $0x88] sm:$0xff] (!%p388_p2)  ;;  %v583_v5 = vld [vmem:[%s1966_s5 + $0x90] sm:$0xff] (!%p388_p2)  ;;  %p1536_p3 = scmp.lt.s32.totalorder (!%p388_p2), %s1133_s26, 1  ;;  %vm715_vm0 = vcmask (!%p388_p2), 523264   ;;  %vm1075_vm1 = vcmask (!%p388_p2), 15360  }
   0x6   : > { %391 = sbr.rel (%p388_p2) target bundleno = 719 (0x2cf), region = 72  ;;  %v565_v2 = vld [vmem:[%s1966_s5] sm:$0xff] (!%p388_p2)  ;;  %v1300_v3 = vpack.c.bf16 (!%p388_p2), %v582_v1, %v581_v0  ;;  %v566_v4 = vld [vmem:[%s1966_s5 + $0x8] sm:$0xff] (!%p388_p2)  ;;  %v584_v6 = vld [vmem:[%s1966_s5 + $0x98] sm:$0xff] (!%p388_p2) }
   0x7   : > { %v1302_v7 = vpack.c.bf16 (!%p388_p2), %v566_v4, %v565_v2  ;;  %v1304_v8 = vpack.c.bf16 (!%p388_p2), %v584_v6, %v583_v5  ;;  %v567_v9 = vld [vmem:[%s1966_s5 + $0x10] sm:$0xff] (!%p388_p2)  ;;  %v568_v10 = vld [vmem:[%s1966_s5 + $0x18] sm:$0xff] (!%p388_p2)  ;;  %v585_v11 = vld [vmem:[%s1966_s5 + $0xa0] sm:$0xff] (!%p388_p2) }
   0x8   : > { %1301 = vmatprep.subr.bf16.mxu1 (!%p388_p2), %v1300_v3  ;;  %v586_v12 = vld [vmem:[%s1966_s5 + $0xa8] sm:$0xff] (!%p388_p2)  ;;  %v1306_v13 = vpack.c.bf16 (!%p388_p2), %v568_v10, %v567_v9  ;;  %v569_v14 = vld [vmem:[%s1966_s5 + $0x20] sm:$0xff] (!%p388_p2)  ;;  %v587_v17 = vld [vmem:[%s1966_s5 + $0xb0] sm:$0xff] (!%p388_p2) }
   0x9   : > { %1303 = vmatpush3.bf16.msra.mxu1 (!%p388_p2), %v1302_v7  ;;  %v570_v15 = vld [vmem:[%s1966_s5 + $0x28] sm:$0xff] (!%p388_p2)  ;;  %v1308_v16 = vpack.c.bf16 (!%p388_p2), %v586_v12, %v585_v11  ;;  %v461_v18 = vld [vmem:[%s1964_s3 + $0x80] sm:$0xff] (!%p388_p2)  ;;  %v588_v20 = vld [vmem:[%s1966_s5 + $0xb8] sm:$0xff] (!%p388_p2) }
   0xa   : > { %1305 = vmatprep.subr.bf16.mxu1 (!%p388_p2), %v1304_v8  ;;  %v462_v19 = vld [vmem:[%s1964_s3 + $0x88] sm:$0xff] (!%p388_p2)  ;;  %v445_v22 = vld [vmem:[%s1964_s3] sm:$0xff] (!%p388_p2)  ;;  %v1310_v25 = vpack.c.bf16 (!%p388_p2), %v570_v15, %v569_v14  ;;  %v463_v26 = vld [vmem:[%s1964_s3 + $0x90] sm:$0xff] (!%p388_p2)  ;;  %v1312_v29 = vpack.c.bf16 (!%p388_p2), %v588_v20, %v587_v17 }
   0xb   : > { %v1268_v21 = vpack.c.bf16 (!%p388_p2), %v462_v19, %v461_v18  ;;  %v446_v23 = vld [vmem:[%s1964_s3 + $0x8] sm:$0xff] (!%p388_p2)  ;;  %v464_v27 = vld [vmem:[%s1964_s3 + $0x98] sm:$0xff] (!%p388_p2)  ;;  %v447_v28 = vld [vmem:[%s1964_s3 + $0x10] sm:$0xff] (!%p388_p2) }
   0xc   : > { %v1270_v24 = vpack.c.bf16 (!%p388_p2), %v446_v23, %v445_v22  ;;  %v571_v30 = vld [vmem:[%s1966_s5 + $0x30] sm:$0xff] (!%p388_p2)  ;;  %v572_v31 = vld [vmem:[%s1966_s5 + $0x38] sm:$0xff] (!%p388_p2)  ;;  %v1272_v32 = vpack.c.bf16 (!%p388_p2), %v464_v27, %v463_v26  ;;  %v589_v34 = vld [vmem:[%s1966_s5 + $0xc0] sm:$0xff] (!%p388_p2) }
   0xd   : > { %s1977_s26 = smov (!%p1536_p3, %s1133_s26), 1  ;;  %1307 = vmatpush3.bf16.msra.mxu1 %v1306_v13  ;;  %1269 = vmatprep.subr.bf16.mxu0 %v1268_v21  ;;  %v448_v33 = vld [vmem:[%s1964_s3 + $0x18] sm:$0xff]  ;;  %v590_v35 = vld [vmem:[%s1966_s5 + $0xc8] sm:$0xff]  ;;  %v465_v37 = vld [vmem:[%s1964_s3 + $0xa0] sm:$0xff]  ;;  %v1314_v41 = vpack.c.bf16 %v572_v31, %v571_v30 }
   0xe   : > { %1309 = vmatprep.subr.bf16.mxu1 %v1308_v16  ;;  %1271 = vmatpush3.bf16.msra.mxu0 %v1270_v24  ;;  %v1274_v36 = vpack.c.bf16 %v448_v33, %v447_v28  ;;  %v466_v38 = vld [vmem:[%s1964_s3 + $0xa8] sm:$0xff]  ;;  %v449_v39 = vld [vmem:[%s1964_s3 + $0x20] sm:$0xff]  ;;  %s1152_s28 = sshll.u32 %s1977_s26, 5  ;;  %v1316_v45 = vpack.c.bf16 %v590_v35, %v589_v34  ;;  %v591_v46 = vld [vmem:[%s1966_s5 + $0xd0] sm:$0xff]  ;;  %s1153_s30 = sshll.u32 %s1977_s26, 4 }
   0xf   : > { %1273 = vmatprep.subr.bf16.mxu0 %v1272_v32  ;;  %v450_v40 = vld [vmem:[%s1964_s3 + $0x28] sm:$0xff]  ;;  %v573_v42 = vld [vmem:[%s1966_s5 + $0x40] sm:$0xff]  ;;  %v1276_v44 = vpack.c.bf16 %v466_v38, %v465_v37  ;;  %v467_v48 = vld [vmem:[%s1964_s3 + $0xb0] sm:$0xff]  ;;  %s1634_s17 = scalar_lea.vmem %s1962_s1, %s1152_s28  ;;  %s440_s20 = scalar_lea.vmem %s1974_s13, %s1153_s30 }
  0x10   : > { %v574_v43 = vld [vmem:[%s1966_s5 + $0x48] sm:$0xff]  ;;  %v1278_v47 = vpack.c.bf16 %v450_v40, %v449_v39  ;;  %v468_v49 = vld [vmem:[%s1964_s3 + $0xb8] sm:$0xff]  ;;  %v451_v52 = vld [vmem:[%s1964_s3 + $0x30] sm:$0xff] }
  0x11   : > { %1311 = vmatpush3.bf16.msra.mxu1 %v1310_v25  ;;  %v592_v50 = vld [vmem:[%s1966_s5 + $0xd8] sm:$0xff]  ;;  %v1280_v51 = vpack.c.bf16 %v468_v49, %v467_v48  ;;  %v1318_v54 = vpack.c.bf16 %v574_v43, %v573_v42  ;;  %v575_v55 = vld [vmem:[%s1966_s5 + $0x50] sm:$0xff]  ;;  %v469_v56 = vld [vmem:[%s1964_s3 + $0xc0] sm:$0xff] }
  0x12   : > { %1313 = vmatprep.subr.bf16.mxu1 %v1312_v29  ;;  %1275 = vmatpush3.bf16.msra.mxu0 %v1274_v36  ;;  %v452_v53 = vld [vmem:[%s1964_s3 + $0x38] sm:$0xff]  ;;  %v470_v57 = vld [vmem:[%s1964_s3 + $0xc8] sm:$0xff]  ;;  %v1320_v58 = vpack.c.bf16 %v592_v50, %v591_v46  ;;  %v593_v60 = vld [vmem:[%s1966_s5 + $0xe0] sm:$0xff] }
  0x13   : > { %1277 = vmatprep.subr.bf16.mxu0 %v1276_v44  ;;  %v576_v59 = vld [vmem:[%s1966_s5 + $0x58] sm:$0xff]  ;;  %v1282_v61 = vpack.c.bf16 %v452_v53, %v451_v52  ;;  %v562_v62 = vld [vmem:[%s1634_s17 + $0x8] sm:$0xff]  ;;  %v1284_v0 = vpack.c.bf16 %v470_v57, %v469_v56  ;;  %v453_v1 = vld [vmem:[%s1964_s3 + $0x40] sm:$0xff] }
  0x14   : > { %v594_v63 = vld [vmem:[%s1966_s5 + $0xe8] sm:$0xff]  ;;  %668 = vmatprep.mubr.f32.mxu1 %v562_v62  ;;  %v471_v3 = vld [vmem:[%s1964_s3 + $0xd0] sm:$0xff]  ;;  %v472_v4 = vld [vmem:[%s1964_s3 + $0xd8] sm:$0xff]  ;;  %v1322_v5 = vpack.c.bf16 %v576_v59, %v575_v55 }
  0x15   : > { %1315 = vmatpush3.bf16.msra.mxu1 %v1314_v41  ;;  %v454_v2 = vld [vmem:[%s1964_s3 + $0x48] sm:$0xff]  ;;  %v577_v6 = vld [vmem:[%s1966_s5 + $0x60] sm:$0xff]  ;;  %v1324_v7 = vpack.c.bf16 %v594_v63, %v593_v60  ;;  %v595_v9 = vld [vmem:[%s1966_s5 + $0xf0] sm:$0xff]  ;;  %v1288_v12 = vpack.c.bf16 %v472_v4, %v471_v3  ;;  %v1423_v3 = vmov 0.0  }
  0x16   : > { %1317 = vmatprep.subr.bf16.mxu1 %v1316_v45  ;;  %1279 = vmatpush3.bf16.msra.mxu0 %v1278_v47  ;;  %v578_v8 = vld [vmem:[%s1966_s5 + $0x68] sm:$0xff]  ;;  %v596_v10 = vld [vmem:[%s1966_s5 + $0xf8] sm:$0xff]  ;;  %v1286_v11 = vpack.c.bf16 %v454_v2, %v453_v1  ;;  %v455_v13 = vld [vmem:[%s1964_s3 + $0x50] sm:$0xff] }
  0x17   : > { %1281 = vmatprep.subr.bf16.mxu0 %v1280_v51  ;;  %v456_v14 = vld [vmem:[%s1964_s3 + $0x58] sm:$0xff]  ;;  %v442_v15 = vld [vmem:[%s1961_s0 + $0x8] sm:$0xff]  ;;  %v473_v16 = vld [vmem:[%s1964_s3 + $0xe0] sm:$0xff]  ;;  %v1326_v18 = vpack.c.bf16 %v578_v8, %v577_v6  ;;  %v1328_v19 = vpack.c.bf16 %v596_v10, %v595_v9 }
  0x18   : > { %v474_v17 = vld [vmem:[%s1964_s3 + $0xe8] sm:$0xff]  ;;  %548 = vmatprep.mubr.f32.mxu0 %v442_v15  ;;  %v579_v20 = vld [vmem:[%s1966_s5 + $0x70] sm:$0xff]  ;;  %v580_v21 = vld [vmem:[%s1966_s5 + $0x78] sm:$0xff]  ;;  %v1290_v22 = vpack.c.bf16 %v456_v14, %v455_v13 }
  0x19   : > { %1319 = vmatpush3.bf16.msra.mxu1 %v1318_v54  ;;  %v1292_v23 = vpack.c.bf16 %v474_v17, %v473_v16  ;;  %v457_v24 = vld [vmem:[%s1964_s3 + $0x60] sm:$0xff]  ;;  %v458_v25 = vld [vmem:[%s1964_s3 + $0x68] sm:$0xff]  ;;  %v475_v26 = vld [vmem:[%s1964_s3 + $0xf0] sm:$0xff]  ;;  %v1330_v28 = vpack.c.bf16 %v580_v21, %v579_v20  ;;  %v1425_v21 = vmov 1  }
  0x1a   : > { %1321 = vmatprep.subr.bf16.mxu1 %v1320_v58  ;;  %1283 = vmatpush3.bf16.msra.mxu0 %v1282_v61  ;;  %v476_v27 = vld [vmem:[%s1964_s3 + $0xf8] sm:$0xff]  ;;  %v1294_v29 = vpack.c.bf16 %v458_v25, %v457_v24  ;;  %v459_v31 = vld [vmem:[%s1964_s3 + $0x70] sm:$0xff]  ;;  %v700_v33 = vld [vmem:[%s1969_s8 + $0x8] sm:$0xff] }
  0x1b   : > { %1285 = vmatprep.subr.bf16.mxu0 %v1284_v0  ;;  %v1296_v30 = vpack.c.bf16 %v476_v27, %v475_v26  ;;  %v460_v32 = vld [vmem:[%s1964_s3 + $0x78] sm:$0xff]  ;;  %v561_v35 = vld [vmem:[%s1634_s17] sm:$0xff]  ;;  %v701_v40 = vld [vmem:[%s1969_s8 + $0x10] sm:$0xff] }
  0x1c   : > { %v702_v34 = vld [vmem:[%s1969_s8 + $0x18] sm:$0xff]  ;;  %v1298_v37 = vpack.c.bf16 %v460_v32, %v459_v31  ;;  %v699_v39 = vld [vmem:[%s1969_s8] sm:$0xff]  ;;  %v704_v41 = vld [vmem:[%s1969_s8 + $0x28] sm:$0xff] }
  0x1d   : > { %1323 = vmatpush3.bf16.msra.mxu1 %v1322_v5  ;;  %v564_v36 = vld [vmem:[%s1634_s17 + $0x18] sm:$0xff]  ;;  %v1332_v38 = vpack.c.bf16 %v702_v34, %v700_v33  ;;  %v563_v43 = vld [vmem:[%s1634_s17 + $0x10] sm:$0xff]  ;;  %v441_v44 = vld [vmem:[%s1961_s0] sm:$0xff]  ;;  %v1334_v45 = vpack.c.bf16 %v701_v40, %v699_v39 }
  0x1e   : > { %1325 = vmatprep.subr.bf16.mxu1 %v1324_v7  ;;  %1287 = vmatpush3.bf16.msra.mxu0 %v1286_v11  ;;  %v706_v42 = vld [vmem:[%s1969_s8 + $0x38] sm:$0xff]  ;;  %v703_v48 = vld [vmem:[%s1969_s8 + $0x20] sm:$0xff]  ;;  %v705_v49 = vld [vmem:[%s1969_s8 + $0x30] sm:$0xff]  ;;  %v1424_v7 = vmov 0  }
  0x1f   : > { %1289 = vmatprep.subr.bf16.mxu0 %v1288_v12  ;;  %v444_v46 = vld [vmem:[%s1961_s0 + $0x18] sm:$0xff]  ;;  %v1336_v47 = vpack.c.bf16 %v706_v42, %v704_v41  ;;  %v708_v50 = vld [vmem:[%s1969_s8 + $0x48] sm:$0xff]  ;;  %v443_v52 = vld [vmem:[%s1961_s0 + $0x10] sm:$0xff]  ;;  %v1338_v53 = vpack.c.bf16 %v705_v49, %v703_v48  ;;  %1411 = vset.pattern.permute.xlu0 %v1424_v7 }
  0x20   : > { %v710_v51 = vld [vmem:[%s1969_s8 + $0x58] sm:$0xff]  ;;  %v707_v55 = vld [vmem:[%s1969_s8 + $0x40] sm:$0xff]  ;;  %v709_v56 = vld [vmem:[%s1969_s8 + $0x50] sm:$0xff]  ;;  %1413 = vset.pattern.permute.xlu1 %v1424_v7 }
  0x21   : > { %1327 = vmatpush3.bf16.msra.mxu1 %v1326_v18  ;;  %v1340_v54 = vpack.c.bf16 %v710_v51, %v708_v50  ;;  %v1342_v57 = vpack.c.bf16 %v709_v56, %v707_v55  ;;  %v712_v58 = vld [vmem:[%s1969_s8 + $0x68] sm:$0xff]  ;;  %v714_v59 = vld [vmem:[%s1969_s8 + $0x78] sm:$0xff]  ;;  %v711_v61 = vld [vmem:[%s1969_s8 + $0x60] sm:$0xff] }
  0x22   : > { %1329 = vmatprep.subr.bf16.mxu1 %v1328_v19  ;;  %1291 = vmatpush3.bf16.msra.mxu0 %v1290_v22  ;;  %v1344_v60 = vpack.c.bf16 %v714_v59, %v712_v58  ;;  %v713_v62 = vld [vmem:[%s1969_s8 + $0x70] sm:$0xff]  ;;  %v684_v0 = vld [vmem:[%s1968_s7 + $0x8] sm:$0xff]  ;;  %v686_v1 = vld [vmem:[%s1968_s7 + $0x18] sm:$0xff] }
  0x23   : > { %1293 = vmatprep.subr.bf16.mxu0 %v1292_v23  ;;  %v1346_v63 = vpack.c.bf16 %v713_v62, %v711_v61  ;;  %v1348_v2 = vpack.c.bf16 %v686_v1, %v684_v0  ;;  %v681_v4 = vld [vmem:[%s1963_s2] sm:$0xff]  ;;  %v682_v5 = vld [vmem:[%s1963_s2 + $0x8] sm:$0xff]  ;;  %v979_v13 = vld [vmem:[%s1972_s11 + $0x90] sm:$0xff] }
  0x24   : > { %v977_v6 = vld [vmem:[%s1972_s11 + $0x80] sm:$0xff]  ;;  %v978_v8 = vld [vmem:[%s1972_s11 + $0x88] sm:$0xff]  ;;  %885 = vperm.xlu0 %1411, %v681_v4   ;;  %890 = vperm.xlu1 %1413, %v682_v5   ;;  %v980_v14 = vld [vmem:[%s1972_s11 + $0x98] sm:$0xff] }
  0x25   : > { %1331 = vmatpush3.bf16.msra.mxu1 %v1330_v28  ;;  %v961_v9 = vld [vmem:[%s1972_s11] sm:$0xff]  ;;  %v962_v10 = vld [vmem:[%s1972_s11 + $0x8] sm:$0xff]  ;;  %v1364_v11 = vpack.c.bf16 %v978_v8, %v977_v6  ;;  %v963_v15 = vld [vmem:[%s1972_s11 + $0x10] sm:$0xff]  ;;  %v1368_v19 = vpack.c.bf16 %v980_v14, %v979_v13 }
  0x26   : > { %1295 = vmatpush3.bf16.msra.mxu0 %v1294_v29  ;;  %v1366_v12 = vpack.c.bf16 %v962_v10, %v961_v9  ;;  %v964_v16 = vld [vmem:[%s1972_s11 + $0x18] sm:$0xff]  ;;  %v981_v17 = vld [vmem:[%s1972_s11 + $0xa0] sm:$0xff]  ;;  %v982_v18 = vld [vmem:[%s1972_s11 + $0xa8] sm:$0xff] }
  0x27   : > { %1297 = vmatprep.subr.bf16.mxu0 %v1296_v30  ;;  %1365 = vmatprep.subr.bf16.mxu1 %v1364_v11  ;;  %v1370_v20 = vpack.c.bf16 %v964_v16, %v963_v15  ;;  %v1372_v22 = vpack.c.bf16 %v982_v18, %v981_v17  ;;  %v965_v23 = vld [vmem:[%s1972_s11 + $0x20] sm:$0xff]  ;;  %v966_v24 = vld [vmem:[%s1972_s11 + $0x28] sm:$0xff]  ;;  %v983_v25 = vld [vmem:[%s1972_s11 + $0xb0] sm:$0xff] }
  0x28   : > { %669 = vmatmul.mubr.f32.vlgmr.msra.gmra.mrb[0].mxu1 %v561_v35  ;;  %1412 = vset.pattern.permute.xlu0 %v1425_v21  ;;  %v984_v26 = vld [vmem:[%s1972_s11 + $0xb8] sm:$0xff]  ;;  %v1374_v27 = vpack.c.bf16 %v966_v24, %v965_v23  ;;  %v967_v29 = vld [vmem:[%s1972_s11 + $0x30] sm:$0xff]  ;;  %v985_v31 = vld [vmem:[%s1972_s11 + $0xc0] sm:$0xff] }
  0x29   : > { %673 = vmatprep.mubr.f32.mxu1 %v564_v36  ;;  %1367 = vmatpush3.bf16.msra.mxu1 %v1366_v12  ;;  %v1376_v28 = vpack.c.bf16 %v984_v26, %v983_v25  ;;  %v968_v30 = vld [vmem:[%s1972_s11 + $0x38] sm:$0xff]  ;;  %v986_v32 = vld [vmem:[%s1972_s11 + $0xc8] sm:$0xff]  ;;  %v969_v35 = vld [vmem:[%s1972_s11 + $0x40] sm:$0xff] }
  0x2a   : > { %1299 = vmatpush3.bf16.msra.mxu0 %v1298_v37  ;;  %1414 = vset.pattern.permute.xlu1 %v1425_v21  ;;  %v1378_v33 = vpack.c.bf16 %v968_v30, %v967_v29  ;;  %v1380_v34 = vpack.c.bf16 %v986_v32, %v985_v31  ;;  %v970_v36 = vld [vmem:[%s1972_s11 + $0x48] sm:$0xff]  ;;  %v987_v37 = vld [vmem:[%s1972_s11 + $0xd0] sm:$0xff]  ;;  %v1143_v42 = vld [vmem:[%s1967_s6] ss:$0 sm:$0xff] }
  0x2b   : > { %1333 = vmatprep.subr.bf16.mxu0 %v1332_v38  ;;  %915 = vperm.xlu0 %1412, %v681_v4   ;;  %v988_v38 = vld [vmem:[%s1972_s11 + $0xd8] sm:$0xff]  ;;  %v1382_v39 = vpack.c.bf16 %v970_v36, %v969_v35  ;;  %v689_v58 = vld [vmem:[%s1968_s7 + $0x30] sm:$0xff]  ;;  %v692_v61 = vld [vmem:[%s1968_s7 + $0x48] sm:$0xff]  ;;  %v894_v35 = vlaneseq }
  0x2c   : > { %674 = vmatmul.mubr.f32.gmra.mrb[2].mxu1 %v563_v43  ;;  %919 = vperm.xlu1 %1414, %v682_v5   ;;  %v1384_v40 = vpack.c.bf16 %v988_v38, %v987_v37  ;;  %v690_v48 = vld [vmem:[%s1968_s7 + $0x38] sm:$0xff]  ;;  %v691_v5 = vld [vmem:[%s1968_s7 + $0x40] sm:$0xff]  ;;  %v693_v6 = vld [vmem:[%s1968_s7 + $0x50] sm:$0xff] }
  0x2d   : > { %549 = vmatmul.mubr.f32.vlgmr.msra.gmra.mrb[0].mxu0 %v441_v44  ;;  %1369 = vmatprep.subr.bf16.mxu1 %v1368_v19  ;;  %v694_v62 = vld [vmem:[%s1968_s7 + $0x58] sm:$0xff]  ;;  %v696_v9 = vld [vmem:[%s1968_s7 + $0x68] sm:$0xff]  ;;  %v1142_v11 = vld [vmem:[%s1965_s4] ss:$0 sm:$0xff]  ;;  %v1358_v12 = vpack.c.bf16 %v693_v6, %v691_v5  ;;  %v895_v36 = vshrl.u32 %v894_v35, 7 }
  0x2e   : > { %553 = vmatprep.mubr.f32.mxu0 %v444_v46  ;;  %1335 = vmatpush1.bf16.msra.mxu0 %v1334_v45  ;;  %v683_v45 = vld [vmem:[%s1968_s7] sm:$0xff]  ;;  %v685_v46 = vld [vmem:[%s1968_s7 + $0x10] sm:$0xff]  ;;  %v1356_v4 = vpack.c.bf16 %v694_v62, %v692_v61  ;;  %v698_v10 = vld [vmem:[%s1968_s7 + $0x78] sm:$0xff] }
  0x2f   : > { %1337 = vmatprep.subr.bf16.mxu0 %v1336_v47  ;;  %1371 = vmatpush3.bf16.msra.mxu1 %v1370_v20  ;;  %v688_v47 = vld [vmem:[%s1968_s7 + $0x28] sm:$0xff]  ;;  %v1350_v51 = vpack.c.bf16 %v685_v46, %v683_v45  ;;  %v1360_v13 = vpack.c.bf16 %v698_v10, %v696_v9  ;;  %v695_v14 = vld [vmem:[%s1968_s7 + $0x60] sm:$0xff]  ;;  %v697_v15 = vld [vmem:[%s1968_s7 + $0x70] sm:$0xff]  ;;  %v896_v38 = vsub.s32 0, %v895_v36 }
  0x30   : > { %1373 = vmatprep.subr.bf16.mxu1 %v1372_v22  ;;  %v1352_v56 = vpack.c.bf16 %v690_v48, %v688_v47  ;;  %v1362_v17 = vpack.c.bf16 %v697_v15, %v695_v14  ;;  %v971_v21 = vld [vmem:[%s1972_s11 + $0x50] sm:$0xff]  ;;  %v972_v22 = vld [vmem:[%s1972_s11 + $0x58] sm:$0xff]  ;;  %v989_v24 = vld [vmem:[%s1972_s11 + $0xe0] sm:$0xff] }
  0x31   : > { %554 = vmatmul.mubr.f32.gmra.mrb[2].mxu0 %v443_v52  ;;  %v1386_v23 = vpack.c.bf16 %v972_v22, %v971_v21  ;;  %v973_v26 = vld [vmem:[%s1972_s11 + $0x60] sm:$0xff]  ;;  %v991_v29 = vld [vmem:[%s1972_s11 + $0xf0] sm:$0xff]  ;;  %v992_v30 = vld [vmem:[%s1972_s11 + $0xf8] sm:$0xff] }
  0x32   : > { %1339 = vmatpush1.bf16.msra.mxu0 %v1338_v53  ;;  %786 = vmatprep.mubr.f32.mxu0 %v1423_v3  ;;  %v1392_v31 = vpack.c.bf16 %v992_v30, %v991_v29  ;;  %v975_v32 = vld [vmem:[%s1972_s11 + $0x70] sm:$0xff]  ;;  %v941_v48 = vld [vmem:[%s1971_s10] sm:$0x3] }
  0x33   : > { %1341 = vmatprep.subr.bf16.mxu0 %v1340_v54  ;;  %1375 = vmatpush3.bf16.msra.mxu1 %v1374_v27  ;;  %v974_v27 = vld [vmem:[%s1972_s11 + $0x68] sm:$0xff] }
  0x34   : > { %1377 = vmatprep.subr.bf16.mxu1 %v1376_v28  ;;  %v1390_v28 = vpack.c.bf16 %v974_v27, %v973_v26 }
  0x36   : > { %1343 = vmatpush1.bf16.msra.mxu0 %v1342_v57  ;;  %v687_v57 = vld [vmem:[%s1968_s7 + $0x20] sm:$0xff] }
  0x37   : > { %1345 = vmatprep.subr.bf16.mxu0 %v1344_v60  ;;  %1379 = vmatpush3.bf16.msra.mxu1 %v1378_v33  ;;  %v1354_v0 = vpack.c.bf16 %v689_v58, %v687_v57  ;;  %v976_v33 = vld [vmem:[%s1972_s11 + $0x78] sm:$0xff] }
  0x38   : > { %1381 = vmatprep.subr.bf16.mxu1 %v1380_v34  ;;  %v1394_v34 = vpack.c.bf16 %v976_v33, %v975_v32 }
  0x3a   : > { %1347 = vmatpush1.bf16.msra.mxu0 %v1346_v63 }
  0x3b   : > { %1349 = vmatprep.subr.bf16.mxu0 %v1348_v2  ;;  %1383 = vmatpush3.bf16.msra.mxu1 %v1382_v39  ;;  %v900_v39 = vsub.s32 1, %v895_v36 }
  0x3c   : > { %1385 = vmatprep.subr.bf16.mxu1 %v1384_v40  ;;  %v882_v40 = vld [vmem:[%s1970_s9] ss:$2 sm:$0x3] }
  0x3d   : > { %v901_v45 = vrot.slane %v882_v40, %v900_v39 }
  0x3f   : > { %1387 = vmatpush3.bf16.msra.mxu1 %v1386_v23 }
  0xa3   : > { %v886_v37 = vpop.permute.xlu0 %885 }
  0xaa   : > { %v916_v47 = vpop.permute.xlu0 %915 }
  0xfb   : > { %v1224_v41 = vpop.f32.mrb[0].mxu1 }
  0xfc   : > { %v1225_v43 = vpop.f32.mrb[1].mxu1 }
  0xfd   : > { %v1226_v44 = vadd.f32 %v1225_v43, %v1224_v41  ;;  %v1148_v41 = vld [vmem:[%s1970_s9 + $0x1] ss:$2 sm:$0x3]  ;;  %v897_v43 = vrot.slane %v882_v40, %v896_v38 }
  0xfe   : > { %v930_v46 = vrot.slane %v1148_v41, %v900_v39 }
  0xff   : > { %v671_v49 = vadd.f32 %v1226_v44, %v1143_v42  ;;  %v1227_v50 = vpop.f32.mrb[2].mxu1  ;;  %v926_v44 = vrot.slane %v1148_v41, %v896_v38 }
 0x100   : > { %v1228_v52 = vpop.f32.mrb[3].mxu1  ;;  %v1186_v53 = vpop.f32.mrb[0].mxu0 }
 0x101   : > { %v679_v54 = vmax.f32 %v671_v49, 0.0  ;;  %v1229_v55 = vadd.f32 %v1228_v52, %v1227_v50  ;;  %v1187_v59 = vpop.f32.mrb[1].mxu0  ;;  %v904_v49 = vmul.f32 %v897_v43, %v886_v37  ;;  %v933_v50 = vmul.f32 %v926_v44, %v916_v47 }
 0x102   : > { %v1188_v60 = vadd.f32 %v1187_v59, %v1186_v53  ;;  %v934_v52 = vmul.f32 %v930_v46, %v916_v47  ;;  %v950_v59 = vrot.slane %v941_v48, %v900_v39 }
 0x103   : > { %1144 = vmatmul.mubr.msk.f32.vlgmr.msra.gmra.mrb[4].mxu0 %vm715_vm0, %v679_v54  ;;  %v676_v63 = vadd.f32 %v1229_v55, %v1143_v42  ;;  %v891_v42 = vpop.permute.xlu1 %890 }
 0x104   : > { %1351 = vmatpush1.bf16.msra.mxu0 %v1350_v51  ;;  %792 = vmatprep.mubr.f32.mxu0 %v1423_v3  ;;  %v1189_v1 = vpop.f32.mrb[2].mxu0  ;;  %v551_v16 = vadd.f32 %v1188_v60, %v1142_v11  ;;  %v905_v51 = vmul.f32 %v901_v45, %v886_v37  ;;  %v906_v60 = vmul.f32 %v897_v43, %v891_v42 }
 0x105   : > { %v680_v2 = vmax.f32 %v676_v63, 0.0  ;;  %1353 = vmatprep.subr.bf16.mxu0 %v1352_v56  ;;  %v1190_v7 = vpop.f32.mrb[3].mxu0  ;;  %v946_v56 = vrot.slane %v941_v48, %v896_v38  ;;  %v907_v63 = vmul.f32 %v901_v45, %v891_v42 }
 0x106   : > { %v1191_v8 = vadd.f32 %v1190_v7, %v1189_v1  ;;  %v559_v18 = vmax.f32 %v551_v16, 0.0 }
 0x107   : > { %1145 = vmatmul.mubr.msk.f32.gmra.mrb[6].mxu0 %vm715_vm0, %v680_v2  ;;  %v920_v54 = vpop.permute.xlu1 %919 }
 0x108   : > { %1355 = vmatpush1.bf16.msra.mxu0 %v1354_v0  ;;  %869 = vmatprep.mubr.f32.mxu0 %v1423_v3  ;;  %v556_v19 = vadd.f32 %v1191_v8, %v1142_v11  ;;  %v935_v62 = vmul.f32 %v926_v44, %v920_v54  ;;  %v936_v1 = vmul.f32 %v930_v46, %v920_v54 }
 0x109   : > { %1357 = vmatprep.subr.bf16.mxu0 %v1356_v4 }
 0x10a   : > { %v560_v20 = vmax.f32 %v556_v19, 0.0 }
 0x10c   : > { %1359 = vmatpush1.bf16.msra.mxu0 %v1358_v12 }
 0x10d   : > { %1361 = vmatprep.subr.bf16.mxu0 %v1360_v13 }
 0x110   : > { %1363 = vmatpush1.bf16.msra.mxu0 %v1362_v17 }
 0x113   : > { %1146 = vmatmul.mubr.msk.f32.vlgmr.msra.gmra.mrb[4].mxu0 %vm715_vm0, %v559_v18  ;;  %v1149_v18 = vld [vmem:[%s1973_s12] ss:$0 sm:$0xff] }
 0x114   : > { %875 = vmatprep.mubr.f32.mxu0 %v1423_v3  ;;  %v990_v3 = vld [vmem:[%s1972_s11 + $0xe8] sm:$0xff] }
 0x115   : > { %v1388_v25 = vpack.c.bf16 %v990_v3, %v989_v24 }
 0x117   : > { %1147 = vmatmul.mubr.msk.f32.gmra.mrb[6].mxu0 %vm715_vm0, %v560_v20  ;;  %1389 = vmatprep.subr.bf16.mxu1 %v1388_v25 }
 0x118   : > { %1391 = vmatpush3.bf16.msra.mxu1 %v1390_v28 }
 0x119   : > { %1393 = vmatprep.subr.bf16.mxu1 %v1392_v31 }
 0x11c   : > { %1395 = vmatpush3.bf16.msra.mxu1 %v1394_v34 }
 0x1e6   : > { %v871_v53 = vpop.f32.mrb[4].mxu0 }
 0x1e7   : > { %v908_v55 = vadd.f32 %v904_v49, %v871_v53  ;;  %v873_v57 = vpop.f32.mrb[5].mxu0 }
 0x1e8   : > { %v909_v58 = vadd.f32 %v905_v51, %v873_v57 }
 0x1e9   : > { %v937_v61 = vadd.f32 %v933_v50, %v908_v55 }
 0x1ea   : > { %v938_v0 = vadd.f32 %v934_v52, %v909_v58  ;;  %v877_v2 = vpop.f32.mrb[6].mxu0 }
 0x1eb   : > { %v953_v4 = vadd.f32 %v946_v56, %v937_v61  ;;  %v910_v5 = vadd.f32 %v906_v60, %v877_v2  ;;  %v879_v6 = vpop.f32.mrb[7].mxu0 }
 0x1ec   : > { %v911_v7 = vadd.f32 %v907_v63, %v879_v6  ;;  %v954_v8 = vadd.f32 %v950_v59, %v938_v0 }
 0x1ed   : > { %v939_v9 = vadd.f32 %v935_v62, %v910_v5  ;;  %v957_v12 = vmax.f32 %v953_v4, 0.0 }
 0x1ee   : > { %v940_v10 = vadd.f32 %v936_v1, %v911_v7  ;;  %v958_v11 = vmax.f32 %v954_v8, 0.0 }
 0x1ef   : > { %v955_v13 = vadd.f32 %v946_v56, %v939_v9 }
 0x1f0   : > { %1064 = vmatprep.mubr.f32.mxu1 %v958_v11  ;;  %v956_v14 = vadd.f32 %v950_v59, %v940_v10 }
 0x1f1   : > { %1065 = vmatmul.mubr.f32.vlgmr.msra.gmra.mrb[4].mxu1 %v957_v12  ;;  %v959_v16 = vmax.f32 %v955_v13, 0.0 }
 0x1f2   : > { %v960_v15 = vmax.f32 %v956_v14, 0.0 }
 0x1f4   : > { %1069 = vmatprep.mubr.f32.mxu1 %v960_v15 }
 0x1f5   : > { %1070 = vmatmul.mubr.f32.gmra.mrb[6].mxu1 %v959_v16 }
 0x2c4   : > { %v1262_v17 = vpop.f32.mrb[4].mxu1 }
 0x2c5   : > { %v1263_v19 = vpop.f32.mrb[5].mxu1 }
 0x2c6   : > { %v1264_v20 = vadd.f32 %v1263_v19, %v1262_v17 }
 0x2c8   : > { %v1067_v21 = vadd.f32 %v1264_v20, %v1149_v18  ;;  %v1265_v22 = vpop.f32.mrb[6].mxu1 }
 0x2c9   : > { %v1266_v23 = vpop.f32.mrb[7].mxu1 }
 0x2ca   : > { %1076 = vst.msk [vmem:[%s440_s20] sm:$0xff] %vm1075_vm1, %v1067_v21  ;;  %v1267_v24 = vadd.f32 %v1266_v23, %v1265_v22 }
 0x2cc   : > { %v1072_v3 = vadd.f32 %v1267_v24, %v1149_v18 }
 0x2ce   : > { %1077 = vst.msk [vmem:[%s440_s20 + $0x8] sm:$0xff] %vm1075_vm1, %v1072_v3 }
 0x2cf PF: > { %s23_s25 = sadd.s32 1, %s1421_s25  }
 0x2d0   : > { %p20_p4 = scmp.ge.s32.totalorder %s23_s25, 4  }
 0x2d2   :  { %22 = sbr.rel (!%p20_p4) target bundleno = 1 (0x1), region = 103 }

// kernel: deformable_detr_forward.4
= control target key start
LH: loop header
LB: loop body
LE: loop exit
PB: predicated region body
PF: predicated region fallthrough
CT: control target
= control target key end

     0   :  { %s9312_s18 = smov 0   ;;  %s12229_s0 = inlined_call_operand.vmem [shape: bf16[4,18,16,192], index: 0, kind: input, shape index: {}]   ;;  %s12230_s1 = inlined_call_operand.vmem [shape: bf16[3,192,1024], index: 1, kind: input, shape index: {}]   ;;  %s12231_s2 = inlined_call_operand.vmem [shape: f32[1,1024], index: 2, kind: input, shape index: {}]   ;;  %s12232_s3 = inlined_call_operand.vmem [shape: bf16[1024,9], index: 3, kind: input, shape index: {}]   ;;  %s12233_s4 = inlined_call_operand.vmem [shape: f32[1,9], index: 4, kind: input, shape index: {}]   ;;  %s12234_s5 = inlined_call_operand.vmem [shape: f32[4,256,9], index: 5, kind: output, shape index: {}]  }
   0x1 LB: > { %s7203_s19 = sadd.s32 4294967295, %s9280_s18   ;;  %p7207_p0 = scmp.ge.s32.totalorder %s9280_s18, 1  ;;  %s9280_s18 = sphi %s9312_s18, %s15_s18  }
   0x2   : > { %p187_p1 = scmp.lt.s32.totalorder %s9280_s18, 5 }
   0x4   : > { %p188_p2 = pnand %p7207_p0, %p187_p1 }
   0x5   : > { %v7243_v0 = vld [vmem:[%s12230_s1 + $0x300] sm:$0xff] (!%p188_p2)  ;;  %v7244_v2 = vld [vmem:[%s12230_s1 + $0x308] sm:$0xff] (!%p188_p2)  ;;  %p9340_p3 = scmp.lt.s32.totalorder (!%p188_p2), %s7203_s19, 3  ;;  %vm1108_vm0 = vcmask (!%p188_p2), 523264   ;;  %vm7115_vm2 = vcmask (!%p188_p2), 72704  }
   0x6   : > { %191 = sbr.rel (%p188_p2) target bundleno = 1298 (0x512), region = 40  ;;  %v7247_v1 = vld [vmem:[%s12230_s1 + $0x320] sm:$0xff] (!%p188_p2)  ;;  %v7248_v4 = vld [vmem:[%s12230_s1 + $0x328] sm:$0xff] (!%p188_p2) }
   0x7   : > { %v7372_v3 = vcombine.high (!%p188_p2), %v7243_v0, %v7247_v1  ;;  %v7371_v5 = vcombine.low (!%p188_p2), %v7243_v0, %v7247_v1  ;;  %v7251_v6 = vld [vmem:[%s12230_s1 + $0x340] sm:$0xff] (!%p188_p2)  ;;  %v7374_v8 = vcombine.high (!%p188_p2), %v7244_v2, %v7248_v4  ;;  %v7373_v9 = vcombine.low (!%p188_p2), %v7244_v2, %v7248_v4  ;;  %v7252_v11 = vld [vmem:[%s12230_s1 + $0x348] sm:$0xff] (!%p188_p2) }
   0x8   : > { %v7255_v7 = vld [vmem:[%s12230_s1 + $0x360] sm:$0xff] (!%p188_p2)  ;;  %v7256_v12 = vld [vmem:[%s12230_s1 + $0x368] sm:$0xff] (!%p188_p2) }
   0x9   : > { %v7380_v10 = vcombine.high (!%p188_p2), %v7251_v6, %v7255_v7  ;;  %v7259_v13 = vld [vmem:[%s12230_s1 + $0x380] sm:$0xff] (!%p188_p2)  ;;  %1157 = vmatprep.subr.bf16.mxu0 (!%p188_p2), %v7372_v3  ;;  %v7382_v14 = vcombine.high (!%p188_p2), %v7252_v11, %v7256_v12  ;;  %v7260_v16 = vld [vmem:[%s12230_s1 + $0x388] sm:$0xff] (!%p188_p2)  ;;  %1350 = vmatprep.subr.bf16.mxu1 (!%p188_p2), %v7374_v8  ;;  %v7379_v18 = vcombine.low (!%p188_p2), %v7251_v6, %v7255_v7 }
   0xa   : > { %v7263_v15 = vld [vmem:[%s12230_s1 + $0x3a0] sm:$0xff] (!%p188_p2)  ;;  %v7264_v17 = vld [vmem:[%s12230_s1 + $0x3a8] sm:$0xff] (!%p188_p2)  ;;  %1158 = vmatpush1.bf16.msra.mxu0 (!%p188_p2), %v7371_v5  ;;  %1351 = vmatpush1.bf16.msra.mxu1 (!%p188_p2), %v7373_v9  ;;  %v7381_v19 = vcombine.low (!%p188_p2), %v7252_v11, %v7256_v12 }
   0xb   : > { %1159 = vmatprep.subr.bf16.mxu0 (!%p188_p2), %v7380_v10  ;;  %v7388_v20 = vcombine.high (!%p188_p2), %v7259_v13, %v7263_v15  ;;  %1352 = vmatprep.subr.bf16.mxu1 (!%p188_p2), %v7382_v14  ;;  %v7390_v21 = vcombine.high (!%p188_p2), %v7260_v16, %v7264_v17  ;;  %v7267_v22 = vld [vmem:[%s12230_s1 + $0x3c0] sm:$0xff] (!%p188_p2)  ;;  %v7268_v24 = vld [vmem:[%s12230_s1 + $0x3c8] sm:$0xff] (!%p188_p2)  ;;  %v7387_v26 = vcombine.low (!%p188_p2), %v7259_v13, %v7263_v15 }
   0xc   : > { %v7271_v23 = vld [vmem:[%s12230_s1 + $0x3e0] sm:$0xff] (!%p188_p2)  ;;  %v7272_v25 = vld [vmem:[%s12230_s1 + $0x3e8] sm:$0xff] (!%p188_p2)  ;;  %v7389_v27 = vcombine.low (!%p188_p2), %v7260_v16, %v7264_v17 }
   0xd   : > { %s12237_s19 = smov (!%p9340_p3, %s7203_s19), 3  ;;  %v7396_v28 = vcombine.high %v7267_v22, %v7271_v23  ;;  %v7398_v29 = vcombine.high %v7268_v24, %v7272_v25  ;;  %v7275_v30 = vld [vmem:[%s12230_s1 + $0x400] sm:$0xff]  ;;  %v7276_v32 = vld [vmem:[%s12230_s1 + $0x408] sm:$0xff]  ;;  %v7395_v34 = vcombine.low %v7267_v22, %v7271_v23  ;;  %v7397_v35 = vcombine.low %v7268_v24, %v7272_v25 }
   0xe   : > { %1160 = vmatpush1.bf16.msra.mxu0 %v7379_v18  ;;  %1353 = vmatpush1.bf16.msra.mxu1 %v7381_v19  ;;  %s9071_s30 = smul.u32 288, %s12237_s19  ;;  %v7279_v31 = vld [vmem:[%s12230_s1 + $0x420] sm:$0xff]  ;;  %v7280_v33 = vld [vmem:[%s12230_s1 + $0x428] sm:$0xff]  ;;  %s8110_s23 = sshll.u32 %s12237_s19, 8 }
   0xf   : > { %1161 = vmatprep.subr.bf16.mxu0 %v7388_v20  ;;  %1354 = vmatprep.subr.bf16.mxu1 %v7390_v21  ;;  %v7404_v36 = vcombine.high %v7275_v30, %v7279_v31  ;;  %v7406_v37 = vcombine.high %v7276_v32, %v7280_v33  ;;  %v7283_v38 = vld [vmem:[%s12230_s1 + $0x440] sm:$0xff]  ;;  %v7284_v40 = vld [vmem:[%s12230_s1 + $0x448] sm:$0xff]  ;;  %v7403_v42 = vcombine.low %v7275_v30, %v7279_v31  ;;  %v7245_v30 = vld [vmem:[%s12230_s1 + $0x310] sm:$0xff]  ;;  %s12066_s26 = scalar_lea.vmem %s12234_s5, %s8110_s23 }
  0x10   : > { %s9396_s16 = scalar_lea.vmem %s12229_s0, %s9071_s30  ;;  %v7287_v39 = vld [vmem:[%s12230_s1 + $0x460] sm:$0xff]  ;;  %v7288_v41 = vld [vmem:[%s12230_s1 + $0x468] sm:$0xff]  ;;  %v7405_v44 = vcombine.low %v7276_v32, %v7280_v33  ;;  %v7249_v32 = vld [vmem:[%s12230_s1 + $0x330] sm:$0xff] }
  0x11   : > { %v9080_v43 = vld [vmem:[%s9396_s16 + $0x14] ss:$8 sps:$4 sm:$0xff]   ;;  %v7412_v45 = vcombine.high %v7283_v38, %v7287_v39  ;;  %v7414_v46 = vcombine.high %v7284_v40, %v7288_v41  ;;  %v7291_v47 = vld [vmem:[%s12230_s1 + $0x480] sm:$0xff]  ;;  %v7292_v49 = vld [vmem:[%s12230_s1 + $0x488] sm:$0xff]  ;;  %v7411_v51 = vcombine.low %v7283_v38, %v7287_v39  ;;  %v7413_v52 = vcombine.low %v7284_v40, %v7288_v41 }
  0x12   : > { %1162 = vmatpush1.bf16.msra.mxu0 %v7387_v26  ;;  %1355 = vmatpush1.bf16.msra.mxu1 %v7389_v27  ;;  %v7295_v48 = vld [vmem:[%s12230_s1 + $0x4a0] sm:$0xff]  ;;  %v7296_v50 = vld [vmem:[%s12230_s1 + $0x4a8] sm:$0xff]  ;;  %v7246_v33 = vld [vmem:[%s12230_s1 + $0x318] sm:$0xff] }
  0x13   : > { %1163 = vmatprep.subr.bf16.mxu0 %v7396_v28  ;;  %1356 = vmatprep.subr.bf16.mxu1 %v7398_v29  ;;  %v7420_v53 = vcombine.high %v7291_v47, %v7295_v48  ;;  %v7422_v54 = vcombine.high %v7292_v49, %v7296_v50  ;;  %v7299_v55 = vld [vmem:[%s12230_s1 + $0x4c0] sm:$0xff]  ;;  %v7300_v57 = vld [vmem:[%s12230_s1 + $0x4c8] sm:$0xff]  ;;  %v7419_v59 = vcombine.low %v7291_v47, %v7295_v48  ;;  %v9498_v38 = vld [vmem:[%s9396_s16 + $0x10] ss:$8 sps:$4 sm:$0xff]  }
  0x14   : > { %7467 = vmatprep.mubr.msk.bf16.mxu0 %vm1108_vm0, %v9080_v43  ;;  %7483 = vmatprep.mubr.msk.bf16.mxu1 %vm1108_vm0, %v9080_v43  ;;  %v7303_v56 = vld [vmem:[%s12230_s1 + $0x4e0] sm:$0xff]  ;;  %v7304_v58 = vld [vmem:[%s12230_s1 + $0x4e8] sm:$0xff]  ;;  %v7421_v60 = vcombine.low %v7292_v49, %v7296_v50  ;;  %v7253_v40 = vld [vmem:[%s12230_s1 + $0x350] sm:$0xff] }
  0x15   : > { %v7428_v61 = vcombine.high %v7299_v55, %v7303_v56  ;;  %v7430_v62 = vcombine.high %v7300_v57, %v7304_v58  ;;  %v7307_v63 = vld [vmem:[%s12230_s1 + $0x500] sm:$0xff]  ;;  %v7308_v1 = vld [vmem:[%s12230_s1 + $0x508] sm:$0xff]  ;;  %v7427_v3 = vcombine.low %v7299_v55, %v7303_v56  ;;  %v7429_v4 = vcombine.low %v7300_v57, %v7304_v58  ;;  %v7257_v41 = vld [vmem:[%s12230_s1 + $0x370] sm:$0xff] }
  0x16   : > { %1164 = vmatpush1.bf16.msra.mxu0 %v7395_v34  ;;  %1357 = vmatpush1.bf16.msra.mxu1 %v7397_v35  ;;  %v7311_v0 = vld [vmem:[%s12230_s1 + $0x520] sm:$0xff]  ;;  %v7312_v2 = vld [vmem:[%s12230_s1 + $0x528] sm:$0xff]  ;;  %v7250_v34 = vld [vmem:[%s12230_s1 + $0x338] sm:$0xff]  ;;  %v7384_v47 = vcombine.high %v7253_v40, %v7257_v41 }
  0x17   : > { %1165 = vmatprep.subr.bf16.mxu0 %v7404_v36  ;;  %1358 = vmatprep.subr.bf16.mxu1 %v7406_v37  ;;  %v7436_v5 = vcombine.high %v7307_v63, %v7311_v0  ;;  %v7438_v6 = vcombine.high %v7308_v1, %v7312_v2  ;;  %v7315_v7 = vld [vmem:[%s12230_s1 + $0x540] sm:$0xff]  ;;  %v7316_v9 = vld [vmem:[%s12230_s1 + $0x548] sm:$0xff]  ;;  %v7435_v11 = vcombine.low %v7307_v63, %v7311_v0  ;;  %v7254_v43 = vld [vmem:[%s12230_s1 + $0x358] sm:$0xff] }
  0x18   : > { %v7319_v8 = vld [vmem:[%s12230_s1 + $0x560] sm:$0xff]  ;;  %v7320_v10 = vld [vmem:[%s12230_s1 + $0x568] sm:$0xff]  ;;  %v7437_v12 = vcombine.low %v7308_v1, %v7312_v2  ;;  %v7376_v37 = vcombine.high %v7245_v30, %v7249_v32  ;;  %v7378_v39 = vcombine.high %v7246_v33, %v7250_v34  ;;  %v7261_v48 = vld [vmem:[%s12230_s1 + $0x390] sm:$0xff] }
  0x19   : > { %v7444_v13 = vcombine.high %v7315_v7, %v7319_v8  ;;  %v7446_v14 = vcombine.high %v7316_v9, %v7320_v10  ;;  %v7323_v15 = vld [vmem:[%s12230_s1 + $0x580] sm:$0xff]  ;;  %v7324_v17 = vld [vmem:[%s12230_s1 + $0x588] sm:$0xff]  ;;  %v7443_v19 = vcombine.low %v7315_v7, %v7319_v8  ;;  %v7445_v20 = vcombine.low %v7316_v9, %v7320_v10  ;;  %v7265_v49 = vld [vmem:[%s12230_s1 + $0x3b0] sm:$0xff] }
  0x1a   : > { %1166 = vmatpush1.bf16.msra.mxu0 %v7403_v42  ;;  %1359 = vmatpush1.bf16.msra.mxu1 %v7405_v44  ;;  %v7327_v16 = vld [vmem:[%s12230_s1 + $0x5a0] sm:$0xff]  ;;  %v7328_v18 = vld [vmem:[%s12230_s1 + $0x5a8] sm:$0xff]  ;;  %v7375_v42 = vcombine.low %v7245_v30, %v7249_v32  ;;  %v7258_v44 = vld [vmem:[%s12230_s1 + $0x378] sm:$0xff]  ;;  %v7392_v56 = vcombine.high %v7261_v48, %v7265_v49 }
  0x1b   : > { %1167 = vmatprep.subr.bf16.mxu0 %v7412_v45  ;;  %1360 = vmatprep.subr.bf16.mxu1 %v7414_v46  ;;  %v7452_v21 = vcombine.high %v7323_v15, %v7327_v16  ;;  %v7454_v22 = vcombine.high %v7324_v17, %v7328_v18  ;;  %v7331_v23 = vld [vmem:[%s12230_s1 + $0x5c0] sm:$0xff]  ;;  %v7332_v25 = vld [vmem:[%s12230_s1 + $0x5c8] sm:$0xff]  ;;  %v7451_v27 = vcombine.low %v7323_v15, %v7327_v16  ;;  %v7262_v50 = vld [vmem:[%s12230_s1 + $0x398] sm:$0xff] }
  0x1c   : > { %v7335_v24 = vld [vmem:[%s12230_s1 + $0x5e0] sm:$0xff]  ;;  %v7336_v26 = vld [vmem:[%s12230_s1 + $0x5e8] sm:$0xff]  ;;  %v7453_v28 = vcombine.low %v7324_v17, %v7328_v18  ;;  %v7377_v45 = vcombine.low %v7246_v33, %v7250_v34  ;;  %v7385_v55 = vcombine.low %v7254_v43, %v7258_v44  ;;  %v7269_v57 = vld [vmem:[%s12230_s1 + $0x3d0] sm:$0xff] }
  0x1d   : > { %v7460_v29 = vcombine.high %v7331_v23, %v7335_v24  ;;  %v7462_v31 = vcombine.high %v7332_v25, %v7336_v26  ;;  %v7459_v35 = vcombine.low %v7331_v23, %v7335_v24  ;;  %v7461_v36 = vcombine.low %v7332_v25, %v7336_v26  ;;  %v9513_v46 = vld [vmem:[%s9396_s16 + $0x24] ss:$8 sps:$4 sm:$0xff]   ;;  %v7273_v58 = vld [vmem:[%s12230_s1 + $0x3f0] sm:$0xff]  ;;  %v7270_v63 = vld [vmem:[%s12230_s1 + $0x3d8] sm:$0xff] }
  0x1e   : > { %1168 = vmatpush1.bf16.msra.mxu0 %v7411_v51  ;;  %1361 = vmatpush1.bf16.msra.mxu1 %v7413_v52  ;;  %v7386_v51 = vcombine.high %v7254_v43, %v7258_v44  ;;  %v7266_v52 = vld [vmem:[%s12230_s1 + $0x3b8] sm:$0xff]  ;;  %v9566_v2 = vld [vmem:[%s12230_s1 + $0x8] sm:$0xff]  ;;  %v7281_v7 = vld [vmem:[%s12230_s1 + $0x430] sm:$0xff]  ;;  %v7400_v9 = vcombine.high %v7269_v57, %v7273_v58 }
  0x1f   : > { %1169 = vmatprep.subr.bf16.mxu0 %v7420_v53  ;;  %1362 = vmatprep.subr.bf16.mxu1 %v7422_v54  ;;  %v7383_v53 = vcombine.low %v7253_v40, %v7257_v41  ;;  %v9532_v54 = vld [vmem:[%s9396_s16 + $0x20] ss:$8 sps:$4 sm:$0xff]   ;;  %v7274_v0 = vld [vmem:[%s12230_s1 + $0x3f8] sm:$0xff]  ;;  %v7393_v8 = vcombine.low %v7262_v50, %v7266_v52  ;;  %v7285_v15 = vld [vmem:[%s12230_s1 + $0x450] sm:$0xff] }
  0x20   : > { %v7402_v10 = vcombine.high %v7270_v63, %v7274_v0  ;;  %v7289_v16 = vld [vmem:[%s12230_s1 + $0x470] sm:$0xff]  ;;  %v9603_v17 = vld [vmem:[%s9396_s16 + $0x44] ss:$8 sps:$4 sm:$0xff]   ;;  %v7401_v18 = vcombine.low %v7270_v63, %v7274_v0  ;;  %v7298_v30 = vld [vmem:[%s12230_s1 + $0x4b8] sm:$0xff] }
  0x21   : > { %v7293_v24 = vld [vmem:[%s12230_s1 + $0x490] sm:$0xff]  ;;  %v7415_v32 = vcombine.low %v7285_v15, %v7289_v16  ;;  %v7306_v40 = vld [vmem:[%s12230_s1 + $0x4f8] sm:$0xff] }
  0x22   : > { %1170 = vmatpush1.bf16.msra.mxu0 %v7419_v59  ;;  %1363 = vmatpush1.bf16.msra.mxu1 %v7421_v60  ;;  %v9543_v59 = vld [vmem:[%s12230_s1] sm:$0xff]  ;;  %v7297_v25 = vld [vmem:[%s12230_s1 + $0x4b0] sm:$0xff]  ;;  %v7322_v63 = vld [vmem:[%s12230_s1 + $0x578] sm:$0xff] }
  0x23   : > { %1171 = vmatprep.subr.bf16.mxu0 %v7428_v61  ;;  %1364 = vmatprep.subr.bf16.mxu1 %v7430_v62  ;;  %v9548_v60 = vld [vmem:[%s12230_s1 + $0x20] sm:$0xff]  ;;  %v9553_v61 = vld [vmem:[%s9396_s16 + $0x34] ss:$8 sps:$4 sm:$0xff]   ;;  %v7394_v62 = vcombine.high %v7262_v50, %v7266_v52 }
  0x24   : > { %v7563_v1 = vcombine.low %v9543_v59, %v9548_v60  ;;  %v7301_v33 = vld [vmem:[%s12230_s1 + $0x4d0] sm:$0xff]  ;;  %v7314_v50 = vld [vmem:[%s12230_s1 + $0x538] sm:$0xff] }
  0x25   : > { %v7305_v34 = vld [vmem:[%s12230_s1 + $0x4f0] sm:$0xff] }
  0x26   : > { %1172 = vmatpush1.bf16.msra.mxu0 %v7427_v3  ;;  %1365 = vmatpush1.bf16.msra.mxu1 %v7429_v4  ;;  %v9571_v3 = vld [vmem:[%s12230_s1 + $0x28] sm:$0xff]  ;;  %v7309_v43 = vld [vmem:[%s12230_s1 + $0x510] sm:$0xff]  ;;  %v7431_v52 = vcombine.low %v7301_v33, %v7305_v34 }
  0x27   : > { %1173 = vmatprep.subr.bf16.mxu0 %v7436_v5  ;;  %1366 = vmatprep.subr.bf16.mxu1 %v7438_v6  ;;  %v7565_v4 = vcombine.low %v9566_v2, %v9571_v3  ;;  %v7391_v5 = vcombine.low %v7261_v48, %v7265_v49  ;;  %v7277_v6 = vld [vmem:[%s12230_s1 + $0x410] sm:$0xff]  ;;  %v7310_v49 = vld [vmem:[%s12230_s1 + $0x518] sm:$0xff] }
  0x28   : > { %v7407_v23 = vcombine.low %v7277_v6, %v7281_v7  ;;  %v7313_v44 = vld [vmem:[%s12230_s1 + $0x530] sm:$0xff]  ;;  %v7442_v0 = vcombine.high %v7310_v49, %v7314_v50 }
  0x2a   : > { %1174 = vmatpush1.bf16.msra.mxu0 %v7435_v11  ;;  %1367 = vmatpush1.bf16.msra.mxu1 %v7437_v12  ;;  %v7278_v11 = vld [vmem:[%s12230_s1 + $0x418] sm:$0xff] }
  0x2b   : > { %1175 = vmatprep.subr.bf16.mxu0 %v7444_v13  ;;  %1368 = vmatprep.subr.bf16.mxu1 %v7446_v14  ;;  %v7282_v12 = vld [vmem:[%s12230_s1 + $0x438] sm:$0xff]  ;;  %v7399_v14 = vcombine.low %v7269_v57, %v7273_v58  ;;  %v7440_v58 = vcombine.high %v7309_v43, %v7313_v44 }
  0x2c   : > { %v9594_v13 = vld [vmem:[%s9396_s16 + $0x30] ss:$8 sps:$4 sm:$0xff]   ;;  %v7409_v26 = vcombine.low %v7278_v11, %v7282_v12 }
  0x2e   : > { %1176 = vmatpush1.bf16.msra.mxu0 %v7443_v19  ;;  %1369 = vmatpush1.bf16.msra.mxu1 %v7445_v20  ;;  %v7408_v19 = vcombine.high %v7277_v6, %v7281_v7  ;;  %v7286_v20 = vld [vmem:[%s12230_s1 + $0x458] sm:$0xff]  ;;  %v7325_v6 = vld [vmem:[%s12230_s1 + $0x590] sm:$0xff] }
  0x2f   : > { %1177 = vmatprep.subr.bf16.mxu0 %v7452_v21  ;;  %1370 = vmatprep.subr.bf16.mxu1 %v7454_v22  ;;  %v7290_v21 = vld [vmem:[%s12230_s1 + $0x478] sm:$0xff]  ;;  %v7410_v22 = vcombine.high %v7278_v11, %v7282_v12  ;;  %v7329_v7 = vld [vmem:[%s12230_s1 + $0x5b0] sm:$0xff] }
  0x30   : > { %v7326_v11 = vld [vmem:[%s12230_s1 + $0x598] sm:$0xff] }
  0x31   : > { %v7330_v12 = vld [vmem:[%s12230_s1 + $0x5b8] sm:$0xff] }
  0x32   : > { %1178 = vmatpush1.bf16.msra.mxu0 %v7451_v27  ;;  %1371 = vmatpush1.bf16.msra.mxu1 %v7453_v28  ;;  %v7416_v27 = vcombine.high %v7285_v15, %v7289_v16  ;;  %v7418_v28 = vcombine.high %v7286_v20, %v7290_v21  ;;  %v7333_v16 = vld [vmem:[%s12230_s1 + $0x5d0] sm:$0xff] }
  0x33   : > { %1179 = vmatprep.subr.bf16.mxu0 %v7460_v29  ;;  %1372 = vmatprep.subr.bf16.mxu1 %v7462_v31  ;;  %v7294_v29 = vld [vmem:[%s12230_s1 + $0x498] sm:$0xff]  ;;  %v9630_v31 = vld [vmem:[%s9396_s16 + $0x40] ss:$8 sps:$4 sm:$0xff]  }
  0x34   : > { %v7426_v41 = vcombine.high %v7294_v29, %v7298_v30 }
  0x36   : > { %1180 = vmatpush1.bf16.msra.mxu0 %v7459_v35  ;;  %1373 = vmatpush1.bf16.msra.mxu1 %v7461_v36  ;;  %v9639_v35 = vld [vmem:[%s9396_s16 + $0x54] ss:$8 sps:$4 sm:$0xff]   ;;  %v7417_v36 = vcombine.low %v7286_v20, %v7290_v21  ;;  %v7456_v21 = vcombine.high %v7325_v6, %v7329_v7 }
  0x37   : > { %1543 = vmatprep.subr.bf16.mxu0 %v7376_v37  ;;  %1736 = vmatprep.subr.bf16.mxu1 %v7378_v39  ;;  %v7424_v37 = vcombine.high %v7293_v24, %v7297_v25  ;;  %v7302_v39 = vld [vmem:[%s12230_s1 + $0x4d8] sm:$0xff] }
  0x38   : > { %v7434_v48 = vcombine.high %v7302_v39, %v7306_v40  ;;  %v7433_v57 = vcombine.low %v7302_v39, %v7306_v40  ;;  %v9745_v39 = vld [vmem:[%s9396_s16 + $0x94] ss:$8 sps:$4 sm:$0xff]   ;;  %v9754_v40 = vld [vmem:[%s9396_s16 + $0x90] ss:$8 sps:$4 sm:$0xff]  }
  0x39   : > { %1190 = vmatmul.mubr.bf16.vlgmr.msra.gmra.mrb[0].mxu0 %v9498_v38  ;;  %1383 = vmatmul.mubr.bf16.vlgmr.msra.gmra.mrb[0].mxu1 %v9498_v38 }
  0x3a   : > { %1544 = vmatpush1.bf16.msra.mxu0 %v7375_v42  ;;  %1737 = vmatpush1.bf16.msra.mxu1 %v7377_v45  ;;  %v7423_v42 = vcombine.low %v7293_v24, %v7297_v25  ;;  %v7425_v45 = vcombine.low %v7294_v29, %v7298_v30  ;;  %v7458_v24 = vcombine.high %v7326_v11, %v7330_v12  ;;  %v9726_v29 = vld [vmem:[%s9396_s16 + $0x70] ss:$8 sps:$4 sm:$0xff]  }
  0x3b   : > { %7468 = vmatprep.mubr.msk.bf16.mxu0 %vm1108_vm0, %v9513_v46  ;;  %7484 = vmatprep.mubr.msk.bf16.mxu1 %vm1108_vm0, %v9513_v46  ;;  %v7455_v25 = vcombine.low %v7325_v6, %v7329_v7  ;;  %v271_v6 = vld [vmem:[%s12230_s1 + $0x68] sm:$0xff] }
  0x3c   : > { %1545 = vmatprep.subr.bf16.mxu0 %v7384_v47  ;;  %1738 = vmatprep.subr.bf16.mxu1 %v7386_v51  ;;  %v7432_v47 = vcombine.high %v7301_v33, %v7305_v34  ;;  %v9666_v51 = vld [vmem:[%s9396_s16 + $0x50] ss:$8 sps:$4 sm:$0xff]   ;;  %v7564_v34 = vcombine.high %v9543_v59, %v9548_v60 }
  0x3e   : > { %1546 = vmatpush1.bf16.msra.mxu0 %v7383_v53  ;;  %1739 = vmatpush1.bf16.msra.mxu1 %v7385_v55  ;;  %v7317_v53 = vld [vmem:[%s12230_s1 + $0x550] sm:$0xff] }
  0x3f   : > { %1547 = vmatprep.subr.bf16.mxu0 %v7392_v56  ;;  %1740 = vmatprep.subr.bf16.mxu1 %v7394_v62  ;;  %v7321_v55 = vld [vmem:[%s12230_s1 + $0x570] sm:$0xff]  ;;  %v9675_v56 = vld [vmem:[%s9396_s16 + $0x64] ss:$8 sps:$4 sm:$0xff]   ;;  %v7318_v62 = vld [vmem:[%s12230_s1 + $0x558] sm:$0xff] }
  0x40   : > { %v7447_v15 = vcombine.low %v7317_v53, %v7321_v55  ;;  %v7449_v20 = vcombine.low %v7318_v62, %v7322_v63 }
  0x41   : > { %1200 = vmatmul.mubr.bf16.gmra.mrb[4].mxu0 %v9532_v54  ;;  %1393 = vmatmul.mubr.bf16.gmra.mrb[4].mxu1 %v9532_v54 }
  0x42   : > { %7469 = vmatprep.mubr.msk.bf16.mxu0 %vm1108_vm0, %v9553_v61  ;;  %7485 = vmatprep.mubr.msk.bf16.mxu1 %vm1108_vm0, %v9553_v61 }
  0x43   : > { %1548 = vmatpush1.bf16.msra.mxu0 %v7391_v5  ;;  %1741 = vmatpush1.bf16.msra.mxu1 %v7393_v8  ;;  %v7439_v5 = vcombine.low %v7309_v43, %v7313_v44  ;;  %v7441_v8 = vcombine.low %v7310_v49, %v7314_v50  ;;  %v9769_v43 = vld [vmem:[%s9396_s16 + $0xb4] ss:$8 sps:$4 sm:$0xff]   ;;  %v9778_v44 = vld [vmem:[%s9396_s16 + $0xb0] ss:$8 sps:$4 sm:$0xff]   ;;  %v9805_v50 = vld [vmem:[%s9396_s16 + $0xe4] ss:$8 sps:$4 sm:$0xff]  }
  0x44   : > { %1549 = vmatprep.subr.bf16.mxu0 %v7400_v9  ;;  %1742 = vmatprep.subr.bf16.mxu1 %v7402_v10  ;;  %v7448_v9 = vcombine.high %v7317_v53, %v7321_v55  ;;  %v7450_v10 = vcombine.high %v7318_v62, %v7322_v63  ;;  %v9802_v49 = vld [vmem:[%s9396_s16 + $0xd0] ss:$8 sps:$4 sm:$0xff]   ;;  %v9817_v53 = vld [vmem:[%s9396_s16 + $0xf4] ss:$8 sps:$4 sm:$0xff]   ;;  %v266_v63 = vld [vmem:[%s12230_s1 + $0x40] sm:$0xff] }
  0x45   : > { %v9826_v55 = vld [vmem:[%s9396_s16 + $0xf0] ss:$8 sps:$4 sm:$0xff]   ;;  %v9843_v62 = vld [vmem:[%s9396_s16 + $0x14] ss:$8 sps:$4 sm:$0xff]  }
  0x47   : > { %1550 = vmatpush1.bf16.msra.mxu0 %v7399_v14  ;;  %1743 = vmatpush1.bf16.msra.mxu1 %v7401_v18  ;;  %v9702_v14 = vld [vmem:[%s9396_s16 + $0x60] ss:$8 sps:$4 sm:$0xff]   ;;  %v7337_v18 = vld [vmem:[%s12230_s1 + $0x5f0] sm:$0xff] }
  0x48   : > { %1551 = vmatprep.subr.bf16.mxu0 %v7408_v19  ;;  %1744 = vmatprep.subr.bf16.mxu1 %v7410_v22  ;;  %v9711_v19 = vld [vmem:[%s9396_s16 + $0x74] ss:$8 sps:$4 sm:$0xff]   ;;  %v7463_v30 = vcombine.low %v7333_v16, %v7337_v18 }
  0x49   : > { %1210 = vmatmul.mubr.bf16.gmra.mrb[8].mxu0 %v9594_v13  ;;  %1403 = vmatmul.mubr.bf16.gmra.mrb[8].mxu1 %v9594_v13  ;;  %v7334_v22 = vld [vmem:[%s12230_s1 + $0x5d8] sm:$0xff] }
  0x4a   : > { %7470 = vmatprep.mubr.msk.bf16.mxu0 %vm1108_vm0, %v9603_v17  ;;  %7486 = vmatprep.mubr.msk.bf16.mxu1 %vm1108_vm0, %v9603_v17 }
  0x4b   : > { %1552 = vmatpush1.bf16.msra.mxu0 %v7407_v23  ;;  %1745 = vmatpush1.bf16.msra.mxu1 %v7409_v26  ;;  %v7338_v23 = vld [vmem:[%s12230_s1 + $0x5f8] sm:$0xff]  ;;  %v7457_v26 = vcombine.low %v7326_v11, %v7330_v12  ;;  %v275_v11 = vld [vmem:[%s12230_s1 + $0x88] sm:$0xff] }
  0x4c   : > { %1553 = vmatprep.subr.bf16.mxu0 %v7416_v27  ;;  %1746 = vmatprep.subr.bf16.mxu1 %v7418_v28  ;;  %v7464_v27 = vcombine.high %v7333_v16, %v7337_v18  ;;  %v7466_v28 = vcombine.high %v7334_v22, %v7338_v23  ;;  %v7465_v33 = vcombine.low %v7334_v22, %v7338_v23  ;;  %v279_v12 = vld [vmem:[%s12230_s1 + $0xa8] sm:$0xff]  ;;  %v9881_v16 = vld [vmem:[%s12230_s1 + $0x10] sm:$0xff] }
  0x4d   : > { %v9886_v18 = vld [vmem:[%s12230_s1 + $0x30] sm:$0xff]  ;;  %v283_v22 = vld [vmem:[%s12230_s1 + $0xc8] sm:$0xff] }
  0x4e   : > { %v7567_v60 = vcombine.low %v9881_v16, %v9886_v18 }
  0x4f   : > { %1554 = vmatpush1.bf16.msra.mxu0 %v7415_v32  ;;  %1747 = vmatpush1.bf16.msra.mxu1 %v7417_v36  ;;  %v9729_v32 = vld [vmem:[%s9396_s16 + $0x84] ss:$8 sps:$4 sm:$0xff]   ;;  %v7566_v36 = vcombine.high %v9566_v2, %v9571_v3 }
  0x50   : > { %1555 = vmatprep.subr.bf16.mxu0 %v7424_v37  ;;  %1748 = vmatprep.subr.bf16.mxu1 %v7426_v41  ;;  %v9742_v37 = vld [vmem:[%s9396_s16 + $0x80] ss:$8 sps:$4 sm:$0xff]   ;;  %v9757_v41 = vld [vmem:[%s9396_s16 + $0xa4] ss:$8 sps:$4 sm:$0xff]  }
  0x51   : > { %1220 = vmatmul.mubr.bf16.gmra.mrb[12].mxu0 %v9630_v31  ;;  %1413 = vmatmul.mubr.bf16.gmra.mrb[12].mxu1 %v9630_v31  ;;  %v282_v3 = vld [vmem:[%s12230_s1 + $0xc0] sm:$0xff] }
  0x52   : > { %7471 = vmatprep.mubr.msk.bf16.mxu0 %vm1108_vm0, %v9639_v35  ;;  %7487 = vmatprep.mubr.msk.bf16.mxu1 %vm1108_vm0, %v9639_v35 }
  0x53   : > { %1556 = vmatpush1.bf16.msra.mxu0 %v7423_v42  ;;  %1749 = vmatpush1.bf16.msra.mxu1 %v7425_v45  ;;  %v9766_v42 = vld [vmem:[%s9396_s16 + $0xa0] ss:$8 sps:$4 sm:$0xff]   ;;  %v9781_v45 = vld [vmem:[%s9396_s16 + $0xc4] ss:$8 sps:$4 sm:$0xff]  }
  0x54   : > { %1557 = vmatprep.subr.bf16.mxu0 %v7432_v47  ;;  %1750 = vmatprep.subr.bf16.mxu1 %v7434_v48  ;;  %v9790_v47 = vld [vmem:[%s9396_s16 + $0xc0] ss:$8 sps:$4 sm:$0xff]   ;;  %v9793_v48 = vld [vmem:[%s9396_s16 + $0xd4] ss:$8 sps:$4 sm:$0xff]  }
  0x57   : > { %1558 = vmatpush1.bf16.msra.mxu0 %v7431_v52  ;;  %1751 = vmatpush1.bf16.msra.mxu1 %v7433_v57  ;;  %v9814_v52 = vld [vmem:[%s9396_s16 + $0xe0] ss:$8 sps:$4 sm:$0xff]   ;;  %v9829_v57 = vld [vmem:[%s9396_s16 + $0x104] ss:$8 sps:$4 sm:$0xff]  }
  0x58   : > { %1559 = vmatprep.subr.bf16.mxu0 %v7440_v58  ;;  %1752 = vmatprep.subr.bf16.mxu1 %v7442_v0  ;;  %v9838_v58 = vld [vmem:[%s9396_s16 + $0x100] ss:$8 sps:$4 sm:$0xff]  }
  0x59   : > { %1230 = vmatmul.mubr.bf16.gmra.mrb[16].mxu0 %v9666_v51  ;;  %1423 = vmatmul.mubr.bf16.gmra.mrb[16].mxu1 %v9666_v51  ;;  %v270_v0 = vld [vmem:[%s12230_s1 + $0x60] sm:$0xff] }
  0x5a   : > { %7472 = vmatprep.mubr.msk.bf16.mxu0 %vm1108_vm0, %v9675_v56  ;;  %7488 = vmatprep.mubr.msk.bf16.mxu1 %vm1108_vm0, %v9675_v56  ;;  %v7572_v7 = vcombine.high %v266_v63, %v270_v0 }
  0x5b   : > { %1560 = vmatpush1.bf16.msra.mxu0 %v7439_v5  ;;  %1753 = vmatpush1.bf16.msra.mxu1 %v7441_v8  ;;  %v267_v5 = vld [vmem:[%s12230_s1 + $0x48] sm:$0xff]  ;;  %v274_v8 = vld [vmem:[%s12230_s1 + $0x80] sm:$0xff] }
  0x5c   : > { %1561 = vmatprep.subr.bf16.mxu0 %v7448_v9  ;;  %1754 = vmatprep.subr.bf16.mxu1 %v7450_v10  ;;  %v278_v9 = vld [vmem:[%s12230_s1 + $0xa0] sm:$0xff]  ;;  %v7574_v10 = vcombine.high %v267_v5, %v271_v6 }
  0x5d   : > { %v7580_v59 = vcombine.high %v274_v8, %v278_v9  ;;  %v7579_v23 = vcombine.low %v274_v8, %v278_v9 }
  0x5f   : > { %1562 = vmatpush1.bf16.msra.mxu0 %v7447_v15  ;;  %1755 = vmatpush1.bf16.msra.mxu1 %v7449_v20  ;;  %v7571_v15 = vcombine.low %v266_v63, %v270_v0  ;;  %v9891_v20 = vld [vmem:[%s12230_s1 + $0x18] sm:$0xff]  ;;  %v298_v0 = vld [vmem:[%s12230_s1 + $0x140] sm:$0xff] }
  0x60   : > { %1563 = vmatprep.subr.bf16.mxu0 %v7456_v21  ;;  %1756 = vmatprep.subr.bf16.mxu1 %v7458_v24  ;;  %v7582_v21 = vcombine.high %v275_v11, %v279_v12  ;;  %v7581_v24 = vcombine.low %v275_v11, %v279_v12  ;;  %v306_v11 = vld [vmem:[%s12230_s1 + $0x180] sm:$0xff] }
  0x61   : > { %1240 = vmatmul.mubr.bf16.gmra.mrb[20].mxu0 %v9702_v14  ;;  %1433 = vmatmul.mubr.bf16.gmra.mrb[20].mxu1 %v9702_v14  ;;  %v310_v12 = vld [vmem:[%s12230_s1 + $0x1a0] sm:$0xff] }
  0x62   : > { %7473 = vmatprep.mubr.msk.bf16.mxu0 %vm1108_vm0, %v9711_v19  ;;  %7489 = vmatprep.mubr.msk.bf16.mxu1 %vm1108_vm0, %v9711_v19 }
  0x63   : > { %1564 = vmatpush1.bf16.msra.mxu0 %v7455_v25  ;;  %1757 = vmatpush1.bf16.msra.mxu1 %v7457_v26 }
  0x64   : > { %1565 = vmatprep.subr.bf16.mxu0 %v7464_v27  ;;  %1758 = vmatprep.subr.bf16.mxu1 %v7466_v28  ;;  %v290_v27 = vld [vmem:[%s12230_s1 + $0x100] sm:$0xff] }
  0x65   : > { %v294_v28 = vld [vmem:[%s12230_s1 + $0x120] sm:$0xff] }
  0x67   : > { %1566 = vmatpush1.bf16.msra.mxu0 %v7463_v30  ;;  %1759 = vmatpush1.bf16.msra.mxu1 %v7465_v33  ;;  %v291_v30 = vld [vmem:[%s12230_s1 + $0x108] sm:$0xff] }
  0x68   : > { %2601 = vmatprep.subr.bf16.mxu0 %v7564_v34  ;;  %2794 = vmatprep.subr.bf16.mxu1 %v7566_v36  ;;  %v295_v33 = vld [vmem:[%s12230_s1 + $0x128] sm:$0xff] }
  0x69   : > { %1250 = vmatmul.mubr.bf16.gmra.mrb[24].mxu0 %v9726_v29  ;;  %1443 = vmatmul.mubr.bf16.gmra.mrb[24].mxu1 %v9726_v29  ;;  %v7598_v63 = vcombine.high %v291_v30, %v295_v33  ;;  %v7597_v8 = vcombine.low %v291_v30, %v295_v33  ;;  %v323_v30 = vld [vmem:[%s12230_s1 + $0x208] sm:$0xff] }
  0x6a   : > { %7474 = vmatprep.mubr.msk.bf16.mxu0 %vm1108_vm0, %v9729_v32  ;;  %7490 = vmatprep.mubr.msk.bf16.mxu1 %vm1108_vm0, %v9729_v32  ;;  %v327_v33 = vld [vmem:[%s12230_s1 + $0x228] sm:$0xff] }
  0x71   : > { %1260 = vmatmul.mubr.bf16.gmra.mrb[28].mxu0 %v9742_v37  ;;  %1453 = vmatmul.mubr.bf16.gmra.mrb[28].mxu1 %v9742_v37 }
  0x72   : > { %7475 = vmatprep.mubr.msk.bf16.mxu0 %vm1108_vm0, %v9745_v39  ;;  %7491 = vmatprep.mubr.msk.bf16.mxu1 %vm1108_vm0, %v9745_v39 }
  0x79   : > { %1270 = vmatmul.mubr.bf16.gmra.mrb[32].mxu0 %v9754_v40  ;;  %1463 = vmatmul.mubr.bf16.gmra.mrb[32].mxu1 %v9754_v40 }
  0x7a   : > { %7476 = vmatprep.mubr.msk.bf16.mxu0 %vm1108_vm0, %v9757_v41  ;;  %7492 = vmatprep.mubr.msk.bf16.mxu1 %vm1108_vm0, %v9757_v41 }
  0x81   : > { %1280 = vmatmul.mubr.bf16.gmra.mrb[36].mxu0 %v9766_v42  ;;  %1473 = vmatmul.mubr.bf16.gmra.mrb[36].mxu1 %v9766_v42 }
  0x82   : > { %7477 = vmatprep.mubr.msk.bf16.mxu0 %vm1108_vm0, %v9769_v43  ;;  %7493 = vmatprep.mubr.msk.bf16.mxu1 %vm1108_vm0, %v9769_v43 }
  0x89   : > { %1290 = vmatmul.mubr.bf16.gmra.mrb[40].mxu0 %v9778_v44  ;;  %1483 = vmatmul.mubr.bf16.gmra.mrb[40].mxu1 %v9778_v44 }
  0x8a   : > { %7478 = vmatprep.mubr.msk.bf16.mxu0 %vm1108_vm0, %v9781_v45  ;;  %7494 = vmatprep.mubr.msk.bf16.mxu1 %vm1108_vm0, %v9781_v45 }
  0x91   : > { %1300 = vmatmul.mubr.bf16.gmra.mrb[44].mxu0 %v9790_v47  ;;  %1493 = vmatmul.mubr.bf16.gmra.mrb[44].mxu1 %v9790_v47 }
  0x92   : > { %7479 = vmatprep.mubr.msk.bf16.mxu0 %vm1108_vm0, %v9793_v48  ;;  %7495 = vmatprep.mubr.msk.bf16.mxu1 %vm1108_vm0, %v9793_v48 }
  0x99   : > { %1310 = vmatmul.mubr.bf16.gmra.mrb[48].mxu0 %v9802_v49  ;;  %1503 = vmatmul.mubr.bf16.gmra.mrb[48].mxu1 %v9802_v49 }
  0x9a   : > { %7480 = vmatprep.mubr.msk.bf16.mxu0 %vm1108_vm0, %v9805_v50  ;;  %7496 = vmatprep.mubr.msk.bf16.mxu1 %vm1108_vm0, %v9805_v50 }
  0xa1   : > { %1320 = vmatmul.mubr.bf16.gmra.mrb[52].mxu0 %v9814_v52  ;;  %1513 = vmatmul.mubr.bf16.gmra.mrb[52].mxu1 %v9814_v52 }
  0xa2   : > { %7481 = vmatprep.mubr.msk.bf16.mxu0 %vm1108_vm0, %v9817_v53  ;;  %7497 = vmatprep.mubr.msk.bf16.mxu1 %vm1108_vm0, %v9817_v53 }
  0xa9   : > { %1330 = vmatmul.mubr.bf16.gmra.mrb[56].mxu0 %v9826_v55  ;;  %1523 = vmatmul.mubr.bf16.gmra.mrb[56].mxu1 %v9826_v55 }
  0xaa   : > { %7482 = vmatprep.mubr.msk.bf16.mxu0 %vm1108_vm0, %v9829_v57  ;;  %7498 = vmatprep.mubr.msk.bf16.mxu1 %vm1108_vm0, %v9829_v57 }
  0xb1   : > { %1340 = vmatmul.mubr.bf16.gmra.mrb[60].mxu0 %v9838_v58  ;;  %1533 = vmatmul.mubr.bf16.gmra.mrb[60].mxu1 %v9838_v58 }
  0xb2   : > { %7499 = vmatprep.mubr.msk.bf16.mxu0 %vm1108_vm0, %v9843_v62  ;;  %7515 = vmatprep.mubr.msk.bf16.mxu1 %vm1108_vm0, %v9843_v62 }
  0xb9   : > { %1576 = vmatmul.mubr.bf16.vlgmr.msra.gmra.mrb[64].mxu0 %v9498_v38  ;;  %1769 = vmatmul.mubr.bf16.vlgmr.msra.gmra.mrb[64].mxu1 %v9498_v38  ;;  %v7573_v38 = vcombine.low %v267_v5, %v271_v6  ;;  %v302_v5 = vld [vmem:[%s12230_s1 + $0x160] sm:$0xff]  ;;  %v303_v6 = vld [vmem:[%s12230_s1 + $0x168] sm:$0xff] }
  0xba   : > { %2602 = vmatpush1.bf16.msra.mxu0 %v7563_v1  ;;  %2795 = vmatpush1.bf16.msra.mxu1 %v7565_v4  ;;  %v9903_v1 = vld [vmem:[%s12230_s1 + $0x38] sm:$0xff]  ;;  %v286_v4 = vld [vmem:[%s12230_s1 + $0xe0] sm:$0xff]  ;;  %v7604_v9 = vcombine.high %v298_v0, %v302_v5 }
  0xbb   : > { %7500 = vmatprep.mubr.msk.bf16.mxu0 %vm1108_vm0, %v9513_v46  ;;  %7516 = vmatprep.mubr.msk.bf16.mxu1 %vm1108_vm0, %v9513_v46  ;;  %v7569_v2 = vcombine.low %v9891_v20, %v9903_v1  ;;  %v287_v46 = vld [vmem:[%s12230_s1 + $0xe8] sm:$0xff]  ;;  %v7588_v25 = vcombine.high %v282_v3, %v286_v4  ;;  %v7587_v34 = vcombine.low %v282_v3, %v286_v4  ;;  %v314_v4 = vld [vmem:[%s12230_s1 + $0x1c0] sm:$0xff] }
  0xbc   : > { %2603 = vmatprep.subr.bf16.mxu0 %v7572_v7  ;;  %2796 = vmatprep.subr.bf16.mxu1 %v7574_v10  ;;  %v7590_v26 = vcombine.high %v283_v22, %v287_v46  ;;  %v7589_v36 = vcombine.low %v283_v22, %v287_v46  ;;  %v7595_v7 = vcombine.low %v290_v27, %v294_v28  ;;  %v318_v22 = vld [vmem:[%s12230_s1 + $0x1e0] sm:$0xff]  ;;  %v319_v46 = vld [vmem:[%s12230_s1 + $0x1e8] sm:$0xff] }
  0xbe   : > { %2604 = vmatpush1.bf16.msra.mxu0 %v7571_v15  ;;  %2797 = vmatpush1.bf16.msra.mxu1 %v7573_v38  ;;  %v307_v15 = vld [vmem:[%s12230_s1 + $0x188] sm:$0xff] }
  0xbf   : > { %2605 = vmatprep.subr.bf16.mxu0 %v7580_v59  ;;  %2798 = vmatprep.subr.bf16.mxu1 %v7582_v21  ;;  %v311_v38 = vld [vmem:[%s12230_s1 + $0x1a8] sm:$0xff]  ;;  %v7603_v59 = vcombine.low %v298_v0, %v302_v5  ;;  %v334_v0 = vld [vmem:[%s12230_s1 + $0x260] sm:$0xff] }
  0xc0   : > { %v7614_v3 = vcombine.high %v307_v15, %v311_v38  ;;  %v335_v5 = vld [vmem:[%s12230_s1 + $0x268] sm:$0xff] }
  0xc1   : > { %1586 = vmatmul.mubr.bf16.gmra.mrb[68].mxu0 %v9532_v54  ;;  %1779 = vmatmul.mubr.bf16.gmra.mrb[68].mxu1 %v9532_v54  ;;  %v7596_v54 = vcombine.high %v290_v27, %v294_v28  ;;  %v322_v27 = vld [vmem:[%s12230_s1 + $0x200] sm:$0xff] }
  0xc2   : > { %7501 = vmatprep.mubr.msk.bf16.mxu0 %vm1108_vm0, %v9553_v61  ;;  %7517 = vmatprep.mubr.msk.bf16.mxu1 %vm1108_vm0, %v9553_v61  ;;  %v299_v61 = vld [vmem:[%s12230_s1 + $0x148] sm:$0xff]  ;;  %v326_v28 = vld [vmem:[%s12230_s1 + $0x220] sm:$0xff] }
  0xc3   : > { %2606 = vmatpush1.bf16.msra.mxu0 %v7579_v23  ;;  %2799 = vmatpush1.bf16.msra.mxu1 %v7581_v24  ;;  %v7606_v10 = vcombine.high %v299_v61, %v303_v6  ;;  %v7605_v21 = vcombine.low %v299_v61, %v303_v6  ;;  %v7611_v23 = vcombine.low %v306_v11, %v310_v12 }
  0xc4   : > { %2607 = vmatprep.subr.bf16.mxu0 %v7588_v25  ;;  %2800 = vmatprep.subr.bf16.mxu1 %v7590_v26  ;;  %v7613_v24 = vcombine.low %v307_v15, %v311_v38  ;;  %v7620_v25 = vcombine.high %v314_v4, %v318_v22  ;;  %v7627_v61 = vcombine.low %v322_v27, %v326_v28 }
  0xc5   : > { %v7629_v6 = vcombine.low %v323_v30, %v327_v33 }
  0xc7   : > { %2608 = vmatpush1.bf16.msra.mxu0 %v7587_v34  ;;  %2801 = vmatpush1.bf16.msra.mxu1 %v7589_v36  ;;  %v7619_v34 = vcombine.low %v314_v4, %v318_v22 }
  0xc8   : > { %2609 = vmatprep.subr.bf16.mxu0 %v7596_v54  ;;  %2802 = vmatprep.subr.bf16.mxu1 %v7598_v63  ;;  %v7630_v54 = vcombine.high %v323_v30, %v327_v33  ;;  %v330_v63 = vld [vmem:[%s12230_s1 + $0x240] sm:$0xff]  ;;  %v280_v30 = vld [vmem:[%s12230_s1 + $0xb0] sm:$0xff] }
  0xc9   : > { %1596 = vmatmul.mubr.bf16.gmra.mrb[72].mxu0 %v9594_v13  ;;  %1789 = vmatmul.mubr.bf16.gmra.mrb[72].mxu1 %v9594_v13  ;;  %v7612_v13 = vcombine.high %v306_v11, %v310_v12  ;;  %v339_v11 = vld [vmem:[%s12230_s1 + $0x288] sm:$0xff]  ;;  %v7635_v15 = vcombine.low %v330_v63, %v334_v0 }
  0xca   : > { %7502 = vmatprep.mubr.msk.bf16.mxu0 %vm1108_vm0, %v9603_v17  ;;  %7518 = vmatprep.mubr.msk.bf16.mxu1 %vm1108_vm0, %v9603_v17  ;;  %v315_v17 = vld [vmem:[%s12230_s1 + $0x1c8] sm:$0xff] }
  0xcb   : > { %2610 = vmatpush1.bf16.msra.mxu0 %v7595_v7  ;;  %2803 = vmatpush1.bf16.msra.mxu1 %v7597_v8  ;;  %v7622_v26 = vcombine.high %v315_v17, %v319_v46  ;;  %v7621_v36 = vcombine.low %v315_v17, %v319_v46  ;;  %v7636_v7 = vcombine.high %v330_v63, %v334_v0  ;;  %v343_v12 = vld [vmem:[%s12230_s1 + $0x2a8] sm:$0xff]  ;;  %v10154_v63 = vld [vmem:[%s12230_s1 + $0x620] sm:$0xff] }
  0xcc   : > { %2611 = vmatprep.subr.bf16.mxu0 %v7604_v9  ;;  %2804 = vmatprep.subr.bf16.mxu1 %v7606_v10  ;;  %v338_v9 = vld [vmem:[%s12230_s1 + $0x280] sm:$0xff]  ;;  %v7645_v22 = vcombine.low %v339_v11, %v343_v12  ;;  %v10159_v0 = vld [vmem:[%s12230_s1 + $0x608] sm:$0xff] }
  0xcd   : > { %v342_v10 = vld [vmem:[%s12230_s1 + $0x2a0] sm:$0xff] }
  0xce   : > { %v7643_v4 = vcombine.low %v338_v9, %v342_v10 }
  0xcf   : > { %2612 = vmatpush1.bf16.msra.mxu0 %v7603_v59  ;;  %2805 = vmatpush1.bf16.msra.mxu1 %v7605_v21  ;;  %v7646_v59 = vcombine.high %v339_v11, %v343_v12  ;;  %v346_v21 = vld [vmem:[%s12230_s1 + $0x2c0] sm:$0xff]  ;;  %v292_v12 = vld [vmem:[%s12230_s1 + $0x110] sm:$0xff] }
  0xd0   : > { %2613 = vmatprep.subr.bf16.mxu0 %v7612_v13  ;;  %2806 = vmatprep.subr.bf16.mxu1 %v7614_v3  ;;  %v350_v13 = vld [vmem:[%s12230_s1 + $0x2e0] sm:$0xff]  ;;  %v351_v3 = vld [vmem:[%s12230_s1 + $0x2e8] sm:$0xff] }
  0xd1   : > { %1606 = vmatmul.mubr.bf16.gmra.mrb[76].mxu0 %v9630_v31  ;;  %1799 = vmatmul.mubr.bf16.gmra.mrb[76].mxu1 %v9630_v31  ;;  %v7628_v31 = vcombine.high %v322_v27, %v326_v28  ;;  %v7652_v17 = vcombine.high %v346_v21, %v350_v13  ;;  %v276_v28 = vld [vmem:[%s12230_s1 + $0x90] sm:$0xff] }
  0xd2   : > { %7503 = vmatprep.mubr.msk.bf16.mxu0 %vm1108_vm0, %v9639_v35  ;;  %7519 = vmatprep.mubr.msk.bf16.mxu1 %vm1108_vm0, %v9639_v35  ;;  %v331_v35 = vld [vmem:[%s12230_s1 + $0x248] sm:$0xff] }
  0xd3   : > { %2614 = vmatpush1.bf16.msra.mxu0 %v7611_v23  ;;  %2807 = vmatpush1.bf16.msra.mxu1 %v7613_v24  ;;  %v7638_v8 = vcombine.high %v331_v35, %v335_v5  ;;  %v7637_v38 = vcombine.low %v331_v35, %v335_v5  ;;  %v7651_v23 = vcombine.low %v346_v21, %v350_v13  ;;  %v10171_v35 = vld [vmem:[%s12230_s1 + $0x628] sm:$0xff]  ;;  %v288_v5 = vld [vmem:[%s12230_s1 + $0xf0] sm:$0xff] }
  0xd4   : > { %2615 = vmatprep.subr.bf16.mxu0 %v7620_v25  ;;  %2808 = vmatprep.subr.bf16.mxu1 %v7622_v26  ;;  %v7568_v25 = vcombine.high %v9881_v16, %v9886_v18  ;;  %v7570_v26 = vcombine.high %v9891_v20, %v9903_v1  ;;  %v7584_v18 = vcombine.high %v276_v28, %v280_v30 }
  0xd5   : > { %v7885_v1 = vcombine.low %v10159_v0, %v10171_v35 }
  0xd7   : > { %2616 = vmatpush1.bf16.msra.mxu0 %v7619_v34  ;;  %2809 = vmatpush1.bf16.msra.mxu1 %v7621_v36  ;;  %v277_v34 = vld [vmem:[%s12230_s1 + $0x98] sm:$0xff] }
  0xd8   : > { %2617 = vmatprep.subr.bf16.mxu0 %v7628_v31  ;;  %2810 = vmatprep.subr.bf16.mxu1 %v7630_v54  ;;  %v281_v36 = vld [vmem:[%s12230_s1 + $0xb8] sm:$0xff]  ;;  %v10149_v54 = vld [vmem:[%s12230_s1 + $0x600] sm:$0xff] }
  0xd9   : > { %1616 = vmatmul.mubr.bf16.gmra.mrb[80].mxu0 %v9666_v51  ;;  %1809 = vmatmul.mubr.bf16.gmra.mrb[80].mxu1 %v9666_v51  ;;  %v7644_v51 = vcombine.high %v338_v9, %v342_v10  ;;  %v7586_v20 = vcombine.high %v277_v34, %v281_v36  ;;  %v10190_v10 = vld [vmem:[%s9396_s16 + $0x10] ss:$8 sps:$4 sm:$0xff]  }
  0xda   : > { %7504 = vmatprep.mubr.msk.bf16.mxu0 %vm1108_vm0, %v9675_v56  ;;  %7520 = vmatprep.mubr.msk.bf16.mxu1 %vm1108_vm0, %v9675_v56  ;;  %v347_v56 = vld [vmem:[%s12230_s1 + $0x2c8] sm:$0xff] }
  0xdb   : > { %2618 = vmatpush1.bf16.msra.mxu0 %v7627_v61  ;;  %2811 = vmatpush1.bf16.msra.mxu1 %v7629_v6  ;;  %v7654_v46 = vcombine.high %v347_v56, %v351_v3  ;;  %v7653_v24 = vcombine.low %v347_v56, %v351_v3  ;;  %v285_v61 = vld [vmem:[%s12230_s1 + $0xd8] sm:$0xff] }
  0xdc   : > { %2619 = vmatprep.subr.bf16.mxu0 %v7636_v7  ;;  %2812 = vmatprep.subr.bf16.mxu1 %v7638_v8  ;;  %v289_v6 = vld [vmem:[%s12230_s1 + $0xf8] sm:$0xff]  ;;  %v7583_v7 = vcombine.low %v276_v28, %v280_v30  ;;  %v7585_v8 = vcombine.low %v277_v34, %v281_v36 }
  0xdd   : > { %v7594_v11 = vcombine.high %v285_v61, %v289_v6  ;;  %v7593_v13 = vcombine.low %v285_v61, %v289_v6  ;;  %v313_v28 = vld [vmem:[%s12230_s1 + $0x1b8] sm:$0xff] }
  0xde   : > { %v10262_v6 = vld [vmem:[%s9396_s16 + $0x30] ss:$8 sps:$4 sm:$0xff]  }
  0xdf   : > { %2620 = vmatpush1.bf16.msra.mxu0 %v7635_v15  ;;  %2813 = vmatpush1.bf16.msra.mxu1 %v7637_v38  ;;  %v296_v15 = vld [vmem:[%s12230_s1 + $0x130] sm:$0xff]  ;;  %v10201_v38 = vld [vmem:[%s9396_s16 + $0x24] ss:$8 sps:$4 sm:$0xff]  }
  0xe0   : > { %2621 = vmatprep.subr.bf16.mxu0 %v7644_v51  ;;  %2814 = vmatprep.subr.bf16.mxu1 %v7646_v59  ;;  %v293_v51 = vld [vmem:[%s12230_s1 + $0x118] sm:$0xff]  ;;  %v7600_v56 = vcombine.high %v292_v12, %v296_v15 }
  0xe1   : > { %1626 = vmatmul.mubr.bf16.gmra.mrb[84].mxu0 %v9702_v14  ;;  %1819 = vmatmul.mubr.bf16.gmra.mrb[84].mxu1 %v9702_v14  ;;  %v10106_v14 = vld [vmem:[%s9396_s16 + $0x4] ss:$8 sps:$4 sm:$0xff]   ;;  %v297_v59 = vld [vmem:[%s12230_s1 + $0x138] sm:$0xff] }
  0xe2   : > { %7505 = vmatprep.mubr.msk.bf16.mxu0 %vm1108_vm0, %v9711_v19  ;;  %7521 = vmatprep.mubr.msk.bf16.mxu1 %vm1108_vm0, %v9711_v19  ;;  %v10115_v19 = vld [vmem:[%s9396_s16] ss:$8 sps:$4 sm:$0xff]   ;;  %v7602_v3 = vcombine.high %v293_v51, %v297_v59 }
  0xe3   : > { %2622 = vmatpush1.bf16.msra.mxu0 %v7643_v4  ;;  %2815 = vmatpush1.bf16.msra.mxu1 %v7645_v22  ;;  %v300_v4 = vld [vmem:[%s12230_s1 + $0x150] sm:$0xff] }
  0xe4   : > { %2623 = vmatprep.subr.bf16.mxu0 %v7652_v17  ;;  %2816 = vmatprep.subr.bf16.mxu1 %v7654_v46  ;;  %v304_v22 = vld [vmem:[%s12230_s1 + $0x170] sm:$0xff]  ;;  %v301_v17 = vld [vmem:[%s12230_s1 + $0x158] sm:$0xff] }
  0xe5   : > { %v305_v46 = vld [vmem:[%s12230_s1 + $0x178] sm:$0xff]  ;;  %v7607_v30 = vcombine.low %v300_v4, %v304_v22 }
  0xe7   : > { %2624 = vmatpush1.bf16.msra.mxu0 %v7651_v23  ;;  %2817 = vmatpush1.bf16.msra.mxu1 %v7653_v24  ;;  %v7599_v23 = vcombine.low %v292_v12, %v296_v15  ;;  %v7601_v24 = vcombine.low %v293_v51, %v297_v59  ;;  %v325_v12 = vld [vmem:[%s12230_s1 + $0x218] sm:$0xff] }
  0xe8   : > { %2987 = vmatprep.subr.bf16.mxu0 %v7568_v25  ;;  %3180 = vmatprep.subr.bf16.mxu1 %v7570_v26  ;;  %v7608_v25 = vcombine.high %v300_v4, %v304_v22  ;;  %v10226_v26 = vld [vmem:[%s9396_s16 + $0x20] ss:$8 sps:$4 sm:$0xff]   ;;  %v329_v15 = vld [vmem:[%s12230_s1 + $0x238] sm:$0xff] }
  0xe9   : > { %1636 = vmatmul.mubr.bf16.gmra.mrb[88].mxu0 %v9726_v29  ;;  %1829 = vmatmul.mubr.bf16.gmra.mrb[88].mxu1 %v9726_v29  ;;  %v268_v29 = vld [vmem:[%s12230_s1 + $0x50] sm:$0xff]  ;;  %v333_v4 = vld [vmem:[%s12230_s1 + $0x258] sm:$0xff] }
  0xea   : > { %7506 = vmatprep.mubr.msk.bf16.mxu0 %vm1108_vm0, %v9729_v32  ;;  %7522 = vmatprep.mubr.msk.bf16.mxu1 %vm1108_vm0, %v9729_v32  ;;  %v272_v32 = vld [vmem:[%s12230_s1 + $0x70] sm:$0xff]  ;;  %v337_v22 = vld [vmem:[%s12230_s1 + $0x278] sm:$0xff] }
  0xeb   : > { %v7576_v27 = vcombine.high %v268_v29, %v272_v32  ;;  %v7575_v31 = vcombine.low %v268_v29, %v272_v32  ;;  %v7610_v29 = vcombine.high %v301_v17, %v305_v46  ;;  %v308_v32 = vld [vmem:[%s12230_s1 + $0x190] sm:$0xff] }
  0xf1   : > { %1646 = vmatmul.mubr.bf16.gmra.mrb[92].mxu0 %v9742_v37  ;;  %1839 = vmatmul.mubr.bf16.gmra.mrb[92].mxu1 %v9742_v37 }
  0xf2   : > { %7507 = vmatprep.mubr.msk.bf16.mxu0 %vm1108_vm0, %v9745_v39  ;;  %7523 = vmatprep.mubr.msk.bf16.mxu1 %vm1108_vm0, %v9745_v39 }
  0xf9   : > { %1656 = vmatmul.mubr.bf16.gmra.mrb[96].mxu0 %v9754_v40  ;;  %1849 = vmatmul.mubr.bf16.gmra.mrb[96].mxu1 %v9754_v40 }
  0xfa   : > { %7508 = vmatprep.mubr.msk.bf16.mxu0 %vm1108_vm0, %v9757_v41  ;;  %7524 = vmatprep.mubr.msk.bf16.mxu1 %vm1108_vm0, %v9757_v41 }
 0x101   : > { %1666 = vmatmul.mubr.bf16.gmra.mrb[100].mxu0 %v9766_v42  ;;  %1859 = vmatmul.mubr.bf16.gmra.mrb[100].mxu1 %v9766_v42 }
 0x102   : > { %7509 = vmatprep.mubr.msk.bf16.mxu0 %vm1108_vm0, %v9769_v43  ;;  %7525 = vmatprep.mubr.msk.bf16.mxu1 %vm1108_vm0, %v9769_v43 }
 0x109   : > { %1676 = vmatmul.mubr.bf16.gmra.mrb[104].mxu0 %v9778_v44  ;;  %1869 = vmatmul.mubr.bf16.gmra.mrb[104].mxu1 %v9778_v44 }
 0x10a   : > { %7510 = vmatprep.mubr.msk.bf16.mxu0 %vm1108_vm0, %v9781_v45  ;;  %7526 = vmatprep.mubr.msk.bf16.mxu1 %vm1108_vm0, %v9781_v45 }
 0x111   : > { %1686 = vmatmul.mubr.bf16.gmra.mrb[108].mxu0 %v9790_v47  ;;  %1879 = vmatmul.mubr.bf16.gmra.mrb[108].mxu1 %v9790_v47 }
 0x112   : > { %7511 = vmatprep.mubr.msk.bf16.mxu0 %vm1108_vm0, %v9793_v48  ;;  %7527 = vmatprep.mubr.msk.bf16.mxu1 %vm1108_vm0, %v9793_v48 }
 0x119   : > { %1696 = vmatmul.mubr.bf16.gmra.mrb[112].mxu0 %v9802_v49  ;;  %1889 = vmatmul.mubr.bf16.gmra.mrb[112].mxu1 %v9802_v49 }
 0x11a   : > { %7512 = vmatprep.mubr.msk.bf16.mxu0 %vm1108_vm0, %v9805_v50  ;;  %7528 = vmatprep.mubr.msk.bf16.mxu1 %vm1108_vm0, %v9805_v50 }
 0x121   : > { %1706 = vmatmul.mubr.bf16.gmra.mrb[116].mxu0 %v9814_v52  ;;  %1899 = vmatmul.mubr.bf16.gmra.mrb[116].mxu1 %v9814_v52 }
 0x122   : > { %7513 = vmatprep.mubr.msk.bf16.mxu0 %vm1108_vm0, %v9817_v53  ;;  %7529 = vmatprep.mubr.msk.bf16.mxu1 %vm1108_vm0, %v9817_v53 }
 0x129   : > { %1716 = vmatmul.mubr.bf16.gmra.mrb[120].mxu0 %v9826_v55  ;;  %1909 = vmatmul.mubr.bf16.gmra.mrb[120].mxu1 %v9826_v55 }
 0x12a   : > { %7514 = vmatprep.mubr.msk.bf16.mxu0 %vm1108_vm0, %v9829_v57  ;;  %7530 = vmatprep.mubr.msk.bf16.mxu1 %vm1108_vm0, %v9829_v57  ;;  %v269_v57 = vld [vmem:[%s12230_s1 + $0x58] sm:$0xff] }
 0x131   : > { %1726 = vmatmul.mubr.bf16.gmra.mrb[124].mxu0 %v9838_v58  ;;  %1919 = vmatmul.mubr.bf16.gmra.mrb[124].mxu1 %v9838_v58  ;;  %v273_v58 = vld [vmem:[%s12230_s1 + $0x78] sm:$0xff] }
 0x132   : > { %7659 = vmatprep.mubr.msk.bf16.mxu0 %vm1108_vm0, %v10106_v14  ;;  %7675 = vmatprep.mubr.msk.bf16.mxu1 %vm1108_vm0, %v10106_v14  ;;  %v7578_v33 = vcombine.high %v269_v57, %v273_v58  ;;  %v7577_v16 = vcombine.low %v269_v57, %v273_v58  ;;  %v312_v57 = vld [vmem:[%s12230_s1 + $0x1b0] sm:$0xff] }
 0x133   : > { %v10237_v58 = vld [vmem:[%s9396_s16 + $0x34] ss:$8 sps:$4 sm:$0xff]   ;;  %v7616_v34 = vcombine.high %v308_v32, %v312_v57 }
 0x139   : > { %2634 = vmatmul.mubr.bf16.vlgmr.msra.gmra.mrb[0].mxu0 %v10115_v19  ;;  %2827 = vmatmul.mubr.bf16.vlgmr.msra.gmra.mrb[0].mxu1 %v10115_v19 }
 0x13a   : > { %2988 = vmatpush1.bf16.msra.mxu0 %v7567_v60  ;;  %3181 = vmatpush1.bf16.msra.mxu1 %v7569_v2  ;;  %v7883_v60 = vcombine.low %v10149_v54, %v10154_v63  ;;  %v284_v2 = vld [vmem:[%s12230_s1 + $0xd0] sm:$0xff] }
 0x13b   : > { %7660 = vmatprep.mubr.msk.bf16.mxu0 %vm1108_vm0, %v9843_v62  ;;  %7676 = vmatprep.mubr.msk.bf16.mxu1 %vm1108_vm0, %v9843_v62  ;;  %v7592_v9 = vcombine.high %v284_v2, %v288_v5  ;;  %v7591_v21 = vcombine.low %v284_v2, %v288_v5  ;;  %v7615_v2 = vcombine.low %v308_v32, %v312_v57  ;;  %v344_v32 = vld [vmem:[%s12230_s1 + $0x2b0] sm:$0xff] }
 0x13c   : > { %2989 = vmatprep.subr.bf16.mxu0 %v7576_v27  ;;  %3182 = vmatprep.subr.bf16.mxu1 %v7578_v33  ;;  %v309_v27 = vld [vmem:[%s12230_s1 + $0x198] sm:$0xff]  ;;  %v7609_v33 = vcombine.low %v301_v17, %v305_v46  ;;  %v7633_v46 = vcombine.low %v325_v12, %v329_v15 }
 0x13d   : > { %v7618_v36 = vcombine.high %v309_v27, %v313_v28  ;;  %v7617_v5 = vcombine.low %v309_v27, %v313_v28  ;;  %v10309_v57 = vld [vmem:[%s9396_s16 + $0x54] ss:$8 sps:$4 sm:$0xff]  }
 0x13e   : > { %2990 = vmatpush1.bf16.msra.mxu0 %v7575_v31  ;;  %3183 = vmatpush1.bf16.msra.mxu1 %v7577_v16  ;;  %v316_v31 = vld [vmem:[%s12230_s1 + $0x1d0] sm:$0xff]  ;;  %v341_v27 = vld [vmem:[%s12230_s1 + $0x298] sm:$0xff] }
 0x13f   : > { %2991 = vmatprep.subr.bf16.mxu0 %v7584_v18  ;;  %3184 = vmatprep.subr.bf16.mxu1 %v7586_v20  ;;  %v320_v16 = vld [vmem:[%s12230_s1 + $0x1f0] sm:$0xff]  ;;  %v317_v18 = vld [vmem:[%s12230_s1 + $0x1d8] sm:$0xff] }
 0x140   : > { %v321_v20 = vld [vmem:[%s12230_s1 + $0x1f8] sm:$0xff]  ;;  %v7624_v61 = vcombine.high %v316_v31, %v320_v16  ;;  %v7623_v51 = vcombine.low %v316_v31, %v320_v16  ;;  %v348_v31 = vld [vmem:[%s12230_s1 + $0x2d0] sm:$0xff] }
 0x141   : > { %2644 = vmatmul.mubr.bf16.gmra.mrb[4].mxu0 %v10190_v10  ;;  %2837 = vmatmul.mubr.bf16.gmra.mrb[4].mxu1 %v10190_v10  ;;  %v7625_v59 = vcombine.low %v317_v18, %v321_v20  ;;  %v345_v28 = vld [vmem:[%s12230_s1 + $0x2b8] sm:$0xff]  ;;  %v352_v16 = vld [vmem:[%s12230_s1 + $0x2f0] sm:$0xff] }
 0x142   : > { %7661 = vmatprep.mubr.msk.bf16.mxu0 %vm1108_vm0, %v10201_v38  ;;  %7677 = vmatprep.mubr.msk.bf16.mxu1 %vm1108_vm0, %v10201_v38 }
 0x143   : > { %2992 = vmatpush1.bf16.msra.mxu0 %v7583_v7  ;;  %3185 = vmatpush1.bf16.msra.mxu1 %v7585_v8  ;;  %v7626_v7 = vcombine.high %v317_v18, %v321_v20  ;;  %v324_v8 = vld [vmem:[%s12230_s1 + $0x210] sm:$0xff]  ;;  %v349_v18 = vld [vmem:[%s12230_s1 + $0x2d8] sm:$0xff] }
 0x144   : > { %2993 = vmatprep.subr.bf16.mxu0 %v7592_v9  ;;  %3186 = vmatprep.subr.bf16.mxu1 %v7594_v11  ;;  %v328_v9 = vld [vmem:[%s12230_s1 + $0x230] sm:$0xff]  ;;  %v10273_v11 = vld [vmem:[%s9396_s16 + $0x44] ss:$8 sps:$4 sm:$0xff]   ;;  %v353_v20 = vld [vmem:[%s12230_s1 + $0x2f8] sm:$0xff] }
 0x145   : > { %v7631_v17 = vcombine.low %v324_v8, %v328_v9 }
 0x147   : > { %2994 = vmatpush1.bf16.msra.mxu0 %v7591_v21  ;;  %3187 = vmatpush1.bf16.msra.mxu1 %v7593_v13  ;;  %v7632_v21 = vcombine.high %v324_v8, %v328_v9  ;;  %v7634_v13 = vcombine.high %v325_v12, %v329_v15  ;;  %v7658_v8 = vcombine.high %v349_v18, %v353_v20  ;;  %v10339_v9 = vld [vmem:[%s9396_s16 + $0x64] ss:$8 sps:$4 sm:$0xff]  }
 0x148   : > { %2995 = vmatprep.subr.bf16.mxu0 %v7600_v56  ;;  %3188 = vmatprep.subr.bf16.mxu1 %v7602_v3  ;;  %v332_v56 = vld [vmem:[%s12230_s1 + $0x250] sm:$0xff]  ;;  %v7655_v12 = vcombine.low %v348_v31, %v352_v16  ;;  %v7657_v15 = vcombine.low %v349_v18, %v353_v20 }
 0x149   : > { %2654 = vmatmul.mubr.bf16.gmra.mrb[8].mxu0 %v10226_v26  ;;  %2847 = vmatmul.mubr.bf16.gmra.mrb[8].mxu1 %v10226_v26  ;;  %v336_v3 = vld [vmem:[%s12230_s1 + $0x270] sm:$0xff] }
 0x14a   : > { %7662 = vmatprep.mubr.msk.bf16.mxu0 %vm1108_vm0, %v10237_v58  ;;  %7678 = vmatprep.mubr.msk.bf16.mxu1 %vm1108_vm0, %v10237_v58 }
 0x14b   : > { %2996 = vmatpush1.bf16.msra.mxu0 %v7599_v23  ;;  %3189 = vmatpush1.bf16.msra.mxu1 %v7601_v24  ;;  %v7640_v23 = vcombine.high %v332_v56, %v336_v3  ;;  %v10298_v24 = vld [vmem:[%s9396_s16 + $0x40] ss:$8 sps:$4 sm:$0xff]  }
 0x14c   : > { %2997 = vmatprep.subr.bf16.mxu0 %v7608_v25  ;;  %3190 = vmatprep.subr.bf16.mxu1 %v7610_v29  ;;  %v7642_v25 = vcombine.high %v333_v4, %v337_v22  ;;  %v340_v29 = vld [vmem:[%s12230_s1 + $0x290] sm:$0xff] }
 0x14f   : > { %2998 = vmatpush1.bf16.msra.mxu0 %v7607_v30  ;;  %3191 = vmatpush1.bf16.msra.mxu1 %v7609_v33  ;;  %v7639_v30 = vcombine.low %v332_v56, %v336_v3  ;;  %v7641_v33 = vcombine.low %v333_v4, %v337_v22  ;;  %v10362_v56 = vld [vmem:[%s9396_s16 + $0x70] ss:$8 sps:$4 sm:$0xff]   ;;  %v10367_v3 = vld [vmem:[%s9396_s16 + $0x84] ss:$8 sps:$4 sm:$0xff]  }
 0x150   : > { %2999 = vmatprep.subr.bf16.mxu0 %v7616_v34  ;;  %3192 = vmatprep.subr.bf16.mxu1 %v7618_v36  ;;  %v7648_v34 = vcombine.high %v340_v29, %v344_v32  ;;  %v7650_v36 = vcombine.high %v341_v27, %v345_v28 }
 0x151   : > { %2664 = vmatmul.mubr.bf16.gmra.mrb[12].mxu0 %v10262_v6  ;;  %2857 = vmatmul.mubr.bf16.gmra.mrb[12].mxu1 %v10262_v6 }
 0x152   : > { %7663 = vmatprep.mubr.msk.bf16.mxu0 %vm1108_vm0, %v10273_v11  ;;  %7679 = vmatprep.mubr.msk.bf16.mxu1 %vm1108_vm0, %v10273_v11 }
 0x153   : > { %3000 = vmatpush1.bf16.msra.mxu0 %v7615_v2  ;;  %3193 = vmatpush1.bf16.msra.mxu1 %v7617_v5  ;;  %v7647_v2 = vcombine.low %v340_v29, %v344_v32  ;;  %v7649_v5 = vcombine.low %v341_v27, %v345_v28  ;;  %v7788_v29 = vld [vmem:[%s12230_s1 + $0x708] sm:$0xff] }
 0x154   : > { %3001 = vmatprep.subr.bf16.mxu0 %v7624_v61  ;;  %3194 = vmatprep.subr.bf16.mxu1 %v7626_v7  ;;  %v7656_v61 = vcombine.high %v348_v31, %v352_v16  ;;  %v10334_v7 = vld [vmem:[%s9396_s16 + $0x50] ss:$8 sps:$4 sm:$0xff]   ;;  %v7792_v32 = vld [vmem:[%s12230_s1 + $0x728] sm:$0xff] }
 0x155   : > { %v7917_v16 = vcombine.low %v7788_v29, %v7792_v32 }
 0x157   : > { %3002 = vmatpush1.bf16.msra.mxu0 %v7623_v51  ;;  %3195 = vmatpush1.bf16.msra.mxu1 %v7625_v59  ;;  %v7884_v51 = vcombine.high %v10149_v54, %v10154_v63  ;;  %v7886_v59 = vcombine.high %v10159_v0, %v10171_v35  ;;  %v10475_v54 = vld [vmem:[%s12230_s1 + $0x638] sm:$0xff]  ;;  %v7783_v35 = vld [vmem:[%s12230_s1 + $0x6e0] sm:$0xff] }
 0x158   : > { %3003 = vmatprep.subr.bf16.mxu0 %v7632_v21  ;;  %3196 = vmatprep.subr.bf16.mxu1 %v7634_v13  ;;  %v10350_v21 = vld [vmem:[%s9396_s16 + $0x60] ss:$8 sps:$4 sm:$0xff]   ;;  %v10355_v13 = vld [vmem:[%s9396_s16 + $0x74] ss:$8 sps:$4 sm:$0xff]  }
 0x159   : > { %2674 = vmatmul.mubr.bf16.gmra.mrb[16].mxu0 %v10298_v24  ;;  %2867 = vmatmul.mubr.bf16.gmra.mrb[16].mxu1 %v10298_v24 }
 0x15a   : > { %7664 = vmatprep.mubr.msk.bf16.mxu0 %vm1108_vm0, %v10309_v57  ;;  %7680 = vmatprep.mubr.msk.bf16.mxu1 %vm1108_vm0, %v10309_v57 }
 0x15b   : > { %3004 = vmatpush1.bf16.msra.mxu0 %v7631_v17  ;;  %3197 = vmatpush1.bf16.msra.mxu1 %v7633_v46 }
 0x15c   : > { %3005 = vmatprep.subr.bf16.mxu0 %v7640_v23  ;;  %3198 = vmatprep.subr.bf16.mxu1 %v7642_v25  ;;  %v7787_v23 = vld [vmem:[%s12230_s1 + $0x700] sm:$0xff] }
 0x15d   : > { %v7791_v25 = vld [vmem:[%s12230_s1 + $0x720] sm:$0xff] }
 0x15e   : > { %v7915_v31 = vcombine.low %v7787_v23, %v7791_v25 }
 0x15f   : > { %3006 = vmatpush1.bf16.msra.mxu0 %v7639_v30  ;;  %3199 = vmatpush1.bf16.msra.mxu1 %v7641_v33  ;;  %v7918_v30 = vcombine.high %v7788_v29, %v7792_v32  ;;  %v7795_v33 = vld [vmem:[%s12230_s1 + $0x740] sm:$0xff] }
 0x160   : > { %3007 = vmatprep.subr.bf16.mxu0 %v7648_v34  ;;  %3200 = vmatprep.subr.bf16.mxu1 %v7650_v36  ;;  %v7799_v34 = vld [vmem:[%s12230_s1 + $0x760] sm:$0xff]  ;;  %v7800_v36 = vld [vmem:[%s12230_s1 + $0x768] sm:$0xff] }
 0x161   : > { %2684 = vmatmul.mubr.bf16.gmra.mrb[20].mxu0 %v10334_v7  ;;  %2877 = vmatmul.mubr.bf16.gmra.mrb[20].mxu1 %v10334_v7  ;;  %v7924_v18 = vcombine.high %v7795_v33, %v7799_v34 }
 0x162   : > { %7665 = vmatprep.mubr.msk.bf16.mxu0 %vm1108_vm0, %v10339_v9  ;;  %7681 = vmatprep.mubr.msk.bf16.mxu1 %vm1108_vm0, %v10339_v9 }
 0x163   : > { %3008 = vmatpush1.bf16.msra.mxu0 %v7647_v2  ;;  %3201 = vmatpush1.bf16.msra.mxu1 %v7649_v5  ;;  %v7803_v2 = vld [vmem:[%s12230_s1 + $0x780] sm:$0xff] }
 0x164   : > { %3009 = vmatprep.subr.bf16.mxu0 %v7656_v61  ;;  %3202 = vmatprep.subr.bf16.mxu1 %v7658_v8  ;;  %v7807_v5 = vld [vmem:[%s12230_s1 + $0x7a0] sm:$0xff]  ;;  %v7804_v61 = vld [vmem:[%s12230_s1 + $0x788] sm:$0xff] }
 0x165   : > { %v7808_v8 = vld [vmem:[%s12230_s1 + $0x7a8] sm:$0xff] }
 0x167   : > { %3010 = vmatpush1.bf16.msra.mxu0 %v7655_v12  ;;  %3203 = vmatpush1.bf16.msra.mxu1 %v7657_v15  ;;  %v7923_v12 = vcombine.low %v7795_v33, %v7799_v34 }
 0x168   : > { %4175 = vmatprep.subr.bf16.mxu0 %v7884_v51  ;;  %4368 = vmatprep.subr.bf16.mxu1 %v7886_v59  ;;  %v7934_v51 = vcombine.high %v7804_v61, %v7808_v8  ;;  %v7811_v59 = vld [vmem:[%s12230_s1 + $0x7c0] sm:$0xff] }
 0x169   : > { %2694 = vmatmul.mubr.bf16.gmra.mrb[24].mxu0 %v10350_v21  ;;  %2887 = vmatmul.mubr.bf16.gmra.mrb[24].mxu1 %v10350_v21 }
 0x16a   : > { %7666 = vmatprep.mubr.msk.bf16.mxu0 %vm1108_vm0, %v10355_v13  ;;  %7682 = vmatprep.mubr.msk.bf16.mxu1 %vm1108_vm0, %v10355_v13 }
 0x171   : > { %2704 = vmatmul.mubr.bf16.gmra.mrb[28].mxu0 %v10362_v56  ;;  %2897 = vmatmul.mubr.bf16.gmra.mrb[28].mxu1 %v10362_v56 }
 0x172   : > { %7667 = vmatprep.mubr.msk.bf16.mxu0 %vm1108_vm0, %v10367_v3  ;;  %7683 = vmatprep.mubr.msk.bf16.mxu1 %vm1108_vm0, %v10367_v3 }
 0x179   : > { %2714 = vmatmul.mubr.bf16.gmra.mrb[32].mxu0 %v9742_v37  ;;  %2907 = vmatmul.mubr.bf16.gmra.mrb[32].mxu1 %v9742_v37  ;;  %v7763_v37 = vld [vmem:[%s12230_s1 + $0x640] sm:$0xff] }
 0x17a   : > { %7668 = vmatprep.mubr.msk.bf16.mxu0 %vm1108_vm0, %v9745_v39  ;;  %7684 = vmatprep.mubr.msk.bf16.mxu1 %vm1108_vm0, %v9745_v39  ;;  %v7767_v39 = vld [vmem:[%s12230_s1 + $0x660] sm:$0xff] }
 0x181   : > { %2724 = vmatmul.mubr.bf16.gmra.mrb[36].mxu0 %v9754_v40  ;;  %2917 = vmatmul.mubr.bf16.gmra.mrb[36].mxu1 %v9754_v40  ;;  %v7764_v40 = vld [vmem:[%s12230_s1 + $0x648] sm:$0xff] }
 0x182   : > { %7669 = vmatprep.mubr.msk.bf16.mxu0 %vm1108_vm0, %v9757_v41  ;;  %7685 = vmatprep.mubr.msk.bf16.mxu1 %vm1108_vm0, %v9757_v41  ;;  %v7768_v41 = vld [vmem:[%s12230_s1 + $0x668] sm:$0xff] }
 0x189   : > { %2734 = vmatmul.mubr.bf16.gmra.mrb[40].mxu0 %v9766_v42  ;;  %2927 = vmatmul.mubr.bf16.gmra.mrb[40].mxu1 %v9766_v42  ;;  %v7892_v42 = vcombine.high %v7763_v37, %v7767_v39 }
 0x18a   : > { %7670 = vmatprep.mubr.msk.bf16.mxu0 %vm1108_vm0, %v9769_v43  ;;  %7686 = vmatprep.mubr.msk.bf16.mxu1 %vm1108_vm0, %v9769_v43  ;;  %v7771_v43 = vld [vmem:[%s12230_s1 + $0x680] sm:$0xff] }
 0x191   : > { %2744 = vmatmul.mubr.bf16.gmra.mrb[44].mxu0 %v9778_v44  ;;  %2937 = vmatmul.mubr.bf16.gmra.mrb[44].mxu1 %v9778_v44  ;;  %v7775_v44 = vld [vmem:[%s12230_s1 + $0x6a0] sm:$0xff] }
 0x192   : > { %7671 = vmatprep.mubr.msk.bf16.mxu0 %vm1108_vm0, %v9781_v45  ;;  %7687 = vmatprep.mubr.msk.bf16.mxu1 %vm1108_vm0, %v9781_v45  ;;  %v7894_v45 = vcombine.high %v7764_v40, %v7768_v41  ;;  %v7899_v4 = vcombine.low %v7771_v43, %v7775_v44 }
 0x199   : > { %2754 = vmatmul.mubr.bf16.gmra.mrb[48].mxu0 %v9790_v47  ;;  %2947 = vmatmul.mubr.bf16.gmra.mrb[48].mxu1 %v9790_v47  ;;  %v7772_v47 = vld [vmem:[%s12230_s1 + $0x688] sm:$0xff] }
 0x19a   : > { %7672 = vmatprep.mubr.msk.bf16.mxu0 %vm1108_vm0, %v9793_v48  ;;  %7688 = vmatprep.mubr.msk.bf16.mxu1 %vm1108_vm0, %v9793_v48  ;;  %v7776_v48 = vld [vmem:[%s12230_s1 + $0x6a8] sm:$0xff] }
 0x19b   : > { %v7902_v63 = vcombine.high %v7772_v47, %v7776_v48  ;;  %v7901_v22 = vcombine.low %v7772_v47, %v7776_v48  ;;  %v7820_v47 = vld [vmem:[%s12230_s1 + $0x808] sm:$0xff] }
 0x19c   : > { %v7824_v48 = vld [vmem:[%s12230_s1 + $0x828] sm:$0xff] }
 0x1a1   : > { %2764 = vmatmul.mubr.bf16.gmra.mrb[52].mxu0 %v9802_v49  ;;  %2957 = vmatmul.mubr.bf16.gmra.mrb[52].mxu1 %v9802_v49  ;;  %v7891_v49 = vcombine.low %v7763_v37, %v7767_v39  ;;  %v7815_v37 = vld [vmem:[%s12230_s1 + $0x7e0] sm:$0xff]  ;;  %v7816_v39 = vld [vmem:[%s12230_s1 + $0x7e8] sm:$0xff] }
 0x1a2   : > { %7673 = vmatprep.mubr.msk.bf16.mxu0 %vm1108_vm0, %v9805_v50  ;;  %7689 = vmatprep.mubr.msk.bf16.mxu1 %vm1108_vm0, %v9805_v50  ;;  %v10453_v50 = vld [vmem:[%s12230_s1 + $0x610] sm:$0xff] }
 0x1a9   : > { %2774 = vmatmul.mubr.bf16.gmra.mrb[56].mxu0 %v9814_v52  ;;  %2967 = vmatmul.mubr.bf16.gmra.mrb[56].mxu1 %v9814_v52  ;;  %v10458_v52 = vld [vmem:[%s12230_s1 + $0x630] sm:$0xff] }
 0x1aa   : > { %7674 = vmatprep.mubr.msk.bf16.mxu0 %vm1108_vm0, %v9817_v53  ;;  %7690 = vmatprep.mubr.msk.bf16.mxu1 %vm1108_vm0, %v9817_v53  ;;  %v10463_v53 = vld [vmem:[%s12230_s1 + $0x618] sm:$0xff] }
 0x1ab   : > { %v7889_v0 = vcombine.low %v10463_v53, %v10475_v54 }
 0x1b1   : > { %2784 = vmatmul.mubr.bf16.gmra.mrb[60].mxu0 %v9826_v55  ;;  %2977 = vmatmul.mubr.bf16.gmra.mrb[60].mxu1 %v9826_v55  ;;  %v7893_v55 = vcombine.low %v7764_v40, %v7768_v41  ;;  %v7931_v40 = vcombine.low %v7803_v2, %v7807_v5  ;;  %v7933_v41 = vcombine.low %v7804_v61, %v7808_v8  ;;  %v9266_v61 = vld [vmem:[%s9396_s16 + $0xc0] ss:$8 sps:$4 sm:$0xff]   ;;  %v9267_v8 = vld [vmem:[%s9396_s16 + $0xd4] ss:$8 sps:$4 sm:$0xff]  }
 0x1b2   : > { %7691 = vmatprep.mubr.msk.bf16.mxu0 %vm1108_vm0, %v10106_v14  ;;  %7707 = vmatprep.mubr.msk.bf16.mxu1 %vm1108_vm0, %v10106_v14  ;;  %v7900_v14 = vcombine.high %v7771_v43, %v7775_v44  ;;  %v7819_v44 = vld [vmem:[%s12230_s1 + $0x800] sm:$0xff] }
 0x1b9   : > { %3020 = vmatmul.mubr.bf16.vlgmr.msra.gmra.mrb[64].mxu0 %v10115_v19  ;;  %3213 = vmatmul.mubr.bf16.vlgmr.msra.gmra.mrb[64].mxu1 %v10115_v19  ;;  %v7887_v19 = vcombine.low %v10453_v50, %v10458_v52 }
 0x1ba   : > { %4176 = vmatpush1.bf16.msra.mxu0 %v7883_v60  ;;  %4369 = vmatpush1.bf16.msra.mxu1 %v7885_v1  ;;  %v7779_v60 = vld [vmem:[%s12230_s1 + $0x6c0] sm:$0xff]  ;;  %v7780_v1 = vld [vmem:[%s12230_s1 + $0x6c8] sm:$0xff] }
 0x1bb   : > { %7692 = vmatprep.mubr.msk.bf16.mxu0 %vm1108_vm0, %v9843_v62  ;;  %7708 = vmatprep.mubr.msk.bf16.mxu1 %vm1108_vm0, %v9843_v62  ;;  %v7784_v62 = vld [vmem:[%s12230_s1 + $0x6e8] sm:$0xff]  ;;  %v7908_v17 = vcombine.high %v7779_v60, %v7783_v35  ;;  %v7907_v27 = vcombine.low %v7779_v60, %v7783_v35  ;;  %v7831_v60 = vld [vmem:[%s12230_s1 + $0x860] sm:$0xff] }
 0x1bc   : > { %4177 = vmatprep.subr.bf16.mxu0 %v7892_v42  ;;  %4370 = vmatprep.subr.bf16.mxu1 %v7894_v45  ;;  %v7910_v46 = vcombine.high %v7780_v1, %v7784_v62  ;;  %v7909_v28 = vcombine.low %v7780_v1, %v7784_v62  ;;  %v7940_v42 = vcombine.high %v7811_v59, %v7815_v37  ;;  %v7823_v45 = vld [vmem:[%s12230_s1 + $0x820] sm:$0xff]  ;;  %v7832_v35 = vld [vmem:[%s12230_s1 + $0x868] sm:$0xff] }
 0x1bd   : > { %v7947_v1 = vcombine.low %v7819_v44, %v7823_v45  ;;  %v7949_v62 = vcombine.low %v7820_v47, %v7824_v48 }
 0x1be   : > { %4178 = vmatpush1.bf16.msra.mxu0 %v7891_v49  ;;  %4371 = vmatpush1.bf16.msra.mxu1 %v7893_v55  ;;  %v7939_v49 = vcombine.low %v7811_v59, %v7815_v37  ;;  %v10664_v59 = vld [vmem:[%s9396_s16 + $0x24] ss:$8 sps:$4 sm:$0xff]   ;;  %v9272_v37 = vld [vmem:[%s9396_s16 + $0xf0] ss:$8 sps:$4 sm:$0xff]  }
 0x1bf   : > { %4179 = vmatprep.subr.bf16.mxu0 %v7900_v14  ;;  %4372 = vmatprep.subr.bf16.mxu1 %v7902_v63  ;;  %v7950_v14 = vcombine.high %v7820_v47, %v7824_v48  ;;  %v7827_v63 = vld [vmem:[%s12230_s1 + $0x840] sm:$0xff]  ;;  %v7777_v47 = vld [vmem:[%s12230_s1 + $0x6b0] sm:$0xff] }
 0x1c0   : > { %v7955_v29 = vcombine.low %v7827_v63, %v7831_v60 }
 0x1c1   : > { %3030 = vmatmul.mubr.bf16.gmra.mrb[68].mxu0 %v10190_v10  ;;  %3223 = vmatmul.mubr.bf16.gmra.mrb[68].mxu1 %v10190_v10  ;;  %v7916_v10 = vcombine.high %v7787_v23, %v7791_v25  ;;  %v7836_v23 = vld [vmem:[%s12230_s1 + $0x888] sm:$0xff] }
 0x1c2   : > { %7693 = vmatprep.mubr.msk.bf16.mxu0 %vm1108_vm0, %v10201_v38  ;;  %7709 = vmatprep.mubr.msk.bf16.mxu1 %vm1108_vm0, %v10201_v38  ;;  %v7796_v38 = vld [vmem:[%s12230_s1 + $0x748] sm:$0xff] }
 0x1c3   : > { %4180 = vmatpush1.bf16.msra.mxu0 %v7899_v4  ;;  %4373 = vmatpush1.bf16.msra.mxu1 %v7901_v22  ;;  %v7926_v20 = vcombine.high %v7796_v38, %v7800_v36  ;;  %v7925_v15 = vcombine.low %v7796_v38, %v7800_v36  ;;  %v7956_v4 = vcombine.high %v7827_v63, %v7831_v60  ;;  %v7840_v25 = vld [vmem:[%s12230_s1 + $0x8a8] sm:$0xff] }
 0x1c4   : > { %4181 = vmatprep.subr.bf16.mxu0 %v7908_v17  ;;  %4374 = vmatprep.subr.bf16.mxu1 %v7910_v46  ;;  %v7835_v17 = vld [vmem:[%s12230_s1 + $0x880] sm:$0xff]  ;;  %v7965_v34 = vcombine.low %v7836_v23, %v7840_v25 }
 0x1c5   : > { %v7839_v46 = vld [vmem:[%s12230_s1 + $0x8a0] sm:$0xff] }
 0x1c6   : > { %v7963_v33 = vcombine.low %v7835_v17, %v7839_v46 }
 0x1c7   : > { %4182 = vmatpush1.bf16.msra.mxu0 %v7907_v27  ;;  %4375 = vmatpush1.bf16.msra.mxu1 %v7909_v28  ;;  %v7966_v27 = vcombine.high %v7836_v23, %v7840_v25  ;;  %v7843_v28 = vld [vmem:[%s12230_s1 + $0x8c0] sm:$0xff] }
 0x1c8   : > { %4183 = vmatprep.subr.bf16.mxu0 %v7916_v10  ;;  %4376 = vmatprep.subr.bf16.mxu1 %v7918_v30  ;;  %v7847_v10 = vld [vmem:[%s12230_s1 + $0x8e0] sm:$0xff]  ;;  %v7848_v30 = vld [vmem:[%s12230_s1 + $0x8e8] sm:$0xff] }
 0x1c9   : > { %3040 = vmatmul.mubr.bf16.gmra.mrb[72].mxu0 %v10226_v26  ;;  %3233 = vmatmul.mubr.bf16.gmra.mrb[72].mxu1 %v10226_v26  ;;  %v7932_v26 = vcombine.high %v7803_v2, %v7807_v5  ;;  %v7972_v38 = vcombine.high %v7843_v28, %v7847_v10  ;;  %v9264_v2 = vld [vmem:[%s9396_s16 + $0xb0] ss:$8 sps:$4 sm:$0xff]   ;;  %v9265_v5 = vld [vmem:[%s9396_s16 + $0xc4] ss:$8 sps:$4 sm:$0xff]  }
 0x1ca   : > { %7694 = vmatprep.mubr.msk.bf16.mxu0 %vm1108_vm0, %v10237_v58  ;;  %7710 = vmatprep.mubr.msk.bf16.mxu1 %vm1108_vm0, %v10237_v58  ;;  %v7812_v58 = vld [vmem:[%s12230_s1 + $0x7c8] sm:$0xff] }
 0x1cb   : > { %4184 = vmatpush1.bf16.msra.mxu0 %v7915_v31  ;;  %4377 = vmatpush1.bf16.msra.mxu1 %v7917_v16  ;;  %v7942_v43 = vcombine.high %v7812_v58, %v7816_v39  ;;  %v7941_v55 = vcombine.low %v7812_v58, %v7816_v39  ;;  %v7971_v31 = vcombine.low %v7843_v28, %v7847_v10  ;;  %v10672_v58 = vld [vmem:[%s9396_s16 + $0x20] ss:$8 sps:$4 sm:$0xff]   ;;  %v7765_v39 = vld [vmem:[%s12230_s1 + $0x650] sm:$0xff] }
 0x1cc   : > { %4185 = vmatprep.subr.bf16.mxu0 %v7924_v18  ;;  %4378 = vmatprep.subr.bf16.mxu1 %v7926_v20  ;;  %v7888_v18 = vcombine.high %v10453_v50, %v10458_v52  ;;  %v7890_v20 = vcombine.high %v10463_v53, %v10475_v54  ;;  %v7781_v50 = vld [vmem:[%s12230_s1 + $0x6d0] sm:$0xff]  ;;  %v10723_v53 = vld [vmem:[%s9396_s16 + $0x44] ss:$8 sps:$4 sm:$0xff]   ;;  %v7786_v54 = vld [vmem:[%s12230_s1 + $0x6f8] sm:$0xff] }
 0x1cd   : > { %v7785_v52 = vld [vmem:[%s12230_s1 + $0x6f0] sm:$0xff] }
 0x1ce   : > { %v7911_v23 = vcombine.low %v7781_v50, %v7785_v52  ;;  %v7801_v28 = vld [vmem:[%s12230_s1 + $0x770] sm:$0xff] }
 0x1cf   : > { %4186 = vmatpush1.bf16.msra.mxu0 %v7923_v12  ;;  %4379 = vmatpush1.bf16.msra.mxu1 %v7925_v15  ;;  %v9268_v12 = vld [vmem:[%s9396_s16 + $0xd0] ss:$8 sps:$4 sm:$0xff]   ;;  %v9269_v15 = vld [vmem:[%s9396_s16 + $0xe4] ss:$8 sps:$4 sm:$0xff]   ;;  %v10759_v10 = vld [vmem:[%s9396_s16 + $0x54] ss:$8 sps:$4 sm:$0xff]  }
 0x1d0   : > { %4187 = vmatprep.subr.bf16.mxu0 %v7932_v26  ;;  %4380 = vmatprep.subr.bf16.mxu1 %v7934_v51  ;;  %v9270_v26 = vld [vmem:[%s9396_s16 + $0xe0] ss:$8 sps:$4 sm:$0xff]   ;;  %v9271_v51 = vld [vmem:[%s9396_s16 + $0xf4] ss:$8 sps:$4 sm:$0xff]  }
 0x1d1   : > { %3050 = vmatmul.mubr.bf16.gmra.mrb[76].mxu0 %v10262_v6  ;;  %3243 = vmatmul.mubr.bf16.gmra.mrb[76].mxu1 %v10262_v6  ;;  %v7948_v6 = vcombine.high %v7819_v44, %v7823_v45  ;;  %v7773_v45 = vld [vmem:[%s12230_s1 + $0x690] sm:$0xff] }
 0x1d2   : > { %7695 = vmatprep.mubr.msk.bf16.mxu0 %vm1108_vm0, %v10273_v11  ;;  %7711 = vmatprep.mubr.msk.bf16.mxu1 %vm1108_vm0, %v10273_v11  ;;  %v7828_v11 = vld [vmem:[%s12230_s1 + $0x848] sm:$0xff]  ;;  %v7904_v63 = vcombine.high %v7773_v45, %v7777_v47 }
 0x1d3   : > { %4188 = vmatpush1.bf16.msra.mxu0 %v7931_v40  ;;  %4381 = vmatpush1.bf16.msra.mxu1 %v7933_v41  ;;  %v7958_v22 = vcombine.high %v7828_v11, %v7832_v35  ;;  %v7957_v32 = vcombine.low %v7828_v11, %v7832_v35  ;;  %v7769_v40 = vld [vmem:[%s12230_s1 + $0x670] sm:$0xff]  ;;  %v7766_v41 = vld [vmem:[%s12230_s1 + $0x658] sm:$0xff] }
 0x1d4   : > { %4189 = vmatprep.subr.bf16.mxu0 %v7940_v42  ;;  %4382 = vmatprep.subr.bf16.mxu1 %v7942_v43  ;;  %v7770_v42 = vld [vmem:[%s12230_s1 + $0x678] sm:$0xff]  ;;  %v7896_v44 = vcombine.high %v7765_v39, %v7769_v40 }
 0x1d5   : > { %v10687_v43 = vld [vmem:[%s9396_s16 + $0x34] ss:$8 sps:$4 sm:$0xff]   ;;  %v7898_v48 = vcombine.high %v7766_v41, %v7770_v42  ;;  %v10714_v11 = vld [vmem:[%s9396_s16 + $0x30] ss:$8 sps:$4 sm:$0xff]  }
 0x1d7   : > { %4190 = vmatpush1.bf16.msra.mxu0 %v7939_v49  ;;  %4383 = vmatpush1.bf16.msra.mxu1 %v7941_v55  ;;  %v7774_v49 = vld [vmem:[%s12230_s1 + $0x698] sm:$0xff] }
 0x1d8   : > { %4191 = vmatprep.subr.bf16.mxu0 %v7948_v6  ;;  %4384 = vmatprep.subr.bf16.mxu1 %v7950_v14  ;;  %v7778_v55 = vld [vmem:[%s12230_s1 + $0x6b8] sm:$0xff]  ;;  %v7895_v6 = vcombine.low %v7765_v39, %v7769_v40  ;;  %v7897_v14 = vcombine.low %v7766_v41, %v7770_v42  ;;  %v7825_v39 = vld [vmem:[%s12230_s1 + $0x830] sm:$0xff] }
 0x1d9   : > { %3060 = vmatmul.mubr.bf16.gmra.mrb[80].mxu0 %v10298_v24  ;;  %3253 = vmatmul.mubr.bf16.gmra.mrb[80].mxu1 %v10298_v24  ;;  %v7964_v24 = vcombine.high %v7835_v17, %v7839_v46  ;;  %v7906_v60 = vcombine.high %v7774_v49, %v7778_v55  ;;  %v7905_v35 = vcombine.low %v7774_v49, %v7778_v55  ;;  %v7790_v17 = vld [vmem:[%s12230_s1 + $0x718] sm:$0xff]  ;;  %v7829_v49 = vld [vmem:[%s12230_s1 + $0x850] sm:$0xff] }
 0x1da   : > { %7696 = vmatprep.mubr.msk.bf16.mxu0 %vm1108_vm0, %v10309_v57  ;;  %7712 = vmatprep.mubr.msk.bf16.mxu1 %vm1108_vm0, %v10309_v57  ;;  %v7844_v57 = vld [vmem:[%s12230_s1 + $0x8c8] sm:$0xff]  ;;  %v7794_v46 = vld [vmem:[%s12230_s1 + $0x738] sm:$0xff]  ;;  %v7833_v55 = vld [vmem:[%s12230_s1 + $0x870] sm:$0xff] }
 0x1db   : > { %4192 = vmatpush1.bf16.msra.mxu0 %v7947_v1  ;;  %4385 = vmatpush1.bf16.msra.mxu1 %v7949_v62  ;;  %v7974_v36 = vcombine.high %v7844_v57, %v7848_v30  ;;  %v7973_v16 = vcombine.low %v7844_v57, %v7848_v30  ;;  %v7912_v1 = vcombine.high %v7781_v50, %v7785_v52  ;;  %v7798_v57 = vld [vmem:[%s12230_s1 + $0x758] sm:$0xff] }
 0x1dc   : > { %4193 = vmatprep.subr.bf16.mxu0 %v7956_v4  ;;  %4386 = vmatprep.subr.bf16.mxu1 %v7958_v22  ;;  %v7789_v4 = vld [vmem:[%s12230_s1 + $0x710] sm:$0xff]  ;;  %v7802_v30 = vld [vmem:[%s12230_s1 + $0x778] sm:$0xff]  ;;  %v7960_v52 = vcombine.high %v7829_v49, %v7833_v55 }
 0x1dd   : > { %v7793_v22 = vld [vmem:[%s12230_s1 + $0x730] sm:$0xff]  ;;  %v7822_v40 = vld [vmem:[%s12230_s1 + $0x818] sm:$0xff] }
 0x1de   : > { %v7826_v41 = vld [vmem:[%s12230_s1 + $0x838] sm:$0xff] }
 0x1df   : > { %4194 = vmatpush1.bf16.msra.mxu0 %v7955_v29  ;;  %4387 = vmatpush1.bf16.msra.mxu1 %v7957_v32  ;;  %v7920_v29 = vcombine.high %v7789_v4, %v7793_v22  ;;  %v10750_v32 = vld [vmem:[%s9396_s16 + $0x40] ss:$8 sps:$4 sm:$0xff]   ;;  %v7953_v50 = vcombine.low %v7822_v40, %v7826_v41 }
 0x1e0   : > { %4195 = vmatprep.subr.bf16.mxu0 %v7964_v24  ;;  %4388 = vmatprep.subr.bf16.mxu1 %v7966_v27  ;;  %v7922_v24 = vcombine.high %v7790_v17, %v7794_v46  ;;  %v7797_v27 = vld [vmem:[%s12230_s1 + $0x750] sm:$0xff] }
 0x1e1   : > { %3070 = vmatmul.mubr.bf16.gmra.mrb[84].mxu0 %v10334_v7  ;;  %3263 = vmatmul.mubr.bf16.gmra.mrb[84].mxu1 %v10334_v7  ;;  %v9258_v7 = vld [vmem:[%s9396_s16 + $0x80] ss:$8 sps:$4 sm:$0xff]  }
 0x1e2   : > { %7697 = vmatprep.mubr.msk.bf16.mxu0 %vm1108_vm0, %v10339_v9  ;;  %7713 = vmatprep.mubr.msk.bf16.mxu1 %vm1108_vm0, %v10339_v9  ;;  %v9259_v9 = vld [vmem:[%s9396_s16 + $0x94] ss:$8 sps:$4 sm:$0xff]  }
 0x1e3   : > { %4196 = vmatpush1.bf16.msra.mxu0 %v7963_v33  ;;  %4389 = vmatpush1.bf16.msra.mxu1 %v7965_v34  ;;  %v7919_v33 = vcombine.low %v7789_v4, %v7793_v22  ;;  %v7921_v34 = vcombine.low %v7790_v17, %v7794_v46  ;;  %v10858_v17 = vld [vmem:[%s9396_s16 + $0x70] ss:$8 sps:$4 sm:$0xff]  }
 0x1e4   : > { %4197 = vmatprep.subr.bf16.mxu0 %v7972_v38  ;;  %4390 = vmatprep.subr.bf16.mxu1 %v7974_v36  ;;  %v7928_v38 = vcombine.high %v7797_v27, %v7801_v28  ;;  %v7930_v36 = vcombine.high %v7798_v57, %v7802_v30 }
 0x1e7   : > { %4198 = vmatpush1.bf16.msra.mxu0 %v7971_v31  ;;  %4391 = vmatpush1.bf16.msra.mxu1 %v7973_v16  ;;  %v7805_v31 = vld [vmem:[%s12230_s1 + $0x790] sm:$0xff] }
 0x1e8   : > { %4561 = vmatprep.subr.bf16.mxu0 %v7888_v18  ;;  %4754 = vmatprep.subr.bf16.mxu1 %v7890_v20  ;;  %v7809_v16 = vld [vmem:[%s12230_s1 + $0x7b0] sm:$0xff]  ;;  %v7806_v18 = vld [vmem:[%s12230_s1 + $0x798] sm:$0xff] }
 0x1e9   : > { %3080 = vmatmul.mubr.bf16.gmra.mrb[88].mxu0 %v10350_v21  ;;  %3273 = vmatmul.mubr.bf16.gmra.mrb[88].mxu1 %v10350_v21  ;;  %v9260_v21 = vld [vmem:[%s9396_s16 + $0x90] ss:$8 sps:$4 sm:$0xff]  }
 0x1ea   : > { %7698 = vmatprep.mubr.msk.bf16.mxu0 %vm1108_vm0, %v10355_v13  ;;  %7714 = vmatprep.mubr.msk.bf16.mxu1 %vm1108_vm0, %v10355_v13  ;;  %v9261_v13 = vld [vmem:[%s9396_s16 + $0xa4] ss:$8 sps:$4 sm:$0xff]   ;;  %v7810_v20 = vld [vmem:[%s12230_s1 + $0x7b8] sm:$0xff] }
 0x1f1   : > { %3090 = vmatmul.mubr.bf16.gmra.mrb[92].mxu0 %v10362_v56  ;;  %3283 = vmatmul.mubr.bf16.gmra.mrb[92].mxu1 %v10362_v56  ;;  %v9262_v56 = vld [vmem:[%s9396_s16 + $0xa0] ss:$8 sps:$4 sm:$0xff]  }
 0x1f2   : > { %7699 = vmatprep.mubr.msk.bf16.mxu0 %vm1108_vm0, %v10367_v3  ;;  %7715 = vmatprep.mubr.msk.bf16.mxu1 %vm1108_vm0, %v10367_v3  ;;  %v9263_v3 = vld [vmem:[%s9396_s16 + $0xb4] ss:$8 sps:$4 sm:$0xff]  }
 0x1f9   : > { %3100 = vmatmul.mubr.bf16.gmra.mrb[96].mxu0 %v9258_v7  ;;  %3293 = vmatmul.mubr.bf16.gmra.mrb[96].mxu1 %v9258_v7  ;;  %v7927_v7 = vcombine.low %v7797_v27, %v7801_v28  ;;  %v7850_v27 = vld [vmem:[%s12230_s1 + $0x8f8] sm:$0xff] }
 0x1fa   : > { %7700 = vmatprep.mubr.msk.bf16.mxu0 %vm1108_vm0, %v9259_v9  ;;  %7716 = vmatprep.mubr.msk.bf16.mxu1 %vm1108_vm0, %v9259_v9  ;;  %v7929_v9 = vcombine.low %v7798_v57, %v7802_v30 }
 0x201   : > { %3110 = vmatmul.mubr.bf16.gmra.mrb[100].mxu0 %v9260_v21  ;;  %3303 = vmatmul.mubr.bf16.gmra.mrb[100].mxu1 %v9260_v21  ;;  %v7936_v21 = vcombine.high %v7805_v31, %v7809_v16 }
 0x202   : > { %7701 = vmatprep.mubr.msk.bf16.mxu0 %vm1108_vm0, %v9261_v13  ;;  %7717 = vmatprep.mubr.msk.bf16.mxu1 %vm1108_vm0, %v9261_v13  ;;  %v10786_v13 = vld [vmem:[%s9396_s16 + $0x50] ss:$8 sps:$4 sm:$0xff]  }
 0x209   : > { %3120 = vmatmul.mubr.bf16.gmra.mrb[104].mxu0 %v9262_v56  ;;  %3313 = vmatmul.mubr.bf16.gmra.mrb[104].mxu1 %v9262_v56  ;;  %v7938_v56 = vcombine.high %v7806_v18, %v7810_v20 }
 0x20a   : > { %7702 = vmatprep.mubr.msk.bf16.mxu0 %vm1108_vm0, %v9263_v3  ;;  %7718 = vmatprep.mubr.msk.bf16.mxu1 %vm1108_vm0, %v9263_v3  ;;  %v7813_v3 = vld [vmem:[%s12230_s1 + $0x7d0] sm:$0xff] }
 0x211   : > { %3130 = vmatmul.mubr.bf16.gmra.mrb[108].mxu0 %v9264_v2  ;;  %3323 = vmatmul.mubr.bf16.gmra.mrb[108].mxu1 %v9264_v2  ;;  %v7817_v2 = vld [vmem:[%s12230_s1 + $0x7f0] sm:$0xff] }
 0x212   : > { %7703 = vmatprep.mubr.msk.bf16.mxu0 %vm1108_vm0, %v9265_v5  ;;  %7719 = vmatprep.mubr.msk.bf16.mxu1 %vm1108_vm0, %v9265_v5  ;;  %v10795_v5 = vld [vmem:[%s9396_s16 + $0x64] ss:$8 sps:$4 sm:$0xff]   ;;  %v7943_v42 = vcombine.low %v7813_v3, %v7817_v2 }
 0x219   : > { %3140 = vmatmul.mubr.bf16.gmra.mrb[112].mxu0 %v9266_v61  ;;  %3333 = vmatmul.mubr.bf16.gmra.mrb[112].mxu1 %v9266_v61  ;;  %v7814_v61 = vld [vmem:[%s12230_s1 + $0x7d8] sm:$0xff] }
 0x21a   : > { %7704 = vmatprep.mubr.msk.bf16.mxu0 %vm1108_vm0, %v9267_v8  ;;  %7720 = vmatprep.mubr.msk.bf16.mxu1 %vm1108_vm0, %v9267_v8  ;;  %v7818_v8 = vld [vmem:[%s12230_s1 + $0x7f8] sm:$0xff] }
 0x221   : > { %3150 = vmatmul.mubr.bf16.gmra.mrb[116].mxu0 %v9268_v12  ;;  %3343 = vmatmul.mubr.bf16.gmra.mrb[116].mxu1 %v9268_v12  ;;  %v7935_v12 = vcombine.low %v7805_v31, %v7809_v16  ;;  %v10885_v31 = vld [vmem:[%s9396_s16 + $0x80] ss:$8 sps:$4 sm:$0xff]  }
 0x222   : > { %7705 = vmatprep.mubr.msk.bf16.mxu0 %vm1108_vm0, %v9269_v15  ;;  %7721 = vmatprep.mubr.msk.bf16.mxu1 %vm1108_vm0, %v9269_v15  ;;  %v7937_v15 = vcombine.low %v7806_v18, %v7810_v20  ;;  %v9181_v16 = vld [vmem:[%s12232_s3 + $0xc0] sm:$0xff]   ;;  %v10891_v18 = vld [vmem:[%s9396_s16 + $0x94] ss:$8 sps:$4 sm:$0xff]   ;;  %v10900_v20 = vld [vmem:[%s9396_s16 + $0x90] ss:$8 sps:$4 sm:$0xff]  }
 0x229   : > { %3160 = vmatmul.mubr.bf16.gmra.mrb[120].mxu0 %v9270_v26  ;;  %3353 = vmatmul.mubr.bf16.gmra.mrb[120].mxu1 %v9270_v26  ;;  %v7944_v26 = vcombine.high %v7813_v3, %v7817_v2  ;;  %v10927_v3 = vld [vmem:[%s9396_s16 + $0xc4] ss:$8 sps:$4 sm:$0xff]   ;;  %v10936_v2 = vld [vmem:[%s9396_s16 + $0xc0] ss:$8 sps:$4 sm:$0xff]  }
 0x22a   : > { %7706 = vmatprep.mubr.msk.bf16.mxu0 %vm1108_vm0, %v9271_v51  ;;  %7722 = vmatprep.mubr.msk.bf16.mxu1 %vm1108_vm0, %v9271_v51  ;;  %v7946_v51 = vcombine.high %v7814_v61, %v7818_v8 }
 0x231   : > { %3170 = vmatmul.mubr.bf16.gmra.mrb[124].mxu0 %v9272_v37  ;;  %3363 = vmatmul.mubr.bf16.gmra.mrb[124].mxu1 %v9272_v37  ;;  %v7821_v37 = vld [vmem:[%s12230_s1 + $0x810] sm:$0xff] }
 0x232   : > { %7979 = vmatprep.mubr.msk.bf16.mxu0 %vm1108_vm0, %v10664_v59  ;;  %7995 = vmatprep.mubr.msk.bf16.mxu1 %vm1108_vm0, %v10664_v59 }
 0x239   : > { %4208 = vmatmul.mubr.bf16.vlgmr.msra.gmra.mrb[0].mxu0 %v10672_v58  ;;  %4401 = vmatmul.mubr.bf16.vlgmr.msra.gmra.mrb[0].mxu1 %v10672_v58 }
 0x23a   : > { %4562 = vmatpush1.bf16.msra.mxu0 %v7887_v19  ;;  %4755 = vmatpush1.bf16.msra.mxu1 %v7889_v0  ;;  %v7782_v19 = vld [vmem:[%s12230_s1 + $0x6d8] sm:$0xff]  ;;  %v7903_v0 = vcombine.low %v7773_v45, %v7777_v47  ;;  %v7952_v45 = vcombine.high %v7821_v37, %v7825_v39  ;;  %v10822_v47 = vld [vmem:[%s9396_s16 + $0x60] ss:$8 sps:$4 sm:$0xff]  }
 0x23b   : > { %7980 = vmatprep.mubr.msk.bf16.mxu0 %vm1108_vm0, %v10687_v43  ;;  %7996 = vmatprep.mubr.msk.bf16.mxu1 %vm1108_vm0, %v10687_v43  ;;  %v7914_v62 = vcombine.high %v7782_v19, %v7786_v54  ;;  %v7913_v25 = vcombine.low %v7782_v19, %v7786_v54  ;;  %v7837_v54 = vld [vmem:[%s12230_s1 + $0x890] sm:$0xff] }
 0x23c   : > { %4563 = vmatprep.subr.bf16.mxu0 %v7896_v44  ;;  %4756 = vmatprep.subr.bf16.mxu1 %v7898_v48  ;;  %v7945_v44 = vcombine.low %v7814_v61, %v7818_v8  ;;  %v7954_v48 = vcombine.high %v7822_v40, %v7826_v41  ;;  %v10939_v61 = vld [vmem:[%s9396_s16 + $0xd4] ss:$8 sps:$4 sm:$0xff]   ;;  %v10948_v8 = vld [vmem:[%s9396_s16 + $0xd0] ss:$8 sps:$4 sm:$0xff]  }
 0x23d   : > { %v10987_v40 = vld [vmem:[%s9396_s16 + $0x114] ss:$8 sps:$4 sm:$0xff]   ;;  %v10996_v41 = vld [vmem:[%s9396_s16 + $0x110] ss:$8 sps:$4 sm:$0xff]  }
 0x23e   : > { %4564 = vmatpush1.bf16.msra.mxu0 %v7895_v6  ;;  %4757 = vmatpush1.bf16.msra.mxu1 %v7897_v14  ;;  %v10831_v6 = vld [vmem:[%s9396_s16 + $0x74] ss:$8 sps:$4 sm:$0xff]  }
 0x23f   : > { %4565 = vmatprep.subr.bf16.mxu0 %v7904_v63  ;;  %4758 = vmatprep.subr.bf16.mxu1 %v7906_v60  ;;  %v7830_v14 = vld [vmem:[%s12230_s1 + $0x858] sm:$0xff]  ;;  %v7951_v60 = vcombine.low %v7821_v37, %v7825_v39  ;;  %v10975_v37 = vld [vmem:[%s9396_s16 + $0x104] ss:$8 sps:$4 sm:$0xff]   ;;  %v10984_v39 = vld [vmem:[%s9396_s16 + $0x100] ss:$8 sps:$4 sm:$0xff]  }
 0x240   : > { %v7834_v63 = vld [vmem:[%s12230_s1 + $0x878] sm:$0xff] }
 0x241   : > { %4218 = vmatmul.mubr.bf16.gmra.mrb[4].mxu0 %v10714_v11  ;;  %4411 = vmatmul.mubr.bf16.gmra.mrb[4].mxu1 %v10714_v11  ;;  %v7962_v19 = vcombine.high %v7830_v14, %v7834_v63  ;;  %v7961_v4 = vcombine.low %v7830_v14, %v7834_v63  ;;  %v9188_v14 = vld [vmem:[%s12232_s3 + $0x10] sm:$0xff]  }
 0x242   : > { %7981 = vmatprep.mubr.msk.bf16.mxu0 %vm1108_vm0, %v10723_v53  ;;  %7997 = vmatprep.mubr.msk.bf16.mxu1 %vm1108_vm0, %v10723_v53  ;;  %v9190_v63 = vld [vmem:[%s12232_s3 + $0x90] sm:$0xff]  }
 0x243   : > { %4566 = vmatpush1.bf16.msra.mxu0 %v7903_v0  ;;  %4759 = vmatpush1.bf16.msra.mxu1 %v7905_v35  ;;  %v7841_v0 = vld [vmem:[%s12230_s1 + $0x8b0] sm:$0xff]  ;;  %v7838_v35 = vld [vmem:[%s12230_s1 + $0x898] sm:$0xff] }
 0x244   : > { %4567 = vmatprep.subr.bf16.mxu0 %v7912_v1  ;;  %4760 = vmatprep.subr.bf16.mxu1 %v7914_v62  ;;  %v7842_v1 = vld [vmem:[%s12230_s1 + $0x8b8] sm:$0xff]  ;;  %v7959_v62 = vcombine.low %v7829_v49, %v7833_v55  ;;  %v7968_v22 = vcombine.high %v7837_v54, %v7841_v0  ;;  %v7967_v28 = vcombine.low %v7837_v54, %v7841_v0  ;;  %v9186_v49 = vld [vmem:[%s12232_s3 + $0x88] sm:$0xff]   ;;  %v9187_v55 = vld [vmem:[%s12232_s3 + $0x50] sm:$0xff]  }
 0x245   : > { %v7970_v46 = vcombine.high %v7838_v35, %v7842_v1  ;;  %v7969_v57 = vcombine.low %v7838_v35, %v7842_v1  ;;  %v9198_v54 = vld [vmem:[%s12232_s3 + $0xa0] sm:$0xff]   ;;  %v9199_v0 = vld [vmem:[%s12232_s3 + $0x68] sm:$0xff]  }
 0x246   : > { %v9201_v35 = vld [vmem:[%s12232_s3 + $0xe8] sm:$0xff]  }
 0x247   : > { %4568 = vmatpush1.bf16.msra.mxu0 %v7911_v23  ;;  %4761 = vmatpush1.bf16.msra.mxu1 %v7913_v25  ;;  %v7845_v23 = vld [vmem:[%s12230_s1 + $0x8d0] sm:$0xff]  ;;  %v9200_v1 = vld [vmem:[%s12232_s3 + $0x28] sm:$0xff]  }
 0x248   : > { %4569 = vmatprep.subr.bf16.mxu0 %v7920_v29  ;;  %4762 = vmatprep.subr.bf16.mxu1 %v7922_v24  ;;  %v7849_v25 = vld [vmem:[%s12230_s1 + $0x8f0] sm:$0xff]  ;;  %v10867_v29 = vld [vmem:[%s9396_s16 + $0x84] ss:$8 sps:$4 sm:$0xff]   ;;  %v7846_v24 = vld [vmem:[%s12230_s1 + $0x8d8] sm:$0xff] }
 0x249   : > { %4228 = vmatmul.mubr.bf16.gmra.mrb[8].mxu0 %v10750_v32  ;;  %4421 = vmatmul.mubr.bf16.gmra.mrb[8].mxu1 %v10750_v32  ;;  %v7976_v30 = vcombine.high %v7845_v23, %v7849_v25 }
 0x24a   : > { %7982 = vmatprep.mubr.msk.bf16.mxu0 %vm1108_vm0, %v10759_v10  ;;  %7998 = vmatprep.mubr.msk.bf16.mxu1 %vm1108_vm0, %v10759_v10 }
 0x24b   : > { %4570 = vmatpush1.bf16.msra.mxu0 %v7919_v33  ;;  %4763 = vmatpush1.bf16.msra.mxu1 %v7921_v34  ;;  %v7978_v33 = vcombine.high %v7846_v24, %v7850_v27  ;;  %v7975_v34 = vcombine.low %v7845_v23, %v7849_v25  ;;  %v9209_v23 = vld [vmem:[%s12232_s3 + $0xf8] sm:$0xff]  }
 0x24c   : > { %4571 = vmatprep.subr.bf16.mxu0 %v7928_v38  ;;  %4764 = vmatprep.subr.bf16.mxu1 %v7930_v36  ;;  %v7977_v38 = vcombine.low %v7846_v24, %v7850_v27  ;;  %v9179_v36 = vld [vmem:[%s12232_s3 + $0x40] sm:$0xff]   ;;  %v9208_v25 = vld [vmem:[%s12232_s3 + $0x38] sm:$0xff]  }
 0x24d   : > { %v9210_v24 = vld [vmem:[%s12232_s3 + $0xb8] sm:$0xff]  }
 0x24f   : > { %4572 = vmatpush1.bf16.msra.mxu0 %v7927_v7  ;;  %4765 = vmatpush1.bf16.msra.mxu1 %v7929_v9  ;;  %v10903_v7 = vld [vmem:[%s9396_s16 + $0xa4] ss:$8 sps:$4 sm:$0xff]   ;;  %v10912_v9 = vld [vmem:[%s9396_s16 + $0xa0] ss:$8 sps:$4 sm:$0xff]  }
 0x250   : > { %4573 = vmatprep.subr.bf16.mxu0 %v7936_v21  ;;  %4766 = vmatprep.subr.bf16.mxu1 %v7938_v56  ;;  %v10915_v21 = vld [vmem:[%s9396_s16 + $0xb4] ss:$8 sps:$4 sm:$0xff]   ;;  %v10924_v56 = vld [vmem:[%s9396_s16 + $0xb0] ss:$8 sps:$4 sm:$0xff]  }
 0x251   : > { %4238 = vmatmul.mubr.bf16.gmra.mrb[12].mxu0 %v10786_v13  ;;  %4431 = vmatmul.mubr.bf16.gmra.mrb[12].mxu1 %v10786_v13 }
 0x252   : > { %7983 = vmatprep.mubr.msk.bf16.mxu0 %vm1108_vm0, %v10795_v5  ;;  %7999 = vmatprep.mubr.msk.bf16.mxu1 %vm1108_vm0, %v10795_v5 }
 0x253   : > { %4574 = vmatpush1.bf16.msra.mxu0 %v7935_v12  ;;  %4767 = vmatpush1.bf16.msra.mxu1 %v7937_v15  ;;  %v10951_v12 = vld [vmem:[%s9396_s16 + $0xe4] ss:$8 sps:$4 sm:$0xff]   ;;  %v10960_v15 = vld [vmem:[%s9396_s16 + $0xe0] ss:$8 sps:$4 sm:$0xff]  }
 0x254   : > { %4575 = vmatprep.subr.bf16.mxu0 %v7944_v26  ;;  %4768 = vmatprep.subr.bf16.mxu1 %v7946_v51  ;;  %v10963_v26 = vld [vmem:[%s9396_s16 + $0xf4] ss:$8 sps:$4 sm:$0xff]   ;;  %v10972_v51 = vld [vmem:[%s9396_s16 + $0xf0] ss:$8 sps:$4 sm:$0xff]  }
 0x257   : > { %4576 = vmatpush1.bf16.msra.mxu0 %v7943_v42  ;;  %4769 = vmatpush1.bf16.msra.mxu1 %v7945_v44  ;;  %v9180_v42 = vld [vmem:[%s12232_s3] sm:$0xff]  }
 0x258   : > { %4577 = vmatprep.subr.bf16.mxu0 %v7952_v45  ;;  %4770 = vmatprep.subr.bf16.mxu1 %v7954_v48  ;;  %v9182_v44 = vld [vmem:[%s12232_s3 + $0x80] sm:$0xff]   ;;  %v9183_v45 = vld [vmem:[%s12232_s3 + $0x48] sm:$0xff]  }
 0x259   : > { %4248 = vmatmul.mubr.bf16.gmra.mrb[16].mxu0 %v10822_v47  ;;  %4441 = vmatmul.mubr.bf16.gmra.mrb[16].mxu1 %v10822_v47  ;;  %v9185_v48 = vld [vmem:[%s12232_s3 + $0xc8] sm:$0xff]  }
 0x25a   : > { %7984 = vmatprep.mubr.msk.bf16.mxu0 %vm1108_vm0, %v10831_v6  ;;  %8000 = vmatprep.mubr.msk.bf16.mxu1 %vm1108_vm0, %v10831_v6 }
 0x25b   : > { %4578 = vmatpush1.bf16.msra.mxu0 %v7951_v60  ;;  %4771 = vmatpush1.bf16.msra.mxu1 %v7953_v50  ;;  %v9193_v60 = vld [vmem:[%s12232_s3 + $0xd8] sm:$0xff]  }
 0x25c   : > { %4579 = vmatprep.subr.bf16.mxu0 %v7960_v52  ;;  %4772 = vmatprep.subr.bf16.mxu1 %v7962_v19  ;;  %v9192_v50 = vld [vmem:[%s12232_s3 + $0x18] sm:$0xff]   ;;  %v9196_v19 = vld [vmem:[%s12232_s3 + $0x20] sm:$0xff]  }
 0x25d   : > { %v9194_v52 = vld [vmem:[%s12232_s3 + $0x98] sm:$0xff]  }
 0x25f   : > { %4580 = vmatpush1.bf16.msra.mxu0 %v7959_v62  ;;  %4773 = vmatpush1.bf16.msra.mxu1 %v7961_v4  ;;  %v9202_v62 = vld [vmem:[%s12232_s3 + $0xa8] sm:$0xff]   ;;  %v9204_v4 = vld [vmem:[%s12232_s3 + $0x30] sm:$0xff]  }
 0x260   : > { %4581 = vmatprep.subr.bf16.mxu0 %v7968_v22  ;;  %4774 = vmatprep.subr.bf16.mxu1 %v7970_v46  ;;  %v9206_v22 = vld [vmem:[%s12232_s3 + $0xb0] sm:$0xff]   ;;  %v9207_v46 = vld [vmem:[%s12232_s3 + $0x78] sm:$0xff]  }
 0x261   : > { %4258 = vmatmul.mubr.bf16.gmra.mrb[20].mxu0 %v10858_v17  ;;  %4451 = vmatmul.mubr.bf16.gmra.mrb[20].mxu1 %v10858_v17 }
 0x262   : > { %7985 = vmatprep.mubr.msk.bf16.mxu0 %vm1108_vm0, %v10867_v29  ;;  %8001 = vmatprep.mubr.msk.bf16.mxu1 %vm1108_vm0, %v10867_v29 }
 0x263   : > { %4582 = vmatpush1.bf16.msra.mxu0 %v7967_v28  ;;  %4775 = vmatpush1.bf16.msra.mxu1 %v7969_v57 }
 0x264   : > { %4583 = vmatprep.subr.bf16.mxu0 %v7976_v30  ;;  %4776 = vmatprep.subr.bf16.mxu1 %v7978_v33 }
 0x267   : > { %4584 = vmatpush1.bf16.msra.mxu0 %v7975_v34  ;;  %4777 = vmatpush1.bf16.msra.mxu1 %v7977_v38 }
 0x268   : > { %8111 = vmatprep.subr.bf16.mxu0 %v9179_v36  ;;  %8223 = vmatprep.subr.bf16.mxu1 %v9181_v16 }
 0x269   : > { %4268 = vmatmul.mubr.bf16.gmra.mrb[24].mxu0 %v10885_v31  ;;  %4461 = vmatmul.mubr.bf16.gmra.mrb[24].mxu1 %v10885_v31 }
 0x26a   : > { %7986 = vmatprep.mubr.msk.bf16.mxu0 %vm1108_vm0, %v10891_v18  ;;  %8002 = vmatprep.mubr.msk.bf16.mxu1 %vm1108_vm0, %v10891_v18 }
 0x271   : > { %4278 = vmatmul.mubr.bf16.gmra.mrb[28].mxu0 %v10900_v20  ;;  %4471 = vmatmul.mubr.bf16.gmra.mrb[28].mxu1 %v10900_v20 }
 0x272   : > { %7987 = vmatprep.mubr.msk.bf16.mxu0 %vm1108_vm0, %v10903_v7  ;;  %8003 = vmatprep.mubr.msk.bf16.mxu1 %vm1108_vm0, %v10903_v7 }
 0x279   : > { %4288 = vmatmul.mubr.bf16.gmra.mrb[32].mxu0 %v10912_v9  ;;  %4481 = vmatmul.mubr.bf16.gmra.mrb[32].mxu1 %v10912_v9 }
 0x27a   : > { %7988 = vmatprep.mubr.msk.bf16.mxu0 %vm1108_vm0, %v10915_v21  ;;  %8004 = vmatprep.mubr.msk.bf16.mxu1 %vm1108_vm0, %v10915_v21 }
 0x281   : > { %4298 = vmatmul.mubr.bf16.gmra.mrb[36].mxu0 %v10924_v56  ;;  %4491 = vmatmul.mubr.bf16.gmra.mrb[36].mxu1 %v10924_v56 }
 0x282   : > { %7989 = vmatprep.mubr.msk.bf16.mxu0 %vm1108_vm0, %v10927_v3  ;;  %8005 = vmatprep.mubr.msk.bf16.mxu1 %vm1108_vm0, %v10927_v3 }
 0x289   : > { %4308 = vmatmul.mubr.bf16.gmra.mrb[40].mxu0 %v10936_v2  ;;  %4501 = vmatmul.mubr.bf16.gmra.mrb[40].mxu1 %v10936_v2 }
 0x28a   : > { %7990 = vmatprep.mubr.msk.bf16.mxu0 %vm1108_vm0, %v10939_v61  ;;  %8006 = vmatprep.mubr.msk.bf16.mxu1 %vm1108_vm0, %v10939_v61 }
 0x291   : > { %4318 = vmatmul.mubr.bf16.gmra.mrb[44].mxu0 %v10948_v8  ;;  %4511 = vmatmul.mubr.bf16.gmra.mrb[44].mxu1 %v10948_v8 }
 0x292   : > { %7991 = vmatprep.mubr.msk.bf16.mxu0 %vm1108_vm0, %v10951_v12  ;;  %8007 = vmatprep.mubr.msk.bf16.mxu1 %vm1108_vm0, %v10951_v12 }
 0x299   : > { %4328 = vmatmul.mubr.bf16.gmra.mrb[48].mxu0 %v10960_v15  ;;  %4521 = vmatmul.mubr.bf16.gmra.mrb[48].mxu1 %v10960_v15 }
 0x29a   : > { %7992 = vmatprep.mubr.msk.bf16.mxu0 %vm1108_vm0, %v10963_v26  ;;  %8008 = vmatprep.mubr.msk.bf16.mxu1 %vm1108_vm0, %v10963_v26 }
 0x2a1   : > { %4338 = vmatmul.mubr.bf16.gmra.mrb[52].mxu0 %v10972_v51  ;;  %4531 = vmatmul.mubr.bf16.gmra.mrb[52].mxu1 %v10972_v51 }
 0x2a2   : > { %7993 = vmatprep.mubr.msk.bf16.mxu0 %vm1108_vm0, %v10975_v37  ;;  %8009 = vmatprep.mubr.msk.bf16.mxu1 %vm1108_vm0, %v10975_v37 }
 0x2a9   : > { %4348 = vmatmul.mubr.bf16.gmra.mrb[56].mxu0 %v10984_v39  ;;  %4541 = vmatmul.mubr.bf16.gmra.mrb[56].mxu1 %v10984_v39 }
 0x2aa   : > { %7994 = vmatprep.mubr.msk.bf16.mxu0 %vm1108_vm0, %v10987_v40  ;;  %8010 = vmatprep.mubr.msk.bf16.mxu1 %vm1108_vm0, %v10987_v40 }
 0x2b1   : > { %4358 = vmatmul.mubr.bf16.gmra.mrb[60].mxu0 %v10996_v41  ;;  %4551 = vmatmul.mubr.bf16.gmra.mrb[60].mxu1 %v10996_v41 }
 0x2b2   : > { %8011 = vmatprep.mubr.msk.bf16.mxu0 %vm1108_vm0, %v10664_v59  ;;  %8027 = vmatprep.mubr.msk.bf16.mxu1 %vm1108_vm0, %v10664_v59  ;;  %v9184_v59 = vld [vmem:[%s12232_s3 + $0x8] sm:$0xff]  }
 0x2b9   : > { %4594 = vmatmul.mubr.bf16.vlgmr.msra.gmra.mrb[64].mxu0 %v10672_v58  ;;  %4787 = vmatmul.mubr.bf16.vlgmr.msra.gmra.mrb[64].mxu1 %v10672_v58  ;;  %v9189_v58 = vld [vmem:[%s12232_s3 + $0xd0] sm:$0xff]  }
 0x2ba   : > { %8112 = vmatpush3.bf16.msra.mxu0 %v9180_v42  ;;  %8224 = vmatpush3.bf16.msra.mxu1 %v9182_v44 }
 0x2bb   : > { %8012 = vmatprep.mubr.msk.bf16.mxu0 %vm1108_vm0, %v10687_v43  ;;  %8028 = vmatprep.mubr.msk.bf16.mxu1 %vm1108_vm0, %v10687_v43  ;;  %v9191_v43 = vld [vmem:[%s12232_s3 + $0x58] sm:$0xff]  }
 0x2bc   : > { %8113 = vmatprep.subr.bf16.mxu0 %v9183_v45  ;;  %8225 = vmatprep.subr.bf16.mxu1 %v9185_v48 }
 0x2be   : > { %8114 = vmatpush3.bf16.msra.mxu0 %v9184_v59  ;;  %8226 = vmatpush3.bf16.msra.mxu1 %v9186_v49 }
 0x2bf   : > { %8115 = vmatprep.subr.bf16.mxu0 %v9187_v55  ;;  %8227 = vmatprep.subr.bf16.mxu1 %v9189_v58 }
 0x2c1   : > { %4604 = vmatmul.mubr.bf16.gmra.mrb[68].mxu0 %v10714_v11  ;;  %4797 = vmatmul.mubr.bf16.gmra.mrb[68].mxu1 %v10714_v11  ;;  %v9195_v11 = vld [vmem:[%s12232_s3 + $0x60] sm:$0xff]  }
 0x2c2   : > { %8013 = vmatprep.mubr.msk.bf16.mxu0 %vm1108_vm0, %v10723_v53  ;;  %8029 = vmatprep.mubr.msk.bf16.mxu1 %vm1108_vm0, %v10723_v53  ;;  %v9197_v53 = vld [vmem:[%s12232_s3 + $0xe0] sm:$0xff]  }
 0x2c3   : > { %8116 = vmatpush3.bf16.msra.mxu0 %v9188_v14  ;;  %8228 = vmatpush3.bf16.msra.mxu1 %v9190_v63 }
 0x2c4   : > { %8117 = vmatprep.subr.bf16.mxu0 %v9191_v43  ;;  %8229 = vmatprep.subr.bf16.mxu1 %v9193_v60 }
 0x2c7   : > { %8118 = vmatpush3.bf16.msra.mxu0 %v9192_v50  ;;  %8230 = vmatpush3.bf16.msra.mxu1 %v9194_v52 }
 0x2c8   : > { %8119 = vmatprep.subr.bf16.mxu0 %v9195_v11  ;;  %8231 = vmatprep.subr.bf16.mxu1 %v9197_v53 }
 0x2c9   : > { %4614 = vmatmul.mubr.bf16.gmra.mrb[72].mxu0 %v10750_v32  ;;  %4807 = vmatmul.mubr.bf16.gmra.mrb[72].mxu1 %v10750_v32  ;;  %v9203_v32 = vld [vmem:[%s12232_s3 + $0x70] sm:$0xff]  }
 0x2ca   : > { %8014 = vmatprep.mubr.msk.bf16.mxu0 %vm1108_vm0, %v10759_v10  ;;  %8030 = vmatprep.mubr.msk.bf16.mxu1 %vm1108_vm0, %v10759_v10  ;;  %v9205_v10 = vld [vmem:[%s12232_s3 + $0xf0] sm:$0xff]  }
 0x2cb   : > { %8120 = vmatpush3.bf16.msra.mxu0 %v9196_v19  ;;  %8232 = vmatpush3.bf16.msra.mxu1 %v9198_v54 }
 0x2cc   : > { %8121 = vmatprep.subr.bf16.mxu0 %v9199_v0  ;;  %8233 = vmatprep.subr.bf16.mxu1 %v9201_v35 }
 0x2cf   : > { %8122 = vmatpush3.bf16.msra.mxu0 %v9200_v1  ;;  %8234 = vmatpush3.bf16.msra.mxu1 %v9202_v62 }
 0x2d0   : > { %8123 = vmatprep.subr.bf16.mxu0 %v9203_v32  ;;  %8235 = vmatprep.subr.bf16.mxu1 %v9205_v10 }
 0x2d1   : > { %4624 = vmatmul.mubr.bf16.gmra.mrb[76].mxu0 %v10786_v13  ;;  %4817 = vmatmul.mubr.bf16.gmra.mrb[76].mxu1 %v10786_v13  ;;  %v9211_v13 = vld [vmem:[%s12232_s3 + $0x140] sm:$0xff]  }
 0x2d2   : > { %8015 = vmatprep.mubr.msk.bf16.mxu0 %vm1108_vm0, %v10795_v5  ;;  %8031 = vmatprep.mubr.msk.bf16.mxu1 %vm1108_vm0, %v10795_v5  ;;  %v9213_v5 = vld [vmem:[%s12232_s3 + $0x1c0] sm:$0xff]  }
 0x2d3   : > { %8124 = vmatpush3.bf16.msra.mxu0 %v9204_v4  ;;  %8236 = vmatpush3.bf16.msra.mxu1 %v9206_v22 }
 0x2d4   : > { %8125 = vmatprep.subr.bf16.mxu0 %v9207_v46  ;;  %8237 = vmatprep.subr.bf16.mxu1 %v9209_v23 }
 0x2d7   : > { %8126 = vmatpush3.bf16.msra.mxu0 %v9208_v25  ;;  %8238 = vmatpush3.bf16.msra.mxu1 %v9210_v24 }
 0x2d8   : > { %8335 = vmatprep.subr.bf16.mxu0 %v9211_v13  ;;  %8447 = vmatprep.subr.bf16.mxu1 %v9213_v5 }
 0x2d9   : > { %4634 = vmatmul.mubr.bf16.gmra.mrb[80].mxu0 %v10822_v47  ;;  %4827 = vmatmul.mubr.bf16.gmra.mrb[80].mxu1 %v10822_v47  ;;  %v5205_v47 = vlaneseq }
 0x2da   : > { %8016 = vmatprep.mubr.msk.bf16.mxu0 %vm1108_vm0, %v10831_v6  ;;  %8032 = vmatprep.mubr.msk.bf16.mxu1 %vm1108_vm0, %v10831_v6 }
 0x2db   : > { %v11156_v6 = vshrl.u32 %v5205_v47, 7 }
 0x2dd   : > { %v5215_v27 = vsub.s32 2, %v11156_v6  ;;  %v5211_v28 = vsub.s32 1, %v11156_v6  ;;  %v5219_v57 = vsub.s32 3, %v11156_v6 }
 0x2e1   : > { %4644 = vmatmul.mubr.bf16.gmra.mrb[84].mxu0 %v10858_v17  ;;  %4837 = vmatmul.mubr.bf16.gmra.mrb[84].mxu1 %v10858_v17  ;;  %v5207_v17 = vsub.s32 0, %v11156_v6 }
 0x2e2   : > { %8017 = vmatprep.mubr.msk.bf16.mxu0 %vm1108_vm0, %v10867_v29  ;;  %8033 = vmatprep.mubr.msk.bf16.mxu1 %vm1108_vm0, %v10867_v29  ;;  %v5203_v29 = vld [vmem:[%s12231_s2] sm:$0xff] }
 0x2e3   : > { %v11171_v30 = vrot.slane %v5203_v29, %v5207_v17  ;;  %v11174_v33 = vrot.slane %v5203_v29, %v5215_v27  ;;  %v11176_v34 = vrot.slane %v5203_v29, %v5211_v28  ;;  %v11180_v38 = vrot.slane %v5203_v29, %v5219_v57 }
 0x2e9   : > { %4654 = vmatmul.mubr.bf16.gmra.mrb[88].mxu0 %v10885_v31  ;;  %4847 = vmatmul.mubr.bf16.gmra.mrb[88].mxu1 %v10885_v31 }
 0x2ea   : > { %8018 = vmatprep.mubr.msk.bf16.mxu0 %vm1108_vm0, %v10891_v18  ;;  %8034 = vmatprep.mubr.msk.bf16.mxu1 %vm1108_vm0, %v10891_v18 }
 0x2f1   : > { %4664 = vmatmul.mubr.bf16.gmra.mrb[92].mxu0 %v10900_v20  ;;  %4857 = vmatmul.mubr.bf16.gmra.mrb[92].mxu1 %v10900_v20 }
 0x2f2   : > { %8019 = vmatprep.mubr.msk.bf16.mxu0 %vm1108_vm0, %v10903_v7  ;;  %8035 = vmatprep.mubr.msk.bf16.mxu1 %vm1108_vm0, %v10903_v7 }
 0x2f9   : > { %4674 = vmatmul.mubr.bf16.gmra.mrb[96].mxu0 %v10912_v9  ;;  %4867 = vmatmul.mubr.bf16.gmra.mrb[96].mxu1 %v10912_v9 }
 0x2fa   : > { %8020 = vmatprep.mubr.msk.bf16.mxu0 %vm1108_vm0, %v10915_v21  ;;  %8036 = vmatprep.mubr.msk.bf16.mxu1 %vm1108_vm0, %v10915_v21 }
 0x301   : > { %4684 = vmatmul.mubr.bf16.gmra.mrb[100].mxu0 %v10924_v56  ;;  %4877 = vmatmul.mubr.bf16.gmra.mrb[100].mxu1 %v10924_v56 }
 0x302   : > { %8021 = vmatprep.mubr.msk.bf16.mxu0 %vm1108_vm0, %v10927_v3  ;;  %8037 = vmatprep.mubr.msk.bf16.mxu1 %vm1108_vm0, %v10927_v3 }
 0x309   : > { %4694 = vmatmul.mubr.bf16.gmra.mrb[104].mxu0 %v10936_v2  ;;  %4887 = vmatmul.mubr.bf16.gmra.mrb[104].mxu1 %v10936_v2 }
 0x30a   : > { %8022 = vmatprep.mubr.msk.bf16.mxu0 %vm1108_vm0, %v10939_v61  ;;  %8038 = vmatprep.mubr.msk.bf16.mxu1 %vm1108_vm0, %v10939_v61 }
 0x30c   : > { %v4209_v36 = vpop.f32.mrb[0].mxu0  ;;  %v4402_v16 = vpop.f32.mrb[0].mxu1 }
 0x30d   : > { %v5245_v31 = vadd.f32 %v11171_v30, %v4209_v36  ;;  %v4211_v18 = vpop.f32.mrb[1].mxu0  ;;  %v5247_v20 = vadd.f32 %v11174_v33, %v4402_v16  ;;  %v4404_v9 = vpop.f32.mrb[1].mxu1 }
 0x30e   : > { %v5246_v7 = vadd.f32 %v11176_v34, %v4211_v18  ;;  %v4213_v21 = vpop.f32.mrb[2].mxu0  ;;  %v5248_v56 = vadd.f32 %v11180_v38, %v4404_v9  ;;  %v4406_v2 = vpop.f32.mrb[2].mxu1 }
 0x30f   : > { %v5253_v3 = vadd.f32 %v11171_v30, %v4213_v21  ;;  %v4215_v42 = vpop.f32.mrb[3].mxu0  ;;  %v5255_v44 = vadd.f32 %v11174_v33, %v4406_v2  ;;  %v4408_v45 = vpop.f32.mrb[3].mxu1  ;;  %v5501_v48 = vmax.f32 %v5245_v31, 0.0  ;;  %v5503_v55 = vmax.f32 %v5247_v20, 0.0 }
 0x310   : > { %v5254_v61 = vadd.f32 %v11176_v34, %v4215_v42  ;;  %v5256_v49 = vadd.f32 %v11180_v38, %v4408_v45  ;;  %v5502_v58 = vmax.f32 %v5246_v7, 0.0  ;;  %v5504_v43 = vmax.f32 %v5248_v56, 0.0 }
 0x311   : > { %v5509_v59 = vmax.f32 %v5253_v3, 0.0  ;;  %4704 = vmatmul.mubr.bf16.gmra.mrb[108].mxu0 %v10948_v8  ;;  %v5511_v14 = vmax.f32 %v5255_v44, 0.0  ;;  %4897 = vmatmul.mubr.bf16.gmra.mrb[108].mxu1 %v10948_v8 }
 0x312   : > { %v5510_v63 = vmax.f32 %v5254_v61, 0.0  ;;  %8023 = vmatprep.mubr.msk.bf16.mxu0 %vm1108_vm0, %v10951_v12  ;;  %v5512_v50 = vmax.f32 %v5256_v49, 0.0  ;;  %8039 = vmatprep.mubr.msk.bf16.mxu1 %vm1108_vm0, %v10951_v12 }
 0x313   : > { %v11196_v60 = vpack.c.bf16 %v5509_v59, %v5501_v48  ;;  %v11200_v52 = vpack.c.bf16 %v5511_v14, %v5503_v55 }
 0x314   : > { %v11202_v11 = vpack.c.bf16 %v5510_v63, %v5502_v58  ;;  %v4219_v53 = vpop.f32.mrb[4].mxu0  ;;  %v11204_v19 = vpack.c.bf16 %v5512_v50, %v5504_v43  ;;  %v4412_v8 = vpop.f32.mrb[4].mxu1 }
 0x315   : > { %v5261_v54 = vadd.f32 %v11171_v30, %v4219_v53  ;;  %v4221_v0 = vpop.f32.mrb[5].mxu0  ;;  %v5263_v35 = vadd.f32 %v11174_v33, %v4412_v8  ;;  %v4414_v62 = vpop.f32.mrb[5].mxu1 }
 0x316   : > { %v5262_v1 = vadd.f32 %v11176_v34, %v4221_v0  ;;  %v4223_v32 = vpop.f32.mrb[6].mxu0  ;;  %v5264_v10 = vadd.f32 %v11180_v38, %v4414_v62  ;;  %v4416_v4 = vpop.f32.mrb[6].mxu1 }
 0x317   : > { %v5269_v12 = vadd.f32 %v11171_v30, %v4223_v32  ;;  %v4225_v22 = vpop.f32.mrb[7].mxu0  ;;  %v5271_v46 = vadd.f32 %v11174_v33, %v4416_v4  ;;  %v4418_v25 = vpop.f32.mrb[7].mxu1  ;;  %v5517_v24 = vmax.f32 %v5261_v54, 0.0  ;;  %v5519_v17 = vmax.f32 %v5263_v35, 0.0 }
 0x318   : > { %v5270_v23 = vadd.f32 %v11176_v34, %v4225_v22  ;;  %v5272_v5 = vadd.f32 %v11180_v38, %v4418_v25  ;;  %v5518_v29 = vmax.f32 %v5262_v1, 0.0  ;;  %v5520_v57 = vmax.f32 %v5264_v10, 0.0 }
 0x319   : > { %v5525_v13 = vmax.f32 %v5269_v12, 0.0  ;;  %4714 = vmatmul.mubr.bf16.gmra.mrb[112].mxu0 %v10960_v15  ;;  %v5527_v27 = vmax.f32 %v5271_v46, 0.0  ;;  %4907 = vmatmul.mubr.bf16.gmra.mrb[112].mxu1 %v10960_v15 }
 0x31a   : > { %v5526_v28 = vmax.f32 %v5270_v23, 0.0  ;;  %8024 = vmatprep.mubr.msk.bf16.mxu0 %vm1108_vm0, %v10963_v26  ;;  %v5528_v31 = vmax.f32 %v5272_v5, 0.0  ;;  %8040 = vmatprep.mubr.msk.bf16.mxu1 %vm1108_vm0, %v10963_v26 }
 0x31b   : > { %v11218_v36 = vpack.c.bf16 %v5525_v13, %v5517_v24  ;;  %v11222_v16 = vpack.c.bf16 %v5527_v27, %v5519_v17 }
 0x31c   : > { %v11224_v18 = vpack.c.bf16 %v5526_v28, %v5518_v29  ;;  %v4229_v20 = vpop.f32.mrb[8].mxu0  ;;  %v11226_v7 = vpack.c.bf16 %v5528_v31, %v5520_v57  ;;  %v4422_v15 = vpop.f32.mrb[8].mxu1 }
 0x31d   : > { %v5277_v9 = vadd.f32 %v11171_v30, %v4229_v20  ;;  %v4231_v21 = vpop.f32.mrb[9].mxu0  ;;  %v5279_v56 = vadd.f32 %v11174_v33, %v4422_v15  ;;  %v4424_v2 = vpop.f32.mrb[9].mxu1 }
 0x31e   : > { %v5278_v3 = vadd.f32 %v11176_v34, %v4231_v21  ;;  %v4233_v42 = vpop.f32.mrb[10].mxu0  ;;  %v5280_v44 = vadd.f32 %v11180_v38, %v4424_v2  ;;  %v4426_v61 = vpop.f32.mrb[10].mxu1 }
 0x31f   : > { %v5285_v26 = vadd.f32 %v11171_v30, %v4233_v42  ;;  %v4235_v45 = vpop.f32.mrb[11].mxu0  ;;  %v5287_v48 = vadd.f32 %v11174_v33, %v4426_v61  ;;  %v4428_v49 = vpop.f32.mrb[11].mxu1  ;;  %v5533_v55 = vmax.f32 %v5277_v9, 0.0  ;;  %v5535_v63 = vmax.f32 %v5279_v56, 0.0 }
 0x320   : > { %v5286_v59 = vadd.f32 %v11176_v34, %v4235_v45  ;;  %v5288_v14 = vadd.f32 %v11180_v38, %v4428_v49  ;;  %v5534_v43 = vmax.f32 %v5278_v3, 0.0  ;;  %v5536_v54 = vmax.f32 %v5280_v44, 0.0 }
 0x321   : > { %v5541_v58 = vmax.f32 %v5285_v26, 0.0  ;;  %4724 = vmatmul.mubr.bf16.gmra.mrb[116].mxu0 %v10972_v51  ;;  %v5543_v50 = vmax.f32 %v5287_v48, 0.0  ;;  %4917 = vmatmul.mubr.bf16.gmra.mrb[116].mxu1 %v10972_v51 }
 0x322   : > { %v5542_v53 = vmax.f32 %v5286_v59, 0.0  ;;  %8025 = vmatprep.mubr.msk.bf16.mxu0 %vm1108_vm0, %v10975_v37  ;;  %v5544_v0 = vmax.f32 %v5288_v14, 0.0  ;;  %8041 = vmatprep.mubr.msk.bf16.mxu1 %vm1108_vm0, %v10975_v37 }
 0x323   : > { %v11240_v8 = vpack.c.bf16 %v5541_v58, %v5533_v55  ;;  %v11244_v35 = vpack.c.bf16 %v5543_v50, %v5535_v63 }
 0x324   : > { %v11246_v1 = vpack.c.bf16 %v5542_v53, %v5534_v43  ;;  %v4239_v62 = vpop.f32.mrb[12].mxu0  ;;  %v11248_v32 = vpack.c.bf16 %v5544_v0, %v5536_v54  ;;  %v4432_v51 = vpop.f32.mrb[12].mxu1 }
 0x325   : > { %v5293_v10 = vadd.f32 %v11171_v30, %v4239_v62  ;;  %v4241_v12 = vpop.f32.mrb[13].mxu0  ;;  %v5295_v4 = vadd.f32 %v11174_v33, %v4432_v51  ;;  %v4434_v46 = vpop.f32.mrb[13].mxu1 }
 0x326   : > { %v5294_v22 = vadd.f32 %v11176_v34, %v4241_v12  ;;  %v4243_v23 = vpop.f32.mrb[14].mxu0  ;;  %v5296_v25 = vadd.f32 %v11180_v38, %v4434_v46  ;;  %v4436_v24 = vpop.f32.mrb[14].mxu1 }
 0x327   : > { %v5301_v37 = vadd.f32 %v11171_v30, %v4243_v23  ;;  %v4245_v13 = vpop.f32.mrb[15].mxu0  ;;  %v5303_v5 = vadd.f32 %v11174_v33, %v4436_v24  ;;  %v4438_v29 = vpop.f32.mrb[15].mxu1  ;;  %v5549_v27 = vmax.f32 %v5293_v10, 0.0  ;;  %v5551_v31 = vmax.f32 %v5295_v4, 0.0 }
 0x328   : > { %v5302_v17 = vadd.f32 %v11176_v34, %v4245_v13  ;;  %v5304_v57 = vadd.f32 %v11180_v38, %v4438_v29  ;;  %v5550_v20 = vmax.f32 %v5294_v22, 0.0  ;;  %v5552_v21 = vmax.f32 %v5296_v25, 0.0 }
 0x329   : > { %v5557_v28 = vmax.f32 %v5301_v37, 0.0  ;;  %4734 = vmatmul.mubr.bf16.gmra.mrb[120].mxu0 %v10984_v39  ;;  %v5559_v9 = vmax.f32 %v5303_v5, 0.0  ;;  %4927 = vmatmul.mubr.bf16.gmra.mrb[120].mxu1 %v10984_v39 }
 0x32a   : > { %v5558_v15 = vmax.f32 %v5302_v17, 0.0  ;;  %8026 = vmatprep.mubr.msk.bf16.mxu0 %vm1108_vm0, %v10987_v40  ;;  %v5560_v3 = vmax.f32 %v5304_v57, 0.0  ;;  %8042 = vmatprep.mubr.msk.bf16.mxu1 %vm1108_vm0, %v10987_v40 }
 0x32b   : > { %v11262_v56 = vpack.c.bf16 %v5557_v28, %v5549_v27  ;;  %v11266_v2 = vpack.c.bf16 %v5559_v9, %v5551_v31  ;;  %v9212_v9 = vld [vmem:[%s12232_s3 + $0x100] sm:$0xff]  }
 0x32c   : > { %v11268_v42 = vpack.c.bf16 %v5558_v15, %v5550_v20  ;;  %v4249_v44 = vpop.f32.mrb[16].mxu0  ;;  %v11270_v26 = vpack.c.bf16 %v5560_v3, %v5552_v21  ;;  %v4442_v39 = vpop.f32.mrb[16].mxu1 }
 0x32d   : > { %v5309_v61 = vadd.f32 %v11171_v30, %v4249_v44  ;;  %v4251_v45 = vpop.f32.mrb[17].mxu0  ;;  %v5311_v48 = vadd.f32 %v11174_v33, %v4442_v39  ;;  %v4444_v49 = vpop.f32.mrb[17].mxu1  ;;  %v9214_v44 = vld [vmem:[%s12232_s3 + $0x180] sm:$0xff]  }
 0x32e   : > { %v5310_v59 = vadd.f32 %v11176_v34, %v4251_v45  ;;  %v4253_v55 = vpop.f32.mrb[18].mxu0  ;;  %v5312_v58 = vadd.f32 %v11180_v38, %v4444_v49  ;;  %v4446_v14 = vpop.f32.mrb[18].mxu1 }
 0x32f   : > { %v5317_v40 = vadd.f32 %v11171_v30, %v4253_v55  ;;  %v4255_v63 = vpop.f32.mrb[19].mxu0  ;;  %v5319_v43 = vadd.f32 %v11174_v33, %v4446_v14  ;;  %v4448_v53 = vpop.f32.mrb[19].mxu1  ;;  %v5565_v54 = vmax.f32 %v5309_v61, 0.0  ;;  %v5567_v10 = vmax.f32 %v5311_v48, 0.0  ;;  %v9215_v61 = vld [vmem:[%s12232_s3 + $0x148] sm:$0xff]  }
 0x330   : > { %v5318_v50 = vadd.f32 %v11176_v34, %v4255_v63  ;;  %v5320_v62 = vadd.f32 %v11180_v38, %v4448_v53  ;;  %v5566_v51 = vmax.f32 %v5310_v59, 0.0  ;;  %v5568_v22 = vmax.f32 %v5312_v58, 0.0  ;;  %v9217_v59 = vld [vmem:[%s12232_s3 + $0x1c8] sm:$0xff]  }
 0x331   : > { %v5573_v0 = vmax.f32 %v5317_v40, 0.0  ;;  %4744 = vmatmul.mubr.bf16.gmra.mrb[124].mxu0 %v10996_v41  ;;  %v5575_v12 = vmax.f32 %v5319_v43, 0.0  ;;  %4937 = vmatmul.mubr.bf16.gmra.mrb[124].mxu1 %v10996_v41 }
 0x332   : > { %v5574_v4 = vmax.f32 %v5318_v50, 0.0  ;;  %6436 = vmatprep.mubr.bf16.mxu0 %v11202_v11  ;;  %v5576_v23 = vmax.f32 %v5320_v62, 0.0  ;;  %6597 = vmatprep.mubr.bf16.mxu1 %v11204_v19 }
 0x333   : > { %v11283_v46 = vpack.c.bf16 %v5573_v0, %v5565_v54  ;;  %v11286_v25 = vpack.c.bf16 %v5575_v12, %v5567_v10 }
 0x334   : > { %v11288_v37 = vpack.c.bf16 %v5574_v4, %v5566_v51  ;;  %v4259_v24 = vpop.f32.mrb[20].mxu0  ;;  %v11290_v13 = vpack.c.bf16 %v5576_v23, %v5568_v22  ;;  %v4452_v17 = vpop.f32.mrb[20].mxu1  ;;  %v9221_v51 = vld [vmem:[%s12232_s3 + $0x1d0] sm:$0xff]  }
 0x335   : > { %v5325_v5 = vadd.f32 %v11171_v30, %v4259_v24  ;;  %v4261_v29 = vpop.f32.mrb[21].mxu0  ;;  %v5327_v41 = vadd.f32 %v11174_v33, %v4452_v17  ;;  %v4454_v27 = vpop.f32.mrb[21].mxu1 }
 0x336   : > { %v5326_v11 = vadd.f32 %v11176_v34, %v4261_v29  ;;  %v4263_v28 = vpop.f32.mrb[22].mxu0  ;;  %v5328_v57 = vadd.f32 %v11180_v38, %v4454_v27  ;;  %v4456_v31 = vpop.f32.mrb[22].mxu1 }
 0x337   : > { %v5333_v19 = vadd.f32 %v11171_v30, %v4263_v28  ;;  %v4265_v20 = vpop.f32.mrb[23].mxu0  ;;  %v5335_v15 = vadd.f32 %v11174_v33, %v4456_v31  ;;  %v4458_v3 = vpop.f32.mrb[23].mxu1  ;;  %v5581_v39 = vmax.f32 %v5325_v5, 0.0  ;;  %v5583_v49 = vmax.f32 %v5327_v41, 0.0  ;;  %v9220_v41 = vld [vmem:[%s12232_s3 + $0x110] sm:$0xff]  }
 0x338   : > { %v5334_v21 = vadd.f32 %v11176_v34, %v4265_v20  ;;  %v5336_v48 = vadd.f32 %v11180_v38, %v4458_v3  ;;  %v5582_v55 = vmax.f32 %v5326_v11, 0.0  ;;  %v5584_v14 = vmax.f32 %v5328_v57, 0.0  ;;  %v9222_v57 = vld [vmem:[%s12232_s3 + $0x190] sm:$0xff]  }
 0x339   : > { %v5589_v45 = vmax.f32 %v5333_v19, 0.0  ;;  %6437 = vmatmul.mubr.bf16.vlgmr.msra.gmra.mrb[128].mxu0 %v11196_v60  ;;  %v5591_v58 = vmax.f32 %v5335_v15, 0.0  ;;  %6598 = vmatmul.mubr.bf16.vlgmr.msra.gmra.mrb[128].mxu1 %v11200_v52  ;;  %v9216_v60 = vld [vmem:[%s12232_s3 + $0x108] sm:$0xff]   ;;  %v9223_v19 = vld [vmem:[%s12232_s3 + $0x158] sm:$0xff]  }
 0x33a   : > { %v5590_v40 = vmax.f32 %v5334_v21, 0.0  ;;  %6444 = vmatprep.mubr.bf16.mxu0 %v11224_v18  ;;  %v5592_v43 = vmax.f32 %v5336_v48, 0.0  ;;  %6605 = vmatprep.mubr.bf16.mxu1 %v11226_v7  ;;  %v9218_v52 = vld [vmem:[%s12232_s3 + $0x188] sm:$0xff]   ;;  %v9219_v18 = vld [vmem:[%s12232_s3 + $0x150] sm:$0xff]   ;;  %v9225_v15 = vld [vmem:[%s12232_s3 + $0x1d8] sm:$0xff]  }
 0x33b   : > { %v11315_v63 = vpack.c.bf16 %v5589_v45, %v5581_v39  ;;  %8336 = vmatpush3.bf16.msra.mxu0 %v9212_v9  ;;  %v11321_v50 = vpack.c.bf16 %v5591_v58, %v5583_v49  ;;  %8448 = vmatpush3.bf16.msra.mxu1 %v9214_v44 }
 0x33c   : > { %v11323_v53 = vpack.c.bf16 %v5590_v40, %v5582_v55  ;;  %v4269_v54 = vpop.f32.mrb[24].mxu0  ;;  %8337 = vmatprep.subr.bf16.mxu0 %v9215_v61  ;;  %v11331_v7 = vpack.c.bf16 %v5592_v43, %v5584_v14  ;;  %v4462_v62 = vpop.f32.mrb[24].mxu1  ;;  %8449 = vmatprep.subr.bf16.mxu1 %v9217_v59  ;;  %v9229_v43 = vld [vmem:[%s12232_s3 + $0x1e0] sm:$0xff]  }
 0x33d   : > { %v5341_v0 = vadd.f32 %v11171_v30, %v4269_v54  ;;  %v4271_v10 = vpop.f32.mrb[25].mxu0  ;;  %v5343_v12 = vadd.f32 %v11174_v33, %v4462_v62  ;;  %v4464_v22 = vpop.f32.mrb[25].mxu1 }
 0x33e   : > { %v5342_v4 = vadd.f32 %v11176_v34, %v4271_v10  ;;  %v4273_v23 = vpop.f32.mrb[26].mxu0  ;;  %v5344_v24 = vadd.f32 %v11180_v38, %v4464_v22  ;;  %v4466_v17 = vpop.f32.mrb[26].mxu1 }
 0x33f   : > { %v5349_v5 = vadd.f32 %v11171_v30, %v4273_v23  ;;  %v4275_v29 = vpop.f32.mrb[27].mxu0  ;;  %8338 = vmatpush3.bf16.msra.mxu0 %v9216_v60  ;;  %v5351_v11 = vadd.f32 %v11174_v33, %v4466_v17  ;;  %v4468_v28 = vpop.f32.mrb[27].mxu1  ;;  %8450 = vmatpush3.bf16.msra.mxu1 %v9218_v52  ;;  %v5597_v31 = vmax.f32 %v5341_v0, 0.0  ;;  %v5599_v21 = vmax.f32 %v5343_v12, 0.0  ;;  %v9228_v12 = vld [vmem:[%s12232_s3 + $0x120] sm:$0xff]  }
 0x340   : > { %v5350_v27 = vadd.f32 %v11176_v34, %v4275_v29  ;;  %8339 = vmatprep.subr.bf16.mxu0 %v9219_v18  ;;  %v5352_v9 = vadd.f32 %v11180_v38, %v4468_v28  ;;  %8451 = vmatprep.subr.bf16.mxu1 %v9221_v51  ;;  %v5598_v3 = vmax.f32 %v5342_v4, 0.0  ;;  %v5600_v39 = vmax.f32 %v5344_v24, 0.0  ;;  %v9230_v24 = vld [vmem:[%s12232_s3 + $0x1a0] sm:$0xff]  }
 0x341   : > { %v5605_v20 = vmax.f32 %v5349_v5, 0.0  ;;  %6445 = vmatmul.mubr.bf16.gmra.mrb[132].mxu0 %v11218_v36  ;;  %v5607_v44 = vmax.f32 %v5351_v11, 0.0  ;;  %6606 = vmatmul.mubr.bf16.gmra.mrb[132].mxu1 %v11222_v16  ;;  %v9224_v36 = vld [vmem:[%s12232_s3 + $0x118] sm:$0xff]   ;;  %v9231_v5 = vld [vmem:[%s12232_s3 + $0x168] sm:$0xff]  }
 0x342   : > { %v5606_v61 = vmax.f32 %v5350_v27, 0.0  ;;  %6452 = vmatprep.mubr.bf16.mxu0 %v11246_v1  ;;  %v5608_v48 = vmax.f32 %v5352_v9, 0.0  ;;  %6613 = vmatprep.mubr.bf16.mxu1 %v11248_v32  ;;  %v9226_v16 = vld [vmem:[%s12232_s3 + $0x198] sm:$0xff]   ;;  %v9227_v1 = vld [vmem:[%s12232_s3 + $0x160] sm:$0xff]   ;;  %v9233_v11 = vld [vmem:[%s12232_s3 + $0x1e8] sm:$0xff]  }
 0x343   : > { %v11359_v45 = vpack.c.bf16 %v5605_v20, %v5597_v31  ;;  %8340 = vmatpush3.bf16.msra.mxu0 %v9220_v41  ;;  %v11365_v59 = vpack.c.bf16 %v5607_v44, %v5599_v21  ;;  %8452 = vmatpush3.bf16.msra.mxu1 %v9222_v57 }
 0x344   : > { %v11367_v49 = vpack.c.bf16 %v5606_v61, %v5598_v3  ;;  %v4279_v55 = vpop.f32.mrb[28].mxu0  ;;  %8341 = vmatprep.subr.bf16.mxu0 %v9223_v19  ;;  %v11375_v32 = vpack.c.bf16 %v5608_v48, %v5600_v39  ;;  %v4472_v40 = vpop.f32.mrb[28].mxu1  ;;  %8453 = vmatprep.subr.bf16.mxu1 %v9225_v15  ;;  %v9237_v48 = vld [vmem:[%s12232_s3 + $0x1f0] sm:$0xff]  }
 0x345   : > { %v5357_v58 = vadd.f32 %v11171_v30, %v4279_v55  ;;  %v4281_v14 = vpop.f32.mrb[29].mxu0  ;;  %v5359_v60 = vadd.f32 %v11174_v33, %v4472_v40  ;;  %v4474_v52 = vpop.f32.mrb[29].mxu1 }
 0x346   : > { %v5358_v54 = vadd.f32 %v11176_v34, %v4281_v14  ;;  %v4283_v18 = vpop.f32.mrb[30].mxu0  ;;  %v5360_v0 = vadd.f32 %v11180_v38, %v4474_v52  ;;  %v4476_v10 = vpop.f32.mrb[30].mxu1 }
 0x347   : > { %v5365_v62 = vadd.f32 %v11171_v30, %v4283_v18  ;;  %v4285_v51 = vpop.f32.mrb[31].mxu0  ;;  %8342 = vmatpush3.bf16.msra.mxu0 %v9224_v36  ;;  %v5367_v4 = vadd.f32 %v11174_v33, %v4476_v10  ;;  %v4478_v23 = vpop.f32.mrb[31].mxu1  ;;  %8454 = vmatpush3.bf16.msra.mxu1 %v9226_v16  ;;  %v5613_v17 = vmax.f32 %v5357_v58, 0.0  ;;  %v5615_v27 = vmax.f32 %v5359_v60, 0.0  ;;  %v9236_v60 = vld [vmem:[%s12232_s3 + $0x130] sm:$0xff]  }
 0x348   : > { %v5366_v22 = vadd.f32 %v11176_v34, %v4285_v51  ;;  %8343 = vmatprep.subr.bf16.mxu0 %v9227_v1  ;;  %v5368_v41 = vadd.f32 %v11180_v38, %v4478_v23  ;;  %8455 = vmatprep.subr.bf16.mxu1 %v9229_v43  ;;  %v5614_v28 = vmax.f32 %v5358_v54, 0.0  ;;  %v5616_v31 = vmax.f32 %v5360_v0, 0.0  ;;  %v9238_v0 = vld [vmem:[%s12232_s3 + $0x1b0] sm:$0xff]  }
 0x349   : > { %v5621_v29 = vmax.f32 %v5365_v62, 0.0  ;;  %6453 = vmatmul.mubr.bf16.gmra.mrb[136].mxu0 %v11240_v8  ;;  %v5623_v57 = vmax.f32 %v5367_v4, 0.0  ;;  %6614 = vmatmul.mubr.bf16.gmra.mrb[136].mxu1 %v11244_v35  ;;  %v9232_v8 = vld [vmem:[%s12232_s3 + $0x128] sm:$0xff]   ;;  %v9239_v62 = vld [vmem:[%s12232_s3 + $0x178] sm:$0xff]  }
 0x34a   : > { %v5622_v19 = vmax.f32 %v5366_v22, 0.0  ;;  %6460 = vmatprep.mubr.bf16.mxu0 %v11268_v42  ;;  %v5624_v9 = vmax.f32 %v5368_v41, 0.0  ;;  %6621 = vmatprep.mubr.bf16.mxu1 %v11270_v26  ;;  %v9234_v35 = vld [vmem:[%s12232_s3 + $0x1a8] sm:$0xff]   ;;  %v9235_v42 = vld [vmem:[%s12232_s3 + $0x170] sm:$0xff]   ;;  %v9241_v4 = vld [vmem:[%s12232_s3 + $0x1f8] sm:$0xff]  }
 0x34b   : > { %v11403_v20 = vpack.c.bf16 %v5621_v29, %v5613_v17  ;;  %8344 = vmatpush3.bf16.msra.mxu0 %v9228_v12  ;;  %v11409_v15 = vpack.c.bf16 %v5623_v57, %v5615_v27  ;;  %8456 = vmatpush3.bf16.msra.mxu1 %v9230_v24 }
 0x34c   : > { %v11411_v21 = vpack.c.bf16 %v5622_v19, %v5614_v28  ;;  %v4289_v3 = vpop.f32.mrb[32].mxu0  ;;  %8345 = vmatprep.subr.bf16.mxu0 %v9231_v5  ;;  %v11419_v26 = vpack.c.bf16 %v5624_v9, %v5616_v31  ;;  %v4482_v61 = vpop.f32.mrb[32].mxu1  ;;  %8457 = vmatprep.subr.bf16.mxu1 %v9233_v11 }
 0x34d   : > { %v5373_v44 = vadd.f32 %v11171_v30, %v4289_v3  ;;  %v4291_v39 = vpop.f32.mrb[33].mxu0  ;;  %v5375_v36 = vadd.f32 %v11174_v33, %v4482_v61  ;;  %v4484_v16 = vpop.f32.mrb[33].mxu1 }
 0x34e   : > { %v5374_v55 = vadd.f32 %v11176_v34, %v4291_v39  ;;  %v4293_v1 = vpop.f32.mrb[34].mxu0  ;;  %v5376_v58 = vadd.f32 %v11180_v38, %v4484_v16  ;;  %v4486_v14 = vpop.f32.mrb[34].mxu1 }
 0x34f   : > { %v5381_v40 = vadd.f32 %v11171_v30, %v4293_v1  ;;  %v4295_v43 = vpop.f32.mrb[35].mxu0  ;;  %8346 = vmatpush3.bf16.msra.mxu0 %v9232_v8  ;;  %v5383_v54 = vadd.f32 %v11174_v33, %v4486_v14  ;;  %v4488_v18 = vpop.f32.mrb[35].mxu1  ;;  %8458 = vmatpush3.bf16.msra.mxu1 %v9234_v35  ;;  %v5629_v10 = vmax.f32 %v5373_v44, 0.0  ;;  %v5631_v22 = vmax.f32 %v5375_v36, 0.0 }
 0x350   : > { %v5382_v52 = vadd.f32 %v11176_v34, %v4295_v43  ;;  %8347 = vmatprep.subr.bf16.mxu0 %v9235_v42  ;;  %v5384_v12 = vadd.f32 %v11180_v38, %v4488_v18  ;;  %8459 = vmatprep.subr.bf16.mxu1 %v9237_v48  ;;  %v5630_v23 = vmax.f32 %v5374_v55, 0.0  ;;  %v5632_v17 = vmax.f32 %v5376_v58, 0.0 }
 0x351   : > { %v5637_v51 = vmax.f32 %v5381_v40, 0.0  ;;  %6461 = vmatmul.mubr.bf16.gmra.mrb[140].mxu0 %v11262_v56  ;;  %v5639_v24 = vmax.f32 %v5383_v54, 0.0  ;;  %6622 = vmatmul.mubr.bf16.gmra.mrb[140].mxu1 %v11266_v2  ;;  %v9240_v56 = vld [vmem:[%s12232_s3 + $0x138] sm:$0xff]  }
 0x352   : > { %v5638_v5 = vmax.f32 %v5382_v52, 0.0  ;;  %6468 = vmatprep.mubr.bf16.mxu0 %v11288_v37  ;;  %v5640_v41 = vmax.f32 %v5384_v12, 0.0  ;;  %6629 = vmatprep.mubr.bf16.mxu1 %v11290_v13  ;;  %v9242_v2 = vld [vmem:[%s12232_s3 + $0x1b8] sm:$0xff]  }
 0x353   : > { %v11447_v29 = vpack.c.bf16 %v5637_v51, %v5629_v10  ;;  %8348 = vmatpush3.bf16.msra.mxu0 %v9236_v60  ;;  %v11453_v11 = vpack.c.bf16 %v5639_v24, %v5631_v22  ;;  %8460 = vmatpush3.bf16.msra.mxu1 %v9238_v0 }
 0x354   : > { %v11455_v27 = vpack.c.bf16 %v5638_v5, %v5630_v23  ;;  %v4299_v28 = vpop.f32.mrb[36].mxu0  ;;  %8349 = vmatprep.subr.bf16.mxu0 %v9239_v62  ;;  %v11460_v37 = vpack.c.bf16 %v5640_v41, %v5632_v17  ;;  %v4492_v57 = vpop.f32.mrb[36].mxu1  ;;  %8461 = vmatprep.subr.bf16.mxu1 %v9241_v4 }
 0x355   : > { %v5389_v13 = vadd.f32 %v11171_v30, %v4299_v28  ;;  %v4301_v19 = vpop.f32.mrb[37].mxu0  ;;  %v5391_v31 = vadd.f32 %v11174_v33, %v4492_v57  ;;  %v4494_v8 = vpop.f32.mrb[37].mxu1 }
 0x356   : > { %v5390_v9 = vadd.f32 %v11176_v34, %v4301_v19  ;;  %v4303_v3 = vpop.f32.mrb[38].mxu0  ;;  %v5392_v35 = vadd.f32 %v11180_v38, %v4494_v8  ;;  %v4496_v44 = vpop.f32.mrb[38].mxu1 }
 0x357   : > { %v5397_v42 = vadd.f32 %v11171_v30, %v4303_v3  ;;  %v4305_v61 = vpop.f32.mrb[39].mxu0  ;;  %8350 = vmatpush3.bf16.msra.mxu0 %v9240_v56  ;;  %v5399_v39 = vadd.f32 %v11174_v33, %v4496_v44  ;;  %v4498_v36 = vpop.f32.mrb[39].mxu1  ;;  %8462 = vmatpush3.bf16.msra.mxu1 %v9242_v2  ;;  %v5645_v55 = vmax.f32 %v5389_v13, 0.0  ;;  %v5647_v58 = vmax.f32 %v5391_v31, 0.0 }
 0x358   : > { %v5398_v48 = vadd.f32 %v11176_v34, %v4305_v61  ;;  %v5400_v1 = vadd.f32 %v11180_v38, %v4498_v36  ;;  %v5646_v40 = vmax.f32 %v5390_v9, 0.0  ;;  %v5648_v60 = vmax.f32 %v5392_v35, 0.0 }
 0x359   : > { %v5653_v16 = vmax.f32 %v5397_v42, 0.0  ;;  %6469 = vmatmul.mubr.bf16.gmra.mrb[144].mxu0 %v11283_v46  ;;  %v5655_v14 = vmax.f32 %v5399_v39, 0.0  ;;  %6630 = vmatmul.mubr.bf16.gmra.mrb[144].mxu1 %v11286_v25 }
 0x35a   : > { %v5654_v43 = vmax.f32 %v5398_v48, 0.0  ;;  %6476 = vmatprep.mubr.bf16.mxu0 %v11323_v53  ;;  %v5656_v52 = vmax.f32 %v5400_v1, 0.0  ;;  %6637 = vmatprep.mubr.bf16.mxu1 %v11331_v7 }
 0x35b   : > { %v11473_v54 = vpack.c.bf16 %v5653_v16, %v5645_v55  ;;  %v11476_v18 = vpack.c.bf16 %v5655_v14, %v5647_v58 }
 0x35c   : > { %v11478_v0 = vpack.c.bf16 %v5654_v43, %v5646_v40  ;;  %v4309_v62 = vpop.f32.mrb[40].mxu0  ;;  %v11480_v46 = vpack.c.bf16 %v5656_v52, %v5648_v60  ;;  %v4502_v51 = vpop.f32.mrb[40].mxu1 }
 0x35d   : > { %v5405_v10 = vadd.f32 %v11171_v30, %v4309_v62  ;;  %v4311_v12 = vpop.f32.mrb[41].mxu0  ;;  %v5407_v25 = vadd.f32 %v11174_v33, %v4502_v51  ;;  %v4504_v4 = vpop.f32.mrb[41].mxu1 }
 0x35e   : > { %v5406_v53 = vadd.f32 %v11176_v34, %v4311_v12  ;;  %v4313_v22 = vpop.f32.mrb[42].mxu0  ;;  %v5408_v23 = vadd.f32 %v11180_v38, %v4504_v4  ;;  %v4506_v24 = vpop.f32.mrb[42].mxu1 }
 0x35f   : > { %v5413_v7 = vadd.f32 %v11171_v30, %v4313_v22  ;;  %v4315_v5 = vpop.f32.mrb[43].mxu0  ;;  %v5415_v17 = vadd.f32 %v11174_v33, %v4506_v24  ;;  %v4508_v56 = vpop.f32.mrb[43].mxu1  ;;  %v5661_v28 = vmax.f32 %v5405_v10, 0.0  ;;  %v5663_v57 = vmax.f32 %v5407_v25, 0.0 }
 0x360   : > { %v5414_v41 = vadd.f32 %v11176_v34, %v4315_v5  ;;  %v5416_v13 = vadd.f32 %v11180_v38, %v4508_v56  ;;  %v5662_v19 = vmax.f32 %v5406_v53, 0.0  ;;  %v5664_v8 = vmax.f32 %v5408_v23, 0.0 }
 0x361   : > { %v5669_v2 = vmax.f32 %v5413_v7, 0.0  ;;  %6477 = vmatmul.mubr.bf16.gmra.mrb[148].mxu0 %v11315_v63  ;;  %v5671_v31 = vmax.f32 %v5415_v17, 0.0  ;;  %6638 = vmatmul.mubr.bf16.gmra.mrb[148].mxu1 %v11321_v50 }
 0x362   : > { %v5670_v9 = vmax.f32 %v5414_v41, 0.0  ;;  %6484 = vmatprep.mubr.bf16.mxu0 %v11367_v49  ;;  %v5672_v35 = vmax.f32 %v5416_v13, 0.0  ;;  %6645 = vmatprep.mubr.bf16.mxu1 %v11375_v32 }
 0x363   : > { %v11493_v3 = vpack.c.bf16 %v5669_v2, %v5661_v28  ;;  %v11496_v42 = vpack.c.bf16 %v5671_v31, %v5663_v57 }
 0x364   : > { %v11498_v44 = vpack.c.bf16 %v5670_v9, %v5662_v19  ;;  %v4319_v61 = vpop.f32.mrb[44].mxu0  ;;  %v11500_v63 = vpack.c.bf16 %v5672_v35, %v5664_v8  ;;  %v4512_v48 = vpop.f32.mrb[44].mxu1 }
 0x365   : > { %v5421_v39 = vadd.f32 %v11171_v30, %v4319_v61  ;;  %v4321_v36 = vpop.f32.mrb[45].mxu0  ;;  %v5423_v50 = vadd.f32 %v11174_v33, %v4512_v48  ;;  %v4514_v55 = vpop.f32.mrb[45].mxu1 }
 0x366   : > { %v5422_v49 = vadd.f32 %v11176_v34, %v4321_v36  ;;  %v4323_v16 = vpop.f32.mrb[46].mxu0  ;;  %v5424_v1 = vadd.f32 %v11180_v38, %v4514_v55  ;;  %v4516_v58 = vpop.f32.mrb[46].mxu1 }
 0x367   : > { %v5429_v32 = vadd.f32 %v11171_v30, %v4323_v16  ;;  %v4325_v40 = vpop.f32.mrb[47].mxu0  ;;  %v5431_v14 = vadd.f32 %v11174_v33, %v4516_v58  ;;  %v4518_v60 = vpop.f32.mrb[47].mxu1  ;;  %v5677_v52 = vmax.f32 %v5421_v39, 0.0  ;;  %v5679_v51 = vmax.f32 %v5423_v50, 0.0 }
 0x368   : > { %v5430_v43 = vadd.f32 %v11176_v34, %v4325_v40  ;;  %v5432_v10 = vadd.f32 %v11180_v38, %v4518_v60  ;;  %v5678_v12 = vmax.f32 %v5422_v49, 0.0  ;;  %v5680_v4 = vmax.f32 %v5424_v1, 0.0 }
 0x369   : > { %v5685_v62 = vmax.f32 %v5429_v32, 0.0  ;;  %6485 = vmatmul.mubr.bf16.gmra.mrb[152].mxu0 %v11359_v45  ;;  %v5687_v25 = vmax.f32 %v5431_v14, 0.0  ;;  %6646 = vmatmul.mubr.bf16.gmra.mrb[152].mxu1 %v11365_v59 }
 0x36a   : > { %v5686_v53 = vmax.f32 %v5430_v43, 0.0  ;;  %6492 = vmatprep.mubr.bf16.mxu0 %v11411_v21  ;;  %v5688_v23 = vmax.f32 %v5432_v10, 0.0  ;;  %6653 = vmatprep.mubr.bf16.mxu1 %v11419_v26 }
 0x36b   : > { %v11513_v22 = vpack.c.bf16 %v5685_v62, %v5677_v52  ;;  %v11516_v7 = vpack.c.bf16 %v5687_v25, %v5679_v51 }
 0x36c   : > { %v11518_v24 = vpack.c.bf16 %v5686_v53, %v5678_v12  ;;  %v4329_v5 = vpop.f32.mrb[48].mxu0  ;;  %v11520_v45 = vpack.c.bf16 %v5688_v23, %v5680_v4  ;;  %v4522_v41 = vpop.f32.mrb[48].mxu1 }
 0x36d   : > { %v5437_v17 = vadd.f32 %v11171_v30, %v4329_v5  ;;  %v4331_v56 = vpop.f32.mrb[49].mxu0  ;;  %v5439_v59 = vadd.f32 %v11174_v33, %v4522_v41  ;;  %v4524_v28 = vpop.f32.mrb[49].mxu1 }
 0x36e   : > { %v5438_v21 = vadd.f32 %v11176_v34, %v4331_v56  ;;  %v4333_v2 = vpop.f32.mrb[50].mxu0  ;;  %v5440_v13 = vadd.f32 %v11180_v38, %v4524_v28  ;;  %v4526_v57 = vpop.f32.mrb[50].mxu1 }
 0x36f   : > { %v5445_v26 = vadd.f32 %v11171_v30, %v4333_v2  ;;  %v4335_v19 = vpop.f32.mrb[51].mxu0  ;;  %v5447_v31 = vadd.f32 %v11174_v33, %v4526_v57  ;;  %v4528_v8 = vpop.f32.mrb[51].mxu1  ;;  %v5693_v35 = vmax.f32 %v5437_v17, 0.0  ;;  %v5695_v48 = vmax.f32 %v5439_v59, 0.0 }
 0x370   : > { %v5446_v9 = vadd.f32 %v11176_v34, %v4335_v19  ;;  %v5448_v39 = vadd.f32 %v11180_v38, %v4528_v8  ;;  %v5694_v36 = vmax.f32 %v5438_v21, 0.0  ;;  %v5696_v55 = vmax.f32 %v5440_v13, 0.0 }
 0x371   : > { %v5701_v61 = vmax.f32 %v5445_v26, 0.0  ;;  %6493 = vmatmul.mubr.bf16.gmra.mrb[156].mxu0 %v11403_v20  ;;  %v5703_v50 = vmax.f32 %v5447_v31, 0.0  ;;  %6654 = vmatmul.mubr.bf16.gmra.mrb[156].mxu1 %v11409_v15 }
 0x372   : > { %v5702_v49 = vmax.f32 %v5446_v9, 0.0  ;;  %6500 = vmatprep.mubr.bf16.mxu0 %v11455_v27  ;;  %v5704_v1 = vmax.f32 %v5448_v39, 0.0  ;;  %6661 = vmatprep.mubr.bf16.mxu1 %v11460_v37 }
 0x373   : > { %v11533_v16 = vpack.c.bf16 %v5701_v61, %v5693_v35  ;;  %v11536_v32 = vpack.c.bf16 %v5703_v50, %v5695_v48 }
 0x374   : > { %v11538_v58 = vpack.c.bf16 %v5702_v49, %v5694_v36  ;;  %v4339_v40 = vpop.f32.mrb[52].mxu0  ;;  %v11540_v20 = vpack.c.bf16 %v5704_v1, %v5696_v55  ;;  %v4532_v43 = vpop.f32.mrb[52].mxu1 }
 0x375   : > { %v5453_v14 = vadd.f32 %v11171_v30, %v4339_v40  ;;  %v4341_v60 = vpop.f32.mrb[53].mxu0  ;;  %v5455_v15 = vadd.f32 %v11174_v33, %v4532_v43  ;;  %v4534_v52 = vpop.f32.mrb[53].mxu1 }
 0x376   : > { %v5454_v27 = vadd.f32 %v11176_v34, %v4341_v60  ;;  %v4343_v62 = vpop.f32.mrb[54].mxu0  ;;  %v5456_v10 = vadd.f32 %v11180_v38, %v4534_v52  ;;  %v4536_v51 = vpop.f32.mrb[54].mxu1 }
 0x377   : > { %v5461_v37 = vadd.f32 %v11171_v30, %v4343_v62  ;;  %v4345_v12 = vpop.f32.mrb[55].mxu0  ;;  %v5463_v25 = vadd.f32 %v11174_v33, %v4536_v51  ;;  %v4538_v4 = vpop.f32.mrb[55].mxu1  ;;  %v5709_v23 = vmax.f32 %v5453_v14, 0.0  ;;  %v5711_v41 = vmax.f32 %v5455_v15, 0.0 }
 0x378   : > { %v5462_v53 = vadd.f32 %v11176_v34, %v4345_v12  ;;  %v5464_v17 = vadd.f32 %v11180_v38, %v4538_v4  ;;  %v5710_v56 = vmax.f32 %v5454_v27, 0.0  ;;  %v5712_v28 = vmax.f32 %v5456_v10, 0.0 }
 0x379   : > { %v5717_v5 = vmax.f32 %v5461_v37, 0.0  ;;  %6501 = vmatmul.mubr.bf16.gmra.mrb[160].mxu0 %v11447_v29  ;;  %v5719_v59 = vmax.f32 %v5463_v25, 0.0  ;;  %6662 = vmatmul.mubr.bf16.gmra.mrb[160].mxu1 %v11453_v11  ;;  %v5231_v25 = vsub.s32 6, %v11156_v6 }
 0x37a   : > { %v5718_v21 = vmax.f32 %v5462_v53, 0.0  ;;  %6508 = vmatprep.mubr.bf16.mxu0 %v11478_v0  ;;  %v5720_v13 = vmax.f32 %v5464_v17, 0.0  ;;  %6669 = vmatprep.mubr.bf16.mxu1 %v11480_v46 }
 0x37b   : > { %v11553_v2 = vpack.c.bf16 %v5717_v5, %v5709_v23  ;;  %v11556_v26 = vpack.c.bf16 %v5719_v59, %v5711_v41  ;;  %v5227_v23 = vsub.s32 5, %v11156_v6 }
 0x37c   : > { %v11558_v57 = vpack.c.bf16 %v5718_v21, %v5710_v56  ;;  %v4349_v19 = vpop.f32.mrb[56].mxu0  ;;  %v11560_v29 = vpack.c.bf16 %v5720_v13, %v5712_v28  ;;  %v4542_v9 = vpop.f32.mrb[56].mxu1  ;;  %v5235_v13 = vsub.s32 7, %v11156_v6 }
 0x37d   : > { %v5469_v31 = vadd.f32 %v11171_v30, %v4349_v19  ;;  %v4351_v8 = vpop.f32.mrb[57].mxu0  ;;  %v5471_v11 = vadd.f32 %v11174_v33, %v4542_v9  ;;  %v4544_v35 = vpop.f32.mrb[57].mxu1 }
 0x37e   : > { %v5470_v0 = vadd.f32 %v11176_v34, %v4351_v8  ;;  %v4353_v61 = vpop.f32.mrb[58].mxu0  ;;  %v5472_v39 = vadd.f32 %v11180_v38, %v4544_v35  ;;  %v4546_v48 = vpop.f32.mrb[58].mxu1  ;;  %v9273_v8 = vld [vmem:[%s12231_s2] sm:$0xff] }
 0x37f   : > { %v5477_v46 = vadd.f32 %v11171_v30, %v4353_v61  ;;  %v4355_v36 = vpop.f32.mrb[59].mxu0  ;;  %v5479_v50 = vadd.f32 %v11174_v33, %v4546_v48  ;;  %v4548_v55 = vpop.f32.mrb[59].mxu1  ;;  %v5725_v1 = vmax.f32 %v5469_v31, 0.0  ;;  %v5727_v43 = vmax.f32 %v5471_v11, 0.0 }
 0x380   : > { %v5478_v49 = vadd.f32 %v11176_v34, %v4355_v36  ;;  %v5480_v14 = vadd.f32 %v11180_v38, %v4548_v55  ;;  %v5726_v60 = vmax.f32 %v5470_v0, 0.0  ;;  %v5728_v52 = vmax.f32 %v5472_v39, 0.0 }
 0x381   : > { %v5733_v40 = vmax.f32 %v5477_v46, 0.0  ;;  %6509 = vmatmul.mubr.bf16.gmra.mrb[164].mxu0 %v11473_v54  ;;  %v5735_v15 = vmax.f32 %v5479_v50, 0.0  ;;  %6670 = vmatmul.mubr.bf16.gmra.mrb[164].mxu1 %v11476_v18  ;;  %v5223_v54 = vsub.s32 4, %v11156_v6  ;;  %v11598_v0 = vrot.slane %v9273_v8, %v5231_v25 }
 0x382   : > { %v5734_v27 = vmax.f32 %v5478_v49, 0.0  ;;  %6516 = vmatprep.mubr.bf16.mxu0 %v11498_v44  ;;  %v5736_v10 = vmax.f32 %v5480_v14, 0.0  ;;  %6677 = vmatprep.mubr.bf16.mxu1 %v11500_v63  ;;  %v11602_v6 = vrot.slane %v9273_v8, %v5227_v23  ;;  %v11609_v49 = vrot.slane %v9273_v8, %v5235_v13 }
 0x383   : > { %v11573_v62 = vpack.c.bf16 %v5733_v40, %v5725_v1  ;;  %v11576_v37 = vpack.c.bf16 %v5735_v15, %v5727_v43  ;;  %v11596_v11 = vrot.slane %v9273_v8, %v5223_v54 }
 0x384   : > { %v11578_v51 = vpack.c.bf16 %v5734_v27, %v5726_v60  ;;  %v4359_v12 = vpop.f32.mrb[60].mxu0  ;;  %v11582_v53 = vpack.c.bf16 %v5736_v10, %v5728_v52  ;;  %v4552_v44 = vpop.f32.mrb[60].mxu1 }
 0x385   : > { %v5485_v18 = vadd.f32 %v11171_v30, %v4359_v12  ;;  %v4361_v4 = vpop.f32.mrb[61].mxu0  ;;  %v5487_v5 = vadd.f32 %v11174_v33, %v4552_v44  ;;  %v4554_v17 = vpop.f32.mrb[61].mxu1 }
 0x386   : > { %v5486_v63 = vadd.f32 %v11176_v34, %v4361_v4  ;;  %v4363_v41 = vpop.f32.mrb[62].mxu0  ;;  %v5488_v56 = vadd.f32 %v11180_v38, %v4554_v17  ;;  %v4556_v21 = vpop.f32.mrb[62].mxu1 }
 0x387   : > { %v5493_v59 = vadd.f32 %v11171_v30, %v4363_v41  ;;  %v4365_v28 = vpop.f32.mrb[63].mxu0  ;;  %v5495_v19 = vadd.f32 %v11174_v33, %v4556_v21  ;;  %v4558_v9 = vpop.f32.mrb[63].mxu1  ;;  %v5741_v35 = vmax.f32 %v5485_v18, 0.0  ;;  %v5743_v33 = vmax.f32 %v5487_v5, 0.0 }
 0x388   : > { %v5494_v31 = vadd.f32 %v11176_v34, %v4365_v28  ;;  %v5496_v30 = vadd.f32 %v11180_v38, %v4558_v9  ;;  %v5742_v39 = vmax.f32 %v5486_v63, 0.0  ;;  %v5744_v48 = vmax.f32 %v5488_v56, 0.0 }
 0x389   : > { %v5749_v61 = vmax.f32 %v5493_v59, 0.0  ;;  %6517 = vmatmul.mubr.bf16.gmra.mrb[168].mxu0 %v11493_v3  ;;  %v5751_v34 = vmax.f32 %v5495_v19, 0.0  ;;  %6678 = vmatmul.mubr.bf16.gmra.mrb[168].mxu1 %v11496_v42 }
 0x38a   : > { %v5750_v46 = vmax.f32 %v5494_v31, 0.0  ;;  %6524 = vmatprep.mubr.bf16.mxu0 %v11518_v24  ;;  %v5752_v50 = vmax.f32 %v5496_v30, 0.0  ;;  %6685 = vmatprep.mubr.bf16.mxu1 %v11520_v45 }
 0x38b   : > { %v11606_v36 = vpack.c.bf16 %v5749_v61, %v5741_v35  ;;  %v11611_v38 = vpack.c.bf16 %v5751_v34, %v5743_v33 }
 0x38c   : > { %v11613_v3 = vpack.c.bf16 %v5750_v46, %v5742_v39  ;;  %v4595_v55 = vpop.f32.mrb[64].mxu0  ;;  %v11615_v1 = vpack.c.bf16 %v5752_v50, %v5744_v48  ;;  %v4788_v42 = vpop.f32.mrb[64].mxu1 }
 0x38d   : > { %v5249_v40 = vadd.f32 %v11596_v11, %v4595_v55  ;;  %v4597_v14 = vpop.f32.mrb[65].mxu0  ;;  %v5251_v24 = vadd.f32 %v11598_v0, %v4788_v42  ;;  %v4790_v60 = vpop.f32.mrb[65].mxu1 }
 0x38e   : > { %v5250_v43 = vadd.f32 %v11602_v6, %v4597_v14  ;;  %v4599_v15 = vpop.f32.mrb[66].mxu0  ;;  %v5252_v45 = vadd.f32 %v11609_v49, %v4790_v60  ;;  %v4792_v52 = vpop.f32.mrb[66].mxu1 }
 0x38f   : > { %v5257_v27 = vadd.f32 %v11596_v11, %v4599_v15  ;;  %v4601_v10 = vpop.f32.mrb[67].mxu0  ;;  %v5259_v12 = vadd.f32 %v11598_v0, %v4792_v52  ;;  %v4794_v25 = vpop.f32.mrb[67].mxu1  ;;  %v5505_v18 = vmax.f32 %v5249_v40, 0.0  ;;  %v5507_v23 = vmax.f32 %v5251_v24, 0.0 }
 0x390   : > { %v5258_v54 = vadd.f32 %v11602_v6, %v4601_v10  ;;  %v5260_v4 = vadd.f32 %v11609_v49, %v4794_v25  ;;  %v5506_v5 = vmax.f32 %v5250_v43, 0.0  ;;  %v5508_v41 = vmax.f32 %v5252_v45, 0.0 }
 0x391   : > { %v5513_v44 = vmax.f32 %v5257_v27, 0.0  ;;  %6525 = vmatmul.mubr.bf16.gmra.mrb[172].mxu0 %v11513_v22  ;;  %v5515_v63 = vmax.f32 %v5259_v12, 0.0  ;;  %6686 = vmatmul.mubr.bf16.gmra.mrb[172].mxu1 %v11516_v7 }
 0x392   : > { %v5514_v17 = vmax.f32 %v5258_v54, 0.0  ;;  %6532 = vmatprep.mubr.bf16.mxu0 %v11538_v58  ;;  %v5516_v59 = vmax.f32 %v5260_v4, 0.0  ;;  %6693 = vmatprep.mubr.bf16.mxu1 %v11540_v20 }
 0x393   : > { %v11628_v56 = vpack.c.bf16 %v5513_v44, %v5505_v18  ;;  %v11631_v21 = vpack.c.bf16 %v5515_v63, %v5507_v23 }
 0x394   : > { %v11633_v28 = vpack.c.bf16 %v5514_v17, %v5506_v5  ;;  %v4605_v13 = vpop.f32.mrb[68].mxu0  ;;  %v11635_v22 = vpack.c.bf16 %v5516_v59, %v5508_v41  ;;  %v4798_v31 = vpop.f32.mrb[68].mxu1 }
 0x395   : > { %v5265_v19 = vadd.f32 %v11596_v11, %v4605_v13  ;;  %v4607_v9 = vpop.f32.mrb[69].mxu0  ;;  %v5267_v7 = vadd.f32 %v11598_v0, %v4798_v31  ;;  %v4800_v8 = vpop.f32.mrb[69].mxu1 }
 0x396   : > { %v5266_v58 = vadd.f32 %v11602_v6, %v4607_v9  ;;  %v4609_v35 = vpop.f32.mrb[70].mxu0  ;;  %v5268_v61 = vadd.f32 %v11609_v49, %v4800_v8  ;;  %v4802_v30 = vpop.f32.mrb[70].mxu1 }
 0x397   : > { %v5273_v20 = vadd.f32 %v11596_v11, %v4609_v35  ;;  %v4611_v33 = vpop.f32.mrb[71].mxu0  ;;  %v5275_v39 = vadd.f32 %v11598_v0, %v4802_v30  ;;  %v4804_v46 = vpop.f32.mrb[71].mxu1  ;;  %v5521_v48 = vmax.f32 %v5265_v19, 0.0  ;;  %v5523_v40 = vmax.f32 %v5267_v7, 0.0 }
 0x398   : > { %v5274_v34 = vadd.f32 %v11602_v6, %v4611_v33  ;;  %v5276_v55 = vadd.f32 %v11609_v49, %v4804_v46  ;;  %v5522_v42 = vmax.f32 %v5266_v58, 0.0  ;;  %v5524_v43 = vmax.f32 %v5268_v61, 0.0 }
 0x399   : > { %v5529_v50 = vmax.f32 %v5273_v20, 0.0  ;;  %6533 = vmatmul.mubr.bf16.gmra.mrb[176].mxu0 %v11533_v16  ;;  %v5531_v14 = vmax.f32 %v5275_v39, 0.0  ;;  %6694 = vmatmul.mubr.bf16.gmra.mrb[176].mxu1 %v11536_v32 }
 0x39a   : > { %v5530_v24 = vmax.f32 %v5274_v34, 0.0  ;;  %6540 = vmatprep.mubr.bf16.mxu0 %v11558_v57  ;;  %v5532_v15 = vmax.f32 %v5276_v55, 0.0  ;;  %6701 = vmatprep.mubr.bf16.mxu1 %v11560_v29 }
 0x39b   : > { %v11648_v60 = vpack.c.bf16 %v5529_v50, %v5521_v48  ;;  %v11651_v45 = vpack.c.bf16 %v5531_v14, %v5523_v40 }
 0x39c   : > { %v11653_v27 = vpack.c.bf16 %v5530_v24, %v5522_v42  ;;  %v4615_v52 = vpop.f32.mrb[72].mxu0  ;;  %v11655_v16 = vpack.c.bf16 %v5532_v15, %v5524_v43  ;;  %v4808_v12 = vpop.f32.mrb[72].mxu1 }
 0x39d   : > { %v5281_v10 = vadd.f32 %v11596_v11, %v4615_v52  ;;  %v4617_v54 = vpop.f32.mrb[73].mxu0  ;;  %v5283_v32 = vadd.f32 %v11598_v0, %v4808_v12  ;;  %v4810_v25 = vpop.f32.mrb[73].mxu1 }
 0x39e   : > { %v5282_v57 = vadd.f32 %v11602_v6, %v4617_v54  ;;  %v4619_v18 = vpop.f32.mrb[74].mxu0  ;;  %v5284_v44 = vadd.f32 %v11609_v49, %v4810_v25  ;;  %v4812_v4 = vpop.f32.mrb[74].mxu1 }
 0x39f   : > { %v5289_v29 = vadd.f32 %v11596_v11, %v4619_v18  ;;  %v4621_v23 = vpop.f32.mrb[75].mxu0  ;;  %v5291_v5 = vadd.f32 %v11598_v0, %v4812_v4  ;;  %v4814_v17 = vpop.f32.mrb[75].mxu1  ;;  %v5537_v41 = vmax.f32 %v5281_v10, 0.0  ;;  %v5539_v19 = vmax.f32 %v5283_v32, 0.0 }
 0x3a0   : > { %v5290_v63 = vadd.f32 %v11602_v6, %v4621_v23  ;;  %v5292_v13 = vadd.f32 %v11609_v49, %v4814_v17  ;;  %v5538_v31 = vmax.f32 %v5282_v57, 0.0  ;;  %v5540_v58 = vmax.f32 %v5284_v44, 0.0 }
 0x3a1   : > { %v5545_v59 = vmax.f32 %v5289_v29, 0.0  ;;  %6541 = vmatmul.mubr.bf16.gmra.mrb[180].mxu0 %v11553_v2  ;;  %v5547_v9 = vmax.f32 %v5291_v5, 0.0  ;;  %6702 = vmatmul.mubr.bf16.gmra.mrb[180].mxu1 %v11556_v26 }
 0x3a2   : > { %v5546_v7 = vmax.f32 %v5290_v63, 0.0  ;;  %6548 = vmatprep.mubr.bf16.mxu0 %v11578_v51  ;;  %v5548_v35 = vmax.f32 %v5292_v13, 0.0  ;;  %6709 = vmatprep.mubr.bf16.mxu1 %v11582_v53 }
 0x3a3   : > { %v11668_v8 = vpack.c.bf16 %v5545_v59, %v5537_v41  ;;  %v11671_v61 = vpack.c.bf16 %v5547_v9, %v5539_v19 }
 0x3a4   : > { %v11673_v20 = vpack.c.bf16 %v5546_v7, %v5538_v31  ;;  %v4625_v30 = vpop.f32.mrb[76].mxu0  ;;  %v11675_v2 = vpack.c.bf16 %v5548_v35, %v5540_v58  ;;  %v4818_v39 = vpop.f32.mrb[76].mxu1 }
 0x3a5   : > { %v5297_v33 = vadd.f32 %v11596_v11, %v4625_v30  ;;  %v4627_v34 = vpop.f32.mrb[77].mxu0  ;;  %v5299_v26 = vadd.f32 %v11598_v0, %v4818_v39  ;;  %v4820_v46 = vpop.f32.mrb[77].mxu1 }
 0x3a6   : > { %v5298_v51 = vadd.f32 %v11602_v6, %v4627_v34  ;;  %v4629_v48 = vpop.f32.mrb[78].mxu0  ;;  %v5300_v50 = vadd.f32 %v11609_v49, %v4820_v46  ;;  %v4822_v55 = vpop.f32.mrb[78].mxu1 }
 0x3a7   : > { %v5305_v53 = vadd.f32 %v11596_v11, %v4629_v48  ;;  %v4631_v40 = vpop.f32.mrb[79].mxu0  ;;  %v5307_v42 = vadd.f32 %v11598_v0, %v4822_v55  ;;  %v4824_v24 = vpop.f32.mrb[79].mxu1  ;;  %v5553_v43 = vmax.f32 %v5297_v33, 0.0  ;;  %v5555_v10 = vmax.f32 %v5299_v26, 0.0 }
 0x3a8   : > { %v5306_v14 = vadd.f32 %v11602_v6, %v4631_v40  ;;  %v5308_v52 = vadd.f32 %v11609_v49, %v4824_v24  ;;  %v5554_v12 = vmax.f32 %v5298_v51, 0.0  ;;  %v5556_v57 = vmax.f32 %v5300_v50, 0.0 }
 0x3a9   : > { %v5561_v15 = vmax.f32 %v5305_v53, 0.0  ;;  %6549 = vmatmul.mubr.bf16.gmra.mrb[184].mxu0 %v11573_v62  ;;  %v5563_v54 = vmax.f32 %v5307_v42, 0.0  ;;  %6710 = vmatmul.mubr.bf16.gmra.mrb[184].mxu1 %v11576_v37 }
 0x3aa   : > { %v5562_v32 = vmax.f32 %v5306_v14, 0.0  ;;  %6556 = vmatprep.mubr.bf16.mxu0 %v11613_v3  ;;  %v5564_v18 = vmax.f32 %v5308_v52, 0.0  ;;  %6717 = vmatprep.mubr.bf16.mxu1 %v11615_v1 }
 0x3ab   : > { %v11688_v25 = vpack.c.bf16 %v5561_v15, %v5553_v43  ;;  %v11691_v44 = vpack.c.bf16 %v5563_v54, %v5555_v10 }
 0x3ac   : > { %v11693_v29 = vpack.c.bf16 %v5562_v32, %v5554_v12  ;;  %v4635_v4 = vpop.f32.mrb[80].mxu0  ;;  %v11695_v62 = vpack.c.bf16 %v5564_v18, %v5556_v57  ;;  %v4828_v5 = vpop.f32.mrb[80].mxu1 }
 0x3ad   : > { %v5313_v23 = vadd.f32 %v11596_v11, %v4635_v4  ;;  %v4637_v63 = vpop.f32.mrb[81].mxu0  ;;  %v5315_v37 = vadd.f32 %v11598_v0, %v4828_v5  ;;  %v4830_v17 = vpop.f32.mrb[81].mxu1 }
 0x3ae   : > { %v5314_v3 = vadd.f32 %v11602_v6, %v4637_v63  ;;  %v4639_v41 = vpop.f32.mrb[82].mxu0  ;;  %v5316_v59 = vadd.f32 %v11609_v49, %v4830_v17  ;;  %v4832_v13 = vpop.f32.mrb[82].mxu1 }
 0x3af   : > { %v5321_v1 = vadd.f32 %v11596_v11, %v4639_v41  ;;  %v4641_v19 = vpop.f32.mrb[83].mxu0  ;;  %v5323_v31 = vadd.f32 %v11598_v0, %v4832_v13  ;;  %v4834_v7 = vpop.f32.mrb[83].mxu1  ;;  %v5569_v58 = vmax.f32 %v5313_v23, 0.0  ;;  %v5571_v33 = vmax.f32 %v5315_v37, 0.0 }
 0x3b0   : > { %v5322_v9 = vadd.f32 %v11602_v6, %v4641_v19  ;;  %v5324_v30 = vadd.f32 %v11609_v49, %v4834_v7  ;;  %v5570_v39 = vmax.f32 %v5314_v3, 0.0  ;;  %v5572_v51 = vmax.f32 %v5316_v59, 0.0 }
 0x3b1   : > { %v5577_v35 = vmax.f32 %v5321_v1, 0.0  ;;  %6557 = vmatmul.mubr.bf16.gmra.mrb[188].mxu0 %v11606_v36  ;;  %v5579_v34 = vmax.f32 %v5323_v31, 0.0  ;;  %6718 = vmatmul.mubr.bf16.gmra.mrb[188].mxu1 %v11611_v38 }
 0x3b2   : > { %v5578_v26 = vmax.f32 %v5322_v9, 0.0  ;;  %6758 = vmatprep.mubr.bf16.mxu0 %v11633_v28  ;;  %v5580_v48 = vmax.f32 %v5324_v30, 0.0  ;;  %6919 = vmatprep.mubr.bf16.mxu1 %v11635_v22 }
 0x3b3   : > { %v11708_v46 = vpack.c.bf16 %v5577_v35, %v5569_v58  ;;  %v11711_v50 = vpack.c.bf16 %v5579_v34, %v5571_v33 }
 0x3b4   : > { %v11713_v53 = vpack.c.bf16 %v5578_v26, %v5570_v39  ;;  %v4645_v55 = vpop.f32.mrb[84].mxu0  ;;  %v11715_v36 = vpack.c.bf16 %v5580_v48, %v5572_v51  ;;  %v4838_v42 = vpop.f32.mrb[84].mxu1 }
 0x3b5   : > { %v5329_v40 = vadd.f32 %v11596_v11, %v4645_v55  ;;  %v4647_v14 = vpop.f32.mrb[85].mxu0  ;;  %v5331_v38 = vadd.f32 %v11598_v0, %v4838_v42  ;;  %v4840_v24 = vpop.f32.mrb[85].mxu1 }
 0x3b6   : > { %v5330_v28 = vadd.f32 %v11602_v6, %v4647_v14  ;;  %v4649_v43 = vpop.f32.mrb[86].mxu0  ;;  %v5332_v15 = vadd.f32 %v11609_v49, %v4840_v24  ;;  %v4842_v52 = vpop.f32.mrb[86].mxu1 }
 0x3b7   : > { %v5337_v22 = vadd.f32 %v11596_v11, %v4649_v43  ;;  %v4651_v10 = vpop.f32.mrb[87].mxu0  ;;  %v5339_v12 = vadd.f32 %v11598_v0, %v4842_v52  ;;  %v4844_v32 = vpop.f32.mrb[87].mxu1  ;;  %v5585_v57 = vmax.f32 %v5329_v40, 0.0  ;;  %v5587_v23 = vmax.f32 %v5331_v38, 0.0 }
 0x3b8   : > { %v5338_v54 = vadd.f32 %v11602_v6, %v4651_v10  ;;  %v5340_v4 = vadd.f32 %v11609_v49, %v4844_v32  ;;  %v5586_v5 = vmax.f32 %v5330_v28, 0.0  ;;  %v5588_v3 = vmax.f32 %v5332_v15, 0.0 }
 0x3b9   : > { %v5593_v18 = vmax.f32 %v5337_v22, 0.0  ;;  %6759 = vmatmul.mubr.bf16.vlgmr.msra.gmra.mrb[192].mxu0 %v11628_v56  ;;  %v5595_v63 = vmax.f32 %v5339_v12, 0.0  ;;  %6920 = vmatmul.mubr.bf16.vlgmr.msra.gmra.mrb[192].mxu1 %v11631_v21 }
 0x3ba   : > { %v5594_v37 = vmax.f32 %v5338_v54, 0.0  ;;  %6766 = vmatprep.mubr.bf16.mxu0 %v11653_v27  ;;  %v5596_v41 = vmax.f32 %v5340_v4, 0.0  ;;  %6927 = vmatprep.mubr.bf16.mxu1 %v11655_v16 }
 0x3bb   : > { %v11728_v17 = vpack.c.bf16 %v5593_v18, %v5585_v57  ;;  %v11731_v59 = vpack.c.bf16 %v5595_v63, %v5587_v23 }
 0x3bc   : > { %v11733_v1 = vpack.c.bf16 %v5594_v37, %v5586_v5  ;;  %v4655_v13 = vpop.f32.mrb[88].mxu0  ;;  %v11735_v56 = vpack.c.bf16 %v5596_v41, %v5588_v3  ;;  %v4848_v31 = vpop.f32.mrb[88].mxu1 }
 0x3bd   : > { %v5345_v19 = vadd.f32 %v11596_v11, %v4655_v13  ;;  %v4657_v9 = vpop.f32.mrb[89].mxu0  ;;  %v5347_v21 = vadd.f32 %v11598_v0, %v4848_v31  ;;  %v4850_v7 = vpop.f32.mrb[89].mxu1 }
 0x3be   : > { %v5346_v27 = vadd.f32 %v11602_v6, %v4657_v9  ;;  %v4659_v58 = vpop.f32.mrb[90].mxu0  ;;  %v5348_v35 = vadd.f32 %v11609_v49, %v4850_v7  ;;  %v4852_v30 = vpop.f32.mrb[90].mxu1 }
 0x3bf   : > { %v5353_v16 = vadd.f32 %v11596_v11, %v4659_v58  ;;  %v4661_v33 = vpop.f32.mrb[91].mxu0  ;;  %v5355_v39 = vadd.f32 %v11598_v0, %v4852_v30  ;;  %v4854_v26 = vpop.f32.mrb[91].mxu1  ;;  %v5601_v51 = vmax.f32 %v5345_v19, 0.0  ;;  %v5603_v40 = vmax.f32 %v5347_v21, 0.0 }
 0x3c0   : > { %v5354_v34 = vadd.f32 %v11602_v6, %v4661_v33  ;;  %v5356_v55 = vadd.f32 %v11609_v49, %v4854_v26  ;;  %v5602_v42 = vmax.f32 %v5346_v27, 0.0  ;;  %v5604_v28 = vmax.f32 %v5348_v35, 0.0 }
 0x3c1   : > { %v5609_v48 = vmax.f32 %v5353_v16, 0.0  ;;  %6767 = vmatmul.mubr.bf16.gmra.mrb[196].mxu0 %v11648_v60  ;;  %v5611_v14 = vmax.f32 %v5355_v39, 0.0  ;;  %6928 = vmatmul.mubr.bf16.gmra.mrb[196].mxu1 %v11651_v45 }
 0x3c2   : > { %v5610_v38 = vmax.f32 %v5354_v34, 0.0  ;;  %6774 = vmatprep.mubr.bf16.mxu0 %v11673_v20  ;;  %v5612_v43 = vmax.f32 %v5356_v55, 0.0  ;;  %6935 = vmatprep.mubr.bf16.mxu1 %v11675_v2 }
 0x3c3   : > { %v11748_v24 = vpack.c.bf16 %v5609_v48, %v5601_v51  ;;  %v11751_v15 = vpack.c.bf16 %v5611_v14, %v5603_v40 }
 0x3c4   : > { %v11753_v22 = vpack.c.bf16 %v5610_v38, %v5602_v42  ;;  %v4665_v52 = vpop.f32.mrb[92].mxu0  ;;  %v11755_v60 = vpack.c.bf16 %v5612_v43, %v5604_v28  ;;  %v4858_v12 = vpop.f32.mrb[92].mxu1 }
 0x3c5   : > { %v5361_v10 = vadd.f32 %v11596_v11, %v4665_v52  ;;  %v4667_v54 = vpop.f32.mrb[93].mxu0  ;;  %v5363_v45 = vadd.f32 %v11598_v0, %v4858_v12  ;;  %v4860_v32 = vpop.f32.mrb[93].mxu1 }
 0x3c6   : > { %v5362_v20 = vadd.f32 %v11602_v6, %v4667_v54  ;;  %v4669_v57 = vpop.f32.mrb[94].mxu0  ;;  %v5364_v18 = vadd.f32 %v11609_v49, %v4860_v32  ;;  %v4862_v4 = vpop.f32.mrb[94].mxu1 }
 0x3c7   : > { %v5369_v2 = vadd.f32 %v11596_v11, %v4669_v57  ;;  %v4671_v23 = vpop.f32.mrb[95].mxu0  ;;  %v5371_v5 = vadd.f32 %v11598_v0, %v4862_v4  ;;  %v4864_v37 = vpop.f32.mrb[95].mxu1  ;;  %v5617_v3 = vmax.f32 %v5361_v10, 0.0  ;;  %v5619_v19 = vmax.f32 %v5363_v45, 0.0 }
 0x3c8   : > { %v5370_v63 = vadd.f32 %v11602_v6, %v4671_v23  ;;  %v5372_v13 = vadd.f32 %v11609_v49, %v4864_v37  ;;  %v5618_v31 = vmax.f32 %v5362_v20, 0.0  ;;  %v5620_v27 = vmax.f32 %v5364_v18, 0.0 }
 0x3c9   : > { %v5625_v41 = vmax.f32 %v5369_v2, 0.0  ;;  %6775 = vmatmul.mubr.bf16.gmra.mrb[200].mxu0 %v11668_v8  ;;  %v5627_v9 = vmax.f32 %v5371_v5, 0.0  ;;  %6936 = vmatmul.mubr.bf16.gmra.mrb[200].mxu1 %v11671_v61 }
 0x3ca   : > { %v5626_v21 = vmax.f32 %v5370_v63, 0.0  ;;  %6782 = vmatprep.mubr.bf16.mxu0 %v11693_v29  ;;  %v5628_v58 = vmax.f32 %v5372_v13, 0.0  ;;  %6943 = vmatprep.mubr.bf16.mxu1 %v11695_v62 }
 0x3cb   : > { %v11768_v7 = vpack.c.bf16 %v5625_v41, %v5617_v3  ;;  %v11771_v35 = vpack.c.bf16 %v5627_v9, %v5619_v19 }
 0x3cc   : > { %v11773_v16 = vpack.c.bf16 %v5626_v21, %v5618_v31  ;;  %v4675_v30 = vpop.f32.mrb[96].mxu0  ;;  %v11775_v8 = vpack.c.bf16 %v5628_v58, %v5620_v27  ;;  %v4868_v39 = vpop.f32.mrb[96].mxu1 }
 0x3cd   : > { %v5377_v33 = vadd.f32 %v11596_v11, %v4675_v30  ;;  %v4677_v34 = vpop.f32.mrb[97].mxu0  ;;  %v5379_v61 = vadd.f32 %v11598_v0, %v4868_v39  ;;  %v4870_v26 = vpop.f32.mrb[97].mxu1 }
 0x3ce   : > { %v5378_v29 = vadd.f32 %v11602_v6, %v4677_v34  ;;  %v4679_v51 = vpop.f32.mrb[98].mxu0  ;;  %v5380_v48 = vadd.f32 %v11609_v49, %v4870_v26  ;;  %v4872_v55 = vpop.f32.mrb[98].mxu1 }
 0x3cf   : > { %v5385_v62 = vadd.f32 %v11596_v11, %v4679_v51  ;;  %v4681_v40 = vpop.f32.mrb[99].mxu0  ;;  %v5387_v42 = vadd.f32 %v11598_v0, %v4872_v55  ;;  %v4874_v38 = vpop.f32.mrb[99].mxu1  ;;  %v5633_v28 = vmax.f32 %v5377_v33, 0.0  ;;  %v5635_v10 = vmax.f32 %v5379_v61, 0.0 }
 0x3d0   : > { %v5386_v14 = vadd.f32 %v11602_v6, %v4681_v40  ;;  %v5388_v52 = vadd.f32 %v11609_v49, %v4874_v38  ;;  %v5634_v12 = vmax.f32 %v5378_v29, 0.0  ;;  %v5636_v20 = vmax.f32 %v5380_v48, 0.0 }
 0x3d1   : > { %v5641_v43 = vmax.f32 %v5385_v62, 0.0  ;;  %6783 = vmatmul.mubr.bf16.gmra.mrb[204].mxu0 %v11688_v25  ;;  %v5643_v54 = vmax.f32 %v5387_v42, 0.0  ;;  %6944 = vmatmul.mubr.bf16.gmra.mrb[204].mxu1 %v11691_v44 }
 0x3d2   : > { %v5642_v45 = vmax.f32 %v5386_v14, 0.0  ;;  %6790 = vmatprep.mubr.bf16.mxu0 %v11713_v53  ;;  %v5644_v57 = vmax.f32 %v5388_v52, 0.0  ;;  %6951 = vmatprep.mubr.bf16.mxu1 %v11715_v36 }
 0x3d3   : > { %v11788_v32 = vpack.c.bf16 %v5641_v43, %v5633_v28  ;;  %v11791_v18 = vpack.c.bf16 %v5643_v54, %v5635_v10 }
 0x3d4   : > { %v11793_v2 = vpack.c.bf16 %v5642_v45, %v5634_v12  ;;  %v4685_v4 = vpop.f32.mrb[100].mxu0  ;;  %v11795_v25 = vpack.c.bf16 %v5644_v57, %v5636_v20  ;;  %v4878_v5 = vpop.f32.mrb[100].mxu1 }
 0x3d5   : > { %v5393_v23 = vadd.f32 %v11596_v11, %v4685_v4  ;;  %v4687_v63 = vpop.f32.mrb[101].mxu0  ;;  %v5395_v44 = vadd.f32 %v11598_v0, %v4878_v5  ;;  %v4880_v37 = vpop.f32.mrb[101].mxu1 }
 0x3d6   : > { %v5394_v53 = vadd.f32 %v11602_v6, %v4687_v63  ;;  %v4689_v3 = vpop.f32.mrb[102].mxu0  ;;  %v5396_v41 = vadd.f32 %v11609_v49, %v4880_v37  ;;  %v4882_v13 = vpop.f32.mrb[102].mxu1 }
 0x3d7   : > { %v5401_v36 = vadd.f32 %v11596_v11, %v4689_v3  ;;  %v4691_v19 = vpop.f32.mrb[103].mxu0  ;;  %v5403_v31 = vadd.f32 %v11598_v0, %v4882_v13  ;;  %v4884_v21 = vpop.f32.mrb[103].mxu1  ;;  %v5649_v27 = vmax.f32 %v5393_v23, 0.0  ;;  %v5651_v33 = vmax.f32 %v5395_v44, 0.0 }
 0x3d8   : > { %v5402_v9 = vadd.f32 %v11602_v6, %v4691_v19  ;;  %v5404_v30 = vadd.f32 %v11609_v49, %v4884_v21  ;;  %v5650_v39 = vmax.f32 %v5394_v53, 0.0  ;;  %v5652_v29 = vmax.f32 %v5396_v41, 0.0 }
 0x3d9   : > { %v5657_v58 = vmax.f32 %v5401_v36, 0.0  ;;  %6791 = vmatmul.mubr.bf16.gmra.mrb[208].mxu0 %v11708_v46  ;;  %v5659_v34 = vmax.f32 %v5403_v31, 0.0  ;;  %6952 = vmatmul.mubr.bf16.gmra.mrb[208].mxu1 %v11711_v50 }
 0x3da   : > { %v5658_v61 = vmax.f32 %v5402_v9, 0.0  ;;  %6798 = vmatprep.mubr.bf16.mxu0 %v11733_v1  ;;  %v5660_v51 = vmax.f32 %v5404_v30, 0.0  ;;  %6959 = vmatprep.mubr.bf16.mxu1 %v11735_v56 }
 0x3db   : > { %v11808_v26 = vpack.c.bf16 %v5657_v58, %v5649_v27  ;;  %v11811_v48 = vpack.c.bf16 %v5659_v34, %v5651_v33 }
 0x3dc   : > { %v11813_v62 = vpack.c.bf16 %v5658_v61, %v5650_v39  ;;  %v4695_v55 = vpop.f32.mrb[104].mxu0  ;;  %v11815_v46 = vpack.c.bf16 %v5660_v51, %v5652_v29  ;;  %v4888_v42 = vpop.f32.mrb[104].mxu1 }
 0x3dd   : > { %v5409_v40 = vadd.f32 %v11596_v11, %v4695_v55  ;;  %v4697_v14 = vpop.f32.mrb[105].mxu0  ;;  %v5411_v50 = vadd.f32 %v11598_v0, %v4888_v42  ;;  %v4890_v38 = vpop.f32.mrb[105].mxu1 }
 0x3de   : > { %v5410_v1 = vadd.f32 %v11602_v6, %v4697_v14  ;;  %v4699_v28 = vpop.f32.mrb[106].mxu0  ;;  %v5412_v43 = vadd.f32 %v11609_v49, %v4890_v38  ;;  %v4892_v52 = vpop.f32.mrb[106].mxu1 }
 0x3df   : > { %v5417_v56 = vadd.f32 %v11596_v11, %v4699_v28  ;;  %v4701_v10 = vpop.f32.mrb[107].mxu0  ;;  %v5419_v12 = vadd.f32 %v11598_v0, %v4892_v52  ;;  %v4894_v45 = vpop.f32.mrb[107].mxu1  ;;  %v5665_v20 = vmax.f32 %v5409_v40, 0.0  ;;  %v5667_v23 = vmax.f32 %v5411_v50, 0.0 }
 0x3e0   : > { %v5418_v54 = vadd.f32 %v11602_v6, %v4701_v10  ;;  %v5420_v4 = vadd.f32 %v11609_v49, %v4894_v45  ;;  %v5666_v5 = vmax.f32 %v5410_v1, 0.0  ;;  %v5668_v53 = vmax.f32 %v5412_v43, 0.0 }
 0x3e1   : > { %v5673_v57 = vmax.f32 %v5417_v56, 0.0  ;;  %6799 = vmatmul.mubr.bf16.gmra.mrb[212].mxu0 %v11728_v17  ;;  %v5675_v63 = vmax.f32 %v5419_v12, 0.0  ;;  %6960 = vmatmul.mubr.bf16.gmra.mrb[212].mxu1 %v11731_v59 }
 0x3e2   : > { %v5674_v44 = vmax.f32 %v5418_v54, 0.0  ;;  %6806 = vmatprep.mubr.bf16.mxu0 %v11753_v22  ;;  %v5676_v3 = vmax.f32 %v5420_v4, 0.0  ;;  %6967 = vmatprep.mubr.bf16.mxu1 %v11755_v60 }
 0x3e3   : > { %v11828_v37 = vpack.c.bf16 %v5673_v57, %v5665_v20  ;;  %v11831_v41 = vpack.c.bf16 %v5675_v63, %v5667_v23 }
 0x3e4   : > { %v11833_v36 = vpack.c.bf16 %v5674_v44, %v5666_v5  ;;  %v4705_v13 = vpop.f32.mrb[108].mxu0  ;;  %v11835_v17 = vpack.c.bf16 %v5676_v3, %v5668_v53  ;;  %v4898_v31 = vpop.f32.mrb[108].mxu1 }
 0x3e5   : > { %v5425_v19 = vadd.f32 %v11596_v11, %v4705_v13  ;;  %v4707_v9 = vpop.f32.mrb[109].mxu0  ;;  %v5427_v59 = vadd.f32 %v11598_v0, %v4898_v31  ;;  %v4900_v21 = vpop.f32.mrb[109].mxu1 }
 0x3e6   : > { %v5426_v22 = vadd.f32 %v11602_v6, %v4707_v9  ;;  %v4709_v27 = vpop.f32.mrb[110].mxu0  ;;  %v5428_v58 = vadd.f32 %v11609_v49, %v4900_v21  ;;  %v4902_v30 = vpop.f32.mrb[110].mxu1 }
 0x3e7   : > { %v5433_v60 = vadd.f32 %v11596_v11, %v4709_v27  ;;  %v4711_v33 = vpop.f32.mrb[111].mxu0  ;;  %v5435_v39 = vadd.f32 %v11598_v0, %v4902_v30  ;;  %v4904_v61 = vpop.f32.mrb[111].mxu1  ;;  %v5681_v29 = vmax.f32 %v5425_v19, 0.0  ;;  %v5683_v40 = vmax.f32 %v5427_v59, 0.0 }
 0x3e8   : > { %v5434_v34 = vadd.f32 %v11602_v6, %v4711_v33  ;;  %v5436_v55 = vadd.f32 %v11609_v49, %v4904_v61  ;;  %v5682_v42 = vmax.f32 %v5426_v22, 0.0  ;;  %v5684_v1 = vmax.f32 %v5428_v58, 0.0 }
 0x3e9   : > { %v5689_v51 = vmax.f32 %v5433_v60, 0.0  ;;  %6807 = vmatmul.mubr.bf16.gmra.mrb[216].mxu0 %v11748_v24  ;;  %v5691_v14 = vmax.f32 %v5435_v39, 0.0  ;;  %6968 = vmatmul.mubr.bf16.gmra.mrb[216].mxu1 %v11751_v15 }
 0x3ea   : > { %v5690_v50 = vmax.f32 %v5434_v34, 0.0  ;;  %6814 = vmatprep.mubr.bf16.mxu0 %v11773_v16  ;;  %v5692_v28 = vmax.f32 %v5436_v55, 0.0  ;;  %6975 = vmatprep.mubr.bf16.mxu1 %v11775_v8 }
 0x3eb   : > { %v11848_v38 = vpack.c.bf16 %v5689_v51, %v5681_v29  ;;  %v11851_v43 = vpack.c.bf16 %v5691_v14, %v5683_v40 }
 0x3ec   : > { %v11853_v56 = vpack.c.bf16 %v5690_v50, %v5682_v42  ;;  %v4715_v52 = vpop.f32.mrb[112].mxu0  ;;  %v11855_v24 = vpack.c.bf16 %v5692_v28, %v5684_v1  ;;  %v4908_v12 = vpop.f32.mrb[112].mxu1 }
 0x3ed   : > { %v5441_v10 = vadd.f32 %v11596_v11, %v4715_v52  ;;  %v4717_v54 = vpop.f32.mrb[113].mxu0  ;;  %v5443_v15 = vadd.f32 %v11598_v0, %v4908_v12  ;;  %v4910_v45 = vpop.f32.mrb[113].mxu1 }
 0x3ee   : > { %v5442_v16 = vadd.f32 %v11602_v6, %v4717_v54  ;;  %v4719_v20 = vpop.f32.mrb[114].mxu0  ;;  %v5444_v57 = vadd.f32 %v11609_v49, %v4910_v45  ;;  %v4912_v4 = vpop.f32.mrb[114].mxu1 }
 0x3ef   : > { %v5449_v8 = vadd.f32 %v11596_v11, %v4719_v20  ;;  %v4721_v23 = vpop.f32.mrb[115].mxu0  ;;  %v5451_v5 = vadd.f32 %v11598_v0, %v4912_v4  ;;  %v4914_v44 = vpop.f32.mrb[115].mxu1  ;;  %v5697_v53 = vmax.f32 %v5441_v10, 0.0  ;;  %v5699_v19 = vmax.f32 %v5443_v15, 0.0 }
 0x3f0   : > { %v5450_v63 = vadd.f32 %v11602_v6, %v4721_v23  ;;  %v5452_v13 = vadd.f32 %v11609_v49, %v4914_v44  ;;  %v5698_v31 = vmax.f32 %v5442_v16, 0.0  ;;  %v5700_v22 = vmax.f32 %v5444_v57, 0.0 }
 0x3f1   : > { %v5705_v3 = vmax.f32 %v5449_v8, 0.0  ;;  %6815 = vmatmul.mubr.bf16.gmra.mrb[220].mxu0 %v11768_v7  ;;  %v5707_v9 = vmax.f32 %v5451_v5, 0.0  ;;  %6976 = vmatmul.mubr.bf16.gmra.mrb[220].mxu1 %v11771_v35 }
 0x3f2   : > { %v5706_v59 = vmax.f32 %v5450_v63, 0.0  ;;  %6822 = vmatprep.mubr.bf16.mxu0 %v11793_v2  ;;  %v5708_v27 = vmax.f32 %v5452_v13, 0.0  ;;  %6983 = vmatprep.mubr.bf16.mxu1 %v11795_v25 }
 0x3f3   : > { %v11868_v21 = vpack.c.bf16 %v5705_v3, %v5697_v53  ;;  %v11871_v58 = vpack.c.bf16 %v5707_v9, %v5699_v19 }
 0x3f4   : > { %v11873_v60 = vpack.c.bf16 %v5706_v59, %v5698_v31  ;;  %v4725_v30 = vpop.f32.mrb[116].mxu0  ;;  %v11875_v7 = vpack.c.bf16 %v5708_v27, %v5700_v22  ;;  %v4918_v39 = vpop.f32.mrb[116].mxu1 }
 0x3f5   : > { %v5457_v33 = vadd.f32 %v11596_v11, %v4725_v30  ;;  %v4727_v34 = vpop.f32.mrb[117].mxu0  ;;  %v5459_v35 = vadd.f32 %v11598_v0, %v4918_v39  ;;  %v4920_v61 = vpop.f32.mrb[117].mxu1 }
 0x3f6   : > { %v5458_v2 = vadd.f32 %v11602_v6, %v4727_v34  ;;  %v4729_v29 = vpop.f32.mrb[118].mxu0  ;;  %v5460_v51 = vadd.f32 %v11609_v49, %v4920_v61  ;;  %v4922_v55 = vpop.f32.mrb[118].mxu1 }
 0x3f7   : > { %v5465_v25 = vadd.f32 %v11596_v11, %v4729_v29  ;;  %v4731_v40 = vpop.f32.mrb[119].mxu0  ;;  %v5467_v42 = vadd.f32 %v11598_v0, %v4922_v55  ;;  %v4924_v50 = vpop.f32.mrb[119].mxu1  ;;  %v5713_v1 = vmax.f32 %v5457_v33, 0.0  ;;  %v5715_v10 = vmax.f32 %v5459_v35, 0.0 }
 0x3f8   : > { %v5466_v14 = vadd.f32 %v11602_v6, %v4731_v40  ;;  %v5468_v52 = vadd.f32 %v11609_v49, %v4924_v50  ;;  %v5714_v12 = vmax.f32 %v5458_v2, 0.0  ;;  %v5716_v16 = vmax.f32 %v5460_v51, 0.0 }
 0x3f9   : > { %v5721_v28 = vmax.f32 %v5465_v25, 0.0  ;;  %6823 = vmatmul.mubr.bf16.gmra.mrb[224].mxu0 %v11788_v32  ;;  %v5723_v54 = vmax.f32 %v5467_v42, 0.0  ;;  %6984 = vmatmul.mubr.bf16.gmra.mrb[224].mxu1 %v11791_v18 }
 0x3fa   : > { %v5722_v15 = vmax.f32 %v5466_v14, 0.0  ;;  %6830 = vmatprep.mubr.bf16.mxu0 %v11813_v62  ;;  %v5724_v20 = vmax.f32 %v5468_v52, 0.0  ;;  %6991 = vmatprep.mubr.bf16.mxu1 %v11815_v46 }
 0x3fb   : > { %v11888_v45 = vpack.c.bf16 %v5721_v28, %v5713_v1  ;;  %v11891_v57 = vpack.c.bf16 %v5723_v54, %v5715_v10 }
 0x3fc   : > { %v11893_v8 = vpack.c.bf16 %v5722_v15, %v5714_v12  ;;  %v4735_v4 = vpop.f32.mrb[120].mxu0  ;;  %v11895_v32 = vpack.c.bf16 %v5724_v20, %v5716_v16  ;;  %v4928_v5 = vpop.f32.mrb[120].mxu1 }
 0x3fd   : > { %v5473_v23 = vadd.f32 %v11596_v11, %v4735_v4  ;;  %v4737_v63 = vpop.f32.mrb[121].mxu0  ;;  %v5475_v18 = vadd.f32 %v11598_v0, %v4928_v5  ;;  %v4930_v44 = vpop.f32.mrb[121].mxu1 }
 0x3fe   : > { %v5474_v62 = vadd.f32 %v11602_v6, %v4737_v63  ;;  %v4739_v53 = vpop.f32.mrb[122].mxu0  ;;  %v5476_v3 = vadd.f32 %v11609_v49, %v4930_v44  ;;  %v4932_v13 = vpop.f32.mrb[122].mxu1 }
 0x3ff   : > { %v5481_v46 = vadd.f32 %v11596_v11, %v4739_v53  ;;  %v4741_v19 = vpop.f32.mrb[123].mxu0  ;;  %v5483_v31 = vadd.f32 %v11598_v0, %v4932_v13  ;;  %v4934_v59 = vpop.f32.mrb[123].mxu1  ;;  %v5729_v22 = vmax.f32 %v5473_v23, 0.0  ;;  %v5731_v33 = vmax.f32 %v5475_v18, 0.0 }
 0x400   : > { %v5482_v9 = vadd.f32 %v11602_v6, %v4741_v19  ;;  %v5484_v30 = vadd.f32 %v11609_v49, %v4934_v59  ;;  %v5730_v39 = vmax.f32 %v5474_v62, 0.0  ;;  %v5732_v2 = vmax.f32 %v5476_v3, 0.0 }
 0x401   : > { %v5737_v27 = vmax.f32 %v5481_v46, 0.0  ;;  %6831 = vmatmul.mubr.bf16.gmra.mrb[228].mxu0 %v11808_v26  ;;  %v5739_v34 = vmax.f32 %v5483_v31, 0.0  ;;  %6992 = vmatmul.mubr.bf16.gmra.mrb[228].mxu1 %v11811_v48 }
 0x402   : > { %v5738_v35 = vmax.f32 %v5482_v9, 0.0  ;;  %6838 = vmatprep.mubr.bf16.mxu0 %v11833_v36  ;;  %v5740_v29 = vmax.f32 %v5484_v30, 0.0  ;;  %6999 = vmatprep.mubr.bf16.mxu1 %v11835_v17 }
 0x403   : > { %v11908_v61 = vpack.c.bf16 %v5737_v27, %v5729_v22  ;;  %v11911_v51 = vpack.c.bf16 %v5739_v34, %v5731_v33 }
 0x404   : > { %v11913_v25 = vpack.c.bf16 %v5738_v35, %v5730_v39  ;;  %v4745_v55 = vpop.f32.mrb[124].mxu0  ;;  %v11915_v26 = vpack.c.bf16 %v5740_v29, %v5732_v2  ;;  %v4938_v42 = vpop.f32.mrb[124].mxu1 }
 0x405   : > { %v5489_v40 = vadd.f32 %v11596_v11, %v4745_v55  ;;  %v4747_v14 = vpop.f32.mrb[125].mxu0  ;;  %v5491_v48 = vadd.f32 %v11598_v0, %v4938_v42  ;;  %v4940_v50 = vpop.f32.mrb[125].mxu1 }
 0x406   : > { %v5490_v36 = vadd.f32 %v11602_v6, %v4747_v14  ;;  %v4749_v1 = vpop.f32.mrb[126].mxu0  ;;  %v5492_v28 = vadd.f32 %v11609_v49, %v4940_v50  ;;  %v4942_v52 = vpop.f32.mrb[126].mxu1 }
 0x407   : > { %v5497_v17 = vadd.f32 %v11596_v11, %v4749_v1  ;;  %v4751_v10 = vpop.f32.mrb[127].mxu0  ;;  %v5499_v12 = vadd.f32 %v11598_v0, %v4942_v52  ;;  %v4944_v15 = vpop.f32.mrb[127].mxu1  ;;  %v5745_v16 = vmax.f32 %v5489_v40, 0.0  ;;  %v5747_v23 = vmax.f32 %v5491_v48, 0.0 }
 0x408   : > { %v5498_v54 = vadd.f32 %v11602_v6, %v4751_v10  ;;  %v5500_v4 = vadd.f32 %v11609_v49, %v4944_v15  ;;  %v5746_v5 = vmax.f32 %v5490_v36, 0.0  ;;  %v5748_v11 = vmax.f32 %v5492_v28, 0.0 }
 0x409   : > { %v5753_v20 = vmax.f32 %v5497_v17, 0.0  ;;  %6839 = vmatmul.mubr.bf16.gmra.mrb[232].mxu0 %v11828_v37  ;;  %v5755_v63 = vmax.f32 %v5499_v12, 0.0  ;;  %7000 = vmatmul.mubr.bf16.gmra.mrb[232].mxu1 %v11831_v41  ;;  %v11940_v41 = vld [vmem:[%s12233_s4] ss:$0 sm:$0xff] }
 0x40a   : > { %v5754_v18 = vmax.f32 %v5498_v54, 0.0  ;;  %6846 = vmatprep.mubr.bf16.mxu0 %v11853_v56  ;;  %v5756_v0 = vmax.f32 %v5500_v4, 0.0  ;;  %7007 = vmatprep.mubr.bf16.mxu1 %v11855_v24 }
 0x40b   : > { %v11928_v62 = vpack.c.bf16 %v5753_v20, %v5745_v16  ;;  %v11931_v6 = vpack.c.bf16 %v5755_v63, %v5747_v23 }
 0x40c   : > { %v11933_v44 = vpack.c.bf16 %v5754_v18, %v5746_v5  ;;  %v8127_v49 = vpop.f32.mrb[128].mxu0  ;;  %v11935_v37 = vpack.c.bf16 %v5756_v0, %v5748_v11  ;;  %v8239_v53 = vpop.f32.mrb[128].mxu1 }
 0x40d   : > { %v8128_v56 = vpop.f32.mrb[129].mxu0  ;;  %v8240_v46 = vpop.f32.mrb[129].mxu1 }
 0x40e   : > { %v8129_v3 = vadd.f32 %v8128_v56, %v8127_v49  ;;  %v8130_v13 = vpop.f32.mrb[130].mxu0  ;;  %v8241_v19 = vadd.f32 %v8240_v46, %v8239_v53  ;;  %v8242_v31 = vpop.f32.mrb[130].mxu1 }
 0x40f   : > { %v8131_v24 = vpop.f32.mrb[131].mxu0  ;;  %v8243_v22 = vpop.f32.mrb[131].mxu1 }
 0x410   : > { %v6439_v9 = vadd.f32 %v8129_v3, %v11940_v41  ;;  %v8132_v59 = vadd.f32 %v8131_v24, %v8130_v13  ;;  %v8244_v27 = vadd.f32 %v8243_v22, %v8242_v31 }
 0x411   : > { %6847 = vmatmul.mubr.bf16.gmra.mrb[236].mxu0 %v11848_v38  ;;  %7008 = vmatmul.mubr.bf16.gmra.mrb[236].mxu1 %v11851_v43 }
 0x412   : > { %v11944_v30 = vadd.f32 %v8241_v19, %v6439_v9  ;;  %v6442_v33 = vadd.f32 %v8132_v59, %v11940_v41  ;;  %6854 = vmatprep.mubr.bf16.mxu0 %v11873_v60  ;;  %7015 = vmatprep.mubr.bf16.mxu1 %v11875_v7 }
 0x414   : > { %v11950_v39 = vadd.f32 %v8244_v27, %v6442_v33  ;;  %v8133_v34 = vpop.f32.mrb[132].mxu0  ;;  %v8245_v35 = vpop.f32.mrb[132].mxu1 }
 0x415   : > { %v8134_v2 = vpop.f32.mrb[133].mxu0  ;;  %v8246_v55 = vpop.f32.mrb[133].mxu1 }
 0x416   : > { %v8135_v29 = vadd.f32 %v8134_v2, %v8133_v34  ;;  %v8136_v40 = vpop.f32.mrb[134].mxu0  ;;  %v8247_v42 = vadd.f32 %v8246_v55, %v8245_v35  ;;  %v8248_v38 = vpop.f32.mrb[134].mxu1 }
 0x417   : > { %v8137_v14 = vpop.f32.mrb[135].mxu0  ;;  %v8249_v50 = vpop.f32.mrb[135].mxu1 }
 0x418   : > { %v6447_v48 = vadd.f32 %v8135_v29, %v11940_v41  ;;  %v8138_v36 = vadd.f32 %v8137_v14, %v8136_v40  ;;  %v8250_v43 = vadd.f32 %v8249_v50, %v8248_v38 }
 0x419   : > { %6855 = vmatmul.mubr.bf16.gmra.mrb[240].mxu0 %v11868_v21  ;;  %7016 = vmatmul.mubr.bf16.gmra.mrb[240].mxu1 %v11871_v58 }
 0x41a   : > { %v11954_v60 = vadd.f32 %v8247_v42, %v6447_v48  ;;  %v6450_v7 = vadd.f32 %v8138_v36, %v11940_v41  ;;  %6862 = vmatprep.mubr.bf16.mxu0 %v11893_v8  ;;  %7023 = vmatprep.mubr.bf16.mxu1 %v11895_v32 }
 0x41c   : > { %v11960_v1 = vadd.f32 %v8250_v43, %v6450_v7  ;;  %v8139_v28 = vpop.f32.mrb[136].mxu0  ;;  %v8251_v17 = vpop.f32.mrb[136].mxu1 }
 0x41d   : > { %v8140_v52 = vpop.f32.mrb[137].mxu0  ;;  %v8252_v12 = vpop.f32.mrb[137].mxu1 }
 0x41e   : > { %v8141_v10 = vadd.f32 %v8140_v52, %v8139_v28  ;;  %v8142_v54 = vpop.f32.mrb[138].mxu0  ;;  %v8253_v15 = vadd.f32 %v8252_v12, %v8251_v17  ;;  %v8254_v21 = vpop.f32.mrb[138].mxu1 }
 0x41f   : > { %v8143_v16 = vpop.f32.mrb[139].mxu0  ;;  %v8255_v23 = vpop.f32.mrb[139].mxu1 }
 0x420   : > { %v6455_v20 = vadd.f32 %v8141_v10, %v11940_v41  ;;  %v8144_v4 = vadd.f32 %v8143_v16, %v8142_v54  ;;  %v8256_v58 = vadd.f32 %v8255_v23, %v8254_v21 }
 0x421   : > { %6863 = vmatmul.mubr.bf16.gmra.mrb[244].mxu0 %v11888_v45  ;;  %7024 = vmatmul.mubr.bf16.gmra.mrb[244].mxu1 %v11891_v57 }
 0x422   : > { %v11964_v8 = vadd.f32 %v8253_v15, %v6455_v20  ;;  %v6458_v32 = vadd.f32 %v8144_v4, %v11940_v41  ;;  %6870 = vmatprep.mubr.bf16.mxu0 %v11913_v25  ;;  %7031 = vmatprep.mubr.bf16.mxu1 %v11915_v26 }
 0x424   : > { %v11970_v5 = vadd.f32 %v8256_v58, %v6458_v32  ;;  %v8145_v63 = vpop.f32.mrb[140].mxu0  ;;  %v8257_v18 = vpop.f32.mrb[140].mxu1 }
 0x425   : > { %v8146_v11 = vpop.f32.mrb[141].mxu0  ;;  %v8258_v49 = vpop.f32.mrb[141].mxu1 }
 0x426   : > { %v8147_v0 = vadd.f32 %v8146_v11, %v8145_v63  ;;  %v8148_v53 = vpop.f32.mrb[142].mxu0  ;;  %v8259_v56 = vadd.f32 %v8258_v49, %v8257_v18  ;;  %v8260_v45 = vpop.f32.mrb[142].mxu1 }
 0x427   : > { %v8149_v3 = vpop.f32.mrb[143].mxu0  ;;  %v8261_v19 = vpop.f32.mrb[143].mxu1 }
 0x428   : > { %v6463_v46 = vadd.f32 %v8147_v0, %v11940_v41  ;;  %v8150_v13 = vadd.f32 %v8149_v3, %v8148_v53  ;;  %v8262_v57 = vadd.f32 %v8261_v19, %v8260_v45 }
 0x429   : > { %6871 = vmatmul.mubr.bf16.gmra.mrb[248].mxu0 %v11908_v61  ;;  %7032 = vmatmul.mubr.bf16.gmra.mrb[248].mxu1 %v11911_v51 }
 0x42a   : > { %v11974_v25 = vadd.f32 %v8259_v56, %v6463_v46  ;;  %v6466_v26 = vadd.f32 %v8150_v13, %v11940_v41  ;;  %6878 = vmatprep.mubr.bf16.mxu0 %v11933_v44  ;;  %7039 = vmatprep.mubr.bf16.mxu1 %v11935_v37 }
 0x42c   : > { %v11980_v31 = vadd.f32 %v8262_v57, %v6466_v26  ;;  %v8151_v24 = vpop.f32.mrb[144].mxu0  ;;  %v8263_v9 = vpop.f32.mrb[144].mxu1 }
 0x42d   : > { %v8152_v59 = vpop.f32.mrb[145].mxu0  ;;  %v8264_v27 = vpop.f32.mrb[145].mxu1 }
 0x42e   : > { %v8153_v22 = vadd.f32 %v8152_v59, %v8151_v24  ;;  %v8154_v33 = vpop.f32.mrb[146].mxu0  ;;  %v8265_v34 = vadd.f32 %v8264_v27, %v8263_v9  ;;  %v8266_v61 = vpop.f32.mrb[146].mxu1 }
 0x42f   : > { %v8155_v35 = vpop.f32.mrb[147].mxu0  ;;  %v8267_v55 = vpop.f32.mrb[147].mxu1 }
 0x430   : > { %v6471_v2 = vadd.f32 %v8153_v22, %v11940_v41  ;;  %v8156_v29 = vadd.f32 %v8155_v35, %v8154_v33  ;;  %v8268_v51 = vadd.f32 %v8267_v55, %v8266_v61 }
 0x431   : > { %6879 = vmatmul.mubr.bf16.gmra.mrb[252].mxu0 %v11928_v62  ;;  %7040 = vmatmul.mubr.bf16.gmra.mrb[252].mxu1 %v11931_v6 }
 0x432   : > { %v11984_v44 = vadd.f32 %v8265_v34, %v6471_v2  ;;  %v6474_v37 = vadd.f32 %v8156_v29, %v11940_v41 }
 0x434   : > { %v11988_v40 = vadd.f32 %v8268_v51, %v6474_v37  ;;  %v8157_v42 = vpop.f32.mrb[148].mxu0  ;;  %v8269_v38 = vpop.f32.mrb[148].mxu1 }
 0x435   : > { %v8158_v14 = vpop.f32.mrb[149].mxu0  ;;  %v8270_v36 = vpop.f32.mrb[149].mxu1 }
 0x436   : > { %v8159_v48 = vadd.f32 %v8158_v14, %v8157_v42  ;;  %v8160_v50 = vpop.f32.mrb[150].mxu0  ;;  %v8271_v43 = vadd.f32 %v8270_v36, %v8269_v38  ;;  %v8272_v7 = vpop.f32.mrb[150].mxu1 }
 0x437   : > { %v8161_v28 = vpop.f32.mrb[151].mxu0  ;;  %v8273_v52 = vpop.f32.mrb[151].mxu1 }
 0x438   : > { %v6479_v17 = vadd.f32 %v8159_v48, %v11940_v41  ;;  %v8162_v62 = vadd.f32 %v8161_v28, %v8160_v50  ;;  %v8274_v10 = vadd.f32 %v8273_v52, %v8272_v7 }
 0x43a   : > { %v11991_v12 = vadd.f32 %v8271_v43, %v6479_v17  ;;  %v6482_v6 = vadd.f32 %v8162_v62, %v11940_v41 }
 0x43c   : > { %v11994_v54 = vadd.f32 %v8274_v10, %v6482_v6  ;;  %v8163_v15 = vpop.f32.mrb[152].mxu0  ;;  %v8275_v21 = vpop.f32.mrb[152].mxu1 }
 0x43d   : > { %v8164_v16 = vpop.f32.mrb[153].mxu0  ;;  %v8276_v4 = vpop.f32.mrb[153].mxu1 }
 0x43e   : > { %v8165_v20 = vadd.f32 %v8164_v16, %v8163_v15  ;;  %v8166_v23 = vpop.f32.mrb[154].mxu0  ;;  %v8277_v58 = vadd.f32 %v8276_v4, %v8275_v21  ;;  %v8278_v32 = vpop.f32.mrb[154].mxu1 }
 0x43f   : > { %v8167_v63 = vpop.f32.mrb[155].mxu0  ;;  %v8279_v0 = vpop.f32.mrb[155].mxu1 }
 0x440   : > { %v6487_v18 = vadd.f32 %v8165_v20, %v11940_v41  ;;  %v8168_v11 = vadd.f32 %v8167_v63, %v8166_v23  ;;  %v8280_v49 = vadd.f32 %v8279_v0, %v8278_v32 }
 0x442   : > { %v11997_v53 = vadd.f32 %v8277_v58, %v6487_v18  ;;  %v6490_v56 = vadd.f32 %v8168_v11, %v11940_v41 }
 0x444   : > { %v12000_v45 = vadd.f32 %v8280_v49, %v6490_v56  ;;  %v8169_v3 = vpop.f32.mrb[156].mxu0  ;;  %v8281_v46 = vpop.f32.mrb[156].mxu1 }
 0x445   : > { %v8170_v13 = vpop.f32.mrb[157].mxu0  ;;  %v8282_v57 = vpop.f32.mrb[157].mxu1 }
 0x446   : > { %v8171_v19 = vadd.f32 %v8170_v13, %v8169_v3  ;;  %v8172_v26 = vpop.f32.mrb[158].mxu0  ;;  %v8283_v24 = vadd.f32 %v8282_v57, %v8281_v46  ;;  %v8284_v9 = vpop.f32.mrb[158].mxu1 }
 0x447   : > { %v8173_v59 = vpop.f32.mrb[159].mxu0  ;;  %v8285_v33 = vpop.f32.mrb[159].mxu1 }
 0x448   : > { %v6495_v22 = vadd.f32 %v8171_v19, %v11940_v41  ;;  %v8174_v27 = vadd.f32 %v8173_v59, %v8172_v26  ;;  %v8286_v34 = vadd.f32 %v8285_v33, %v8284_v9 }
 0x44a   : > { %v12003_v61 = vadd.f32 %v8283_v24, %v6495_v22  ;;  %v6498_v35 = vadd.f32 %v8174_v27, %v11940_v41 }
 0x44c   : > { %v12006_v2 = vadd.f32 %v8286_v34, %v6498_v35  ;;  %v8175_v29 = vpop.f32.mrb[160].mxu0  ;;  %v8287_v55 = vpop.f32.mrb[160].mxu1 }
 0x44d   : > { %v8176_v51 = vpop.f32.mrb[161].mxu0  ;;  %v8288_v42 = vpop.f32.mrb[161].mxu1 }
 0x44e   : > { %v8177_v37 = vadd.f32 %v8176_v51, %v8175_v29  ;;  %v8178_v38 = vpop.f32.mrb[162].mxu0  ;;  %v8289_v14 = vadd.f32 %v8288_v42, %v8287_v55  ;;  %v8290_v48 = vpop.f32.mrb[162].mxu1 }
 0x44f   : > { %v8179_v36 = vpop.f32.mrb[163].mxu0  ;;  %v8291_v7 = vpop.f32.mrb[163].mxu1 }
 0x450   : > { %v6503_v50 = vadd.f32 %v8177_v37, %v11940_v41  ;;  %v8180_v43 = vadd.f32 %v8179_v36, %v8178_v38  ;;  %v8292_v28 = vadd.f32 %v8291_v7, %v8290_v48 }
 0x452   : > { %v12009_v17 = vadd.f32 %v8289_v14, %v6503_v50  ;;  %v6506_v62 = vadd.f32 %v8180_v43, %v11940_v41 }
 0x454   : > { %v12012_v52 = vadd.f32 %v8292_v28, %v6506_v62  ;;  %v8181_v10 = vpop.f32.mrb[164].mxu0  ;;  %v8293_v6 = vpop.f32.mrb[164].mxu1 }
 0x455   : > { %v8182_v15 = vpop.f32.mrb[165].mxu0  ;;  %v8294_v16 = vpop.f32.mrb[165].mxu1 }
 0x456   : > { %v8183_v21 = vadd.f32 %v8182_v15, %v8181_v10  ;;  %v8184_v20 = vpop.f32.mrb[166].mxu0  ;;  %v8295_v4 = vadd.f32 %v8294_v16, %v8293_v6  ;;  %v8296_v23 = vpop.f32.mrb[166].mxu1 }
 0x457   : > { %v8185_v58 = vpop.f32.mrb[167].mxu0  ;;  %v8297_v18 = vpop.f32.mrb[167].mxu1 }
 0x458   : > { %v6511_v32 = vadd.f32 %v8183_v21, %v11940_v41  ;;  %v8186_v63 = vadd.f32 %v8185_v58, %v8184_v20  ;;  %v8298_v11 = vadd.f32 %v8297_v18, %v8296_v23 }
 0x45a   : > { %v12015_v0 = vadd.f32 %v8295_v4, %v6511_v32  ;;  %v6514_v49 = vadd.f32 %v8186_v63, %v11940_v41 }
 0x45c   : > { %v12018_v56 = vadd.f32 %v8298_v11, %v6514_v49  ;;  %v8187_v3 = vpop.f32.mrb[168].mxu0  ;;  %v8299_v46 = vpop.f32.mrb[168].mxu1 }
 0x45d   : > { %v8188_v13 = vpop.f32.mrb[169].mxu0  ;;  %v8300_v57 = vpop.f32.mrb[169].mxu1 }
 0x45e   : > { %v8189_v19 = vadd.f32 %v8188_v13, %v8187_v3  ;;  %v8190_v26 = vpop.f32.mrb[170].mxu0  ;;  %v8301_v24 = vadd.f32 %v8300_v57, %v8299_v46  ;;  %v8302_v9 = vpop.f32.mrb[170].mxu1 }
 0x45f   : > { %v8191_v59 = vpop.f32.mrb[171].mxu0  ;;  %v8303_v33 = vpop.f32.mrb[171].mxu1 }
 0x460   : > { %v6519_v22 = vadd.f32 %v8189_v19, %v11940_v41  ;;  %v8192_v27 = vadd.f32 %v8191_v59, %v8190_v26  ;;  %v8304_v34 = vadd.f32 %v8303_v33, %v8302_v9 }
 0x462   : > { %v12021_v35 = vadd.f32 %v8301_v24, %v6519_v22  ;;  %v6522_v29 = vadd.f32 %v8192_v27, %v11940_v41 }
 0x464   : > { %v12024_v55 = vadd.f32 %v8304_v34, %v6522_v29  ;;  %v8193_v51 = vpop.f32.mrb[172].mxu0  ;;  %v8305_v37 = vpop.f32.mrb[172].mxu1 }
 0x465   : > { %v8194_v42 = vpop.f32.mrb[173].mxu0  ;;  %v8306_v14 = vpop.f32.mrb[173].mxu1 }
 0x466   : > { %v8195_v38 = vadd.f32 %v8194_v42, %v8193_v51  ;;  %v8196_v48 = vpop.f32.mrb[174].mxu0  ;;  %v8307_v36 = vadd.f32 %v8306_v14, %v8305_v37  ;;  %v8308_v50 = vpop.f32.mrb[174].mxu1 }
 0x467   : > { %v8197_v43 = vpop.f32.mrb[175].mxu0  ;;  %v8309_v62 = vpop.f32.mrb[175].mxu1 }
 0x468   : > { %v6527_v7 = vadd.f32 %v8195_v38, %v11940_v41  ;;  %v8198_v28 = vadd.f32 %v8197_v43, %v8196_v48  ;;  %v8310_v10 = vadd.f32 %v8309_v62, %v8308_v50 }
 0x46a   : > { %v12027_v6 = vadd.f32 %v8307_v36, %v6527_v7  ;;  %v6530_v15 = vadd.f32 %v8198_v28, %v11940_v41 }
 0x46c   : > { %v12030_v21 = vadd.f32 %v8310_v10, %v6530_v15  ;;  %v8199_v16 = vpop.f32.mrb[176].mxu0  ;;  %v8311_v20 = vpop.f32.mrb[176].mxu1 }
 0x46d   : > { %v8200_v4 = vpop.f32.mrb[177].mxu0  ;;  %v8312_v58 = vpop.f32.mrb[177].mxu1 }
 0x46e   : > { %v8201_v23 = vadd.f32 %v8200_v4, %v8199_v16  ;;  %v8202_v32 = vpop.f32.mrb[178].mxu0  ;;  %v8313_v63 = vadd.f32 %v8312_v58, %v8311_v20  ;;  %v8314_v18 = vpop.f32.mrb[178].mxu1 }
 0x46f   : > { %v8203_v11 = vpop.f32.mrb[179].mxu0  ;;  %v8315_v46 = vpop.f32.mrb[179].mxu1 }
 0x470   : > { %v6535_v49 = vadd.f32 %v8201_v23, %v11940_v41  ;;  %v8204_v3 = vadd.f32 %v8203_v11, %v8202_v32  ;;  %v8316_v13 = vadd.f32 %v8315_v46, %v8314_v18 }
 0x472   : > { %v12033_v19 = vadd.f32 %v8313_v63, %v6535_v49  ;;  %v6538_v57 = vadd.f32 %v8204_v3, %v11940_v41 }
 0x474   : > { %v12036_v26 = vadd.f32 %v8316_v13, %v6538_v57  ;;  %v8205_v24 = vpop.f32.mrb[180].mxu0  ;;  %v8317_v9 = vpop.f32.mrb[180].mxu1 }
 0x475   : > { %v8206_v59 = vpop.f32.mrb[181].mxu0  ;;  %v8318_v27 = vpop.f32.mrb[181].mxu1 }
 0x476   : > { %v8207_v22 = vadd.f32 %v8206_v59, %v8205_v24  ;;  %v8208_v33 = vpop.f32.mrb[182].mxu0  ;;  %v8319_v34 = vadd.f32 %v8318_v27, %v8317_v9  ;;  %v8320_v29 = vpop.f32.mrb[182].mxu1 }
 0x477   : > { %v8209_v51 = vpop.f32.mrb[183].mxu0  ;;  %v8321_v38 = vpop.f32.mrb[183].mxu1 }
 0x478   : > { %v6543_v37 = vadd.f32 %v8207_v22, %v11940_v41  ;;  %v8210_v42 = vadd.f32 %v8209_v51, %v8208_v33  ;;  %v8322_v14 = vadd.f32 %v8321_v38, %v8320_v29 }
 0x47a   : > { %v12039_v48 = vadd.f32 %v8319_v34, %v6543_v37  ;;  %v6546_v36 = vadd.f32 %v8210_v42, %v11940_v41 }
 0x47c   : > { %v12042_v50 = vadd.f32 %v8322_v14, %v6546_v36  ;;  %v8211_v43 = vpop.f32.mrb[184].mxu0  ;;  %v8323_v7 = vpop.f32.mrb[184].mxu1 }
 0x47d   : > { %v8212_v28 = vpop.f32.mrb[185].mxu0  ;;  %v8324_v10 = vpop.f32.mrb[185].mxu1 }
 0x47e   : > { %v8213_v62 = vadd.f32 %v8212_v28, %v8211_v43  ;;  %v8214_v15 = vpop.f32.mrb[186].mxu0  ;;  %v8325_v16 = vadd.f32 %v8324_v10, %v8323_v7  ;;  %v8326_v20 = vpop.f32.mrb[186].mxu1 }
 0x47f   : > { %v8215_v4 = vpop.f32.mrb[187].mxu0  ;;  %v8327_v32 = vpop.f32.mrb[187].mxu1 }
 0x480   : > { %v6551_v23 = vadd.f32 %v8213_v62, %v11940_v41  ;;  %v8216_v58 = vadd.f32 %v8215_v4, %v8214_v15  ;;  %v8328_v63 = vadd.f32 %v8327_v32, %v8326_v20  ;;  %v12057_v15 = vand.u32 127, %v5205_v47 }
 0x482   : > { %v12045_v18 = vadd.f32 %v8325_v16, %v6551_v23  ;;  %v6554_v11 = vadd.f32 %v8216_v58, %v11940_v41  ;;  %vm7050_vm1 = vcmp.ge.s32.totalorder %v12057_v15, 5 }
 0x484   : > { %v12048_v49 = vadd.f32 %v8328_v63, %v6554_v11  ;;  %v8217_v3 = vpop.f32.mrb[188].mxu0  ;;  %v8329_v46 = vpop.f32.mrb[188].mxu1 }
 0x485   : > { %v8218_v13 = vpop.f32.mrb[189].mxu0  ;;  %v8330_v24 = vpop.f32.mrb[189].mxu1 }
 0x486   : > { %v8219_v57 = vadd.f32 %v8218_v13, %v8217_v3  ;;  %v8220_v9 = vpop.f32.mrb[190].mxu0  ;;  %v8331_v59 = vadd.f32 %v8330_v24, %v8329_v46  ;;  %v8332_v22 = vpop.f32.mrb[190].mxu1 }
 0x487   : > { %v8221_v27 = vpop.f32.mrb[191].mxu0  ;;  %v8333_v29 = vpop.f32.mrb[191].mxu1 }
 0x488   : > { %v6559_v33 = vadd.f32 %v8219_v57, %v11940_v41  ;;  %v8222_v34 = vadd.f32 %v8221_v27, %v8220_v9  ;;  %v8334_v51 = vadd.f32 %v8333_v29, %v8332_v22 }
 0x48a   : > { %v12051_v37 = vadd.f32 %v8331_v59, %v6559_v33  ;;  %v6562_v42 = vadd.f32 %v8222_v34, %v11940_v41 }
 0x48c   : > { %v12054_v38 = vadd.f32 %v8334_v51, %v6562_v42  ;;  %v8351_v14 = vpop.f32.mrb[192].mxu0  ;;  %v8463_v36 = vpop.f32.mrb[192].mxu1 }
 0x48d   : > { %v8352_v43 = vpop.f32.mrb[193].mxu0  ;;  %v8464_v28 = vpop.f32.mrb[193].mxu1 }
 0x48e   : > { %v8353_v7 = vadd.f32 %v8352_v43, %v8351_v14  ;;  %v8354_v62 = vpop.f32.mrb[194].mxu0  ;;  %v8465_v10 = vadd.f32 %v8464_v28, %v8463_v36  ;;  %v8466_v16 = vpop.f32.mrb[194].mxu1 }
 0x48f   : > { %v8355_v20 = vpop.f32.mrb[195].mxu0  ;;  %v8467_v58 = vpop.f32.mrb[195].mxu1 }
 0x490   : > { %v6761_v4 = vadd.f32 %v8353_v7, %v11944_v30  ;;  %v8356_v23 = vadd.f32 %v8355_v20, %v8354_v62  ;;  %v8468_v41 = vadd.f32 %v8467_v58, %v8466_v16 }
 0x492   : > { %v6922_v32 = vadd.f32 %v8465_v10, %v6761_v4  ;;  %v6764_v63 = vadd.f32 %v8356_v23, %v11950_v39 }
 0x494   : > { %v7051_v47 = vmax.f32 %v6922_v32, 0.0  ;;  %v6925_v11 = vadd.f32 %v8468_v41, %v6764_v63  ;;  %v8357_v3 = vpop.f32.mrb[196].mxu0  ;;  %v8469_v30 = vpop.f32.mrb[196].mxu1 }
 0x495   : > { %v8358_v46 = vpop.f32.mrb[197].mxu0  ;;  %v8470_v24 = vpop.f32.mrb[197].mxu1 }
 0x496   : > { %v7083_v13 = vsel %vm7050_vm1, %v7051_v47, %v6922_v32  ;;  %v7052_v57 = vmax.f32 %v6925_v11, 0.0  ;;  %v8359_v39 = vadd.f32 %v8358_v46, %v8357_v3  ;;  %v8360_v9 = vpop.f32.mrb[198].mxu0  ;;  %v8471_v59 = vadd.f32 %v8470_v24, %v8469_v30  ;;  %v8472_v22 = vpop.f32.mrb[198].mxu1 }
 0x497   : > { %7116 = vst.msk [vmem:[%s12066_s26] sm:$0xff] %vm7115_vm2, %v7083_v13  ;;  %v8361_v27 = vpop.f32.mrb[199].mxu0  ;;  %v8473_v51 = vpop.f32.mrb[199].mxu1 }
 0x498   : > { %v7084_v33 = vsel %vm7050_vm1, %v7052_v57, %v6925_v11  ;;  %v6769_v34 = vadd.f32 %v8359_v39, %v11954_v60  ;;  %v8362_v29 = vadd.f32 %v8361_v27, %v8360_v9  ;;  %v8474_v42 = vadd.f32 %v8473_v51, %v8472_v22 }
 0x499   : > { %7117 = vst.msk [vmem:[%s12066_s26 + $0x8] sm:$0xff] %vm7115_vm2, %v7084_v33 }
 0x49a   : > { %v6930_v14 = vadd.f32 %v8471_v59, %v6769_v34  ;;  %v6772_v36 = vadd.f32 %v8362_v29, %v11960_v1 }
 0x49c   : > { %v7053_v43 = vmax.f32 %v6930_v14, 0.0  ;;  %v6933_v7 = vadd.f32 %v8474_v42, %v6772_v36  ;;  %v8363_v28 = vpop.f32.mrb[200].mxu0  ;;  %v8475_v62 = vpop.f32.mrb[200].mxu1 }
 0x49d   : > { %v8364_v10 = vpop.f32.mrb[201].mxu0  ;;  %v8476_v4 = vpop.f32.mrb[201].mxu1 }
 0x49e   : > { %v7085_v16 = vsel %vm7050_vm1, %v7053_v43, %v6930_v14  ;;  %v7054_v20 = vmax.f32 %v6933_v7, 0.0  ;;  %v8365_v60 = vadd.f32 %v8364_v10, %v8363_v28  ;;  %v8366_v23 = vpop.f32.mrb[202].mxu0  ;;  %v8477_v58 = vadd.f32 %v8476_v4, %v8475_v62  ;;  %v8478_v41 = vpop.f32.mrb[202].mxu1 }
 0x49f   : > { %7118 = vst.msk [vmem:[%s12066_s26 + $0x10] sm:$0xff] %vm7115_vm2, %v7085_v16  ;;  %v8367_v32 = vpop.f32.mrb[203].mxu0  ;;  %v8479_v11 = vpop.f32.mrb[203].mxu1 }
 0x4a0   : > { %v7086_v1 = vsel %vm7050_vm1, %v7054_v20, %v6933_v7  ;;  %v6777_v63 = vadd.f32 %v8365_v60, %v11964_v8  ;;  %v8368_v47 = vadd.f32 %v8367_v32, %v8366_v23  ;;  %v8480_v3 = vadd.f32 %v8479_v11, %v8478_v41 }
 0x4a1   : > { %7119 = vst.msk [vmem:[%s12066_s26 + $0x18] sm:$0xff] %vm7115_vm2, %v7086_v1 }
 0x4a2   : > { %v6938_v30 = vadd.f32 %v8477_v58, %v6777_v63  ;;  %v6780_v46 = vadd.f32 %v8368_v47, %v11970_v5 }
 0x4a4   : > { %v7055_v13 = vmax.f32 %v6938_v30, 0.0  ;;  %v6941_v57 = vadd.f32 %v8480_v3, %v6780_v46  ;;  %v8369_v39 = vpop.f32.mrb[204].mxu0  ;;  %v8481_v24 = vpop.f32.mrb[204].mxu1 }
 0x4a5   : > { %v8370_v9 = vpop.f32.mrb[205].mxu0  ;;  %v8482_v27 = vpop.f32.mrb[205].mxu1 }
 0x4a6   : > { %v7087_v59 = vsel %vm7050_vm1, %v7055_v13, %v6938_v30  ;;  %v7056_v22 = vmax.f32 %v6941_v57, 0.0  ;;  %v8371_v8 = vadd.f32 %v8370_v9, %v8369_v39  ;;  %v8372_v33 = vpop.f32.mrb[206].mxu0  ;;  %v8483_v34 = vadd.f32 %v8482_v27, %v8481_v24  ;;  %v8484_v29 = vpop.f32.mrb[206].mxu1 }
 0x4a7   : > { %7120 = vst.msk [vmem:[%s12066_s26 + $0x20] sm:$0xff] %vm7115_vm2, %v7087_v59  ;;  %v8373_v51 = vpop.f32.mrb[207].mxu0  ;;  %v8485_v36 = vpop.f32.mrb[207].mxu1 }
 0x4a8   : > { %v7088_v5 = vsel %vm7050_vm1, %v7056_v22, %v6941_v57  ;;  %v6785_v42 = vadd.f32 %v8371_v8, %v11974_v25  ;;  %v8374_v14 = vadd.f32 %v8373_v51, %v8372_v33  ;;  %v8486_v43 = vadd.f32 %v8485_v36, %v8484_v29 }
 0x4a9   : > { %7121 = vst.msk [vmem:[%s12066_s26 + $0x28] sm:$0xff] %vm7115_vm2, %v7088_v5 }
 0x4aa   : > { %v6946_v7 = vadd.f32 %v8483_v34, %v6785_v42  ;;  %v6788_v28 = vadd.f32 %v8374_v14, %v11980_v31 }
 0x4ac   : > { %v7057_v62 = vmax.f32 %v6946_v7, 0.0  ;;  %v6949_v10 = vadd.f32 %v8486_v43, %v6788_v28  ;;  %v8375_v16 = vpop.f32.mrb[208].mxu0  ;;  %v8487_v20 = vpop.f32.mrb[208].mxu1 }
 0x4ad   : > { %v8376_v60 = vpop.f32.mrb[209].mxu0  ;;  %v8488_v58 = vpop.f32.mrb[209].mxu1 }
 0x4ae   : > { %v7089_v4 = vsel %vm7050_vm1, %v7057_v62, %v6946_v7  ;;  %v7058_v23 = vmax.f32 %v6949_v10, 0.0  ;;  %v8377_v25 = vadd.f32 %v8376_v60, %v8375_v16  ;;  %v8378_v41 = vpop.f32.mrb[210].mxu0  ;;  %v8489_v32 = vadd.f32 %v8488_v58, %v8487_v20  ;;  %v8490_v1 = vpop.f32.mrb[210].mxu1 }
 0x4af   : > { %7122 = vst.msk [vmem:[%s12066_s26 + $0x30] sm:$0xff] %vm7115_vm2, %v7089_v4  ;;  %v8379_v63 = vpop.f32.mrb[211].mxu0  ;;  %v8491_v3 = vpop.f32.mrb[211].mxu1 }
 0x4b0   : > { %v7090_v31 = vsel %vm7050_vm1, %v7058_v23, %v6949_v10  ;;  %v6793_v47 = vadd.f32 %v8377_v25, %v11984_v44  ;;  %v8380_v11 = vadd.f32 %v8379_v63, %v8378_v41  ;;  %v8492_v30 = vadd.f32 %v8491_v3, %v8490_v1 }
 0x4b1   : > { %7123 = vst.msk [vmem:[%s12066_s26 + $0x38] sm:$0xff] %vm7115_vm2, %v7090_v31 }
 0x4b2   : > { %v6954_v46 = vadd.f32 %v8489_v32, %v6793_v47  ;;  %v6796_v13 = vadd.f32 %v8380_v11, %v11988_v40 }
 0x4b4   : > { %v7059_v57 = vmax.f32 %v6954_v46, 0.0  ;;  %v6957_v39 = vadd.f32 %v8492_v30, %v6796_v13  ;;  %v8381_v24 = vpop.f32.mrb[212].mxu0  ;;  %v8493_v9 = vpop.f32.mrb[212].mxu1 }
 0x4b5   : > { %v8382_v59 = vpop.f32.mrb[213].mxu0  ;;  %v8494_v27 = vpop.f32.mrb[213].mxu1 }
 0x4b6   : > { %v7091_v22 = vsel %vm7050_vm1, %v7059_v57, %v6954_v46  ;;  %v7060_v8 = vmax.f32 %v6957_v39, 0.0  ;;  %v8383_v44 = vadd.f32 %v8382_v59, %v8381_v24  ;;  %v8384_v33 = vpop.f32.mrb[214].mxu0  ;;  %v8495_v34 = vadd.f32 %v8494_v27, %v8493_v9  ;;  %v8496_v29 = vpop.f32.mrb[214].mxu1 }
 0x4b7   : > { %7124 = vst.msk [vmem:[%s12066_s26 + $0x40] sm:$0xff] %vm7115_vm2, %v7091_v22  ;;  %v8385_v51 = vpop.f32.mrb[215].mxu0  ;;  %v8497_v14 = vpop.f32.mrb[215].mxu1 }
 0x4b8   : > { %v7092_v40 = vsel %vm7050_vm1, %v7060_v8, %v6957_v39  ;;  %v6801_v5 = vadd.f32 %v8383_v44, %v11991_v12  ;;  %v8386_v42 = vadd.f32 %v8385_v51, %v8384_v33  ;;  %v8498_v36 = vadd.f32 %v8497_v14, %v8496_v29 }
 0x4b9   : > { %7125 = vst.msk [vmem:[%s12066_s26 + $0x48] sm:$0xff] %vm7115_vm2, %v7092_v40 }
 0x4ba   : > { %v6962_v43 = vadd.f32 %v8495_v34, %v6801_v5  ;;  %v6804_v7 = vadd.f32 %v8386_v42, %v11994_v54 }
 0x4bc   : > { %v7061_v28 = vmax.f32 %v6962_v43, 0.0  ;;  %v6965_v62 = vadd.f32 %v8498_v36, %v6804_v7  ;;  %v8387_v10 = vpop.f32.mrb[216].mxu0  ;;  %v8499_v16 = vpop.f32.mrb[216].mxu1 }
 0x4bd   : > { %v8388_v20 = vpop.f32.mrb[217].mxu0  ;;  %v8500_v23 = vpop.f32.mrb[217].mxu1 }
 0x4be   : > { %v7093_v60 = vsel %vm7050_vm1, %v7061_v28, %v6962_v43  ;;  %v7062_v4 = vmax.f32 %v6965_v62, 0.0  ;;  %v8389_v12 = vadd.f32 %v8388_v20, %v8387_v10  ;;  %v8390_v25 = vpop.f32.mrb[218].mxu0  ;;  %v8501_v58 = vadd.f32 %v8500_v23, %v8499_v16  ;;  %v8502_v41 = vpop.f32.mrb[218].mxu1 }
 0x4bf   : > { %7126 = vst.msk [vmem:[%s12066_s26 + $0x50] sm:$0xff] %vm7115_vm2, %v7093_v60  ;;  %v8391_v32 = vpop.f32.mrb[219].mxu0  ;;  %v8503_v31 = vpop.f32.mrb[219].mxu1 }
 0x4c0   : > { %v7094_v54 = vsel %vm7050_vm1, %v7062_v4, %v6965_v62  ;;  %v6809_v1 = vadd.f32 %v8389_v12, %v11997_v53  ;;  %v8392_v63 = vadd.f32 %v8391_v32, %v8390_v25  ;;  %v8504_v47 = vadd.f32 %v8503_v31, %v8502_v41 }
 0x4c1   : > { %7127 = vst.msk [vmem:[%s12066_s26 + $0x58] sm:$0xff] %vm7115_vm2, %v7094_v54 }
 0x4c2   : > { %v6970_v11 = vadd.f32 %v8501_v58, %v6809_v1  ;;  %v6812_v3 = vadd.f32 %v8392_v63, %v12000_v45 }
 0x4c4   : > { %v7063_v30 = vmax.f32 %v6970_v11, 0.0  ;;  %v6973_v46 = vadd.f32 %v8504_v47, %v6812_v3  ;;  %v8393_v13 = vpop.f32.mrb[220].mxu0  ;;  %v8505_v57 = vpop.f32.mrb[220].mxu1 }
 0x4c5   : > { %v8394_v39 = vpop.f32.mrb[221].mxu0  ;;  %v8506_v59 = vpop.f32.mrb[221].mxu1 }
 0x4c6   : > { %v7095_v24 = vsel %vm7050_vm1, %v7063_v30, %v6970_v11  ;;  %v7064_v9 = vmax.f32 %v6973_v46, 0.0  ;;  %v8395_v53 = vadd.f32 %v8394_v39, %v8393_v13  ;;  %v8396_v22 = vpop.f32.mrb[222].mxu0  ;;  %v8507_v8 = vadd.f32 %v8506_v59, %v8505_v57  ;;  %v8508_v44 = vpop.f32.mrb[222].mxu1 }
 0x4c7   : > { %7128 = vst.msk [vmem:[%s12066_s26 + $0x60] sm:$0xff] %vm7115_vm2, %v7095_v24  ;;  %v8397_v27 = vpop.f32.mrb[223].mxu0  ;;  %v8509_v29 = vpop.f32.mrb[223].mxu1 }
 0x4c8   : > { %v7096_v45 = vsel %vm7050_vm1, %v7064_v9, %v6973_v46  ;;  %v6817_v33 = vadd.f32 %v8395_v53, %v12003_v61  ;;  %v8398_v34 = vadd.f32 %v8397_v27, %v8396_v22  ;;  %v8510_v51 = vadd.f32 %v8509_v29, %v8508_v44 }
 0x4c9   : > { %7129 = vst.msk [vmem:[%s12066_s26 + $0x68] sm:$0xff] %vm7115_vm2, %v7096_v45 }
 0x4ca   : > { %v6978_v40 = vadd.f32 %v8507_v8, %v6817_v33  ;;  %v6820_v5 = vadd.f32 %v8398_v34, %v12006_v2 }
 0x4cc   : > { %v7065_v42 = vmax.f32 %v6978_v40, 0.0  ;;  %v6981_v14 = vadd.f32 %v8510_v51, %v6820_v5  ;;  %v8399_v36 = vpop.f32.mrb[224].mxu0  ;;  %v8511_v43 = vpop.f32.mrb[224].mxu1 }
 0x4cd   : > { %v8400_v7 = vpop.f32.mrb[225].mxu0  ;;  %v8512_v10 = vpop.f32.mrb[225].mxu1 }
 0x4ce   : > { %v7097_v28 = vsel %vm7050_vm1, %v7065_v42, %v6978_v40  ;;  %v7066_v62 = vmax.f32 %v6981_v14, 0.0  ;;  %v8401_v61 = vadd.f32 %v8400_v7, %v8399_v36  ;;  %v8402_v16 = vpop.f32.mrb[226].mxu0  ;;  %v8513_v20 = vadd.f32 %v8512_v10, %v8511_v43  ;;  %v8514_v60 = vpop.f32.mrb[226].mxu1 }
 0x4cf   : > { %7130 = vst.msk [vmem:[%s12066_s26 + $0x70] sm:$0xff] %vm7115_vm2, %v7097_v28  ;;  %v8403_v4 = vpop.f32.mrb[227].mxu0  ;;  %v8515_v25 = vpop.f32.mrb[227].mxu1 }
 0x4d0   : > { %v7098_v2 = vsel %vm7050_vm1, %v7066_v62, %v6981_v14  ;;  %v6825_v12 = vadd.f32 %v8401_v61, %v12009_v17  ;;  %v8404_v23 = vadd.f32 %v8403_v4, %v8402_v16  ;;  %v8516_v58 = vadd.f32 %v8515_v25, %v8514_v60 }
 0x4d1   : > { %7131 = vst.msk [vmem:[%s12066_s26 + $0x78] sm:$0xff] %vm7115_vm2, %v7098_v2 }
 0x4d2   : > { %v6986_v41 = vadd.f32 %v8513_v20, %v6825_v12  ;;  %v6828_v32 = vadd.f32 %v8404_v23, %v12012_v52 }
 0x4d4   : > { %v7067_v54 = vmax.f32 %v6986_v41, 0.0  ;;  %v6989_v1 = vadd.f32 %v8516_v58, %v6828_v32  ;;  %v8405_v63 = vpop.f32.mrb[228].mxu0  ;;  %v8517_v31 = vpop.f32.mrb[228].mxu1 }
 0x4d5   : > { %v8406_v47 = vpop.f32.mrb[229].mxu0  ;;  %v8518_v30 = vpop.f32.mrb[229].mxu1 }
 0x4d6   : > { %v7099_v11 = vsel %vm7050_vm1, %v7067_v54, %v6986_v41  ;;  %v7068_v3 = vmax.f32 %v6989_v1, 0.0  ;;  %v8407_v17 = vadd.f32 %v8406_v47, %v8405_v63  ;;  %v8408_v46 = vpop.f32.mrb[230].mxu0  ;;  %v8519_v13 = vadd.f32 %v8518_v30, %v8517_v31  ;;  %v8520_v57 = vpop.f32.mrb[230].mxu1 }
 0x4d7   : > { %7132 = vst.msk [vmem:[%s12066_s26 + $0x80] sm:$0xff] %vm7115_vm2, %v7099_v11  ;;  %v8409_v39 = vpop.f32.mrb[231].mxu0  ;;  %v8521_v53 = vpop.f32.mrb[231].mxu1 }
 0x4d8   : > { %v7100_v52 = vsel %vm7050_vm1, %v7068_v3, %v6989_v1  ;;  %v6833_v24 = vadd.f32 %v8407_v17, %v12015_v0  ;;  %v8410_v9 = vadd.f32 %v8409_v39, %v8408_v46  ;;  %v8522_v59 = vadd.f32 %v8521_v53, %v8520_v57 }
 0x4d9   : > { %7133 = vst.msk [vmem:[%s12066_s26 + $0x88] sm:$0xff] %vm7115_vm2, %v7100_v52 }
 0x4da   : > { %v6994_v22 = vadd.f32 %v8519_v13, %v6833_v24  ;;  %v6836_v8 = vadd.f32 %v8410_v9, %v12018_v56 }
 0x4dc   : > { %v7069_v44 = vmax.f32 %v6994_v22, 0.0  ;;  %v6997_v27 = vadd.f32 %v8522_v59, %v6836_v8  ;;  %v8411_v45 = vpop.f32.mrb[232].mxu0  ;;  %v8523_v33 = vpop.f32.mrb[232].mxu1 }
 0x4dd   : > { %v8412_v34 = vpop.f32.mrb[233].mxu0  ;;  %v8524_v40 = vpop.f32.mrb[233].mxu1 }
 0x4de   : > { %v7101_v29 = vsel %vm7050_vm1, %v7069_v44, %v6994_v22  ;;  %v7070_v51 = vmax.f32 %v6997_v27, 0.0  ;;  %v8413_v0 = vadd.f32 %v8412_v34, %v8411_v45  ;;  %v8414_v5 = vpop.f32.mrb[234].mxu0  ;;  %v8525_v42 = vadd.f32 %v8524_v40, %v8523_v33  ;;  %v8526_v14 = vpop.f32.mrb[234].mxu1 }
 0x4df   : > { %7134 = vst.msk [vmem:[%s12066_s26 + $0x90] sm:$0xff] %vm7115_vm2, %v7101_v29  ;;  %v8415_v36 = vpop.f32.mrb[235].mxu0  ;;  %v8527_v28 = vpop.f32.mrb[235].mxu1 }
 0x4e0   : > { %v7102_v56 = vsel %vm7050_vm1, %v7070_v51, %v6997_v27  ;;  %v6841_v43 = vadd.f32 %v8413_v0, %v12021_v35  ;;  %v8416_v7 = vadd.f32 %v8415_v36, %v8414_v5  ;;  %v8528_v62 = vadd.f32 %v8527_v28, %v8526_v14 }
 0x4e1   : > { %7135 = vst.msk [vmem:[%s12066_s26 + $0x98] sm:$0xff] %vm7115_vm2, %v7102_v56 }
 0x4e2   : > { %v7002_v61 = vadd.f32 %v8525_v42, %v6841_v43  ;;  %v6844_v10 = vadd.f32 %v8416_v7, %v12024_v55 }
 0x4e4   : > { %v7071_v16 = vmax.f32 %v7002_v61, 0.0  ;;  %v7005_v20 = vadd.f32 %v8528_v62, %v6844_v10  ;;  %v8417_v60 = vpop.f32.mrb[236].mxu0  ;;  %v8529_v4 = vpop.f32.mrb[236].mxu1 }
 0x4e5   : > { %v8418_v2 = vpop.f32.mrb[237].mxu0  ;;  %v8530_v25 = vpop.f32.mrb[237].mxu1 }
 0x4e6   : > { %v7103_v12 = vsel %vm7050_vm1, %v7071_v16, %v7002_v61  ;;  %v7072_v23 = vmax.f32 %v7005_v20, 0.0  ;;  %v8419_v35 = vadd.f32 %v8418_v2, %v8417_v60  ;;  %v8420_v58 = vpop.f32.mrb[238].mxu0  ;;  %v8531_v41 = vadd.f32 %v8530_v25, %v8529_v4  ;;  %v8532_v32 = vpop.f32.mrb[238].mxu1 }
 0x4e7   : > { %7136 = vst.msk [vmem:[%s12066_s26 + $0xa0] sm:$0xff] %vm7115_vm2, %v7103_v12  ;;  %v8421_v54 = vpop.f32.mrb[239].mxu0  ;;  %v8533_v31 = vpop.f32.mrb[239].mxu1 }
 0x4e8   : > { %v7104_v55 = vsel %vm7050_vm1, %v7072_v23, %v7005_v20  ;;  %v6849_v1 = vadd.f32 %v8419_v35, %v12027_v6  ;;  %v8422_v63 = vadd.f32 %v8421_v54, %v8420_v58  ;;  %v8534_v47 = vadd.f32 %v8533_v31, %v8532_v32 }
 0x4e9   : > { %7137 = vst.msk [vmem:[%s12066_s26 + $0xa8] sm:$0xff] %vm7115_vm2, %v7104_v55 }
 0x4ea   : > { %v7010_v11 = vadd.f32 %v8531_v41, %v6849_v1  ;;  %v6852_v3 = vadd.f32 %v8422_v63, %v12030_v21 }
 0x4ec   : > { %v7073_v17 = vmax.f32 %v7010_v11, 0.0  ;;  %v7013_v30 = vadd.f32 %v8534_v47, %v6852_v3  ;;  %v8423_v46 = vpop.f32.mrb[240].mxu0  ;;  %v8535_v13 = vpop.f32.mrb[240].mxu1 }
 0x4ed   : > { %v8424_v57 = vpop.f32.mrb[241].mxu0  ;;  %v8536_v24 = vpop.f32.mrb[241].mxu1 }
 0x4ee   : > { %v7105_v39 = vsel %vm7050_vm1, %v7073_v17, %v7010_v11  ;;  %v7074_v52 = vmax.f32 %v7013_v30, 0.0  ;;  %v8425_v6 = vadd.f32 %v8424_v57, %v8423_v46  ;;  %v8426_v9 = vpop.f32.mrb[242].mxu0  ;;  %v8537_v53 = vadd.f32 %v8536_v24, %v8535_v13  ;;  %v8538_v59 = vpop.f32.mrb[242].mxu1 }
 0x4ef   : > { %7138 = vst.msk [vmem:[%s12066_s26 + $0xb0] sm:$0xff] %vm7115_vm2, %v7105_v39  ;;  %v8427_v22 = vpop.f32.mrb[243].mxu0  ;;  %v8539_v27 = vpop.f32.mrb[243].mxu1 }
 0x4f0   : > { %v7106_v21 = vsel %vm7050_vm1, %v7074_v52, %v7013_v30  ;;  %v6857_v8 = vadd.f32 %v8425_v6, %v12033_v19  ;;  %v8428_v44 = vadd.f32 %v8427_v22, %v8426_v9  ;;  %v8540_v45 = vadd.f32 %v8539_v27, %v8538_v59 }
 0x4f1   : > { %7139 = vst.msk [vmem:[%s12066_s26 + $0xb8] sm:$0xff] %vm7115_vm2, %v7106_v21 }
 0x4f2   : > { %v7018_v33 = vadd.f32 %v8537_v53, %v6857_v8  ;;  %v6860_v34 = vadd.f32 %v8428_v44, %v12036_v26 }
 0x4f4   : > { %v7075_v29 = vmax.f32 %v7018_v33, 0.0  ;;  %v7021_v51 = vadd.f32 %v8540_v45, %v6860_v34  ;;  %v8429_v0 = vpop.f32.mrb[244].mxu0  ;;  %v8541_v40 = vpop.f32.mrb[244].mxu1 }
 0x4f5   : > { %v8430_v5 = vpop.f32.mrb[245].mxu0  ;;  %v8542_v36 = vpop.f32.mrb[245].mxu1 }
 0x4f6   : > { %v7107_v42 = vsel %vm7050_vm1, %v7075_v29, %v7018_v33  ;;  %v7076_v14 = vmax.f32 %v7021_v51, 0.0  ;;  %v8431_v19 = vadd.f32 %v8430_v5, %v8429_v0  ;;  %v8432_v56 = vpop.f32.mrb[246].mxu0  ;;  %v8543_v43 = vadd.f32 %v8542_v36, %v8541_v40  ;;  %v8544_v7 = vpop.f32.mrb[246].mxu1 }
 0x4f7   : > { %7140 = vst.msk [vmem:[%s12066_s26 + $0xc0] sm:$0xff] %vm7115_vm2, %v7107_v42  ;;  %v8433_v28 = vpop.f32.mrb[247].mxu0  ;;  %v8545_v10 = vpop.f32.mrb[247].mxu1 }
 0x4f8   : > { %v7108_v26 = vsel %vm7050_vm1, %v7076_v14, %v7021_v51  ;;  %v6865_v62 = vadd.f32 %v8431_v19, %v12039_v48  ;;  %v8434_v61 = vadd.f32 %v8433_v28, %v8432_v56  ;;  %v8546_v16 = vadd.f32 %v8545_v10, %v8544_v7 }
 0x4f9   : > { %7141 = vst.msk [vmem:[%s12066_s26 + $0xc8] sm:$0xff] %vm7115_vm2, %v7108_v26 }
 0x4fa   : > { %v7026_v20 = vadd.f32 %v8543_v43, %v6865_v62  ;;  %v6868_v60 = vadd.f32 %v8434_v61, %v12042_v50 }
 0x4fc   : > { %v7077_v4 = vmax.f32 %v7026_v20, 0.0  ;;  %v7029_v2 = vadd.f32 %v8546_v16, %v6868_v60  ;;  %v8435_v12 = vpop.f32.mrb[248].mxu0  ;;  %v8547_v23 = vpop.f32.mrb[248].mxu1 }
 0x4fd   : > { %v8436_v35 = vpop.f32.mrb[249].mxu0  ;;  %v8548_v41 = vpop.f32.mrb[249].mxu1 }
 0x4fe   : > { %v7109_v25 = vsel %vm7050_vm1, %v7077_v4, %v7026_v20  ;;  %v7078_v58 = vmax.f32 %v7029_v2, 0.0  ;;  %v8437_v48 = vadd.f32 %v8436_v35, %v8435_v12  ;;  %v8438_v32 = vpop.f32.mrb[250].mxu0  ;;  %v8549_v54 = vadd.f32 %v8548_v41, %v8547_v23  ;;  %v8550_v55 = vpop.f32.mrb[250].mxu1 }
 0x4ff   : > { %7142 = vst.msk [vmem:[%s12066_s26 + $0xd0] sm:$0xff] %vm7115_vm2, %v7109_v25  ;;  %v8439_v1 = vpop.f32.mrb[251].mxu0  ;;  %v8551_v47 = vpop.f32.mrb[251].mxu1 }
 0x500   : > { %v7110_v50 = vsel %vm7050_vm1, %v7078_v58, %v7029_v2  ;;  %v6873_v63 = vadd.f32 %v8437_v48, %v12045_v18  ;;  %v8440_v31 = vadd.f32 %v8439_v1, %v8438_v32  ;;  %v8552_v11 = vadd.f32 %v8551_v47, %v8550_v55 }
 0x501   : > { %7143 = vst.msk [vmem:[%s12066_s26 + $0xd8] sm:$0xff] %vm7115_vm2, %v7110_v50 }
 0x502   : > { %v7034_v3 = vadd.f32 %v8549_v54, %v6873_v63  ;;  %v6876_v17 = vadd.f32 %v8440_v31, %v12048_v49 }
 0x504   : > { %v7079_v30 = vmax.f32 %v7034_v3, 0.0  ;;  %v7037_v46 = vadd.f32 %v8552_v11, %v6876_v17  ;;  %v8441_v13 = vpop.f32.mrb[252].mxu0  ;;  %v8553_v57 = vpop.f32.mrb[252].mxu1 }
 0x505   : > { %v8442_v39 = vpop.f32.mrb[253].mxu0  ;;  %v8554_v24 = vpop.f32.mrb[253].mxu1 }
 0x506   : > { %v7111_v52 = vsel %vm7050_vm1, %v7079_v30, %v7034_v3  ;;  %v7080_v6 = vmax.f32 %v7037_v46, 0.0  ;;  %v8443_v18 = vadd.f32 %v8442_v39, %v8441_v13  ;;  %v8444_v9 = vpop.f32.mrb[254].mxu0  ;;  %v8555_v53 = vadd.f32 %v8554_v24, %v8553_v57  ;;  %v8556_v59 = vpop.f32.mrb[254].mxu1 }
 0x507   : > { %7144 = vst.msk [vmem:[%s12066_s26 + $0xe0] sm:$0xff] %vm7115_vm2, %v7111_v52  ;;  %v8445_v49 = vpop.f32.mrb[255].mxu0  ;;  %v8557_v44 = vpop.f32.mrb[255].mxu1 }
 0x508   : > { %v7112_v22 = vsel %vm7050_vm1, %v7080_v6, %v7037_v46  ;;  %v6881_v21 = vadd.f32 %v8443_v18, %v12051_v37  ;;  %v8446_v8 = vadd.f32 %v8445_v49, %v8444_v9  ;;  %v8558_v27 = vadd.f32 %v8557_v44, %v8556_v59 }
 0x509   : > { %7145 = vst.msk [vmem:[%s12066_s26 + $0xe8] sm:$0xff] %vm7115_vm2, %v7112_v22 }
 0x50a   : > { %v7042_v45 = vadd.f32 %v8555_v53, %v6881_v21  ;;  %v6884_v33 = vadd.f32 %v8446_v8, %v12054_v38 }
 0x50c   : > { %v7081_v34 = vmax.f32 %v7042_v45, 0.0  ;;  %v7045_v29 = vadd.f32 %v8558_v27, %v6884_v33 }
 0x50e   : > { %v7113_v51 = vsel %vm7050_vm1, %v7081_v34, %v7042_v45  ;;  %v7082_v0 = vmax.f32 %v7045_v29, 0.0 }
 0x50f   : > { %7146 = vst.msk [vmem:[%s12066_s26 + $0xf0] sm:$0xff] %vm7115_vm2, %v7113_v51 }
 0x510   : > { %v7114_v40 = vsel %vm7050_vm1, %v7082_v0, %v7045_v29 }
 0x511   : > { %7147 = vst.msk [vmem:[%s12066_s26 + $0xf8] sm:$0xff] %vm7115_vm2, %v7114_v40 }
 0x512 PF: > { %s15_s18 = sadd.s32 1, %s9280_s18  }
 0x513   : > { %p12_p4 = scmp.ge.s32.totalorder %s15_s18, 6  }
 0x515   :  { %14 = sbr.rel (!%p12_p4) target bundleno = 1 (0x1), region = 74 }

</bundles_post_ra>
